<compile_context>
chip_gen: v6e
topology: v6e:2x2x1
jax: 0.10.0
libtpu: 0.0.40
codegen_flags: <defaults>
</compile_context>

<pallas_src>
import functools

import jax
import jax.numpy as jnp
from jax.experimental import pallas as pl
from jax.experimental.pallas import tpu as pltpu

_NEG_BIG = -1e30  # bias of padded (fake) classes -> exp() underflows to 0 in log_softmax


# ----------------------------- in-kernel helpers -----------------------------

def _log_softmax(y):
    m = jnp.max(y, axis=-1, keepdims=True)
    s = y - m
    return s - jnp.log(jnp.sum(jnp.exp(s), axis=-1, keepdims=True))


def _gru_cell(gx, h, w_hh, b_hh_n):
    """Fused-gate GRU cell: ONE (B,H)@(H,3H) hidden matmul + one fused r|z sigmoid.

    gx:     (B, 3H) x-side gate pre-activations (gate order r|z|n); b_ih already added,
            b_hh folded in for the r/z gates.
    h:      (B, H) previous hidden state.
    w_hh:   (H, 3H) fused hidden weights.
    b_hh_n: (1, H) hidden-side bias of the n gate (stays inside r*(...), PyTorch GRU).
    """
    H = h.shape[-1]
    gh = jnp.dot(h, w_hh, preferred_element_type=jnp.float32)          # (B, 3H)
    rz = jax.nn.sigmoid(gx[:, :2 * H] + gh[:, :2 * H])                  # fused r|z sigmoid
    r = rz[:, :H]
    z = rz[:, H:]
    n = jnp.tanh(gx[:, 2 * H:] + r * (gh[:, 2 * H:] + b_hh_n))
    return (1.0 - z) * n + z * h


# ------------------------------- fused kernel --------------------------------

def _vae_kernel(onehot_ref, wx0_ref, bx0_ref,
                enc_whh_ref, enc_bhhn_ref, enc_wih_up_ref, enc_bx_up_ref,
                wm_ref, bm_ref, wv_ref, bv_ref,
                noise_ref, cond_ref, wl_ref, bl_ref,
                dec_whh_ref, dec_bhhn_ref, dec_wih_up_ref, dec_bx_up_ref,
                wout_ref, bout_ref,
                cf_whh_ref, cf_bhhn_ref, cb_whh_ref, cb_bhhn_ref,
                cf_wih_up_ref, cf_bx_up_ref, cb_wih_up_ref, cb_bx_up_ref,
                wc_ref, bc_ref,
                mean_ref, logvar_ref, logits_ref, cls_ref,
                gx0_scr, seq_a, seq_b, gxu_a, gxu_b):
    f32 = jnp.float32
    T, B, H = seq_a.shape
    H3 = 3 * H
    L = enc_whh_ref.shape[0]

    # ---- layer-0 x-gate projections of all 4 GRU directions: ONE MXU matmul ----
    gx_all = (jnp.dot(onehot_ref[...], wx0_ref[...], preferred_element_type=f32)
              + bx0_ref[...])                                            # (T*B, 4*3H)
    for d in range(4):  # split per direction ONCE (outside any recurrence loop)
        gx0_scr[d] = gx_all[:, d * H3:(d + 1) * H3].reshape(T, B, H3)

    zero_h = jnp.zeros((B, H), f32)

    # ---- serial recurrences (trace-time unrolled; only the carry h stays in vregs) ----
    def run_fwd(gx_at, h, w_hh, b_n, out_ref, store):
        for t in range(T):
            h = _gru_cell(gx_at(t), h, w_hh, b_n)
            if store:
                out_ref[t] = h
        return h

    def run_bwd(gx_at, h, w_hh, b_n, out_ref, store):
        for s in range(T):
            t = T - 1 - s
            h = _gru_cell(gx_at(t), h, w_hh, b_n)
            if store:
                out_ref[t] = h
        return h

    def uni_stack(d, whh_ref, bhhn_ref, wih_up_ref, bx_up_ref, h_init, keep_top_seq):
        """Layer-major unidirectional stacked GRU.  Layer outputs live in seq_a; the
        x-projections of every upper layer are hoisted into one batched matmul."""
        finals = []
        h = run_fwd(lambda t: gx0_scr[d, t], h_init[0], whh_ref[0], bhhn_ref[0],
                    seq_a, store=(L > 1) or keep_top_seq)
        finals.append(h)
        for l in range(1, L):
            x_seq = seq_a[...].reshape(T * B, H)
            gxu_a[...] = (jnp.dot(x_seq, wih_up_ref[l - 1], preferred_element_type=f32)
                          + bx_up_ref[l - 1]).reshape(T, B, H3)
            h = run_fwd(lambda t: gxu_a[t], h_init[l], whh_ref[l], bhhn_ref[l],
                        seq_a, store=(l < L - 1) or keep_top_seq)
            finals.append(h)
        return finals

    # ============================ encoder + latent =============================
    enc_fin = uni_stack(0, enc_whh_ref, enc_bhhn_ref, enc_wih_up_ref, enc_bx_up_ref,
                        [zero_h] * L, keep_top_seq=False)
    hidden_cat = jnp.concatenate(enc_fin, axis=1)                        # (B, L*H)
    mean = jnp.dot(hidden_cat, wm_ref[...], preferred_element_type=f32) + bm_ref[...]
    logvar = jnp.dot(hidden_cat, wv_ref[...], preferred_element_type=f32) + bv_ref[...]
    z = mean + noise_ref[...] * jnp.exp(0.5 * logvar)
    lat = jnp.concatenate([z, cond_ref[...]], axis=1)                    # (B, latent+C)
    hd = jnp.dot(lat, wl_ref[...], preferred_element_type=f32) + bl_ref[...]   # (B, L*H)
    mean_ref[...] = mean
    logvar_ref[...] = logvar

    # ======================= decoder + fused output head ======================
    # hd.view(B, L, H) mapping: layer l gets columns [l*H, (l+1)*H)  (matches PyTorch).
    h0_dec = [hd[:, l * H:(l + 1) * H] for l in range(L)]
    uni_stack(1, dec_whh_ref, dec_bhhn_ref, dec_wih_up_ref, dec_bx_up_ref,
              h0_dec, keep_top_seq=True)
    hseq = seq_a[...].reshape(T * B, H)
    y = jnp.dot(hseq, wout_ref[...], preferred_element_type=f32) + bout_ref[...]
    logits_ref[...] = _log_softmax(y).reshape(T, B, wout_ref.shape[1])

    # ===================== bidirectional classify GRU stack ===================
    hf = run_fwd(lambda t: gx0_scr[2, t], zero_h, cf_whh_ref[0], cf_bhhn_ref[0],
                 seq_a, store=True)
    hb = run_bwd(lambda t: gx0_scr[3, t], zero_h, cb_whh_ref[0], cb_bhhn_ref[0],
                 seq_b, store=True)
    for l in range(1, L):
        li = l - 1
        last = (l == L - 1)
        x_cat = jnp.concatenate([seq_a[...].reshape(T * B, H),
                                 seq_b[...].reshape(T * B, H)], axis=1)  # (T*B, 2H)
        gxu_a[...] = (jnp.dot(x_cat, cf_wih_up_ref[li], preferred_element_type=f32)
                      + cf_bx_up_ref[li]).reshape(T, B, H3)
        gxu_b[...] = (jnp.dot(x_cat, cb_wih_up_ref[li], preferred_element_type=f32)
                      + cb_bx_up_ref[li]).reshape(T, B, H3)
        hf = run_fwd(lambda t: gxu_a[t], zero_h, cf_whh_ref[l], cf_bhhn_ref[l],
                     seq_a, store=not last)
        if last:
            # Only position T-1 of the top backward direction feeds classify_nn.
            hb = _gru_cell(gxu_b[T - 1], zero_h, cb_whh_ref[l], cb_bhhn_ref[l])
        else:
            hb = run_bwd(lambda t: gxu_b[t], zero_h, cb_whh_ref[l], cb_bhhn_ref[l],
                         seq_b, store=True)
    yc = (jnp.dot(jnp.concatenate([hf, hb], axis=1), wc_ref[...],
                  preferred_element_type=f32) + bc_ref[...])
    cls_ref[...] = _log_softmax(yc)


# ----------------------------- Parameter setup -------------------------------

def _init_linear(key, in_dim, out_dim):
    k1, k2 = jax.random.split(key)
    w = 0.1 * jax.random.normal(k1, (in_dim, out_dim), jnp.float32)
    b = 0.1 * jax.random.normal(k2, (1, out_dim), jnp.float32)
    return w, b


def _init_gru(key, input_size, hid, layers, bidirectional=False):
    dirs = 2 if bidirectional else 1
    params = []
    for l in range(layers):
        in_l = input_size if l == 0 else hid * dirs
        layer = []
        for _ in range(dirs):
            key, k1, k2, k3, k4 = jax.random.split(key, 5)
            w_ih = 0.1 * jax.random.normal(k1, (in_l, 3 * hid), jnp.float32)
            w_hh = 0.1 * jax.random.normal(k2, (hid, 3 * hid), jnp.float32)
            b_ih = 0.1 * jax.random.normal(k3, (1, 3 * hid), jnp.float32)
            b_hh = 0.1 * jax.random.normal(k4, (1, 3 * hid), jnp.float32)
            layer.append((w_ih, b_ih, w_hh, b_hh))
        params.append(layer)
    return params


def init_params(key, num_class, emb, hid, layers, latent, cond):
    keys = jax.random.split(key, 8)
    params = {}
    params["emb"] = 0.1 * jax.random.normal(keys[0], (num_class, emb), jnp.float32)
    params["enc_rnn"] = _init_gru(keys[1], emb, hid, layers, bidirectional=False)
    params["mean_z"] = _init_linear(keys[2], hid * layers, latent)
    params["logvar_z"] = _init_linear(keys[3], hid * layers, latent)
    params["latent2hidden"] = _init_linear(keys[4], latent + cond, layers * hid)
    params["dec_rnn"] = _init_gru(keys[5], emb, hid, layers, bidirectional=False)
    params["output"] = _init_linear(keys[6], hid, num_class)
    key_c = jax.random.split(keys[7], 2)
    params["classify_rnn"] = _init_gru(key_c[0], emb, hid, layers, bidirectional=True)
    params["classify_nn"] = _init_linear(key_c[1], hid * 2, cond)
    return params


# -------------------------------- Forward pass --------------------------------

def _fold_bias(b_ih, b_hh, H):
    # Gate-fused x-side bias: r/z get b_ih + b_hh folded; n keeps only b_ih
    # (its b_hh stays inside r * (W_hn h + b_hn), PyTorch GRU semantics).
    return jnp.concatenate([b_ih[:, :2 * H] + b_hh[:, :2 * H], b_ih[:, 2 * H:]], axis=1)


@functools.partial(jax.jit, static_argnames=("num_class", "hid", "layers", "latent", "cond"))
def forward(params, input_data, noise_key, *, num_class, hid, layers, latent, cond):
    # input_data: (seq_len, batch) int32 token ids.  Unlabeled path (cond=None, z=None).
    seq_len, batch = input_data.shape
    C, H, L, T, NC = cond, hid, layers, seq_len, num_class
    assert L >= 2  # TODO(synk): single-layer GRU stacks not wired (empty upper weights)
    B = batch * C
    NC_pad = ((NC + 127) // 128) * 128
    C_pad = ((C + 127) // 128) * 128

    # --- expand_input: replicate tokens across cond dim; one-hot cond per copy ---
    tokens = jnp.repeat(input_data[:, :, None], C, axis=2).reshape(T * B)
    cond_oh = jnp.tile(jnp.eye(C, dtype=jnp.float32)[None], (batch, 1, 1)).reshape(B, C)
    onehot = jax.nn.one_hot(tokens, NC, dtype=jnp.float32)               # (T*B, NC)

    # --- weight prep (tiny XLA ops; in production pre-pack once) ---
    cls = params["classify_rnn"]
    l0 = [params["enc_rnn"][0][0], params["dec_rnn"][0][0], cls[0][0], cls[0][1]]
    # embedding folded into the layer-0 x-projection: one_hot @ (emb @ W_ih)
    wx0 = jnp.dot(params["emb"], jnp.concatenate([p[0] for p in l0], axis=1))   # (NC, 12H)
    bx0 = jnp.concatenate([_fold_bias(p[1], p[3], H) for p in l0], axis=1)      # (1, 12H)

    def prep_stack(gru, d):
        whh = jnp.stack([gru[l][d][2] for l in range(L)], 0)                    # (L, H, 3H)
        bhhn = jnp.stack([gru[l][d][3][:, 2 * H:] for l in range(L)], 0)        # (L, 1, H)
        wih_up = jnp.stack([gru[l][d][0] for l in range(1, L)], 0)              # (L-1, In, 3H)
        bx_up = jnp.stack([_fold_bias(gru[l][d][1], gru[l][d][3], H)
                           for l in range(1, L)], 0)                            # (L-1, 1, 3H)
        return whh, bhhn, wih_up, bx_up

    enc_p = prep_stack(params["enc_rnn"], 0)
    dec_p = prep_stack(params["dec_rnn"], 0)
    cf_p = prep_stack(cls, 0)
    cb_p = prep_stack(cls, 1)

    wm, bm = params["mean_z"]
    wv, bv = params["logvar_z"]
    wl, bl = params["latent2hidden"]

    # lane-dense (128-padded) output heads; padded classes get bias -1e30
    w_out, b_out = params["output"]
    wout = jnp.concatenate([w_out, jnp.zeros((H, NC_pad - NC), jnp.float32)], axis=1)
    bout = jnp.concatenate([b_out, jnp.full((1, NC_pad - NC), _NEG_BIG, jnp.float32)], axis=1)
    w_c, b_c = params["classify_nn"]
    wc = jnp.concatenate([w_c, jnp.zeros((2 * H, C_pad - C), jnp.float32)], axis=1)
    bc = jnp.concatenate([b_c, jnp.full((1, C_pad - C), _NEG_BIG, jnp.float32)], axis=1)

    noise = jax.random.normal(noise_key, (B, latent), jnp.float32)

    # --- ONE fused pallas_call: enc + reparam + latent2hidden + dec + classify ---
    mean, logvar, logits_pad, cls_pad = pl.pallas_call(
        _vae_kernel,
        out_shape=(jax.ShapeDtypeStruct((B, latent), jnp.float32),
                   jax.ShapeDtypeStruct((B, latent), jnp.float32),
                   jax.ShapeDtypeStruct((T, B, NC_pad), jnp.float32),
                   jax.ShapeDtypeStruct((B, C_pad), jnp.float32)),
        scratch_shapes=[pltpu.VMEM((4, T, B, 3 * H), jnp.float32),  # layer-0 gx, 4 dirs
                        pltpu.VMEM((T, B, H), jnp.float32),         # seq_a
                        pltpu.VMEM((T, B, H), jnp.float32),         # seq_b
                        pltpu.VMEM((T, B, 3 * H), jnp.float32),     # gxu_a
                        pltpu.VMEM((T, B, 3 * H), jnp.float32)],    # gxu_b
        compiler_params=pltpu.CompilerParams(vmem_limit_bytes=32 * 1024 * 1024),
    )(onehot, wx0, bx0,
      *enc_p, wm, bm, wv, bv, noise, cond_oh, wl, bl,
      *dec_p, wout, bout,
      cf_p[0], cf_p[1], cb_p[0], cb_p[1],
      cf_p[2], cf_p[3], cb_p[2], cb_p[3],
      wc, bc)

    # --- unlabeled-path reshapes/permutes (and un-pad the class dims) ---
    logits = logits_pad[:, :, :NC].reshape(T, batch, C, NC).transpose(2, 0, 1, 3)
    classify_logits = cls_pad[:, :C].reshape(batch, C, C).transpose(1, 0, 2)
    mean_o = mean.reshape(batch, C, latent).transpose(1, 0, 2)
    logvar_o = logvar.reshape(batch, C, latent).transpose(1, 0, 2)
    return logits, mean_o, logvar_o, classify_logits


# ------------------------------------ Main ------------------------------------

if __name__ == "__main__":
    num_class = 12
    embedding_size = 16
    hid_size = 32
    hid_layers = 2
    latent_z_size = 8
    cond_size = 4
    seq_len = 8
    batch = 2

    root = jax.random.PRNGKey(0)
    k_param, k_tok, k_noise = jax.random.split(root, 3)

    params = init_params(
        k_param, num_class, embedding_size, hid_size, hid_layers, latent_z_size, cond_size
    )
    input_data = jax.random.randint(k_tok, (seq_len, batch), 0, num_class, dtype=jnp.int32)

    logits, mean, logvar, classify_logits = forward(
        params, input_data, k_noise,
        num_class=num_class, hid=hid_size, layers=hid_layers,
        latent=latent_z_size, cond=cond_size,
    )
    jax.block_until_ready((logits, mean, logvar, classify_logits))

    assert logits.shape == (cond_size, seq_len, batch, num_class)
    assert mean.shape == (cond_size, batch, latent_z_size)
    assert logvar.shape == (cond_size, batch, latent_z_size)
    assert classify_logits.shape == (cond_size, batch, cond_size)
    # log_softmax rows must sum to 1 in prob space
    assert bool(jnp.allclose(jnp.sum(jnp.exp(logits), axis=-1), 1.0, atol=1e-4))
    assert bool(jnp.allclose(jnp.sum(jnp.exp(classify_logits), axis=-1), 1.0, atol=1e-4))

    # TODO(synk): dropout layers (embedding / GRU inter-layer / word dropout) are identity
    # here (eval mode); training-mode stochastic dropout is not implemented.
    print("KERNEL_OK")
</pallas_src>

<mosaic_0001>
module attributes {stable_mosaic.version = 11 : i64} {
  func.func @_vae_kernel(%arg0: memref<64x12xf32, #tpu.memory_space<vmem>>, %arg1: memref<12x384xf32, #tpu.memory_space<vmem>>, %arg2: memref<1x384xf32, #tpu.memory_space<vmem>>, %arg3: memref<2x32x96xf32, #tpu.memory_space<vmem>>, %arg4: memref<2x1x32xf32, #tpu.memory_space<vmem>>, %arg5: memref<1x32x96xf32, #tpu.memory_space<vmem>>, %arg6: memref<1x1x96xf32, #tpu.memory_space<vmem>>, %arg7: memref<64x8xf32, #tpu.memory_space<vmem>>, %arg8: memref<1x8xf32, #tpu.memory_space<vmem>>, %arg9: memref<64x8xf32, #tpu.memory_space<vmem>>, %arg10: memref<1x8xf32, #tpu.memory_space<vmem>>, %arg11: memref<8x8xf32, #tpu.memory_space<vmem>>, %arg12: memref<8x4xf32, #tpu.memory_space<vmem>>, %arg13: memref<12x64xf32, #tpu.memory_space<vmem>>, %arg14: memref<1x64xf32, #tpu.memory_space<vmem>>, %arg15: memref<2x32x96xf32, #tpu.memory_space<vmem>>, %arg16: memref<2x1x32xf32, #tpu.memory_space<vmem>>, %arg17: memref<1x32x96xf32, #tpu.memory_space<vmem>>, %arg18: memref<1x1x96xf32, #tpu.memory_space<vmem>>, %arg19: memref<32x128xf32, #tpu.memory_space<vmem>>, %arg20: memref<1x128xf32, #tpu.memory_space<vmem>>, %arg21: memref<2x32x96xf32, #tpu.memory_space<vmem>>, %arg22: memref<2x1x32xf32, #tpu.memory_space<vmem>>, %arg23: memref<2x32x96xf32, #tpu.memory_space<vmem>>, %arg24: memref<2x1x32xf32, #tpu.memory_space<vmem>>, %arg25: memref<1x64x96xf32, #tpu.memory_space<vmem>>, %arg26: memref<1x1x96xf32, #tpu.memory_space<vmem>>, %arg27: memref<1x64x96xf32, #tpu.memory_space<vmem>>, %arg28: memref<1x1x96xf32, #tpu.memory_space<vmem>>, %arg29: memref<64x128xf32, #tpu.memory_space<vmem>>, %arg30: memref<1x128xf32, #tpu.memory_space<vmem>>, %arg31: memref<8x8xf32, #tpu.memory_space<vmem>>, %arg32: memref<8x8xf32, #tpu.memory_space<vmem>>, %arg33: memref<8x8x128xf32, #tpu.memory_space<vmem>>, %arg34: memref<8x128xf32, #tpu.memory_space<vmem>>, %arg35: memref<4x8x8x96xf32, #tpu.memory_space<vmem>>, %arg36: memref<8x8x32xf32, #tpu.memory_space<vmem>>, %arg37: memref<8x8x32xf32, #tpu.memory_space<vmem>>, %arg38: memref<8x8x96xf32, #tpu.memory_space<vmem>>, %arg39: memref<8x8x96xf32, #tpu.memory_space<vmem>>) attributes {dimension_semantics = [], scalar_prefetch = 0 : i64, scratch_operands = 5 : i64, tpu.core_type = #tpu.core_type<tc>} {
    %c0 = arith.constant 0 : index
    %c0_0 = arith.constant 0 : index
    %0 = vector.load %arg0[%c0, %c0_0] : memref<64x12xf32, #tpu.memory_space<vmem>>, vector<64x12xf32>
    %c0_1 = arith.constant 0 : index
    %c0_2 = arith.constant 0 : index
    %1 = vector.load %arg1[%c0_1, %c0_2] : memref<12x384xf32, #tpu.memory_space<vmem>>, vector<12x384xf32>
    %cst = arith.constant dense<0.000000e+00> : vector<64x384xf32>
    %2 = tpu.matmul %0, %1, %cst {dimension_numbers = #tpu.dot_dimension_numbers<[1], [0], [0], [1], [0, 0, 1, 1], [], []>} : vector<64x12xf32>, vector<12x384xf32>, vector<64x384xf32> -> vector<64x384xf32>
    %c0_3 = arith.constant 0 : index
    %c0_4 = arith.constant 0 : index
    %3 = vector.load %arg2[%c0_3, %c0_4] : memref<1x384xf32, #tpu.memory_space<vmem>>, vector<1x384xf32>
    %4 = vector.broadcast %3 : vector<1x384xf32> to vector<64x384xf32>
    %5 = arith.addf %2, %4 : vector<64x384xf32>
    %6 = vector.extract_strided_slice %5 {offsets = [0, 0], sizes = [64, 96], strides = [1, 1]} : vector<64x384xf32> to vector<64x96xf32>
    %7 = vector.shape_cast %6 : vector<64x96xf32> to vector<8x8x96xf32>
    %c0_5 = arith.constant 0 : index
    %c0_6 = arith.constant 0 : index
    %c0_7 = arith.constant 0 : index
    %c0_8 = arith.constant 0 : index
    %8 = vector.load %arg35[%c0_5, %c0_6, %c0_7, %c0_8] : memref<4x8x8x96xf32, #tpu.memory_space<vmem>>, vector<1x8x8x96xf32>
    %9 = vector.shape_cast %8 : vector<1x8x8x96xf32> to vector<8x8x96xf32>
    %10 = vector.shape_cast %7 : vector<8x8x96xf32> to vector<1x8x8x96xf32>
    tpu.vector_store %arg35[%c0_5, %c0_6, %c0_7, %c0_8], %10 {strides = array<i32>} : memref<4x8x8x96xf32, #tpu.memory_space<vmem>>, vector<1x8x8x96xf32>,
    %11 = vector.extract_strided_slice %5 {offsets = [0, 96], sizes = [64, 96], strides = [1, 1]} : vector<64x384xf32> to vector<64x96xf32>
    %12 = vector.shape_cast %11 : vector<64x96xf32> to vector<8x8x96xf32>
    %c1 = arith.constant 1 : index
    %c0_9 = arith.constant 0 : index
    %c0_10 = arith.constant 0 : index
    %c0_11 = arith.constant 0 : index
    %13 = vector.load %arg35[%c1, %c0_9, %c0_10, %c0_11] : memref<4x8x8x96xf32, #tpu.memory_space<vmem>>, vector<1x8x8x96xf32>
    %14 = vector.shape_cast %13 : vector<1x8x8x96xf32> to vector<8x8x96xf32>
    %15 = vector.shape_cast %12 : vector<8x8x96xf32> to vector<1x8x8x96xf32>
    tpu.vector_store %arg35[%c1, %c0_9, %c0_10, %c0_11], %15 {strides = array<i32>} : memref<4x8x8x96xf32, #tpu.memory_space<vmem>>, vector<1x8x8x96xf32>,
    %16 = vector.extract_strided_slice %5 {offsets = [0, 192], sizes = [64, 96], strides = [1, 1]} : vector<64x384xf32> to vector<64x96xf32>
    %17 = vector.shape_cast %16 : vector<64x96xf32> to vector<8x8x96xf32>
    %c2 = arith.constant 2 : index
    %c0_12 = arith.constant 0 : index
    %c0_13 = arith.constant 0 : index
    %c0_14 = arith.constant 0 : index
    %18 = vector.load %arg35[%c2, %c0_12, %c0_13, %c0_14] : memref<4x8x8x96xf32, #tpu.memory_space<vmem>>, vector<1x8x8x96xf32>
    %19 = vector.shape_cast %18 : vector<1x8x8x96xf32> to vector<8x8x96xf32>
    %20 = vector.shape_cast %17 : vector<8x8x96xf32> to vector<1x8x8x96xf32>
    tpu.vector_store %arg35[%c2, %c0_12, %c0_13, %c0_14], %20 {strides = array<i32>} : memref<4x8x8x96xf32, #tpu.memory_space<vmem>>, vector<1x8x8x96xf32>,
    %21 = vector.extract_strided_slice %5 {offsets = [0, 288], sizes = [64, 96], strides = [1, 1]} : vector<64x384xf32> to vector<64x96xf32>
    %22 = vector.shape_cast %21 : vector<64x96xf32> to vector<8x8x96xf32>
    %c3 = arith.constant 3 : index
    %c0_15 = arith.constant 0 : index
    %c0_16 = arith.constant 0 : index
    %c0_17 = arith.constant 0 : index
    %23 = vector.load %arg35[%c3, %c0_15, %c0_16, %c0_17] : memref<4x8x8x96xf32, #tpu.memory_space<vmem>>, vector<1x8x8x96xf32>
    %24 = vector.shape_cast %23 : vector<1x8x8x96xf32> to vector<8x8x96xf32>
    %25 = vector.shape_cast %22 : vector<8x8x96xf32> to vector<1x8x8x96xf32>
    tpu.vector_store %arg35[%c3, %c0_15, %c0_16, %c0_17], %25 {strides = array<i32>} : memref<4x8x8x96xf32, #tpu.memory_space<vmem>>, vector<1x8x8x96xf32>,
    %cst_18 = arith.constant 0.000000e+00 : f32
    %26 = vector.broadcast %cst_18 : f32 to vector<8x32xf32>
    %c0_19 = arith.constant 0 : index
    %c0_20 = arith.constant 0 : index
    %c0_21 = arith.constant 0 : index
    %27 = vector.load %arg3[%c0_19, %c0_20, %c0_21] : memref<2x32x96xf32, #tpu.memory_space<vmem>>, vector<1x32x96xf32>
    %28 = vector.shape_cast %27 : vector<1x32x96xf32> to vector<32x96xf32>
    %c0_22 = arith.constant 0 : index
    %c0_23 = arith.constant 0 : index
    %c0_24 = arith.constant 0 : index
    %29 = vector.load %arg4[%c0_22, %c0_23, %c0_24] : memref<2x1x32xf32, #tpu.memory_space<vmem>>, vector<1x1x32xf32>
    %30 = vector.shape_cast %29 : vector<1x1x32xf32> to vector<1x32xf32>
    %c0_25 = arith.constant 0 : index
    %c0_26 = arith.constant 0 : index
    %c0_27 = arith.constant 0 : index
    %c0_28 = arith.constant 0 : index
    %31 = vector.load %arg35[%c0_25, %c0_26, %c0_27, %c0_28] : memref<4x8x8x96xf32, #tpu.memory_space<vmem>>, vector<1x1x8x96xf32>
    %32 = vector.shape_cast %31 : vector<1x1x8x96xf32> to vector<8x96xf32>
    %cst_29 = arith.constant dense<0.000000e+00> : vector<8x96xf32>
    %33 = tpu.matmul %26, %28, %cst_29 {dimension_numbers = #tpu.dot_dimension_numbers<[1], [0], [0], [1], [0, 0, 1, 1], [], []>} : vector<8x32xf32>, vector<32x96xf32>, vector<8x96xf32> -> vector<8x96xf32>
    %34 = vector.extract_strided_slice %32 {offsets = [0, 0], sizes = [8, 64], strides = [1, 1]} : vector<8x96xf32> to vector<8x64xf32>
    %35 = vector.extract_strided_slice %33 {offsets = [0, 0], sizes = [8, 64], strides = [1, 1]} : vector<8x96xf32> to vector<8x64xf32>
    %36 = arith.addf %34, %35 : vector<8x64xf32>
    %37 = arith.negf %36 : vector<8x64xf32>
    %38 = math.exp %37 : vector<8x64xf32>
    %cst_30 = arith.constant 1.000000e+00 : f32
    %39 = vector.broadcast %cst_30 : f32 to vector<8x64xf32>
    %40 = arith.addf %39, %38 : vector<8x64xf32>
    %41 = arith.divf %39, %40 : vector<8x64xf32>
    %42 = vector.extract_strided_slice %41 {offsets = [0, 0], sizes = [8, 32], strides = [1, 1]} : vector<8x64xf32> to vector<8x32xf32>
    %43 = vector.extract_strided_slice %41 {offsets = [0, 32], sizes = [8, 32], strides = [1, 1]} : vector<8x64xf32> to vector<8x32xf32>
    %44 = vector.extract_strided_slice %32 {offsets = [0, 64], sizes = [8, 32], strides = [1, 1]} : vector<8x96xf32> to vector<8x32xf32>
    %45 = vector.extract_strided_slice %33 {offsets = [0, 64], sizes = [8, 32], strides = [1, 1]} : vector<8x96xf32> to vector<8x32xf32>
    %46 = vector.broadcast %30 : vector<1x32xf32> to vector<8x32xf32>
    %47 = arith.addf %45, %46 : vector<8x32xf32>
    %48 = arith.mulf %42, %47 : vector<8x32xf32>
    %49 = arith.addf %44, %48 : vector<8x32xf32>
    %50 = math.tanh %49 : vector<8x32xf32>
    %cst_31 = arith.constant 1.000000e+00 : f32
    %51 = vector.broadcast %cst_31 : f32 to vector<8x32xf32>
    %52 = arith.subf %51, %43 : vector<8x32xf32>
    %53 = arith.mulf %52, %50 : vector<8x32xf32>
    %54 = arith.mulf %43, %26 : vector<8x32xf32>
    %55 = arith.addf %53, %54 : vector<8x32xf32>
    %c0_32 = arith.constant 0 : index
    %c0_33 = arith.constant 0 : index
    %c0_34 = arith.constant 0 : index
    %56 = vector.load %arg36[%c0_32, %c0_33, %c0_34] : memref<8x8x32xf32, #tpu.memory_space<vmem>>, vector<1x8x32xf32>
    %57 = vector.shape_cast %56 : vector<1x8x32xf32> to vector<8x32xf32>
    %58 = vector.shape_cast %55 : vector<8x32xf32> to vector<1x8x32xf32>
    tpu.vector_store %arg36[%c0_32, %c0_33, %c0_34], %58 {strides = array<i32>} : memref<8x8x32xf32, #tpu.memory_space<vmem>>, vector<1x8x32xf32>,
    %c0_35 = arith.constant 0 : index
    %c1_36 = arith.constant 1 : index
    %c0_37 = arith.constant 0 : index
    %c0_38 = arith.constant 0 : index
    %59 = vector.load %arg35[%c0_35, %c1_36, %c0_37, %c0_38] : memref<4x8x8x96xf32, #tpu.memory_space<vmem>>, vector<1x1x8x96xf32>
    %60 = vector.shape_cast %59 : vector<1x1x8x96xf32> to vector<8x96xf32>
    %cst_39 = arith.constant dense<0.000000e+00> : vector<8x96xf32>
    %61 = tpu.matmul %55, %28, %cst_39 {dimension_numbers = #tpu.dot_dimension_numbers<[1], [0], [0], [1], [0, 0, 1, 1], [], []>} : vector<8x32xf32>, vector<32x96xf32>, vector<8x96xf32> -> vector<8x96xf32>
    %62 = vector.extract_strided_slice %60 {offsets = [0, 0], sizes = [8, 64], strides = [1, 1]} : vector<8x96xf32> to vector<8x64xf32>
    %63 = vector.extract_strided_slice %61 {offsets = [0, 0], sizes = [8, 64], strides = [1, 1]} : vector<8x96xf32> to vector<8x64xf32>
    %64 = arith.addf %62, %63 : vector<8x64xf32>
    %65 = arith.negf %64 : vector<8x64xf32>
    %66 = math.exp %65 : vector<8x64xf32>
    %cst_40 = arith.constant 1.000000e+00 : f32
    %67 = vector.broadcast %cst_40 : f32 to vector<8x64xf32>
    %68 = arith.addf %67, %66 : vector<8x64xf32>
    %69 = arith.divf %67, %68 : vector<8x64xf32>
    %70 = vector.extract_strided_slice %69 {offsets = [0, 0], sizes = [8, 32], strides = [1, 1]} : vector<8x64xf32> to vector<8x32xf32>
    %71 = vector.extract_strided_slice %69 {offsets = [0, 32], sizes = [8, 32], strides = [1, 1]} : vector<8x64xf32> to vector<8x32xf32>
    %72 = vector.extract_strided_slice %60 {offsets = [0, 64], sizes = [8, 32], strides = [1, 1]} : vector<8x96xf32> to vector<8x32xf32>
    %73 = vector.extract_strided_slice %61 {offsets = [0, 64], sizes = [8, 32], strides = [1, 1]} : vector<8x96xf32> to vector<8x32xf32>
    %74 = vector.broadcast %30 : vector<1x32xf32> to vector<8x32xf32>
    %75 = arith.addf %73, %74 : vector<8x32xf32>
    %76 = arith.mulf %70, %75 : vector<8x32xf32>
    %77 = arith.addf %72, %76 : vector<8x32xf32>
    %78 = math.tanh %77 : vector<8x32xf32>
    %cst_41 = arith.constant 1.000000e+00 : f32
    %79 = vector.broadcast %cst_41 : f32 to vector<8x32xf32>
    %80 = arith.subf %79, %71 : vector<8x32xf32>
    %81 = arith.mulf %80, %78 : vector<8x32xf32>
    %82 = arith.mulf %71, %55 : vector<8x32xf32>
    %83 = arith.addf %81, %82 : vector<8x32xf32>
    %c1_42 = arith.constant 1 : index
    %c0_43 = arith.constant 0 : index
    %c0_44 = arith.constant 0 : index
    %84 = vector.load %arg36[%c1_42, %c0_43, %c0_44] : memref<8x8x32xf32, #tpu.memory_space<vmem>>, vector<1x8x32xf32>
    %85 = vector.shape_cast %84 : vector<1x8x32xf32> to vector<8x32xf32>
    %86 = vector.shape_cast %83 : vector<8x32xf32> to vector<1x8x32xf32>
    tpu.vector_store %arg36[%c1_42, %c0_43, %c0_44], %86 {strides = array<i32>} : memref<8x8x32xf32, #tpu.memory_space<vmem>>, vector<1x8x32xf32>,
    %c0_45 = arith.constant 0 : index
    %c2_46 = arith.constant 2 : index
    %c0_47 = arith.constant 0 : index
    %c0_48 = arith.constant 0 : index
    %87 = vector.load %arg35[%c0_45, %c2_46, %c0_47, %c0_48] : memref<4x8x8x96xf32, #tpu.memory_space<vmem>>, vector<1x1x8x96xf32>
    %88 = vector.shape_cast %87 : vector<1x1x8x96xf32> to vector<8x96xf32>
    %cst_49 = arith.constant dense<0.000000e+00> : vector<8x96xf32>
    %89 = tpu.matmul %83, %28, %cst_49 {dimension_numbers = #tpu.dot_dimension_numbers<[1], [0], [0], [1], [0, 0, 1, 1], [], []>} : vector<8x32xf32>, vector<32x96xf32>, vector<8x96xf32> -> vector<8x96xf32>
    %90 = vector.extract_strided_slice %88 {offsets = [0, 0], sizes = [8, 64], strides = [1, 1]} : vector<8x96xf32> to vector<8x64xf32>
    %91 = vector.extract_strided_slice %89 {offsets = [0, 0], sizes = [8, 64], strides = [1, 1]} : vector<8x96xf32> to vector<8x64xf32>
    %92 = arith.addf %90, %91 : vector<8x64xf32>
    %93 = arith.negf %92 : vector<8x64xf32>
    %94 = math.exp %93 : vector<8x64xf32>
    %cst_50 = arith.constant 1.000000e+00 : f32
    %95 = vector.broadcast %cst_50 : f32 to vector<8x64xf32>
    %96 = arith.addf %95, %94 : vector<8x64xf32>
    %97 = arith.divf %95, %96 : vector<8x64xf32>
    %98 = vector.extract_strided_slice %97 {offsets = [0, 0], sizes = [8, 32], strides = [1, 1]} : vector<8x64xf32> to vector<8x32xf32>
    %99 = vector.extract_strided_slice %97 {offsets = [0, 32], sizes = [8, 32], strides = [1, 1]} : vector<8x64xf32> to vector<8x32xf32>
    %100 = vector.extract_strided_slice %88 {offsets = [0, 64], sizes = [8, 32], strides = [1, 1]} : vector<8x96xf32> to vector<8x32xf32>
    %101 = vector.extract_strided_slice %89 {offsets = [0, 64], sizes = [8, 32], strides = [1, 1]} : vector<8x96xf32> to vector<8x32xf32>
    %102 = vector.broadcast %30 : vector<1x32xf32> to vector<8x32xf32>
    %103 = arith.addf %101, %102 : vector<8x32xf32>
    %104 = arith.mulf %98, %103 : vector<8x32xf32>
    %105 = arith.addf %100, %104 : vector<8x32xf32>
    %106 = math.tanh %105 : vector<8x32xf32>
    %cst_51 = arith.constant 1.000000e+00 : f32
    %107 = vector.broadcast %cst_51 : f32 to vector<8x32xf32>
    %108 = arith.subf %107, %99 : vector<8x32xf32>
    %109 = arith.mulf %108, %106 : vector<8x32xf32>
    %110 = arith.mulf %99, %83 : vector<8x32xf32>
    %111 = arith.addf %109, %110 : vector<8x32xf32>
    %c2_52 = arith.constant 2 : index
    %c0_53 = arith.constant 0 : index
    %c0_54 = arith.constant 0 : index
    %112 = vector.load %arg36[%c2_52, %c0_53, %c0_54] : memref<8x8x32xf32, #tpu.memory_space<vmem>>, vector<1x8x32xf32>
    %113 = vector.shape_cast %112 : vector<1x8x32xf32> to vector<8x32xf32>
    %114 = vector.shape_cast %111 : vector<8x32xf32> to vector<1x8x32xf32>
    tpu.vector_store %arg36[%c2_52, %c0_53, %c0_54], %114 {strides = array<i32>} : memref<8x8x32xf32, #tpu.memory_space<vmem>>, vector<1x8x32xf32>,
    %c0_55 = arith.constant 0 : index
    %c3_56 = arith.constant 3 : index
    %c0_57 = arith.constant 0 : index
    %c0_58 = arith.constant 0 : index
    %115 = vector.load %arg35[%c0_55, %c3_56, %c0_57, %c0_58] : memref<4x8x8x96xf32, #tpu.memory_space<vmem>>, vector<1x1x8x96xf32>
    %116 = vector.shape_cast %115 : vector<1x1x8x96xf32> to vector<8x96xf32>
    %cst_59 = arith.constant dense<0.000000e+00> : vector<8x96xf32>
    %117 = tpu.matmul %111, %28, %cst_59 {dimension_numbers = #tpu.dot_dimension_numbers<[1], [0], [0], [1], [0, 0, 1, 1], [], []>} : vector<8x32xf32>, vector<32x96xf32>, vector<8x96xf32> -> vector<8x96xf32>
    %118 = vector.extract_strided_slice %116 {offsets = [0, 0], sizes = [8, 64], strides = [1, 1]} : vector<8x96xf32> to vector<8x64xf32>
    %119 = vector.extract_strided_slice %117 {offsets = [0, 0], sizes = [8, 64], strides = [1, 1]} : vector<8x96xf32> to vector<8x64xf32>
    %120 = arith.addf %118, %119 : vector<8x64xf32>
    %121 = arith.negf %120 : vector<8x64xf32>
    %122 = math.exp %121 : vector<8x64xf32>
    %cst_60 = arith.constant 1.000000e+00 : f32
    %123 = vector.broadcast %cst_60 : f32 to vector<8x64xf32>
    %124 = arith.addf %123, %122 : vector<8x64xf32>
    %125 = arith.divf %123, %124 : vector<8x64xf32>
    %126 = vector.extract_strided_slice %125 {offsets = [0, 0], sizes = [8, 32], strides = [1, 1]} : vector<8x64xf32> to vector<8x32xf32>
    %127 = vector.extract_strided_slice %125 {offsets = [0, 32], sizes = [8, 32], strides = [1, 1]} : vector<8x64xf32> to vector<8x32xf32>
    %128 = vector.extract_strided_slice %116 {offsets = [0, 64], sizes = [8, 32], strides = [1, 1]} : vector<8x96xf32> to vector<8x32xf32>
    %129 = vector.extract_strided_slice %117 {offsets = [0, 64], sizes = [8, 32], strides = [1, 1]} : vector<8x96xf32> to vector<8x32xf32>
    %130 = vector.broadcast %30 : vector<1x32xf32> to vector<8x32xf32>
    %131 = arith.addf %129, %130 : vector<8x32xf32>
    %132 = arith.mulf %126, %131 : vector<8x32xf32>
    %133 = arith.addf %128, %132 : vector<8x32xf32>
    %134 = math.tanh %133 : vector<8x32xf32>
    %cst_61 = arith.constant 1.000000e+00 : f32
    %135 = vector.broadcast %cst_61 : f32 to vector<8x32xf32>
    %136 = arith.subf %135, %127 : vector<8x32xf32>
    %137 = arith.mulf %136, %134 : vector<8x32xf32>
    %138 = arith.mulf %127, %111 : vector<8x32xf32>
    %139 = arith.addf %137, %138 : vector<8x32xf32>
    %c3_62 = arith.constant 3 : index
    %c0_63 = arith.constant 0 : index
    %c0_64 = arith.constant 0 : index
    %140 = vector.load %arg36[%c3_62, %c0_63, %c0_64] : memref<8x8x32xf32, #tpu.memory_space<vmem>>, vector<1x8x32xf32>
    %141 = vector.shape_cast %140 : vector<1x8x32xf32> to vector<8x32xf32>
    %142 = vector.shape_cast %139 : vector<8x32xf32> to vector<1x8x32xf32>
    tpu.vector_store %arg36[%c3_62, %c0_63, %c0_64], %142 {strides = array<i32>} : memref<8x8x32xf32, #tpu.memory_space<vmem>>, vector<1x8x32xf32>,
    %c0_65 = arith.constant 0 : index
    %c4 = arith.constant 4 : index
    %c0_66 = arith.constant 0 : index
    %c0_67 = arith.constant 0 : index
    %143 = vector.load %arg35[%c0_65, %c4, %c0_66, %c0_67] : memref<4x8x8x96xf32, #tpu.memory_space<vmem>>, vector<1x1x8x96xf32>
    %144 = vector.shape_cast %143 : vector<1x1x8x96xf32> to vector<8x96xf32>
    %cst_68 = arith.constant dense<0.000000e+00> : vector<8x96xf32>
    %145 = tpu.matmul %139, %28, %cst_68 {dimension_numbers = #tpu.dot_dimension_numbers<[1], [0], [0], [1], [0, 0, 1, 1], [], []>} : vector<8x32xf32>, vector<32x96xf32>, vector<8x96xf32> -> vector<8x96xf32>
    %146 = vector.extract_strided_slice %144 {offsets = [0, 0], sizes = [8, 64], strides = [1, 1]} : vector<8x96xf32> to vector<8x64xf32>
    %147 = vector.extract_strided_slice %145 {offsets = [0, 0], sizes = [8, 64], strides = [1, 1]} : vector<8x96xf32> to vector<8x64xf32>
    %148 = arith.addf %146, %147 : vector<8x64xf32>
    %149 = arith.negf %148 : vector<8x64xf32>
    %150 = math.exp %149 : vector<8x64xf32>
    %cst_69 = arith.constant 1.000000e+00 : f32
    %151 = vector.broadcast %cst_69 : f32 to vector<8x64xf32>
    %152 = arith.addf %151, %150 : vector<8x64xf32>
    %153 = arith.divf %151, %152 : vector<8x64xf32>
    %154 = vector.extract_strided_slice %153 {offsets = [0, 0], sizes = [8, 32], strides = [1, 1]} : vector<8x64xf32> to vector<8x32xf32>
    %155 = vector.extract_strided_slice %153 {offsets = [0, 32], sizes = [8, 32], strides = [1, 1]} : vector<8x64xf32> to vector<8x32xf32>
    %156 = vector.extract_strided_slice %144 {offsets = [0, 64], sizes = [8, 32], strides = [1, 1]} : vector<8x96xf32> to vector<8x32xf32>
    %157 = vector.extract_strided_slice %145 {offsets = [0, 64], sizes = [8, 32], strides = [1, 1]} : vector<8x96xf32> to vector<8x32xf32>
    %158 = vector.broadcast %30 : vector<1x32xf32> to vector<8x32xf32>
    %159 = arith.addf %157, %158 : vector<8x32xf32>
    %160 = arith.mulf %154, %159 : vector<8x32xf32>
    %161 = arith.addf %156, %160 : vector<8x32xf32>
    %162 = math.tanh %161 : vector<8x32xf32>
    %cst_70 = arith.constant 1.000000e+00 : f32
    %163 = vector.broadcast %cst_70 : f32 to vector<8x32xf32>
    %164 = arith.subf %163, %155 : vector<8x32xf32>
    %165 = arith.mulf %164, %162 : vector<8x32xf32>
    %166 = arith.mulf %155, %139 : vector<8x32xf32>
    %167 = arith.addf %165, %166 : vector<8x32xf32>
    %c4_71 = arith.constant 4 : index
    %c0_72 = arith.constant 0 : index
    %c0_73 = arith.constant 0 : index
    %168 = vector.load %arg36[%c4_71, %c0_72, %c0_73] : memref<8x8x32xf32, #tpu.memory_space<vmem>>, vector<1x8x32xf32>
    %169 = vector.shape_cast %168 : vector<1x8x32xf32> to vector<8x32xf32>
    %170 = vector.shape_cast %167 : vector<8x32xf32> to vector<1x8x32xf32>
    tpu.vector_store %arg36[%c4_71, %c0_72, %c0_73], %170 {strides = array<i32>} : memref<8x8x32xf32, #tpu.memory_space<vmem>>, vector<1x8x32xf32>,
    %c0_74 = arith.constant 0 : index
    %c5 = arith.constant 5 : index
    %c0_75 = arith.constant 0 : index
    %c0_76 = arith.constant 0 : index
    %171 = vector.load %arg35[%c0_74, %c5, %c0_75, %c0_76] : memref<4x8x8x96xf32, #tpu.memory_space<vmem>>, vector<1x1x8x96xf32>
    %172 = vector.shape_cast %171 : vector<1x1x8x96xf32> to vector<8x96xf32>
    %cst_77 = arith.constant dense<0.000000e+00> : vector<8x96xf32>
    %173 = tpu.matmul %167, %28, %cst_77 {dimension_numbers = #tpu.dot_dimension_numbers<[1], [0], [0], [1], [0, 0, 1, 1], [], []>} : vector<8x32xf32>, vector<32x96xf32>, vector<8x96xf32> -> vector<8x96xf32>
    %174 = vector.extract_strided_slice %172 {offsets = [0, 0], sizes = [8, 64], strides = [1, 1]} : vector<8x96xf32> to vector<8x64xf32>
    %175 = vector.extract_strided_slice %173 {offsets = [0, 0], sizes = [8, 64], strides = [1, 1]} : vector<8x96xf32> to vector<8x64xf32>
    %176 = arith.addf %174, %175 : vector<8x64xf32>
    %177 = arith.negf %176 : vector<8x64xf32>
    %178 = math.exp %177 : vector<8x64xf32>
    %cst_78 = arith.constant 1.000000e+00 : f32
    %179 = vector.broadcast %cst_78 : f32 to vector<8x64xf32>
    %180 = arith.addf %179, %178 : vector<8x64xf32>
    %181 = arith.divf %179, %180 : vector<8x64xf32>
    %182 = vector.extract_strided_slice %181 {offsets = [0, 0], sizes = [8, 32], strides = [1, 1]} : vector<8x64xf32> to vector<8x32xf32>
    %183 = vector.extract_strided_slice %181 {offsets = [0, 32], sizes = [8, 32], strides = [1, 1]} : vector<8x64xf32> to vector<8x32xf32>
    %184 = vector.extract_strided_slice %172 {offsets = [0, 64], sizes = [8, 32], strides = [1, 1]} : vector<8x96xf32> to vector<8x32xf32>
    %185 = vector.extract_strided_slice %173 {offsets = [0, 64], sizes = [8, 32], strides = [1, 1]} : vector<8x96xf32> to vector<8x32xf32>
    %186 = vector.broadcast %30 : vector<1x32xf32> to vector<8x32xf32>
    %187 = arith.addf %185, %186 : vector<8x32xf32>
    %188 = arith.mulf %182, %187 : vector<8x32xf32>
    %189 = arith.addf %184, %188 : vector<8x32xf32>
    %190 = math.tanh %189 : vector<8x32xf32>
    %cst_79 = arith.constant 1.000000e+00 : f32
    %191 = vector.broadcast %cst_79 : f32 to vector<8x32xf32>
    %192 = arith.subf %191, %183 : vector<8x32xf32>
    %193 = arith.mulf %192, %190 : vector<8x32xf32>
    %194 = arith.mulf %183, %167 : vector<8x32xf32>
    %195 = arith.addf %193, %194 : vector<8x32xf32>
    %c5_80 = arith.constant 5 : index
    %c0_81 = arith.constant 0 : index
    %c0_82 = arith.constant 0 : index
    %196 = vector.load %arg36[%c5_80, %c0_81, %c0_82] : memref<8x8x32xf32, #tpu.memory_space<vmem>>, vector<1x8x32xf32>
    %197 = vector.shape_cast %196 : vector<1x8x32xf32> to vector<8x32xf32>
    %198 = vector.shape_cast %195 : vector<8x32xf32> to vector<1x8x32xf32>
    tpu.vector_store %arg36[%c5_80, %c0_81, %c0_82], %198 {strides = array<i32>} : memref<8x8x32xf32, #tpu.memory_space<vmem>>, vector<1x8x32xf32>,
    %c0_83 = arith.constant 0 : index
    %c6 = arith.constant 6 : index
    %c0_84 = arith.constant 0 : index
    %c0_85 = arith.constant 0 : index
    %199 = vector.load %arg35[%c0_83, %c6, %c0_84, %c0_85] : memref<4x8x8x96xf32, #tpu.memory_space<vmem>>, vector<1x1x8x96xf32>
    %200 = vector.shape_cast %199 : vector<1x1x8x96xf32> to vector<8x96xf32>
    %cst_86 = arith.constant dense<0.000000e+00> : vector<8x96xf32>
    %201 = tpu.matmul %195, %28, %cst_86 {dimension_numbers = #tpu.dot_dimension_numbers<[1], [0], [0], [1], [0, 0, 1, 1], [], []>} : vector<8x32xf32>, vector<32x96xf32>, vector<8x96xf32> -> vector<8x96xf32>
    %202 = vector.extract_strided_slice %200 {offsets = [0, 0], sizes = [8, 64], strides = [1, 1]} : vector<8x96xf32> to vector<8x64xf32>
    %203 = vector.extract_strided_slice %201 {offsets = [0, 0], sizes = [8, 64], strides = [1, 1]} : vector<8x96xf32> to vector<8x64xf32>
    %204 = arith.addf %202, %203 : vector<8x64xf32>
    %205 = arith.negf %204 : vector<8x64xf32>
    %206 = math.exp %205 : vector<8x64xf32>
    %cst_87 = arith.constant 1.000000e+00 : f32
    %207 = vector.broadcast %cst_87 : f32 to vector<8x64xf32>
    %208 = arith.addf %207, %206 : vector<8x64xf32>
    %209 = arith.divf %207, %208 : vector<8x64xf32>
    %210 = vector.extract_strided_slice %209 {offsets = [0, 0], sizes = [8, 32], strides = [1, 1]} : vector<8x64xf32> to vector<8x32xf32>
    %211 = vector.extract_strided_slice %209 {offsets = [0, 32], sizes = [8, 32], strides = [1, 1]} : vector<8x64xf32> to vector<8x32xf32>
    %212 = vector.extract_strided_slice %200 {offsets = [0, 64], sizes = [8, 32], strides = [1, 1]} : vector<8x96xf32> to vector<8x32xf32>
    %213 = vector.extract_strided_slice %201 {offsets = [0, 64], sizes = [8, 32], strides = [1, 1]} : vector<8x96xf32> to vector<8x32xf32>
    %214 = vector.broadcast %30 : vector<1x32xf32> to vector<8x32xf32>
    %215 = arith.addf %213, %214 : vector<8x32xf32>
    %216 = arith.mulf %210, %215 : vector<8x32xf32>
    %217 = arith.addf %212, %216 : vector<8x32xf32>
    %218 = math.tanh %217 : vector<8x32xf32>
    %cst_88 = arith.constant 1.000000e+00 : f32
    %219 = vector.broadcast %cst_88 : f32 to vector<8x32xf32>
    %220 = arith.subf %219, %211 : vector<8x32xf32>
    %221 = arith.mulf %220, %218 : vector<8x32xf32>
    %222 = arith.mulf %211, %195 : vector<8x32xf32>
    %223 = arith.addf %221, %222 : vector<8x32xf32>
    %c6_89 = arith.constant 6 : index
    %c0_90 = arith.constant 0 : index
    %c0_91 = arith.constant 0 : index
    %224 = vector.load %arg36[%c6_89, %c0_90, %c0_91] : memref<8x8x32xf32, #tpu.memory_space<vmem>>, vector<1x8x32xf32>
    %225 = vector.shape_cast %224 : vector<1x8x32xf32> to vector<8x32xf32>
    %226 = vector.shape_cast %223 : vector<8x32xf32> to vector<1x8x32xf32>
    tpu.vector_store %arg36[%c6_89, %c0_90, %c0_91], %226 {strides = array<i32>} : memref<8x8x32xf32, #tpu.memory_space<vmem>>, vector<1x8x32xf32>,
    %c0_92 = arith.constant 0 : index
    %c7 = arith.constant 7 : index
    %c0_93 = arith.constant 0 : index
    %c0_94 = arith.constant 0 : index
    %227 = vector.load %arg35[%c0_92, %c7, %c0_93, %c0_94] : memref<4x8x8x96xf32, #tpu.memory_space<vmem>>, vector<1x1x8x96xf32>
    %228 = vector.shape_cast %227 : vector<1x1x8x96xf32> to vector<8x96xf32>
    %cst_95 = arith.constant dense<0.000000e+00> : vector<8x96xf32>
    %229 = tpu.matmul %223, %28, %cst_95 {dimension_numbers = #tpu.dot_dimension_numbers<[1], [0], [0], [1], [0, 0, 1, 1], [], []>} : vector<8x32xf32>, vector<32x96xf32>, vector<8x96xf32> -> vector<8x96xf32>
    %230 = vector.extract_strided_slice %228 {offsets = [0, 0], sizes = [8, 64], strides = [1, 1]} : vector<8x96xf32> to vector<8x64xf32>
    %231 = vector.extract_strided_slice %229 {offsets = [0, 0], sizes = [8, 64], strides = [1, 1]} : vector<8x96xf32> to vector<8x64xf32>
    %232 = arith.addf %230, %231 : vector<8x64xf32>
    %233 = arith.negf %232 : vector<8x64xf32>
    %234 = math.exp %233 : vector<8x64xf32>
    %cst_96 = arith.constant 1.000000e+00 : f32
    %235 = vector.broadcast %cst_96 : f32 to vector<8x64xf32>
    %236 = arith.addf %235, %234 : vector<8x64xf32>
    %237 = arith.divf %235, %236 : vector<8x64xf32>
    %238 = vector.extract_strided_slice %237 {offsets = [0, 0], sizes = [8, 32], strides = [1, 1]} : vector<8x64xf32> to vector<8x32xf32>
    %239 = vector.extract_strided_slice %237 {offsets = [0, 32], sizes = [8, 32], strides = [1, 1]} : vector<8x64xf32> to vector<8x32xf32>
    %240 = vector.extract_strided_slice %228 {offsets = [0, 64], sizes = [8, 32], strides = [1, 1]} : vector<8x96xf32> to vector<8x32xf32>
    %241 = vector.extract_strided_slice %229 {offsets = [0, 64], sizes = [8, 32], strides = [1, 1]} : vector<8x96xf32> to vector<8x32xf32>
    %242 = vector.broadcast %30 : vector<1x32xf32> to vector<8x32xf32>
    %243 = arith.addf %241, %242 : vector<8x32xf32>
    %244 = arith.mulf %238, %243 : vector<8x32xf32>
    %245 = arith.addf %240, %244 : vector<8x32xf32>
    %246 = math.tanh %245 : vector<8x32xf32>
    %cst_97 = arith.constant 1.000000e+00 : f32
    %247 = vector.broadcast %cst_97 : f32 to vector<8x32xf32>
    %248 = arith.subf %247, %239 : vector<8x32xf32>
    %249 = arith.mulf %248, %246 : vector<8x32xf32>
    %250 = arith.mulf %239, %223 : vector<8x32xf32>
    %251 = arith.addf %249, %250 : vector<8x32xf32>
    %c7_98 = arith.constant 7 : index
    %c0_99 = arith.constant 0 : index
    %c0_100 = arith.constant 0 : index
    %252 = vector.load %arg36[%c7_98, %c0_99, %c0_100] : memref<8x8x32xf32, #tpu.memory_space<vmem>>, vector<1x8x32xf32>
    %253 = vector.shape_cast %252 : vector<1x8x32xf32> to vector<8x32xf32>
    %254 = vector.shape_cast %251 : vector<8x32xf32> to vector<1x8x32xf32>
    tpu.vector_store %arg36[%c7_98, %c0_99, %c0_100], %254 {strides = array<i32>} : memref<8x8x32xf32, #tpu.memory_space<vmem>>, vector<1x8x32xf32>,
    %c0_101 = arith.constant 0 : index
    %c0_102 = arith.constant 0 : index
    %c0_103 = arith.constant 0 : index
    %255 = vector.load %arg36[%c0_101, %c0_102, %c0_103] : memref<8x8x32xf32, #tpu.memory_space<vmem>>, vector<8x8x32xf32>
    %256 = vector.shape_cast %255 : vector<8x8x32xf32> to vector<64x32xf32>
    %c0_104 = arith.constant 0 : index
    %c0_105 = arith.constant 0 : index
    %c0_106 = arith.constant 0 : index
    %257 = vector.load %arg5[%c0_104, %c0_105, %c0_106] : memref<1x32x96xf32, #tpu.memory_space<vmem>>, vector<1x32x96xf32>
    %258 = vector.shape_cast %257 : vector<1x32x96xf32> to vector<32x96xf32>
    %cst_107 = arith.constant dense<0.000000e+00> : vector<64x96xf32>
    %259 = tpu.matmul %256, %258, %cst_107 {dimension_numbers = #tpu.dot_dimension_numbers<[1], [0], [0], [1], [0, 0, 1, 1], [], []>} : vector<64x32xf32>, vector<32x96xf32>, vector<64x96xf32> -> vector<64x96xf32>
    %c0_108 = arith.constant 0 : index
    %c0_109 = arith.constant 0 : index
    %c0_110 = arith.constant 0 : index
    %260 = vector.load %arg6[%c0_108, %c0_109, %c0_110] : memref<1x1x96xf32, #tpu.memory_space<vmem>>, vector<1x1x96xf32>
    %261 = vector.shape_cast %260 : vector<1x1x96xf32> to vector<1x96xf32>
    %262 = vector.broadcast %261 : vector<1x96xf32> to vector<64x96xf32>
    %263 = arith.addf %259, %262 : vector<64x96xf32>
    %264 = vector.shape_cast %263 : vector<64x96xf32> to vector<8x8x96xf32>
    %c0_111 = arith.constant 0 : index
    %c0_112 = arith.constant 0 : index
    %c0_113 = arith.constant 0 : index
    %265 = vector.load %arg38[%c0_111, %c0_112, %c0_113] : memref<8x8x96xf32, #tpu.memory_space<vmem>>, vector<8x8x96xf32>
    tpu.vector_store %arg38[%c0_111, %c0_112, %c0_113], %264 {strides = array<i32>} : memref<8x8x96xf32, #tpu.memory_space<vmem>>, vector<8x8x96xf32>,
    %c1_114 = arith.constant 1 : index
    %c0_115 = arith.constant 0 : index
    %c0_116 = arith.constant 0 : index
    %266 = vector.load %arg3[%c1_114, %c0_115, %c0_116] : memref<2x32x96xf32, #tpu.memory_space<vmem>>, vector<1x32x96xf32>
    %267 = vector.shape_cast %266 : vector<1x32x96xf32> to vector<32x96xf32>
    %c1_117 = arith.constant 1 : index
    %c0_118 = arith.constant 0 : index
    %c0_119 = arith.constant 0 : index
    %268 = vector.load %arg4[%c1_117, %c0_118, %c0_119] : memref<2x1x32xf32, #tpu.memory_space<vmem>>, vector<1x1x32xf32>
    %269 = vector.shape_cast %268 : vector<1x1x32xf32> to vector<1x32xf32>
    %c0_120 = arith.constant 0 : index
    %c0_121 = arith.constant 0 : index
    %c0_122 = arith.constant 0 : index
    %270 = vector.load %arg38[%c0_120, %c0_121, %c0_122] : memref<8x8x96xf32, #tpu.memory_space<vmem>>, vector<1x8x96xf32>
    %271 = vector.shape_cast %270 : vector<1x8x96xf32> to vector<8x96xf32>
    %cst_123 = arith.constant dense<0.000000e+00> : vector<8x96xf32>
    %272 = tpu.matmul %26, %267, %cst_123 {dimension_numbers = #tpu.dot_dimension_numbers<[1], [0], [0], [1], [0, 0, 1, 1], [], []>} : vector<8x32xf32>, vector<32x96xf32>, vector<8x96xf32> -> vector<8x96xf32>
    %273 = vector.extract_strided_slice %271 {offsets = [0, 0], sizes = [8, 64], strides = [1, 1]} : vector<8x96xf32> to vector<8x64xf32>
    %274 = vector.extract_strided_slice %272 {offsets = [0, 0], sizes = [8, 64], strides = [1, 1]} : vector<8x96xf32> to vector<8x64xf32>
    %275 = arith.addf %273, %274 : vector<8x64xf32>
    %276 = arith.negf %275 : vector<8x64xf32>
    %277 = math.exp %276 : vector<8x64xf32>
    %cst_124 = arith.constant 1.000000e+00 : f32
    %278 = vector.broadcast %cst_124 : f32 to vector<8x64xf32>
    %279 = arith.addf %278, %277 : vector<8x64xf32>
    %280 = arith.divf %278, %279 : vector<8x64xf32>
    %281 = vector.extract_strided_slice %280 {offsets = [0, 0], sizes = [8, 32], strides = [1, 1]} : vector<8x64xf32> to vector<8x32xf32>
    %282 = vector.extract_strided_slice %280 {offsets = [0, 32], sizes = [8, 32], strides = [1, 1]} : vector<8x64xf32> to vector<8x32xf32>
    %283 = vector.extract_strided_slice %271 {offsets = [0, 64], sizes = [8, 32], strides = [1, 1]} : vector<8x96xf32> to vector<8x32xf32>
    %284 = vector.extract_strided_slice %272 {offsets = [0, 64], sizes = [8, 32], strides = [1, 1]} : vector<8x96xf32> to vector<8x32xf32>
    %285 = vector.broadcast %269 : vector<1x32xf32> to vector<8x32xf32>
    %286 = arith.addf %284, %285 : vector<8x32xf32>
    %287 = arith.mulf %281, %286 : vector<8x32xf32>
    %288 = arith.addf %283, %287 : vector<8x32xf32>
    %289 = math.tanh %288 : vector<8x32xf32>
    %cst_125 = arith.constant 1.000000e+00 : f32
    %290 = vector.broadcast %cst_125 : f32 to vector<8x32xf32>
    %291 = arith.subf %290, %282 : vector<8x32xf32>
    %292 = arith.mulf %291, %289 : vector<8x32xf32>
    %293 = arith.mulf %282, %26 : vector<8x32xf32>
    %294 = arith.addf %292, %293 : vector<8x32xf32>
    %c1_126 = arith.constant 1 : index
    %c0_127 = arith.constant 0 : index
    %c0_128 = arith.constant 0 : index
    %295 = vector.load %arg38[%c1_126, %c0_127, %c0_128] : memref<8x8x96xf32, #tpu.memory_space<vmem>>, vector<1x8x96xf32>
    %296 = vector.shape_cast %295 : vector<1x8x96xf32> to vector<8x96xf32>
    %cst_129 = arith.constant dense<0.000000e+00> : vector<8x96xf32>
    %297 = tpu.matmul %294, %267, %cst_129 {dimension_numbers = #tpu.dot_dimension_numbers<[1], [0], [0], [1], [0, 0, 1, 1], [], []>} : vector<8x32xf32>, vector<32x96xf32>, vector<8x96xf32> -> vector<8x96xf32>
    %298 = vector.extract_strided_slice %296 {offsets = [0, 0], sizes = [8, 64], strides = [1, 1]} : vector<8x96xf32> to vector<8x64xf32>
    %299 = vector.extract_strided_slice %297 {offsets = [0, 0], sizes = [8, 64], strides = [1, 1]} : vector<8x96xf32> to vector<8x64xf32>
    %300 = arith.addf %298, %299 : vector<8x64xf32>
    %301 = arith.negf %300 : vector<8x64xf32>
    %302 = math.exp %301 : vector<8x64xf32>
    %cst_130 = arith.constant 1.000000e+00 : f32
    %303 = vector.broadcast %cst_130 : f32 to vector<8x64xf32>
    %304 = arith.addf %303, %302 : vector<8x64xf32>
    %305 = arith.divf %303, %304 : vector<8x64xf32>
    %306 = vector.extract_strided_slice %305 {offsets = [0, 0], sizes = [8, 32], strides = [1, 1]} : vector<8x64xf32> to vector<8x32xf32>
    %307 = vector.extract_strided_slice %305 {offsets = [0, 32], sizes = [8, 32], strides = [1, 1]} : vector<8x64xf32> to vector<8x32xf32>
    %308 = vector.extract_strided_slice %296 {offsets = [0, 64], sizes = [8, 32], strides = [1, 1]} : vector<8x96xf32> to vector<8x32xf32>
    %309 = vector.extract_strided_slice %297 {offsets = [0, 64], sizes = [8, 32], strides = [1, 1]} : vector<8x96xf32> to vector<8x32xf32>
    %310 = vector.broadcast %269 : vector<1x32xf32> to vector<8x32xf32>
    %311 = arith.addf %309, %310 : vector<8x32xf32>
    %312 = arith.mulf %306, %311 : vector<8x32xf32>
    %313 = arith.addf %308, %312 : vector<8x32xf32>
    %314 = math.tanh %313 : vector<8x32xf32>
    %cst_131 = arith.constant 1.000000e+00 : f32
    %315 = vector.broadcast %cst_131 : f32 to vector<8x32xf32>
    %316 = arith.subf %315, %307 : vector<8x32xf32>
    %317 = arith.mulf %316, %314 : vector<8x32xf32>
    %318 = arith.mulf %307, %294 : vector<8x32xf32>
    %319 = arith.addf %317, %318 : vector<8x32xf32>
    %c2_132 = arith.constant 2 : index
    %c0_133 = arith.constant 0 : index
    %c0_134 = arith.constant 0 : index
    %320 = vector.load %arg38[%c2_132, %c0_133, %c0_134] : memref<8x8x96xf32, #tpu.memory_space<vmem>>, vector<1x8x96xf32>
    %321 = vector.shape_cast %320 : vector<1x8x96xf32> to vector<8x96xf32>
    %cst_135 = arith.constant dense<0.000000e+00> : vector<8x96xf32>
    %322 = tpu.matmul %319, %267, %cst_135 {dimension_numbers = #tpu.dot_dimension_numbers<[1], [0], [0], [1], [0, 0, 1, 1], [], []>} : vector<8x32xf32>, vector<32x96xf32>, vector<8x96xf32> -> vector<8x96xf32>
    %323 = vector.extract_strided_slice %321 {offsets = [0, 0], sizes = [8, 64], strides = [1, 1]} : vector<8x96xf32> to vector<8x64xf32>
    %324 = vector.extract_strided_slice %322 {offsets = [0, 0], sizes = [8, 64], strides = [1, 1]} : vector<8x96xf32> to vector<8x64xf32>
    %325 = arith.addf %323, %324 : vector<8x64xf32>
    %326 = arith.negf %325 : vector<8x64xf32>
    %327 = math.exp %326 : vector<8x64xf32>
    %cst_136 = arith.constant 1.000000e+00 : f32
    %328 = vector.broadcast %cst_136 : f32 to vector<8x64xf32>
    %329 = arith.addf %328, %327 : vector<8x64xf32>
    %330 = arith.divf %328, %329 : vector<8x64xf32>
    %331 = vector.extract_strided_slice %330 {offsets = [0, 0], sizes = [8, 32], strides = [1, 1]} : vector<8x64xf32> to vector<8x32xf32>
    %332 = vector.extract_strided_slice %330 {offsets = [0, 32], sizes = [8, 32], strides = [1, 1]} : vector<8x64xf32> to vector<8x32xf32>
    %333 = vector.extract_strided_slice %321 {offsets = [0, 64], sizes = [8, 32], strides = [1, 1]} : vector<8x96xf32> to vector<8x32xf32>
    %334 = vector.extract_strided_slice %322 {offsets = [0, 64], sizes = [8, 32], strides = [1, 1]} : vector<8x96xf32> to vector<8x32xf32>
    %335 = vector.broadcast %269 : vector<1x32xf32> to vector<8x32xf32>
    %336 = arith.addf %334, %335 : vector<8x32xf32>
    %337 = arith.mulf %331, %336 : vector<8x32xf32>
    %338 = arith.addf %333, %337 : vector<8x32xf32>
    %339 = math.tanh %338 : vector<8x32xf32>
    %cst_137 = arith.constant 1.000000e+00 : f32
    %340 = vector.broadcast %cst_137 : f32 to vector<8x32xf32>
    %341 = arith.subf %340, %332 : vector<8x32xf32>
    %342 = arith.mulf %341, %339 : vector<8x32xf32>
    %343 = arith.mulf %332, %319 : vector<8x32xf32>
    %344 = arith.addf %342, %343 : vector<8x32xf32>
    %c3_138 = arith.constant 3 : index
    %c0_139 = arith.constant 0 : index
    %c0_140 = arith.constant 0 : index
    %345 = vector.load %arg38[%c3_138, %c0_139, %c0_140] : memref<8x8x96xf32, #tpu.memory_space<vmem>>, vector<1x8x96xf32>
    %346 = vector.shape_cast %345 : vector<1x8x96xf32> to vector<8x96xf32>
    %cst_141 = arith.constant dense<0.000000e+00> : vector<8x96xf32>
    %347 = tpu.matmul %344, %267, %cst_141 {dimension_numbers = #tpu.dot_dimension_numbers<[1], [0], [0], [1], [0, 0, 1, 1], [], []>} : vector<8x32xf32>, vector<32x96xf32>, vector<8x96xf32> -> vector<8x96xf32>
    %348 = vector.extract_strided_slice %346 {offsets = [0, 0], sizes = [8, 64], strides = [1, 1]} : vector<8x96xf32> to vector<8x64xf32>
    %349 = vector.extract_strided_slice %347 {offsets = [0, 0], sizes = [8, 64], strides = [1, 1]} : vector<8x96xf32> to vector<8x64xf32>
    %350 = arith.addf %348, %349 : vector<8x64xf32>
    %351 = arith.negf %350 : vector<8x64xf32>
    %352 = math.exp %351 : vector<8x64xf32>
    %cst_142 = arith.constant 1.000000e+00 : f32
    %353 = vector.broadcast %cst_142 : f32 to vector<8x64xf32>
    %354 = arith.addf %353, %352 : vector<8x64xf32>
    %355 = arith.divf %353, %354 : vector<8x64xf32>
    %356 = vector.extract_strided_slice %355 {offsets = [0, 0], sizes = [8, 32], strides = [1, 1]} : vector<8x64xf32> to vector<8x32xf32>
    %357 = vector.extract_strided_slice %355 {offsets = [0, 32], sizes = [8, 32], strides = [1, 1]} : vector<8x64xf32> to vector<8x32xf32>
    %358 = vector.extract_strided_slice %346 {offsets = [0, 64], sizes = [8, 32], strides = [1, 1]} : vector<8x96xf32> to vector<8x32xf32>
    %359 = vector.extract_strided_slice %347 {offsets = [0, 64], sizes = [8, 32], strides = [1, 1]} : vector<8x96xf32> to vector<8x32xf32>
    %360 = vector.broadcast %269 : vector<1x32xf32> to vector<8x32xf32>
    %361 = arith.addf %359, %360 : vector<8x32xf32>
    %362 = arith.mulf %356, %361 : vector<8x32xf32>
    %363 = arith.addf %358, %362 : vector<8x32xf32>
    %364 = math.tanh %363 : vector<8x32xf32>
    %cst_143 = arith.constant 1.000000e+00 : f32
    %365 = vector.broadcast %cst_143 : f32 to vector<8x32xf32>
    %366 = arith.subf %365, %357 : vector<8x32xf32>
    %367 = arith.mulf %366, %364 : vector<8x32xf32>
    %368 = arith.mulf %357, %344 : vector<8x32xf32>
    %369 = arith.addf %367, %368 : vector<8x32xf32>
    %c4_144 = arith.constant 4 : index
    %c0_145 = arith.constant 0 : index
    %c0_146 = arith.constant 0 : index
    %370 = vector.load %arg38[%c4_144, %c0_145, %c0_146] : memref<8x8x96xf32, #tpu.memory_space<vmem>>, vector<1x8x96xf32>
    %371 = vector.shape_cast %370 : vector<1x8x96xf32> to vector<8x96xf32>
    %cst_147 = arith.constant dense<0.000000e+00> : vector<8x96xf32>
    %372 = tpu.matmul %369, %267, %cst_147 {dimension_numbers = #tpu.dot_dimension_numbers<[1], [0], [0], [1], [0, 0, 1, 1], [], []>} : vector<8x32xf32>, vector<32x96xf32>, vector<8x96xf32> -> vector<8x96xf32>
    %373 = vector.extract_strided_slice %371 {offsets = [0, 0], sizes = [8, 64], strides = [1, 1]} : vector<8x96xf32> to vector<8x64xf32>
    %374 = vector.extract_strided_slice %372 {offsets = [0, 0], sizes = [8, 64], strides = [1, 1]} : vector<8x96xf32> to vector<8x64xf32>
    %375 = arith.addf %373, %374 : vector<8x64xf32>
    %376 = arith.negf %375 : vector<8x64xf32>
    %377 = math.exp %376 : vector<8x64xf32>
    %cst_148 = arith.constant 1.000000e+00 : f32
    %378 = vector.broadcast %cst_148 : f32 to vector<8x64xf32>
    %379 = arith.addf %378, %377 : vector<8x64xf32>
    %380 = arith.divf %378, %379 : vector<8x64xf32>
    %381 = vector.extract_strided_slice %380 {offsets = [0, 0], sizes = [8, 32], strides = [1, 1]} : vector<8x64xf32> to vector<8x32xf32>
    %382 = vector.extract_strided_slice %380 {offsets = [0, 32], sizes = [8, 32], strides = [1, 1]} : vector<8x64xf32> to vector<8x32xf32>
    %383 = vector.extract_strided_slice %371 {offsets = [0, 64], sizes = [8, 32], strides = [1, 1]} : vector<8x96xf32> to vector<8x32xf32>
    %384 = vector.extract_strided_slice %372 {offsets = [0, 64], sizes = [8, 32], strides = [1, 1]} : vector<8x96xf32> to vector<8x32xf32>
    %385 = vector.broadcast %269 : vector<1x32xf32> to vector<8x32xf32>
    %386 = arith.addf %384, %385 : vector<8x32xf32>
    %387 = arith.mulf %381, %386 : vector<8x32xf32>
    %388 = arith.addf %383, %387 : vector<8x32xf32>
    %389 = math.tanh %388 : vector<8x32xf32>
    %cst_149 = arith.constant 1.000000e+00 : f32
    %390 = vector.broadcast %cst_149 : f32 to vector<8x32xf32>
    %391 = arith.subf %390, %382 : vector<8x32xf32>
    %392 = arith.mulf %391, %389 : vector<8x32xf32>
    %393 = arith.mulf %382, %369 : vector<8x32xf32>
    %394 = arith.addf %392, %393 : vector<8x32xf32>
    %c5_150 = arith.constant 5 : index
    %c0_151 = arith.constant 0 : index
    %c0_152 = arith.constant 0 : index
    %395 = vector.load %arg38[%c5_150, %c0_151, %c0_152] : memref<8x8x96xf32, #tpu.memory_space<vmem>>, vector<1x8x96xf32>
    %396 = vector.shape_cast %395 : vector<1x8x96xf32> to vector<8x96xf32>
    %cst_153 = arith.constant dense<0.000000e+00> : vector<8x96xf32>
    %397 = tpu.matmul %394, %267, %cst_153 {dimension_numbers = #tpu.dot_dimension_numbers<[1], [0], [0], [1], [0, 0, 1, 1], [], []>} : vector<8x32xf32>, vector<32x96xf32>, vector<8x96xf32> -> vector<8x96xf32>
    %398 = vector.extract_strided_slice %396 {offsets = [0, 0], sizes = [8, 64], strides = [1, 1]} : vector<8x96xf32> to vector<8x64xf32>
    %399 = vector.extract_strided_slice %397 {offsets = [0, 0], sizes = [8, 64], strides = [1, 1]} : vector<8x96xf32> to vector<8x64xf32>
    %400 = arith.addf %398, %399 : vector<8x64xf32>
    %401 = arith.negf %400 : vector<8x64xf32>
    %402 = math.exp %401 : vector<8x64xf32>
    %cst_154 = arith.constant 1.000000e+00 : f32
    %403 = vector.broadcast %cst_154 : f32 to vector<8x64xf32>
    %404 = arith.addf %403, %402 : vector<8x64xf32>
    %405 = arith.divf %403, %404 : vector<8x64xf32>
    %406 = vector.extract_strided_slice %405 {offsets = [0, 0], sizes = [8, 32], strides = [1, 1]} : vector<8x64xf32> to vector<8x32xf32>
    %407 = vector.extract_strided_slice %405 {offsets = [0, 32], sizes = [8, 32], strides = [1, 1]} : vector<8x64xf32> to vector<8x32xf32>
    %408 = vector.extract_strided_slice %396 {offsets = [0, 64], sizes = [8, 32], strides = [1, 1]} : vector<8x96xf32> to vector<8x32xf32>
    %409 = vector.extract_strided_slice %397 {offsets = [0, 64], sizes = [8, 32], strides = [1, 1]} : vector<8x96xf32> to vector<8x32xf32>
    %410 = vector.broadcast %269 : vector<1x32xf32> to vector<8x32xf32>
    %411 = arith.addf %409, %410 : vector<8x32xf32>
    %412 = arith.mulf %406, %411 : vector<8x32xf32>
    %413 = arith.addf %408, %412 : vector<8x32xf32>
    %414 = math.tanh %413 : vector<8x32xf32>
    %cst_155 = arith.constant 1.000000e+00 : f32
    %415 = vector.broadcast %cst_155 : f32 to vector<8x32xf32>
    %416 = arith.subf %415, %407 : vector<8x32xf32>
    %417 = arith.mulf %416, %414 : vector<8x32xf32>
    %418 = arith.mulf %407, %394 : vector<8x32xf32>
    %419 = arith.addf %417, %418 : vector<8x32xf32>
    %c6_156 = arith.constant 6 : index
    %c0_157 = arith.constant 0 : index
    %c0_158 = arith.constant 0 : index
    %420 = vector.load %arg38[%c6_156, %c0_157, %c0_158] : memref<8x8x96xf32, #tpu.memory_space<vmem>>, vector<1x8x96xf32>
    %421 = vector.shape_cast %420 : vector<1x8x96xf32> to vector<8x96xf32>
    %cst_159 = arith.constant dense<0.000000e+00> : vector<8x96xf32>
    %422 = tpu.matmul %419, %267, %cst_159 {dimension_numbers = #tpu.dot_dimension_numbers<[1], [0], [0], [1], [0, 0, 1, 1], [], []>} : vector<8x32xf32>, vector<32x96xf32>, vector<8x96xf32> -> vector<8x96xf32>
    %423 = vector.extract_strided_slice %421 {offsets = [0, 0], sizes = [8, 64], strides = [1, 1]} : vector<8x96xf32> to vector<8x64xf32>
    %424 = vector.extract_strided_slice %422 {offsets = [0, 0], sizes = [8, 64], strides = [1, 1]} : vector<8x96xf32> to vector<8x64xf32>
    %425 = arith.addf %423, %424 : vector<8x64xf32>
    %426 = arith.negf %425 : vector<8x64xf32>
    %427 = math.exp %426 : vector<8x64xf32>
    %cst_160 = arith.constant 1.000000e+00 : f32
    %428 = vector.broadcast %cst_160 : f32 to vector<8x64xf32>
    %429 = arith.addf %428, %427 : vector<8x64xf32>
    %430 = arith.divf %428, %429 : vector<8x64xf32>
    %431 = vector.extract_strided_slice %430 {offsets = [0, 0], sizes = [8, 32], strides = [1, 1]} : vector<8x64xf32> to vector<8x32xf32>
    %432 = vector.extract_strided_slice %430 {offsets = [0, 32], sizes = [8, 32], strides = [1, 1]} : vector<8x64xf32> to vector<8x32xf32>
    %433 = vector.extract_strided_slice %421 {offsets = [0, 64], sizes = [8, 32], strides = [1, 1]} : vector<8x96xf32> to vector<8x32xf32>
    %434 = vector.extract_strided_slice %422 {offsets = [0, 64], sizes = [8, 32], strides = [1, 1]} : vector<8x96xf32> to vector<8x32xf32>
    %435 = vector.broadcast %269 : vector<1x32xf32> to vector<8x32xf32>
    %436 = arith.addf %434, %435 : vector<8x32xf32>
    %437 = arith.mulf %431, %436 : vector<8x32xf32>
    %438 = arith.addf %433, %437 : vector<8x32xf32>
    %439 = math.tanh %438 : vector<8x32xf32>
    %cst_161 = arith.constant 1.000000e+00 : f32
    %440 = vector.broadcast %cst_161 : f32 to vector<8x32xf32>
    %441 = arith.subf %440, %432 : vector<8x32xf32>
    %442 = arith.mulf %441, %439 : vector<8x32xf32>
    %443 = arith.mulf %432, %419 : vector<8x32xf32>
    %444 = arith.addf %442, %443 : vector<8x32xf32>
    %c7_162 = arith.constant 7 : index
    %c0_163 = arith.constant 0 : index
    %c0_164 = arith.constant 0 : index
    %445 = vector.load %arg38[%c7_162, %c0_163, %c0_164] : memref<8x8x96xf32, #tpu.memory_space<vmem>>, vector<1x8x96xf32>
    %446 = vector.shape_cast %445 : vector<1x8x96xf32> to vector<8x96xf32>
    %cst_165 = arith.constant dense<0.000000e+00> : vector<8x96xf32>
    %447 = tpu.matmul %444, %267, %cst_165 {dimension_numbers = #tpu.dot_dimension_numbers<[1], [0], [0], [1], [0, 0, 1, 1], [], []>} : vector<8x32xf32>, vector<32x96xf32>, vector<8x96xf32> -> vector<8x96xf32>
    %448 = vector.extract_strided_slice %446 {offsets = [0, 0], sizes = [8, 64], strides = [1, 1]} : vector<8x96xf32> to vector<8x64xf32>
    %449 = vector.extract_strided_slice %447 {offsets = [0, 0], sizes = [8, 64], strides = [1, 1]} : vector<8x96xf32> to vector<8x64xf32>
    %450 = arith.addf %448, %449 : vector<8x64xf32>
    %451 = arith.negf %450 : vector<8x64xf32>
    %452 = math.exp %451 : vector<8x64xf32>
    %cst_166 = arith.constant 1.000000e+00 : f32
    %453 = vector.broadcast %cst_166 : f32 to vector<8x64xf32>
    %454 = arith.addf %453, %452 : vector<8x64xf32>
    %455 = arith.divf %453, %454 : vector<8x64xf32>
    %456 = vector.extract_strided_slice %455 {offsets = [0, 0], sizes = [8, 32], strides = [1, 1]} : vector<8x64xf32> to vector<8x32xf32>
    %457 = vector.extract_strided_slice %455 {offsets = [0, 32], sizes = [8, 32], strides = [1, 1]} : vector<8x64xf32> to vector<8x32xf32>
    %458 = vector.extract_strided_slice %446 {offsets = [0, 64], sizes = [8, 32], strides = [1, 1]} : vector<8x96xf32> to vector<8x32xf32>
    %459 = vector.extract_strided_slice %447 {offsets = [0, 64], sizes = [8, 32], strides = [1, 1]} : vector<8x96xf32> to vector<8x32xf32>
    %460 = vector.broadcast %269 : vector<1x32xf32> to vector<8x32xf32>
    %461 = arith.addf %459, %460 : vector<8x32xf32>
    %462 = arith.mulf %456, %461 : vector<8x32xf32>
    %463 = arith.addf %458, %462 : vector<8x32xf32>
    %464 = math.tanh %463 : vector<8x32xf32>
    %cst_167 = arith.constant 1.000000e+00 : f32
    %465 = vector.broadcast %cst_167 : f32 to vector<8x32xf32>
    %466 = arith.subf %465, %457 : vector<8x32xf32>
    %467 = arith.mulf %466, %464 : vector<8x32xf32>
    %468 = arith.mulf %457, %444 : vector<8x32xf32>
    %469 = arith.addf %467, %468 : vector<8x32xf32>
    %470 = tpu.concatenate %251, %469 in 1 : vector<8x32xf32>, vector<8x32xf32> -> vector<8x64xf32>
    %c0_168 = arith.constant 0 : index
    %c0_169 = arith.constant 0 : index
    %471 = vector.load %arg7[%c0_168, %c0_169] : memref<64x8xf32, #tpu.memory_space<vmem>>, vector<64x8xf32>
    %cst_170 = arith.constant dense<0.000000e+00> : vector<8x8xf32>
    %472 = tpu.matmul %470, %471, %cst_170 {dimension_numbers = #tpu.dot_dimension_numbers<[1], [0], [0], [1], [0, 0, 1, 1], [], []>} : vector<8x64xf32>, vector<64x8xf32>, vector<8x8xf32> -> vector<8x8xf32>
    %c0_171 = arith.constant 0 : index
    %c0_172 = arith.constant 0 : index
    %473 = vector.load %arg8[%c0_171, %c0_172] : memref<1x8xf32, #tpu.memory_space<vmem>>, vector<1x8xf32>
    %474 = vector.broadcast %473 : vector<1x8xf32> to vector<8x8xf32>
    %475 = arith.addf %472, %474 : vector<8x8xf32>
    %c0_173 = arith.constant 0 : index
    %c0_174 = arith.constant 0 : index
    %476 = vector.load %arg9[%c0_173, %c0_174] : memref<64x8xf32, #tpu.memory_space<vmem>>, vector<64x8xf32>
    %cst_175 = arith.constant dense<0.000000e+00> : vector<8x8xf32>
    %477 = tpu.matmul %470, %476, %cst_175 {dimension_numbers = #tpu.dot_dimension_numbers<[1], [0], [0], [1], [0, 0, 1, 1], [], []>} : vector<8x64xf32>, vector<64x8xf32>, vector<8x8xf32> -> vector<8x8xf32>
    %c0_176 = arith.constant 0 : index
    %c0_177 = arith.constant 0 : index
    %478 = vector.load %arg10[%c0_176, %c0_177] : memref<1x8xf32, #tpu.memory_space<vmem>>, vector<1x8xf32>
    %479 = vector.broadcast %478 : vector<1x8xf32> to vector<8x8xf32>
    %480 = arith.addf %477, %479 : vector<8x8xf32>
    %c0_178 = arith.constant 0 : index
    %c0_179 = arith.constant 0 : index
    %481 = vector.load %arg11[%c0_178, %c0_179] : memref<8x8xf32, #tpu.memory_space<vmem>>, vector<8x8xf32>
    %cst_180 = arith.constant 5.000000e-01 : f32
    %482 = vector.broadcast %cst_180 : f32 to vector<8x8xf32>
    %483 = arith.mulf %482, %480 : vector<8x8xf32>
    %484 = math.exp %483 : vector<8x8xf32>
    %485 = arith.mulf %481, %484 : vector<8x8xf32>
    %486 = arith.addf %475, %485 : vector<8x8xf32>
    %c0_181 = arith.constant 0 : index
    %c0_182 = arith.constant 0 : index
    %487 = vector.load %arg12[%c0_181, %c0_182] : memref<8x4xf32, #tpu.memory_space<vmem>>, vector<8x4xf32>
    %488 = tpu.concatenate %486, %487 in 1 : vector<8x8xf32>, vector<8x4xf32> -> vector<8x12xf32>
    %c0_183 = arith.constant 0 : index
    %c0_184 = arith.constant 0 : index
    %489 = vector.load %arg13[%c0_183, %c0_184] : memref<12x64xf32, #tpu.memory_space<vmem>>, vector<12x64xf32>
    %cst_185 = arith.constant dense<0.000000e+00> : vector<8x64xf32>
    %490 = tpu.matmul %488, %489, %cst_185 {dimension_numbers = #tpu.dot_dimension_numbers<[1], [0], [0], [1], [0, 0, 1, 1], [], []>} : vector<8x12xf32>, vector<12x64xf32>, vector<8x64xf32> -> vector<8x64xf32>
    %c0_186 = arith.constant 0 : index
    %c0_187 = arith.constant 0 : index
    %491 = vector.load %arg14[%c0_186, %c0_187] : memref<1x64xf32, #tpu.memory_space<vmem>>, vector<1x64xf32>
    %492 = vector.broadcast %491 : vector<1x64xf32> to vector<8x64xf32>
    %493 = arith.addf %490, %492 : vector<8x64xf32>
    %c0_188 = arith.constant 0 : index
    %c0_189 = arith.constant 0 : index
    %494 = vector.load %arg31[%c0_188, %c0_189] : memref<8x8xf32, #tpu.memory_space<vmem>>, vector<8x8xf32>
    tpu.vector_store %arg31[%c0_188, %c0_189], %475 {strides = array<i32>} : memref<8x8xf32, #tpu.memory_space<vmem>>, vector<8x8xf32>,
    %c0_190 = arith.constant 0 : index
    %c0_191 = arith.constant 0 : index
    %495 = vector.load %arg32[%c0_190, %c0_191] : memref<8x8xf32, #tpu.memory_space<vmem>>, vector<8x8xf32>
    tpu.vector_store %arg32[%c0_190, %c0_191], %480 {strides = array<i32>} : memref<8x8xf32, #tpu.memory_space<vmem>>, vector<8x8xf32>,
    %496 = vector.extract_strided_slice %493 {offsets = [0, 0], sizes = [8, 32], strides = [1, 1]} : vector<8x64xf32> to vector<8x32xf32>
    %497 = vector.extract_strided_slice %493 {offsets = [0, 32], sizes = [8, 32], strides = [1, 1]} : vector<8x64xf32> to vector<8x32xf32>
    %c0_192 = arith.constant 0 : index
    %c0_193 = arith.constant 0 : index
    %c0_194 = arith.constant 0 : index
    %498 = vector.load %arg15[%c0_192, %c0_193, %c0_194] : memref<2x32x96xf32, #tpu.memory_space<vmem>>, vector<1x32x96xf32>
    %499 = vector.shape_cast %498 : vector<1x32x96xf32> to vector<32x96xf32>
    %c0_195 = arith.constant 0 : index
    %c0_196 = arith.constant 0 : index
    %c0_197 = arith.constant 0 : index
    %500 = vector.load %arg16[%c0_195, %c0_196, %c0_197] : memref<2x1x32xf32, #tpu.memory_space<vmem>>, vector<1x1x32xf32>
    %501 = vector.shape_cast %500 : vector<1x1x32xf32> to vector<1x32xf32>
    %c1_198 = arith.constant 1 : index
    %c0_199 = arith.constant 0 : index
    %c0_200 = arith.constant 0 : index
    %c0_201 = arith.constant 0 : index
    %502 = vector.load %arg35[%c1_198, %c0_199, %c0_200, %c0_201] : memref<4x8x8x96xf32, #tpu.memory_space<vmem>>, vector<1x1x8x96xf32>
    %503 = vector.shape_cast %502 : vector<1x1x8x96xf32> to vector<8x96xf32>
    %cst_202 = arith.constant dense<0.000000e+00> : vector<8x96xf32>
    %504 = tpu.matmul %496, %499, %cst_202 {dimension_numbers = #tpu.dot_dimension_numbers<[1], [0], [0], [1], [0, 0, 1, 1], [], []>} : vector<8x32xf32>, vector<32x96xf32>, vector<8x96xf32> -> vector<8x96xf32>
    %505 = vector.extract_strided_slice %503 {offsets = [0, 0], sizes = [8, 64], strides = [1, 1]} : vector<8x96xf32> to vector<8x64xf32>
    %506 = vector.extract_strided_slice %504 {offsets = [0, 0], sizes = [8, 64], strides = [1, 1]} : vector<8x96xf32> to vector<8x64xf32>
    %507 = arith.addf %505, %506 : vector<8x64xf32>
    %508 = arith.negf %507 : vector<8x64xf32>
    %509 = math.exp %508 : vector<8x64xf32>
    %cst_203 = arith.constant 1.000000e+00 : f32
    %510 = vector.broadcast %cst_203 : f32 to vector<8x64xf32>
    %511 = arith.addf %510, %509 : vector<8x64xf32>
    %512 = arith.divf %510, %511 : vector<8x64xf32>
    %513 = vector.extract_strided_slice %512 {offsets = [0, 0], sizes = [8, 32], strides = [1, 1]} : vector<8x64xf32> to vector<8x32xf32>
    %514 = vector.extract_strided_slice %512 {offsets = [0, 32], sizes = [8, 32], strides = [1, 1]} : vector<8x64xf32> to vector<8x32xf32>
    %515 = vector.extract_strided_slice %503 {offsets = [0, 64], sizes = [8, 32], strides = [1, 1]} : vector<8x96xf32> to vector<8x32xf32>
    %516 = vector.extract_strided_slice %504 {offsets = [0, 64], sizes = [8, 32], strides = [1, 1]} : vector<8x96xf32> to vector<8x32xf32>
    %517 = vector.broadcast %501 : vector<1x32xf32> to vector<8x32xf32>
    %518 = arith.addf %516, %517 : vector<8x32xf32>
    %519 = arith.mulf %513, %518 : vector<8x32xf32>
    %520 = arith.addf %515, %519 : vector<8x32xf32>
    %521 = math.tanh %520 : vector<8x32xf32>
    %cst_204 = arith.constant 1.000000e+00 : f32
    %522 = vector.broadcast %cst_204 : f32 to vector<8x32xf32>
    %523 = arith.subf %522, %514 : vector<8x32xf32>
    %524 = arith.mulf %523, %521 : vector<8x32xf32>
    %525 = arith.mulf %514, %496 : vector<8x32xf32>
    %526 = arith.addf %524, %525 : vector<8x32xf32>
    %c0_205 = arith.constant 0 : index
    %c0_206 = arith.constant 0 : index
    %c0_207 = arith.constant 0 : index
    %527 = vector.load %arg36[%c0_205, %c0_206, %c0_207] : memref<8x8x32xf32, #tpu.memory_space<vmem>>, vector<1x8x32xf32>
    %528 = vector.shape_cast %527 : vector<1x8x32xf32> to vector<8x32xf32>
    %529 = vector.shape_cast %526 : vector<8x32xf32> to vector<1x8x32xf32>
    tpu.vector_store %arg36[%c0_205, %c0_206, %c0_207], %529 {strides = array<i32>} : memref<8x8x32xf32, #tpu.memory_space<vmem>>, vector<1x8x32xf32>,
    %c1_208 = arith.constant 1 : index
    %c1_209 = arith.constant 1 : index
    %c0_210 = arith.constant 0 : index
    %c0_211 = arith.constant 0 : index
    %530 = vector.load %arg35[%c1_208, %c1_209, %c0_210, %c0_211] : memref<4x8x8x96xf32, #tpu.memory_space<vmem>>, vector<1x1x8x96xf32>
    %531 = vector.shape_cast %530 : vector<1x1x8x96xf32> to vector<8x96xf32>
    %cst_212 = arith.constant dense<0.000000e+00> : vector<8x96xf32>
    %532 = tpu.matmul %526, %499, %cst_212 {dimension_numbers = #tpu.dot_dimension_numbers<[1], [0], [0], [1], [0, 0, 1, 1], [], []>} : vector<8x32xf32>, vector<32x96xf32>, vector<8x96xf32> -> vector<8x96xf32>
    %533 = vector.extract_strided_slice %531 {offsets = [0, 0], sizes = [8, 64], strides = [1, 1]} : vector<8x96xf32> to vector<8x64xf32>
    %534 = vector.extract_strided_slice %532 {offsets = [0, 0], sizes = [8, 64], strides = [1, 1]} : vector<8x96xf32> to vector<8x64xf32>
    %535 = arith.addf %533, %534 : vector<8x64xf32>
    %536 = arith.negf %535 : vector<8x64xf32>
    %537 = math.exp %536 : vector<8x64xf32>
    %cst_213 = arith.constant 1.000000e+00 : f32
    %538 = vector.broadcast %cst_213 : f32 to vector<8x64xf32>
    %539 = arith.addf %538, %537 : vector<8x64xf32>
    %540 = arith.divf %538, %539 : vector<8x64xf32>
    %541 = vector.extract_strided_slice %540 {offsets = [0, 0], sizes = [8, 32], strides = [1, 1]} : vector<8x64xf32> to vector<8x32xf32>
    %542 = vector.extract_strided_slice %540 {offsets = [0, 32], sizes = [8, 32], strides = [1, 1]} : vector<8x64xf32> to vector<8x32xf32>
    %543 = vector.extract_strided_slice %531 {offsets = [0, 64], sizes = [8, 32], strides = [1, 1]} : vector<8x96xf32> to vector<8x32xf32>
    %544 = vector.extract_strided_slice %532 {offsets = [0, 64], sizes = [8, 32], strides = [1, 1]} : vector<8x96xf32> to vector<8x32xf32>
    %545 = vector.broadcast %501 : vector<1x32xf32> to vector<8x32xf32>
    %546 = arith.addf %544, %545 : vector<8x32xf32>
    %547 = arith.mulf %541, %546 : vector<8x32xf32>
    %548 = arith.addf %543, %547 : vector<8x32xf32>
    %549 = math.tanh %548 : vector<8x32xf32>
    %cst_214 = arith.constant 1.000000e+00 : f32
    %550 = vector.broadcast %cst_214 : f32 to vector<8x32xf32>
    %551 = arith.subf %550, %542 : vector<8x32xf32>
    %552 = arith.mulf %551, %549 : vector<8x32xf32>
    %553 = arith.mulf %542, %526 : vector<8x32xf32>
    %554 = arith.addf %552, %553 : vector<8x32xf32>
    %c1_215 = arith.constant 1 : index
    %c0_216 = arith.constant 0 : index
    %c0_217 = arith.constant 0 : index
    %555 = vector.load %arg36[%c1_215, %c0_216, %c0_217] : memref<8x8x32xf32, #tpu.memory_space<vmem>>, vector<1x8x32xf32>
    %556 = vector.shape_cast %555 : vector<1x8x32xf32> to vector<8x32xf32>
    %557 = vector.shape_cast %554 : vector<8x32xf32> to vector<1x8x32xf32>
    tpu.vector_store %arg36[%c1_215, %c0_216, %c0_217], %557 {strides = array<i32>} : memref<8x8x32xf32, #tpu.memory_space<vmem>>, vector<1x8x32xf32>,
    %c1_218 = arith.constant 1 : index
    %c2_219 = arith.constant 2 : index
    %c0_220 = arith.constant 0 : index
    %c0_221 = arith.constant 0 : index
    %558 = vector.load %arg35[%c1_218, %c2_219, %c0_220, %c0_221] : memref<4x8x8x96xf32, #tpu.memory_space<vmem>>, vector<1x1x8x96xf32>
    %559 = vector.shape_cast %558 : vector<1x1x8x96xf32> to vector<8x96xf32>
    %cst_222 = arith.constant dense<0.000000e+00> : vector<8x96xf32>
    %560 = tpu.matmul %554, %499, %cst_222 {dimension_numbers = #tpu.dot_dimension_numbers<[1], [0], [0], [1], [0, 0, 1, 1], [], []>} : vector<8x32xf32>, vector<32x96xf32>, vector<8x96xf32> -> vector<8x96xf32>
    %561 = vector.extract_strided_slice %559 {offsets = [0, 0], sizes = [8, 64], strides = [1, 1]} : vector<8x96xf32> to vector<8x64xf32>
    %562 = vector.extract_strided_slice %560 {offsets = [0, 0], sizes = [8, 64], strides = [1, 1]} : vector<8x96xf32> to vector<8x64xf32>
    %563 = arith.addf %561, %562 : vector<8x64xf32>
    %564 = arith.negf %563 : vector<8x64xf32>
    %565 = math.exp %564 : vector<8x64xf32>
    %cst_223 = arith.constant 1.000000e+00 : f32
    %566 = vector.broadcast %cst_223 : f32 to vector<8x64xf32>
    %567 = arith.addf %566, %565 : vector<8x64xf32>
    %568 = arith.divf %566, %567 : vector<8x64xf32>
    %569 = vector.extract_strided_slice %568 {offsets = [0, 0], sizes = [8, 32], strides = [1, 1]} : vector<8x64xf32> to vector<8x32xf32>
    %570 = vector.extract_strided_slice %568 {offsets = [0, 32], sizes = [8, 32], strides = [1, 1]} : vector<8x64xf32> to vector<8x32xf32>
    %571 = vector.extract_strided_slice %559 {offsets = [0, 64], sizes = [8, 32], strides = [1, 1]} : vector<8x96xf32> to vector<8x32xf32>
    %572 = vector.extract_strided_slice %560 {offsets = [0, 64], sizes = [8, 32], strides = [1, 1]} : vector<8x96xf32> to vector<8x32xf32>
    %573 = vector.broadcast %501 : vector<1x32xf32> to vector<8x32xf32>
    %574 = arith.addf %572, %573 : vector<8x32xf32>
    %575 = arith.mulf %569, %574 : vector<8x32xf32>
    %576 = arith.addf %571, %575 : vector<8x32xf32>
    %577 = math.tanh %576 : vector<8x32xf32>
    %cst_224 = arith.constant 1.000000e+00 : f32
    %578 = vector.broadcast %cst_224 : f32 to vector<8x32xf32>
    %579 = arith.subf %578, %570 : vector<8x32xf32>
    %580 = arith.mulf %579, %577 : vector<8x32xf32>
    %581 = arith.mulf %570, %554 : vector<8x32xf32>
    %582 = arith.addf %580, %581 : vector<8x32xf32>
    %c2_225 = arith.constant 2 : index
    %c0_226 = arith.constant 0 : index
    %c0_227 = arith.constant 0 : index
    %583 = vector.load %arg36[%c2_225, %c0_226, %c0_227] : memref<8x8x32xf32, #tpu.memory_space<vmem>>, vector<1x8x32xf32>
    %584 = vector.shape_cast %583 : vector<1x8x32xf32> to vector<8x32xf32>
    %585 = vector.shape_cast %582 : vector<8x32xf32> to vector<1x8x32xf32>
    tpu.vector_store %arg36[%c2_225, %c0_226, %c0_227], %585 {strides = array<i32>} : memref<8x8x32xf32, #tpu.memory_space<vmem>>, vector<1x8x32xf32>,
    %c1_228 = arith.constant 1 : index
    %c3_229 = arith.constant 3 : index
    %c0_230 = arith.constant 0 : index
    %c0_231 = arith.constant 0 : index
    %586 = vector.load %arg35[%c1_228, %c3_229, %c0_230, %c0_231] : memref<4x8x8x96xf32, #tpu.memory_space<vmem>>, vector<1x1x8x96xf32>
    %587 = vector.shape_cast %586 : vector<1x1x8x96xf32> to vector<8x96xf32>
    %cst_232 = arith.constant dense<0.000000e+00> : vector<8x96xf32>
    %588 = tpu.matmul %582, %499, %cst_232 {dimension_numbers = #tpu.dot_dimension_numbers<[1], [0], [0], [1], [0, 0, 1, 1], [], []>} : vector<8x32xf32>, vector<32x96xf32>, vector<8x96xf32> -> vector<8x96xf32>
    %589 = vector.extract_strided_slice %587 {offsets = [0, 0], sizes = [8, 64], strides = [1, 1]} : vector<8x96xf32> to vector<8x64xf32>
    %590 = vector.extract_strided_slice %588 {offsets = [0, 0], sizes = [8, 64], strides = [1, 1]} : vector<8x96xf32> to vector<8x64xf32>
    %591 = arith.addf %589, %590 : vector<8x64xf32>
    %592 = arith.negf %591 : vector<8x64xf32>
    %593 = math.exp %592 : vector<8x64xf32>
    %cst_233 = arith.constant 1.000000e+00 : f32
    %594 = vector.broadcast %cst_233 : f32 to vector<8x64xf32>
    %595 = arith.addf %594, %593 : vector<8x64xf32>
    %596 = arith.divf %594, %595 : vector<8x64xf32>
    %597 = vector.extract_strided_slice %596 {offsets = [0, 0], sizes = [8, 32], strides = [1, 1]} : vector<8x64xf32> to vector<8x32xf32>
    %598 = vector.extract_strided_slice %596 {offsets = [0, 32], sizes = [8, 32], strides = [1, 1]} : vector<8x64xf32> to vector<8x32xf32>
    %599 = vector.extract_strided_slice %587 {offsets = [0, 64], sizes = [8, 32], strides = [1, 1]} : vector<8x96xf32> to vector<8x32xf32>
    %600 = vector.extract_strided_slice %588 {offsets = [0, 64], sizes = [8, 32], strides = [1, 1]} : vector<8x96xf32> to vector<8x32xf32>
    %601 = vector.broadcast %501 : vector<1x32xf32> to vector<8x32xf32>
    %602 = arith.addf %600, %601 : vector<8x32xf32>
    %603 = arith.mulf %597, %602 : vector<8x32xf32>
    %604 = arith.addf %599, %603 : vector<8x32xf32>
    %605 = math.tanh %604 : vector<8x32xf32>
    %cst_234 = arith.constant 1.000000e+00 : f32
    %606 = vector.broadcast %cst_234 : f32 to vector<8x32xf32>
    %607 = arith.subf %606, %598 : vector<8x32xf32>
    %608 = arith.mulf %607, %605 : vector<8x32xf32>
    %609 = arith.mulf %598, %582 : vector<8x32xf32>
    %610 = arith.addf %608, %609 : vector<8x32xf32>
    %c3_235 = arith.constant 3 : index
    %c0_236 = arith.constant 0 : index
    %c0_237 = arith.constant 0 : index
    %611 = vector.load %arg36[%c3_235, %c0_236, %c0_237] : memref<8x8x32xf32, #tpu.memory_space<vmem>>, vector<1x8x32xf32>
    %612 = vector.shape_cast %611 : vector<1x8x32xf32> to vector<8x32xf32>
    %613 = vector.shape_cast %610 : vector<8x32xf32> to vector<1x8x32xf32>
    tpu.vector_store %arg36[%c3_235, %c0_236, %c0_237], %613 {strides = array<i32>} : memref<8x8x32xf32, #tpu.memory_space<vmem>>, vector<1x8x32xf32>,
    %c1_238 = arith.constant 1 : index
    %c4_239 = arith.constant 4 : index
    %c0_240 = arith.constant 0 : index
    %c0_241 = arith.constant 0 : index
    %614 = vector.load %arg35[%c1_238, %c4_239, %c0_240, %c0_241] : memref<4x8x8x96xf32, #tpu.memory_space<vmem>>, vector<1x1x8x96xf32>
    %615 = vector.shape_cast %614 : vector<1x1x8x96xf32> to vector<8x96xf32>
    %cst_242 = arith.constant dense<0.000000e+00> : vector<8x96xf32>
    %616 = tpu.matmul %610, %499, %cst_242 {dimension_numbers = #tpu.dot_dimension_numbers<[1], [0], [0], [1], [0, 0, 1, 1], [], []>} : vector<8x32xf32>, vector<32x96xf32>, vector<8x96xf32> -> vector<8x96xf32>
    %617 = vector.extract_strided_slice %615 {offsets = [0, 0], sizes = [8, 64], strides = [1, 1]} : vector<8x96xf32> to vector<8x64xf32>
    %618 = vector.extract_strided_slice %616 {offsets = [0, 0], sizes = [8, 64], strides = [1, 1]} : vector<8x96xf32> to vector<8x64xf32>
    %619 = arith.addf %617, %618 : vector<8x64xf32>
    %620 = arith.negf %619 : vector<8x64xf32>
    %621 = math.exp %620 : vector<8x64xf32>
    %cst_243 = arith.constant 1.000000e+00 : f32
    %622 = vector.broadcast %cst_243 : f32 to vector<8x64xf32>
    %623 = arith.addf %622, %621 : vector<8x64xf32>
    %624 = arith.divf %622, %623 : vector<8x64xf32>
    %625 = vector.extract_strided_slice %624 {offsets = [0, 0], sizes = [8, 32], strides = [1, 1]} : vector<8x64xf32> to vector<8x32xf32>
    %626 = vector.extract_strided_slice %624 {offsets = [0, 32], sizes = [8, 32], strides = [1, 1]} : vector<8x64xf32> to vector<8x32xf32>
    %627 = vector.extract_strided_slice %615 {offsets = [0, 64], sizes = [8, 32], strides = [1, 1]} : vector<8x96xf32> to vector<8x32xf32>
    %628 = vector.extract_strided_slice %616 {offsets = [0, 64], sizes = [8, 32], strides = [1, 1]} : vector<8x96xf32> to vector<8x32xf32>
    %629 = vector.broadcast %501 : vector<1x32xf32> to vector<8x32xf32>
    %630 = arith.addf %628, %629 : vector<8x32xf32>
    %631 = arith.mulf %625, %630 : vector<8x32xf32>
    %632 = arith.addf %627, %631 : vector<8x32xf32>
    %633 = math.tanh %632 : vector<8x32xf32>
    %cst_244 = arith.constant 1.000000e+00 : f32
    %634 = vector.broadcast %cst_244 : f32 to vector<8x32xf32>
    %635 = arith.subf %634, %626 : vector<8x32xf32>
    %636 = arith.mulf %635, %633 : vector<8x32xf32>
    %637 = arith.mulf %626, %610 : vector<8x32xf32>
    %638 = arith.addf %636, %637 : vector<8x32xf32>
    %c4_245 = arith.constant 4 : index
    %c0_246 = arith.constant 0 : index
    %c0_247 = arith.constant 0 : index
    %639 = vector.load %arg36[%c4_245, %c0_246, %c0_247] : memref<8x8x32xf32, #tpu.memory_space<vmem>>, vector<1x8x32xf32>
    %640 = vector.shape_cast %639 : vector<1x8x32xf32> to vector<8x32xf32>
    %641 = vector.shape_cast %638 : vector<8x32xf32> to vector<1x8x32xf32>
    tpu.vector_store %arg36[%c4_245, %c0_246, %c0_247], %641 {strides = array<i32>} : memref<8x8x32xf32, #tpu.memory_space<vmem>>, vector<1x8x32xf32>,
    %c1_248 = arith.constant 1 : index
    %c5_249 = arith.constant 5 : index
    %c0_250 = arith.constant 0 : index
    %c0_251 = arith.constant 0 : index
    %642 = vector.load %arg35[%c1_248, %c5_249, %c0_250, %c0_251] : memref<4x8x8x96xf32, #tpu.memory_space<vmem>>, vector<1x1x8x96xf32>
    %643 = vector.shape_cast %642 : vector<1x1x8x96xf32> to vector<8x96xf32>
    %cst_252 = arith.constant dense<0.000000e+00> : vector<8x96xf32>
    %644 = tpu.matmul %638, %499, %cst_252 {dimension_numbers = #tpu.dot_dimension_numbers<[1], [0], [0], [1], [0, 0, 1, 1], [], []>} : vector<8x32xf32>, vector<32x96xf32>, vector<8x96xf32> -> vector<8x96xf32>
    %645 = vector.extract_strided_slice %643 {offsets = [0, 0], sizes = [8, 64], strides = [1, 1]} : vector<8x96xf32> to vector<8x64xf32>
    %646 = vector.extract_strided_slice %644 {offsets = [0, 0], sizes = [8, 64], strides = [1, 1]} : vector<8x96xf32> to vector<8x64xf32>
    %647 = arith.addf %645, %646 : vector<8x64xf32>
    %648 = arith.negf %647 : vector<8x64xf32>
    %649 = math.exp %648 : vector<8x64xf32>
    %cst_253 = arith.constant 1.000000e+00 : f32
    %650 = vector.broadcast %cst_253 : f32 to vector<8x64xf32>
    %651 = arith.addf %650, %649 : vector<8x64xf32>
    %652 = arith.divf %650, %651 : vector<8x64xf32>
    %653 = vector.extract_strided_slice %652 {offsets = [0, 0], sizes = [8, 32], strides = [1, 1]} : vector<8x64xf32> to vector<8x32xf32>
    %654 = vector.extract_strided_slice %652 {offsets = [0, 32], sizes = [8, 32], strides = [1, 1]} : vector<8x64xf32> to vector<8x32xf32>
    %655 = vector.extract_strided_slice %643 {offsets = [0, 64], sizes = [8, 32], strides = [1, 1]} : vector<8x96xf32> to vector<8x32xf32>
    %656 = vector.extract_strided_slice %644 {offsets = [0, 64], sizes = [8, 32], strides = [1, 1]} : vector<8x96xf32> to vector<8x32xf32>
    %657 = vector.broadcast %501 : vector<1x32xf32> to vector<8x32xf32>
    %658 = arith.addf %656, %657 : vector<8x32xf32>
    %659 = arith.mulf %653, %658 : vector<8x32xf32>
    %660 = arith.addf %655, %659 : vector<8x32xf32>
    %661 = math.tanh %660 : vector<8x32xf32>
    %cst_254 = arith.constant 1.000000e+00 : f32
    %662 = vector.broadcast %cst_254 : f32 to vector<8x32xf32>
    %663 = arith.subf %662, %654 : vector<8x32xf32>
    %664 = arith.mulf %663, %661 : vector<8x32xf32>
    %665 = arith.mulf %654, %638 : vector<8x32xf32>
    %666 = arith.addf %664, %665 : vector<8x32xf32>
    %c5_255 = arith.constant 5 : index
    %c0_256 = arith.constant 0 : index
    %c0_257 = arith.constant 0 : index
    %667 = vector.load %arg36[%c5_255, %c0_256, %c0_257] : memref<8x8x32xf32, #tpu.memory_space<vmem>>, vector<1x8x32xf32>
    %668 = vector.shape_cast %667 : vector<1x8x32xf32> to vector<8x32xf32>
    %669 = vector.shape_cast %666 : vector<8x32xf32> to vector<1x8x32xf32>
    tpu.vector_store %arg36[%c5_255, %c0_256, %c0_257], %669 {strides = array<i32>} : memref<8x8x32xf32, #tpu.memory_space<vmem>>, vector<1x8x32xf32>,
    %c1_258 = arith.constant 1 : index
    %c6_259 = arith.constant 6 : index
    %c0_260 = arith.constant 0 : index
    %c0_261 = arith.constant 0 : index
    %670 = vector.load %arg35[%c1_258, %c6_259, %c0_260, %c0_261] : memref<4x8x8x96xf32, #tpu.memory_space<vmem>>, vector<1x1x8x96xf32>
    %671 = vector.shape_cast %670 : vector<1x1x8x96xf32> to vector<8x96xf32>
    %cst_262 = arith.constant dense<0.000000e+00> : vector<8x96xf32>
    %672 = tpu.matmul %666, %499, %cst_262 {dimension_numbers = #tpu.dot_dimension_numbers<[1], [0], [0], [1], [0, 0, 1, 1], [], []>} : vector<8x32xf32>, vector<32x96xf32>, vector<8x96xf32> -> vector<8x96xf32>
    %673 = vector.extract_strided_slice %671 {offsets = [0, 0], sizes = [8, 64], strides = [1, 1]} : vector<8x96xf32> to vector<8x64xf32>
    %674 = vector.extract_strided_slice %672 {offsets = [0, 0], sizes = [8, 64], strides = [1, 1]} : vector<8x96xf32> to vector<8x64xf32>
    %675 = arith.addf %673, %674 : vector<8x64xf32>
    %676 = arith.negf %675 : vector<8x64xf32>
    %677 = math.exp %676 : vector<8x64xf32>
    %cst_263 = arith.constant 1.000000e+00 : f32
    %678 = vector.broadcast %cst_263 : f32 to vector<8x64xf32>
    %679 = arith.addf %678, %677 : vector<8x64xf32>
    %680 = arith.divf %678, %679 : vector<8x64xf32>
    %681 = vector.extract_strided_slice %680 {offsets = [0, 0], sizes = [8, 32], strides = [1, 1]} : vector<8x64xf32> to vector<8x32xf32>
    %682 = vector.extract_strided_slice %680 {offsets = [0, 32], sizes = [8, 32], strides = [1, 1]} : vector<8x64xf32> to vector<8x32xf32>
    %683 = vector.extract_strided_slice %671 {offsets = [0, 64], sizes = [8, 32], strides = [1, 1]} : vector<8x96xf32> to vector<8x32xf32>
    %684 = vector.extract_strided_slice %672 {offsets = [0, 64], sizes = [8, 32], strides = [1, 1]} : vector<8x96xf32> to vector<8x32xf32>
    %685 = vector.broadcast %501 : vector<1x32xf32> to vector<8x32xf32>
    %686 = arith.addf %684, %685 : vector<8x32xf32>
    %687 = arith.mulf %681, %686 : vector<8x32xf32>
    %688 = arith.addf %683, %687 : vector<8x32xf32>
    %689 = math.tanh %688 : vector<8x32xf32>
    %cst_264 = arith.constant 1.000000e+00 : f32
    %690 = vector.broadcast %cst_264 : f32 to vector<8x32xf32>
    %691 = arith.subf %690, %682 : vector<8x32xf32>
    %692 = arith.mulf %691, %689 : vector<8x32xf32>
    %693 = arith.mulf %682, %666 : vector<8x32xf32>
    %694 = arith.addf %692, %693 : vector<8x32xf32>
    %c6_265 = arith.constant 6 : index
    %c0_266 = arith.constant 0 : index
    %c0_267 = arith.constant 0 : index
    %695 = vector.load %arg36[%c6_265, %c0_266, %c0_267] : memref<8x8x32xf32, #tpu.memory_space<vmem>>, vector<1x8x32xf32>
    %696 = vector.shape_cast %695 : vector<1x8x32xf32> to vector<8x32xf32>
    %697 = vector.shape_cast %694 : vector<8x32xf32> to vector<1x8x32xf32>
    tpu.vector_store %arg36[%c6_265, %c0_266, %c0_267], %697 {strides = array<i32>} : memref<8x8x32xf32, #tpu.memory_space<vmem>>, vector<1x8x32xf32>,
    %c1_268 = arith.constant 1 : index
    %c7_269 = arith.constant 7 : index
    %c0_270 = arith.constant 0 : index
    %c0_271 = arith.constant 0 : index
    %698 = vector.load %arg35[%c1_268, %c7_269, %c0_270, %c0_271] : memref<4x8x8x96xf32, #tpu.memory_space<vmem>>, vector<1x1x8x96xf32>
    %699 = vector.shape_cast %698 : vector<1x1x8x96xf32> to vector<8x96xf32>
    %cst_272 = arith.constant dense<0.000000e+00> : vector<8x96xf32>
    %700 = tpu.matmul %694, %499, %cst_272 {dimension_numbers = #tpu.dot_dimension_numbers<[1], [0], [0], [1], [0, 0, 1, 1], [], []>} : vector<8x32xf32>, vector<32x96xf32>, vector<8x96xf32> -> vector<8x96xf32>
    %701 = vector.extract_strided_slice %699 {offsets = [0, 0], sizes = [8, 64], strides = [1, 1]} : vector<8x96xf32> to vector<8x64xf32>
    %702 = vector.extract_strided_slice %700 {offsets = [0, 0], sizes = [8, 64], strides = [1, 1]} : vector<8x96xf32> to vector<8x64xf32>
    %703 = arith.addf %701, %702 : vector<8x64xf32>
    %704 = arith.negf %703 : vector<8x64xf32>
    %705 = math.exp %704 : vector<8x64xf32>
    %cst_273 = arith.constant 1.000000e+00 : f32
    %706 = vector.broadcast %cst_273 : f32 to vector<8x64xf32>
    %707 = arith.addf %706, %705 : vector<8x64xf32>
    %708 = arith.divf %706, %707 : vector<8x64xf32>
    %709 = vector.extract_strided_slice %708 {offsets = [0, 0], sizes = [8, 32], strides = [1, 1]} : vector<8x64xf32> to vector<8x32xf32>
    %710 = vector.extract_strided_slice %708 {offsets = [0, 32], sizes = [8, 32], strides = [1, 1]} : vector<8x64xf32> to vector<8x32xf32>
    %711 = vector.extract_strided_slice %699 {offsets = [0, 64], sizes = [8, 32], strides = [1, 1]} : vector<8x96xf32> to vector<8x32xf32>
    %712 = vector.extract_strided_slice %700 {offsets = [0, 64], sizes = [8, 32], strides = [1, 1]} : vector<8x96xf32> to vector<8x32xf32>
    %713 = vector.broadcast %501 : vector<1x32xf32> to vector<8x32xf32>
    %714 = arith.addf %712, %713 : vector<8x32xf32>
    %715 = arith.mulf %709, %714 : vector<8x32xf32>
    %716 = arith.addf %711, %715 : vector<8x32xf32>
    %717 = math.tanh %716 : vector<8x32xf32>
    %cst_274 = arith.constant 1.000000e+00 : f32
    %718 = vector.broadcast %cst_274 : f32 to vector<8x32xf32>
    %719 = arith.subf %718, %710 : vector<8x32xf32>
    %720 = arith.mulf %719, %717 : vector<8x32xf32>
    %721 = arith.mulf %710, %694 : vector<8x32xf32>
    %722 = arith.addf %720, %721 : vector<8x32xf32>
    %c7_275 = arith.constant 7 : index
    %c0_276 = arith.constant 0 : index
    %c0_277 = arith.constant 0 : index
    %723 = vector.load %arg36[%c7_275, %c0_276, %c0_277] : memref<8x8x32xf32, #tpu.memory_space<vmem>>, vector<1x8x32xf32>
    %724 = vector.shape_cast %723 : vector<1x8x32xf32> to vector<8x32xf32>
    %725 = vector.shape_cast %722 : vector<8x32xf32> to vector<1x8x32xf32>
    tpu.vector_store %arg36[%c7_275, %c0_276, %c0_277], %725 {strides = array<i32>} : memref<8x8x32xf32, #tpu.memory_space<vmem>>, vector<1x8x32xf32>,
    %c0_278 = arith.constant 0 : index
    %c0_279 = arith.constant 0 : index
    %c0_280 = arith.constant 0 : index
    %726 = vector.load %arg36[%c0_278, %c0_279, %c0_280] : memref<8x8x32xf32, #tpu.memory_space<vmem>>, vector<8x8x32xf32>
    %727 = vector.shape_cast %726 : vector<8x8x32xf32> to vector<64x32xf32>
    %c0_281 = arith.constant 0 : index
    %c0_282 = arith.constant 0 : index
    %c0_283 = arith.constant 0 : index
    %728 = vector.load %arg17[%c0_281, %c0_282, %c0_283] : memref<1x32x96xf32, #tpu.memory_space<vmem>>, vector<1x32x96xf32>
    %729 = vector.shape_cast %728 : vector<1x32x96xf32> to vector<32x96xf32>
    %cst_284 = arith.constant dense<0.000000e+00> : vector<64x96xf32>
    %730 = tpu.matmul %727, %729, %cst_284 {dimension_numbers = #tpu.dot_dimension_numbers<[1], [0], [0], [1], [0, 0, 1, 1], [], []>} : vector<64x32xf32>, vector<32x96xf32>, vector<64x96xf32> -> vector<64x96xf32>
    %c0_285 = arith.constant 0 : index
    %c0_286 = arith.constant 0 : index
    %c0_287 = arith.constant 0 : index
    %731 = vector.load %arg18[%c0_285, %c0_286, %c0_287] : memref<1x1x96xf32, #tpu.memory_space<vmem>>, vector<1x1x96xf32>
    %732 = vector.shape_cast %731 : vector<1x1x96xf32> to vector<1x96xf32>
    %733 = vector.broadcast %732 : vector<1x96xf32> to vector<64x96xf32>
    %734 = arith.addf %730, %733 : vector<64x96xf32>
    %735 = vector.shape_cast %734 : vector<64x96xf32> to vector<8x8x96xf32>
    %c0_288 = arith.constant 0 : index
    %c0_289 = arith.constant 0 : index
    %c0_290 = arith.constant 0 : index
    %736 = vector.load %arg38[%c0_288, %c0_289, %c0_290] : memref<8x8x96xf32, #tpu.memory_space<vmem>>, vector<8x8x96xf32>
    tpu.vector_store %arg38[%c0_288, %c0_289, %c0_290], %735 {strides = array<i32>} : memref<8x8x96xf32, #tpu.memory_space<vmem>>, vector<8x8x96xf32>,
    %c1_291 = arith.constant 1 : index
    %c0_292 = arith.constant 0 : index
    %c0_293 = arith.constant 0 : index
    %737 = vector.load %arg15[%c1_291, %c0_292, %c0_293] : memref<2x32x96xf32, #tpu.memory_space<vmem>>, vector<1x32x96xf32>
    %738 = vector.shape_cast %737 : vector<1x32x96xf32> to vector<32x96xf32>
    %c1_294 = arith.constant 1 : index
    %c0_295 = arith.constant 0 : index
    %c0_296 = arith.constant 0 : index
    %739 = vector.load %arg16[%c1_294, %c0_295, %c0_296] : memref<2x1x32xf32, #tpu.memory_space<vmem>>, vector<1x1x32xf32>
    %740 = vector.shape_cast %739 : vector<1x1x32xf32> to vector<1x32xf32>
    %c0_297 = arith.constant 0 : index
    %c0_298 = arith.constant 0 : index
    %c0_299 = arith.constant 0 : index
    %741 = vector.load %arg38[%c0_297, %c0_298, %c0_299] : memref<8x8x96xf32, #tpu.memory_space<vmem>>, vector<1x8x96xf32>
    %742 = vector.shape_cast %741 : vector<1x8x96xf32> to vector<8x96xf32>
    %cst_300 = arith.constant dense<0.000000e+00> : vector<8x96xf32>
    %743 = tpu.matmul %497, %738, %cst_300 {dimension_numbers = #tpu.dot_dimension_numbers<[1], [0], [0], [1], [0, 0, 1, 1], [], []>} : vector<8x32xf32>, vector<32x96xf32>, vector<8x96xf32> -> vector<8x96xf32>
    %744 = vector.extract_strided_slice %742 {offsets = [0, 0], sizes = [8, 64], strides = [1, 1]} : vector<8x96xf32> to vector<8x64xf32>
    %745 = vector.extract_strided_slice %743 {offsets = [0, 0], sizes = [8, 64], strides = [1, 1]} : vector<8x96xf32> to vector<8x64xf32>
    %746 = arith.addf %744, %745 : vector<8x64xf32>
    %747 = arith.negf %746 : vector<8x64xf32>
    %748 = math.exp %747 : vector<8x64xf32>
    %cst_301 = arith.constant 1.000000e+00 : f32
    %749 = vector.broadcast %cst_301 : f32 to vector<8x64xf32>
    %750 = arith.addf %749, %748 : vector<8x64xf32>
    %751 = arith.divf %749, %750 : vector<8x64xf32>
    %752 = vector.extract_strided_slice %751 {offsets = [0, 0], sizes = [8, 32], strides = [1, 1]} : vector<8x64xf32> to vector<8x32xf32>
    %753 = vector.extract_strided_slice %751 {offsets = [0, 32], sizes = [8, 32], strides = [1, 1]} : vector<8x64xf32> to vector<8x32xf32>
    %754 = vector.extract_strided_slice %742 {offsets = [0, 64], sizes = [8, 32], strides = [1, 1]} : vector<8x96xf32> to vector<8x32xf32>
    %755 = vector.extract_strided_slice %743 {offsets = [0, 64], sizes = [8, 32], strides = [1, 1]} : vector<8x96xf32> to vector<8x32xf32>
    %756 = vector.broadcast %740 : vector<1x32xf32> to vector<8x32xf32>
    %757 = arith.addf %755, %756 : vector<8x32xf32>
    %758 = arith.mulf %752, %757 : vector<8x32xf32>
    %759 = arith.addf %754, %758 : vector<8x32xf32>
    %760 = math.tanh %759 : vector<8x32xf32>
    %cst_302 = arith.constant 1.000000e+00 : f32
    %761 = vector.broadcast %cst_302 : f32 to vector<8x32xf32>
    %762 = arith.subf %761, %753 : vector<8x32xf32>
    %763 = arith.mulf %762, %760 : vector<8x32xf32>
    %764 = arith.mulf %753, %497 : vector<8x32xf32>
    %765 = arith.addf %763, %764 : vector<8x32xf32>
    %c0_303 = arith.constant 0 : index
    %c0_304 = arith.constant 0 : index
    %c0_305 = arith.constant 0 : index
    %766 = vector.load %arg36[%c0_303, %c0_304, %c0_305] : memref<8x8x32xf32, #tpu.memory_space<vmem>>, vector<1x8x32xf32>
    %767 = vector.shape_cast %766 : vector<1x8x32xf32> to vector<8x32xf32>
    %768 = vector.shape_cast %765 : vector<8x32xf32> to vector<1x8x32xf32>
    tpu.vector_store %arg36[%c0_303, %c0_304, %c0_305], %768 {strides = array<i32>} : memref<8x8x32xf32, #tpu.memory_space<vmem>>, vector<1x8x32xf32>,
    %c1_306 = arith.constant 1 : index
    %c0_307 = arith.constant 0 : index
    %c0_308 = arith.constant 0 : index
    %769 = vector.load %arg38[%c1_306, %c0_307, %c0_308] : memref<8x8x96xf32, #tpu.memory_space<vmem>>, vector<1x8x96xf32>
    %770 = vector.shape_cast %769 : vector<1x8x96xf32> to vector<8x96xf32>
    %cst_309 = arith.constant dense<0.000000e+00> : vector<8x96xf32>
    %771 = tpu.matmul %765, %738, %cst_309 {dimension_numbers = #tpu.dot_dimension_numbers<[1], [0], [0], [1], [0, 0, 1, 1], [], []>} : vector<8x32xf32>, vector<32x96xf32>, vector<8x96xf32> -> vector<8x96xf32>
    %772 = vector.extract_strided_slice %770 {offsets = [0, 0], sizes = [8, 64], strides = [1, 1]} : vector<8x96xf32> to vector<8x64xf32>
    %773 = vector.extract_strided_slice %771 {offsets = [0, 0], sizes = [8, 64], strides = [1, 1]} : vector<8x96xf32> to vector<8x64xf32>
    %774 = arith.addf %772, %773 : vector<8x64xf32>
    %775 = arith.negf %774 : vector<8x64xf32>
    %776 = math.exp %775 : vector<8x64xf32>
    %cst_310 = arith.constant 1.000000e+00 : f32
    %777 = vector.broadcast %cst_310 : f32 to vector<8x64xf32>
    %778 = arith.addf %777, %776 : vector<8x64xf32>
    %779 = arith.divf %777, %778 : vector<8x64xf32>
    %780 = vector.extract_strided_slice %779 {offsets = [0, 0], sizes = [8, 32], strides = [1, 1]} : vector<8x64xf32> to vector<8x32xf32>
    %781 = vector.extract_strided_slice %779 {offsets = [0, 32], sizes = [8, 32], strides = [1, 1]} : vector<8x64xf32> to vector<8x32xf32>
    %782 = vector.extract_strided_slice %770 {offsets = [0, 64], sizes = [8, 32], strides = [1, 1]} : vector<8x96xf32> to vector<8x32xf32>
    %783 = vector.extract_strided_slice %771 {offsets = [0, 64], sizes = [8, 32], strides = [1, 1]} : vector<8x96xf32> to vector<8x32xf32>
    %784 = vector.broadcast %740 : vector<1x32xf32> to vector<8x32xf32>
    %785 = arith.addf %783, %784 : vector<8x32xf32>
    %786 = arith.mulf %780, %785 : vector<8x32xf32>
    %787 = arith.addf %782, %786 : vector<8x32xf32>
    %788 = math.tanh %787 : vector<8x32xf32>
    %cst_311 = arith.constant 1.000000e+00 : f32
    %789 = vector.broadcast %cst_311 : f32 to vector<8x32xf32>
    %790 = arith.subf %789, %781 : vector<8x32xf32>
    %791 = arith.mulf %790, %788 : vector<8x32xf32>
    %792 = arith.mulf %781, %765 : vector<8x32xf32>
    %793 = arith.addf %791, %792 : vector<8x32xf32>
    %c1_312 = arith.constant 1 : index
    %c0_313 = arith.constant 0 : index
    %c0_314 = arith.constant 0 : index
    %794 = vector.load %arg36[%c1_312, %c0_313, %c0_314] : memref<8x8x32xf32, #tpu.memory_space<vmem>>, vector<1x8x32xf32>
    %795 = vector.shape_cast %794 : vector<1x8x32xf32> to vector<8x32xf32>
    %796 = vector.shape_cast %793 : vector<8x32xf32> to vector<1x8x32xf32>
    tpu.vector_store %arg36[%c1_312, %c0_313, %c0_314], %796 {strides = array<i32>} : memref<8x8x32xf32, #tpu.memory_space<vmem>>, vector<1x8x32xf32>,
    %c2_315 = arith.constant 2 : index
    %c0_316 = arith.constant 0 : index
    %c0_317 = arith.constant 0 : index
    %797 = vector.load %arg38[%c2_315, %c0_316, %c0_317] : memref<8x8x96xf32, #tpu.memory_space<vmem>>, vector<1x8x96xf32>
    %798 = vector.shape_cast %797 : vector<1x8x96xf32> to vector<8x96xf32>
    %cst_318 = arith.constant dense<0.000000e+00> : vector<8x96xf32>
    %799 = tpu.matmul %793, %738, %cst_318 {dimension_numbers = #tpu.dot_dimension_numbers<[1], [0], [0], [1], [0, 0, 1, 1], [], []>} : vector<8x32xf32>, vector<32x96xf32>, vector<8x96xf32> -> vector<8x96xf32>
    %800 = vector.extract_strided_slice %798 {offsets = [0, 0], sizes = [8, 64], strides = [1, 1]} : vector<8x96xf32> to vector<8x64xf32>
    %801 = vector.extract_strided_slice %799 {offsets = [0, 0], sizes = [8, 64], strides = [1, 1]} : vector<8x96xf32> to vector<8x64xf32>
    %802 = arith.addf %800, %801 : vector<8x64xf32>
    %803 = arith.negf %802 : vector<8x64xf32>
    %804 = math.exp %803 : vector<8x64xf32>
    %cst_319 = arith.constant 1.000000e+00 : f32
    %805 = vector.broadcast %cst_319 : f32 to vector<8x64xf32>
    %806 = arith.addf %805, %804 : vector<8x64xf32>
    %807 = arith.divf %805, %806 : vector<8x64xf32>
    %808 = vector.extract_strided_slice %807 {offsets = [0, 0], sizes = [8, 32], strides = [1, 1]} : vector<8x64xf32> to vector<8x32xf32>
    %809 = vector.extract_strided_slice %807 {offsets = [0, 32], sizes = [8, 32], strides = [1, 1]} : vector<8x64xf32> to vector<8x32xf32>
    %810 = vector.extract_strided_slice %798 {offsets = [0, 64], sizes = [8, 32], strides = [1, 1]} : vector<8x96xf32> to vector<8x32xf32>
    %811 = vector.extract_strided_slice %799 {offsets = [0, 64], sizes = [8, 32], strides = [1, 1]} : vector<8x96xf32> to vector<8x32xf32>
    %812 = vector.broadcast %740 : vector<1x32xf32> to vector<8x32xf32>
    %813 = arith.addf %811, %812 : vector<8x32xf32>
    %814 = arith.mulf %808, %813 : vector<8x32xf32>
    %815 = arith.addf %810, %814 : vector<8x32xf32>
    %816 = math.tanh %815 : vector<8x32xf32>
    %cst_320 = arith.constant 1.000000e+00 : f32
    %817 = vector.broadcast %cst_320 : f32 to vector<8x32xf32>
    %818 = arith.subf %817, %809 : vector<8x32xf32>
    %819 = arith.mulf %818, %816 : vector<8x32xf32>
    %820 = arith.mulf %809, %793 : vector<8x32xf32>
    %821 = arith.addf %819, %820 : vector<8x32xf32>
    %c2_321 = arith.constant 2 : index
    %c0_322 = arith.constant 0 : index
    %c0_323 = arith.constant 0 : index
    %822 = vector.load %arg36[%c2_321, %c0_322, %c0_323] : memref<8x8x32xf32, #tpu.memory_space<vmem>>, vector<1x8x32xf32>
    %823 = vector.shape_cast %822 : vector<1x8x32xf32> to vector<8x32xf32>
    %824 = vector.shape_cast %821 : vector<8x32xf32> to vector<1x8x32xf32>
    tpu.vector_store %arg36[%c2_321, %c0_322, %c0_323], %824 {strides = array<i32>} : memref<8x8x32xf32, #tpu.memory_space<vmem>>, vector<1x8x32xf32>,
    %c3_324 = arith.constant 3 : index
    %c0_325 = arith.constant 0 : index
    %c0_326 = arith.constant 0 : index
    %825 = vector.load %arg38[%c3_324, %c0_325, %c0_326] : memref<8x8x96xf32, #tpu.memory_space<vmem>>, vector<1x8x96xf32>
    %826 = vector.shape_cast %825 : vector<1x8x96xf32> to vector<8x96xf32>
    %cst_327 = arith.constant dense<0.000000e+00> : vector<8x96xf32>
    %827 = tpu.matmul %821, %738, %cst_327 {dimension_numbers = #tpu.dot_dimension_numbers<[1], [0], [0], [1], [0, 0, 1, 1], [], []>} : vector<8x32xf32>, vector<32x96xf32>, vector<8x96xf32> -> vector<8x96xf32>
    %828 = vector.extract_strided_slice %826 {offsets = [0, 0], sizes = [8, 64], strides = [1, 1]} : vector<8x96xf32> to vector<8x64xf32>
    %829 = vector.extract_strided_slice %827 {offsets = [0, 0], sizes = [8, 64], strides = [1, 1]} : vector<8x96xf32> to vector<8x64xf32>
    %830 = arith.addf %828, %829 : vector<8x64xf32>
    %831 = arith.negf %830 : vector<8x64xf32>
    %832 = math.exp %831 : vector<8x64xf32>
    %cst_328 = arith.constant 1.000000e+00 : f32
    %833 = vector.broadcast %cst_328 : f32 to vector<8x64xf32>
    %834 = arith.addf %833, %832 : vector<8x64xf32>
    %835 = arith.divf %833, %834 : vector<8x64xf32>
    %836 = vector.extract_strided_slice %835 {offsets = [0, 0], sizes = [8, 32], strides = [1, 1]} : vector<8x64xf32> to vector<8x32xf32>
    %837 = vector.extract_strided_slice %835 {offsets = [0, 32], sizes = [8, 32], strides = [1, 1]} : vector<8x64xf32> to vector<8x32xf32>
    %838 = vector.extract_strided_slice %826 {offsets = [0, 64], sizes = [8, 32], strides = [1, 1]} : vector<8x96xf32> to vector<8x32xf32>
    %839 = vector.extract_strided_slice %827 {offsets = [0, 64], sizes = [8, 32], strides = [1, 1]} : vector<8x96xf32> to vector<8x32xf32>
    %840 = vector.broadcast %740 : vector<1x32xf32> to vector<8x32xf32>
    %841 = arith.addf %839, %840 : vector<8x32xf32>
    %842 = arith.mulf %836, %841 : vector<8x32xf32>
    %843 = arith.addf %838, %842 : vector<8x32xf32>
    %844 = math.tanh %843 : vector<8x32xf32>
    %cst_329 = arith.constant 1.000000e+00 : f32
    %845 = vector.broadcast %cst_329 : f32 to vector<8x32xf32>
    %846 = arith.subf %845, %837 : vector<8x32xf32>
    %847 = arith.mulf %846, %844 : vector<8x32xf32>
    %848 = arith.mulf %837, %821 : vector<8x32xf32>
    %849 = arith.addf %847, %848 : vector<8x32xf32>
    %c3_330 = arith.constant 3 : index
    %c0_331 = arith.constant 0 : index
    %c0_332 = arith.constant 0 : index
    %850 = vector.load %arg36[%c3_330, %c0_331, %c0_332] : memref<8x8x32xf32, #tpu.memory_space<vmem>>, vector<1x8x32xf32>
    %851 = vector.shape_cast %850 : vector<1x8x32xf32> to vector<8x32xf32>
    %852 = vector.shape_cast %849 : vector<8x32xf32> to vector<1x8x32xf32>
    tpu.vector_store %arg36[%c3_330, %c0_331, %c0_332], %852 {strides = array<i32>} : memref<8x8x32xf32, #tpu.memory_space<vmem>>, vector<1x8x32xf32>,
    %c4_333 = arith.constant 4 : index
    %c0_334 = arith.constant 0 : index
    %c0_335 = arith.constant 0 : index
    %853 = vector.load %arg38[%c4_333, %c0_334, %c0_335] : memref<8x8x96xf32, #tpu.memory_space<vmem>>, vector<1x8x96xf32>
    %854 = vector.shape_cast %853 : vector<1x8x96xf32> to vector<8x96xf32>
    %cst_336 = arith.constant dense<0.000000e+00> : vector<8x96xf32>
    %855 = tpu.matmul %849, %738, %cst_336 {dimension_numbers = #tpu.dot_dimension_numbers<[1], [0], [0], [1], [0, 0, 1, 1], [], []>} : vector<8x32xf32>, vector<32x96xf32>, vector<8x96xf32> -> vector<8x96xf32>
    %856 = vector.extract_strided_slice %854 {offsets = [0, 0], sizes = [8, 64], strides = [1, 1]} : vector<8x96xf32> to vector<8x64xf32>
    %857 = vector.extract_strided_slice %855 {offsets = [0, 0], sizes = [8, 64], strides = [1, 1]} : vector<8x96xf32> to vector<8x64xf32>
    %858 = arith.addf %856, %857 : vector<8x64xf32>
    %859 = arith.negf %858 : vector<8x64xf32>
    %860 = math.exp %859 : vector<8x64xf32>
    %cst_337 = arith.constant 1.000000e+00 : f32
    %861 = vector.broadcast %cst_337 : f32 to vector<8x64xf32>
    %862 = arith.addf %861, %860 : vector<8x64xf32>
    %863 = arith.divf %861, %862 : vector<8x64xf32>
    %864 = vector.extract_strided_slice %863 {offsets = [0, 0], sizes = [8, 32], strides = [1, 1]} : vector<8x64xf32> to vector<8x32xf32>
    %865 = vector.extract_strided_slice %863 {offsets = [0, 32], sizes = [8, 32], strides = [1, 1]} : vector<8x64xf32> to vector<8x32xf32>
    %866 = vector.extract_strided_slice %854 {offsets = [0, 64], sizes = [8, 32], strides = [1, 1]} : vector<8x96xf32> to vector<8x32xf32>
    %867 = vector.extract_strided_slice %855 {offsets = [0, 64], sizes = [8, 32], strides = [1, 1]} : vector<8x96xf32> to vector<8x32xf32>
    %868 = vector.broadcast %740 : vector<1x32xf32> to vector<8x32xf32>
    %869 = arith.addf %867, %868 : vector<8x32xf32>
    %870 = arith.mulf %864, %869 : vector<8x32xf32>
    %871 = arith.addf %866, %870 : vector<8x32xf32>
    %872 = math.tanh %871 : vector<8x32xf32>
    %cst_338 = arith.constant 1.000000e+00 : f32
    %873 = vector.broadcast %cst_338 : f32 to vector<8x32xf32>
    %874 = arith.subf %873, %865 : vector<8x32xf32>
    %875 = arith.mulf %874, %872 : vector<8x32xf32>
    %876 = arith.mulf %865, %849 : vector<8x32xf32>
    %877 = arith.addf %875, %876 : vector<8x32xf32>
    %c4_339 = arith.constant 4 : index
    %c0_340 = arith.constant 0 : index
    %c0_341 = arith.constant 0 : index
    %878 = vector.load %arg36[%c4_339, %c0_340, %c0_341] : memref<8x8x32xf32, #tpu.memory_space<vmem>>, vector<1x8x32xf32>
    %879 = vector.shape_cast %878 : vector<1x8x32xf32> to vector<8x32xf32>
    %880 = vector.shape_cast %877 : vector<8x32xf32> to vector<1x8x32xf32>
    tpu.vector_store %arg36[%c4_339, %c0_340, %c0_341], %880 {strides = array<i32>} : memref<8x8x32xf32, #tpu.memory_space<vmem>>, vector<1x8x32xf32>,
    %c5_342 = arith.constant 5 : index
    %c0_343 = arith.constant 0 : index
    %c0_344 = arith.constant 0 : index
    %881 = vector.load %arg38[%c5_342, %c0_343, %c0_344] : memref<8x8x96xf32, #tpu.memory_space<vmem>>, vector<1x8x96xf32>
    %882 = vector.shape_cast %881 : vector<1x8x96xf32> to vector<8x96xf32>
    %cst_345 = arith.constant dense<0.000000e+00> : vector<8x96xf32>
    %883 = tpu.matmul %877, %738, %cst_345 {dimension_numbers = #tpu.dot_dimension_numbers<[1], [0], [0], [1], [0, 0, 1, 1], [], []>} : vector<8x32xf32>, vector<32x96xf32>, vector<8x96xf32> -> vector<8x96xf32>
    %884 = vector.extract_strided_slice %882 {offsets = [0, 0], sizes = [8, 64], strides = [1, 1]} : vector<8x96xf32> to vector<8x64xf32>
    %885 = vector.extract_strided_slice %883 {offsets = [0, 0], sizes = [8, 64], strides = [1, 1]} : vector<8x96xf32> to vector<8x64xf32>
    %886 = arith.addf %884, %885 : vector<8x64xf32>
    %887 = arith.negf %886 : vector<8x64xf32>
    %888 = math.exp %887 : vector<8x64xf32>
    %cst_346 = arith.constant 1.000000e+00 : f32
    %889 = vector.broadcast %cst_346 : f32 to vector<8x64xf32>
    %890 = arith.addf %889, %888 : vector<8x64xf32>
    %891 = arith.divf %889, %890 : vector<8x64xf32>
    %892 = vector.extract_strided_slice %891 {offsets = [0, 0], sizes = [8, 32], strides = [1, 1]} : vector<8x64xf32> to vector<8x32xf32>
    %893 = vector.extract_strided_slice %891 {offsets = [0, 32], sizes = [8, 32], strides = [1, 1]} : vector<8x64xf32> to vector<8x32xf32>
    %894 = vector.extract_strided_slice %882 {offsets = [0, 64], sizes = [8, 32], strides = [1, 1]} : vector<8x96xf32> to vector<8x32xf32>
    %895 = vector.extract_strided_slice %883 {offsets = [0, 64], sizes = [8, 32], strides = [1, 1]} : vector<8x96xf32> to vector<8x32xf32>
    %896 = vector.broadcast %740 : vector<1x32xf32> to vector<8x32xf32>
    %897 = arith.addf %895, %896 : vector<8x32xf32>
    %898 = arith.mulf %892, %897 : vector<8x32xf32>
    %899 = arith.addf %894, %898 : vector<8x32xf32>
    %900 = math.tanh %899 : vector<8x32xf32>
    %cst_347 = arith.constant 1.000000e+00 : f32
    %901 = vector.broadcast %cst_347 : f32 to vector<8x32xf32>
    %902 = arith.subf %901, %893 : vector<8x32xf32>
    %903 = arith.mulf %902, %900 : vector<8x32xf32>
    %904 = arith.mulf %893, %877 : vector<8x32xf32>
    %905 = arith.addf %903, %904 : vector<8x32xf32>
    %c5_348 = arith.constant 5 : index
    %c0_349 = arith.constant 0 : index
    %c0_350 = arith.constant 0 : index
    %906 = vector.load %arg36[%c5_348, %c0_349, %c0_350] : memref<8x8x32xf32, #tpu.memory_space<vmem>>, vector<1x8x32xf32>
    %907 = vector.shape_cast %906 : vector<1x8x32xf32> to vector<8x32xf32>
    %908 = vector.shape_cast %905 : vector<8x32xf32> to vector<1x8x32xf32>
    tpu.vector_store %arg36[%c5_348, %c0_349, %c0_350], %908 {strides = array<i32>} : memref<8x8x32xf32, #tpu.memory_space<vmem>>, vector<1x8x32xf32>,
    %c6_351 = arith.constant 6 : index
    %c0_352 = arith.constant 0 : index
    %c0_353 = arith.constant 0 : index
    %909 = vector.load %arg38[%c6_351, %c0_352, %c0_353] : memref<8x8x96xf32, #tpu.memory_space<vmem>>, vector<1x8x96xf32>
    %910 = vector.shape_cast %909 : vector<1x8x96xf32> to vector<8x96xf32>
    %cst_354 = arith.constant dense<0.000000e+00> : vector<8x96xf32>
    %911 = tpu.matmul %905, %738, %cst_354 {dimension_numbers = #tpu.dot_dimension_numbers<[1], [0], [0], [1], [0, 0, 1, 1], [], []>} : vector<8x32xf32>, vector<32x96xf32>, vector<8x96xf32> -> vector<8x96xf32>
    %912 = vector.extract_strided_slice %910 {offsets = [0, 0], sizes = [8, 64], strides = [1, 1]} : vector<8x96xf32> to vector<8x64xf32>
    %913 = vector.extract_strided_slice %911 {offsets = [0, 0], sizes = [8, 64], strides = [1, 1]} : vector<8x96xf32> to vector<8x64xf32>
    %914 = arith.addf %912, %913 : vector<8x64xf32>
    %915 = arith.negf %914 : vector<8x64xf32>
    %916 = math.exp %915 : vector<8x64xf32>
    %cst_355 = arith.constant 1.000000e+00 : f32
    %917 = vector.broadcast %cst_355 : f32 to vector<8x64xf32>
    %918 = arith.addf %917, %916 : vector<8x64xf32>
    %919 = arith.divf %917, %918 : vector<8x64xf32>
    %920 = vector.extract_strided_slice %919 {offsets = [0, 0], sizes = [8, 32], strides = [1, 1]} : vector<8x64xf32> to vector<8x32xf32>
    %921 = vector.extract_strided_slice %919 {offsets = [0, 32], sizes = [8, 32], strides = [1, 1]} : vector<8x64xf32> to vector<8x32xf32>
    %922 = vector.extract_strided_slice %910 {offsets = [0, 64], sizes = [8, 32], strides = [1, 1]} : vector<8x96xf32> to vector<8x32xf32>
    %923 = vector.extract_strided_slice %911 {offsets = [0, 64], sizes = [8, 32], strides = [1, 1]} : vector<8x96xf32> to vector<8x32xf32>
    %924 = vector.broadcast %740 : vector<1x32xf32> to vector<8x32xf32>
    %925 = arith.addf %923, %924 : vector<8x32xf32>
    %926 = arith.mulf %920, %925 : vector<8x32xf32>
    %927 = arith.addf %922, %926 : vector<8x32xf32>
    %928 = math.tanh %927 : vector<8x32xf32>
    %cst_356 = arith.constant 1.000000e+00 : f32
    %929 = vector.broadcast %cst_356 : f32 to vector<8x32xf32>
    %930 = arith.subf %929, %921 : vector<8x32xf32>
    %931 = arith.mulf %930, %928 : vector<8x32xf32>
    %932 = arith.mulf %921, %905 : vector<8x32xf32>
    %933 = arith.addf %931, %932 : vector<8x32xf32>
    %c6_357 = arith.constant 6 : index
    %c0_358 = arith.constant 0 : index
    %c0_359 = arith.constant 0 : index
    %934 = vector.load %arg36[%c6_357, %c0_358, %c0_359] : memref<8x8x32xf32, #tpu.memory_space<vmem>>, vector<1x8x32xf32>
    %935 = vector.shape_cast %934 : vector<1x8x32xf32> to vector<8x32xf32>
    %936 = vector.shape_cast %933 : vector<8x32xf32> to vector<1x8x32xf32>
    tpu.vector_store %arg36[%c6_357, %c0_358, %c0_359], %936 {strides = array<i32>} : memref<8x8x32xf32, #tpu.memory_space<vmem>>, vector<1x8x32xf32>,
    %c7_360 = arith.constant 7 : index
    %c0_361 = arith.constant 0 : index
    %c0_362 = arith.constant 0 : index
    %937 = vector.load %arg38[%c7_360, %c0_361, %c0_362] : memref<8x8x96xf32, #tpu.memory_space<vmem>>, vector<1x8x96xf32>
    %938 = vector.shape_cast %937 : vector<1x8x96xf32> to vector<8x96xf32>
    %cst_363 = arith.constant dense<0.000000e+00> : vector<8x96xf32>
    %939 = tpu.matmul %933, %738, %cst_363 {dimension_numbers = #tpu.dot_dimension_numbers<[1], [0], [0], [1], [0, 0, 1, 1], [], []>} : vector<8x32xf32>, vector<32x96xf32>, vector<8x96xf32> -> vector<8x96xf32>
    %940 = vector.extract_strided_slice %938 {offsets = [0, 0], sizes = [8, 64], strides = [1, 1]} : vector<8x96xf32> to vector<8x64xf32>
    %941 = vector.extract_strided_slice %939 {offsets = [0, 0], sizes = [8, 64], strides = [1, 1]} : vector<8x96xf32> to vector<8x64xf32>
    %942 = arith.addf %940, %941 : vector<8x64xf32>
    %943 = arith.negf %942 : vector<8x64xf32>
    %944 = math.exp %943 : vector<8x64xf32>
    %cst_364 = arith.constant 1.000000e+00 : f32
    %945 = vector.broadcast %cst_364 : f32 to vector<8x64xf32>
    %946 = arith.addf %945, %944 : vector<8x64xf32>
    %947 = arith.divf %945, %946 : vector<8x64xf32>
    %948 = vector.extract_strided_slice %947 {offsets = [0, 0], sizes = [8, 32], strides = [1, 1]} : vector<8x64xf32> to vector<8x32xf32>
    %949 = vector.extract_strided_slice %947 {offsets = [0, 32], sizes = [8, 32], strides = [1, 1]} : vector<8x64xf32> to vector<8x32xf32>
    %950 = vector.extract_strided_slice %938 {offsets = [0, 64], sizes = [8, 32], strides = [1, 1]} : vector<8x96xf32> to vector<8x32xf32>
    %951 = vector.extract_strided_slice %939 {offsets = [0, 64], sizes = [8, 32], strides = [1, 1]} : vector<8x96xf32> to vector<8x32xf32>
    %952 = vector.broadcast %740 : vector<1x32xf32> to vector<8x32xf32>
    %953 = arith.addf %951, %952 : vector<8x32xf32>
    %954 = arith.mulf %948, %953 : vector<8x32xf32>
    %955 = arith.addf %950, %954 : vector<8x32xf32>
    %956 = math.tanh %955 : vector<8x32xf32>
    %cst_365 = arith.constant 1.000000e+00 : f32
    %957 = vector.broadcast %cst_365 : f32 to vector<8x32xf32>
    %958 = arith.subf %957, %949 : vector<8x32xf32>
    %959 = arith.mulf %958, %956 : vector<8x32xf32>
    %960 = arith.mulf %949, %933 : vector<8x32xf32>
    %961 = arith.addf %959, %960 : vector<8x32xf32>
    %c7_366 = arith.constant 7 : index
    %c0_367 = arith.constant 0 : index
    %c0_368 = arith.constant 0 : index
    %962 = vector.load %arg36[%c7_366, %c0_367, %c0_368] : memref<8x8x32xf32, #tpu.memory_space<vmem>>, vector<1x8x32xf32>
    %963 = vector.shape_cast %962 : vector<1x8x32xf32> to vector<8x32xf32>
    %964 = vector.shape_cast %961 : vector<8x32xf32> to vector<1x8x32xf32>
    tpu.vector_store %arg36[%c7_366, %c0_367, %c0_368], %964 {strides = array<i32>} : memref<8x8x32xf32, #tpu.memory_space<vmem>>, vector<1x8x32xf32>,
    %c0_369 = arith.constant 0 : index
    %c0_370 = arith.constant 0 : index
    %c0_371 = arith.constant 0 : index
    %965 = vector.load %arg36[%c0_369, %c0_370, %c0_371] : memref<8x8x32xf32, #tpu.memory_space<vmem>>, vector<8x8x32xf32>
    %966 = vector.shape_cast %965 : vector<8x8x32xf32> to vector<64x32xf32>
    %c0_372 = arith.constant 0 : index
    %c0_373 = arith.constant 0 : index
    %967 = vector.load %arg19[%c0_372, %c0_373] : memref<32x128xf32, #tpu.memory_space<vmem>>, vector<32x128xf32>
    %cst_374 = arith.constant dense<0.000000e+00> : vector<64x128xf32>
    %968 = tpu.matmul %966, %967, %cst_374 {dimension_numbers = #tpu.dot_dimension_numbers<[1], [0], [0], [1], [0, 0, 1, 1], [], []>} : vector<64x32xf32>, vector<32x128xf32>, vector<64x128xf32> -> vector<64x128xf32>
    %c0_375 = arith.constant 0 : index
    %c0_376 = arith.constant 0 : index
    %969 = vector.load %arg20[%c0_375, %c0_376] : memref<1x128xf32, #tpu.memory_space<vmem>>, vector<1x128xf32>
    %970 = vector.broadcast %969 : vector<1x128xf32> to vector<64x128xf32>
    %971 = arith.addf %968, %970 : vector<64x128xf32>
    %cst_377 = arith.constant dense<0xFF800000> : vector<64xf32>
    %972 = vector.multi_reduction <maximumf>, %971, %cst_377 [1] : vector<64x128xf32> to vector<64xf32>
    %973 = vector.shape_cast %972 : vector<64xf32> to vector<64x1xf32>
    %974 = vector.broadcast %973 : vector<64x1xf32> to vector<64x128xf32>
    %975 = arith.subf %971, %974 : vector<64x128xf32>
    %976 = math.exp %975 : vector<64x128xf32>
    %cst_378 = arith.constant dense<0.000000e+00> : vector<64xf32>
    %977 = vector.multi_reduction <add>, %976, %cst_378 [1] : vector<64x128xf32> to vector<64xf32>
    %978 = vector.shape_cast %977 : vector<64xf32> to vector<64x1xf32>
    %979 = math.log %978 : vector<64x1xf32>
    %980 = vector.broadcast %979 : vector<64x1xf32> to vector<64x128xf32>
    %981 = arith.subf %975, %980 : vector<64x128xf32>
    %982 = vector.shape_cast %981 : vector<64x128xf32> to vector<8x8x128xf32>
    %c0_379 = arith.constant 0 : index
    %c0_380 = arith.constant 0 : index
    %c0_381 = arith.constant 0 : index
    %983 = vector.load %arg33[%c0_379, %c0_380, %c0_381] : memref<8x8x128xf32, #tpu.memory_space<vmem>>, vector<8x8x128xf32>
    tpu.vector_store %arg33[%c0_379, %c0_380, %c0_381], %982 {strides = array<i32>} : memref<8x8x128xf32, #tpu.memory_space<vmem>>, vector<8x8x128xf32>,
    %c0_382 = arith.constant 0 : index
    %c0_383 = arith.constant 0 : index
    %c0_384 = arith.constant 0 : index
    %984 = vector.load %arg21[%c0_382, %c0_383, %c0_384] : memref<2x32x96xf32, #tpu.memory_space<vmem>>, vector<1x32x96xf32>
    %985 = vector.shape_cast %984 : vector<1x32x96xf32> to vector<32x96xf32>
    %c0_385 = arith.constant 0 : index
    %c0_386 = arith.constant 0 : index
    %c0_387 = arith.constant 0 : index
    %986 = vector.load %arg22[%c0_385, %c0_386, %c0_387] : memref<2x1x32xf32, #tpu.memory_space<vmem>>, vector<1x1x32xf32>
    %987 = vector.shape_cast %986 : vector<1x1x32xf32> to vector<1x32xf32>
    %c2_388 = arith.constant 2 : index
    %c0_389 = arith.constant 0 : index
    %c0_390 = arith.constant 0 : index
    %c0_391 = arith.constant 0 : index
    %988 = vector.load %arg35[%c2_388, %c0_389, %c0_390, %c0_391] : memref<4x8x8x96xf32, #tpu.memory_space<vmem>>, vector<1x1x8x96xf32>
    %989 = vector.shape_cast %988 : vector<1x1x8x96xf32> to vector<8x96xf32>
    %cst_392 = arith.constant dense<0.000000e+00> : vector<8x96xf32>
    %990 = tpu.matmul %26, %985, %cst_392 {dimension_numbers = #tpu.dot_dimension_numbers<[1], [0], [0], [1], [0, 0, 1, 1], [], []>} : vector<8x32xf32>, vector<32x96xf32>, vector<8x96xf32> -> vector<8x96xf32>
    %991 = vector.extract_strided_slice %989 {offsets = [0, 0], sizes = [8, 64], strides = [1, 1]} : vector<8x96xf32> to vector<8x64xf32>
    %992 = vector.extract_strided_slice %990 {offsets = [0, 0], sizes = [8, 64], strides = [1, 1]} : vector<8x96xf32> to vector<8x64xf32>
    %993 = arith.addf %991, %992 : vector<8x64xf32>
    %994 = arith.negf %993 : vector<8x64xf32>
    %995 = math.exp %994 : vector<8x64xf32>
    %cst_393 = arith.constant 1.000000e+00 : f32
    %996 = vector.broadcast %cst_393 : f32 to vector<8x64xf32>
    %997 = arith.addf %996, %995 : vector<8x64xf32>
    %998 = arith.divf %996, %997 : vector<8x64xf32>
    %999 = vector.extract_strided_slice %998 {offsets = [0, 0], sizes = [8, 32], strides = [1, 1]} : vector<8x64xf32> to vector<8x32xf32>
    %1000 = vector.extract_strided_slice %998 {offsets = [0, 32], sizes = [8, 32], strides = [1, 1]} : vector<8x64xf32> to vector<8x32xf32>
    %1001 = vector.extract_strided_slice %989 {offsets = [0, 64], sizes = [8, 32], strides = [1, 1]} : vector<8x96xf32> to vector<8x32xf32>
    %1002 = vector.extract_strided_slice %990 {offsets = [0, 64], sizes = [8, 32], strides = [1, 1]} : vector<8x96xf32> to vector<8x32xf32>
    %1003 = vector.broadcast %987 : vector<1x32xf32> to vector<8x32xf32>
    %1004 = arith.addf %1002, %1003 : vector<8x32xf32>
    %1005 = arith.mulf %999, %1004 : vector<8x32xf32>
    %1006 = arith.addf %1001, %1005 : vector<8x32xf32>
    %1007 = math.tanh %1006 : vector<8x32xf32>
    %cst_394 = arith.constant 1.000000e+00 : f32
    %1008 = vector.broadcast %cst_394 : f32 to vector<8x32xf32>
    %1009 = arith.subf %1008, %1000 : vector<8x32xf32>
    %1010 = arith.mulf %1009, %1007 : vector<8x32xf32>
    %1011 = arith.mulf %1000, %26 : vector<8x32xf32>
    %1012 = arith.addf %1010, %1011 : vector<8x32xf32>
    %c0_395 = arith.constant 0 : index
    %c0_396 = arith.constant 0 : index
    %c0_397 = arith.constant 0 : index
    %1013 = vector.load %arg36[%c0_395, %c0_396, %c0_397] : memref<8x8x32xf32, #tpu.memory_space<vmem>>, vector<1x8x32xf32>
    %1014 = vector.shape_cast %1013 : vector<1x8x32xf32> to vector<8x32xf32>
    %1015 = vector.shape_cast %1012 : vector<8x32xf32> to vector<1x8x32xf32>
    tpu.vector_store %arg36[%c0_395, %c0_396, %c0_397], %1015 {strides = array<i32>} : memref<8x8x32xf32, #tpu.memory_space<vmem>>, vector<1x8x32xf32>,
    %c2_398 = arith.constant 2 : index
    %c1_399 = arith.constant 1 : index
    %c0_400 = arith.constant 0 : index
    %c0_401 = arith.constant 0 : index
    %1016 = vector.load %arg35[%c2_398, %c1_399, %c0_400, %c0_401] : memref<4x8x8x96xf32, #tpu.memory_space<vmem>>, vector<1x1x8x96xf32>
    %1017 = vector.shape_cast %1016 : vector<1x1x8x96xf32> to vector<8x96xf32>
    %cst_402 = arith.constant dense<0.000000e+00> : vector<8x96xf32>
    %1018 = tpu.matmul %1012, %985, %cst_402 {dimension_numbers = #tpu.dot_dimension_numbers<[1], [0], [0], [1], [0, 0, 1, 1], [], []>} : vector<8x32xf32>, vector<32x96xf32>, vector<8x96xf32> -> vector<8x96xf32>
    %1019 = vector.extract_strided_slice %1017 {offsets = [0, 0], sizes = [8, 64], strides = [1, 1]} : vector<8x96xf32> to vector<8x64xf32>
    %1020 = vector.extract_strided_slice %1018 {offsets = [0, 0], sizes = [8, 64], strides = [1, 1]} : vector<8x96xf32> to vector<8x64xf32>
    %1021 = arith.addf %1019, %1020 : vector<8x64xf32>
    %1022 = arith.negf %1021 : vector<8x64xf32>
    %1023 = math.exp %1022 : vector<8x64xf32>
    %cst_403 = arith.constant 1.000000e+00 : f32
    %1024 = vector.broadcast %cst_403 : f32 to vector<8x64xf32>
    %1025 = arith.addf %1024, %1023 : vector<8x64xf32>
    %1026 = arith.divf %1024, %1025 : vector<8x64xf32>
    %1027 = vector.extract_strided_slice %1026 {offsets = [0, 0], sizes = [8, 32], strides = [1, 1]} : vector<8x64xf32> to vector<8x32xf32>
    %1028 = vector.extract_strided_slice %1026 {offsets = [0, 32], sizes = [8, 32], strides = [1, 1]} : vector<8x64xf32> to vector<8x32xf32>
    %1029 = vector.extract_strided_slice %1017 {offsets = [0, 64], sizes = [8, 32], strides = [1, 1]} : vector<8x96xf32> to vector<8x32xf32>
    %1030 = vector.extract_strided_slice %1018 {offsets = [0, 64], sizes = [8, 32], strides = [1, 1]} : vector<8x96xf32> to vector<8x32xf32>
    %1031 = vector.broadcast %987 : vector<1x32xf32> to vector<8x32xf32>
    %1032 = arith.addf %1030, %1031 : vector<8x32xf32>
    %1033 = arith.mulf %1027, %1032 : vector<8x32xf32>
    %1034 = arith.addf %1029, %1033 : vector<8x32xf32>
    %1035 = math.tanh %1034 : vector<8x32xf32>
    %cst_404 = arith.constant 1.000000e+00 : f32
    %1036 = vector.broadcast %cst_404 : f32 to vector<8x32xf32>
    %1037 = arith.subf %1036, %1028 : vector<8x32xf32>
    %1038 = arith.mulf %1037, %1035 : vector<8x32xf32>
    %1039 = arith.mulf %1028, %1012 : vector<8x32xf32>
    %1040 = arith.addf %1038, %1039 : vector<8x32xf32>
    %c1_405 = arith.constant 1 : index
    %c0_406 = arith.constant 0 : index
    %c0_407 = arith.constant 0 : index
    %1041 = vector.load %arg36[%c1_405, %c0_406, %c0_407] : memref<8x8x32xf32, #tpu.memory_space<vmem>>, vector<1x8x32xf32>
    %1042 = vector.shape_cast %1041 : vector<1x8x32xf32> to vector<8x32xf32>
    %1043 = vector.shape_cast %1040 : vector<8x32xf32> to vector<1x8x32xf32>
    tpu.vector_store %arg36[%c1_405, %c0_406, %c0_407], %1043 {strides = array<i32>} : memref<8x8x32xf32, #tpu.memory_space<vmem>>, vector<1x8x32xf32>,
    %c2_408 = arith.constant 2 : index
    %c2_409 = arith.constant 2 : index
    %c0_410 = arith.constant 0 : index
    %c0_411 = arith.constant 0 : index
    %1044 = vector.load %arg35[%c2_408, %c2_409, %c0_410, %c0_411] : memref<4x8x8x96xf32, #tpu.memory_space<vmem>>, vector<1x1x8x96xf32>
    %1045 = vector.shape_cast %1044 : vector<1x1x8x96xf32> to vector<8x96xf32>
    %cst_412 = arith.constant dense<0.000000e+00> : vector<8x96xf32>
    %1046 = tpu.matmul %1040, %985, %cst_412 {dimension_numbers = #tpu.dot_dimension_numbers<[1], [0], [0], [1], [0, 0, 1, 1], [], []>} : vector<8x32xf32>, vector<32x96xf32>, vector<8x96xf32> -> vector<8x96xf32>
    %1047 = vector.extract_strided_slice %1045 {offsets = [0, 0], sizes = [8, 64], strides = [1, 1]} : vector<8x96xf32> to vector<8x64xf32>
    %1048 = vector.extract_strided_slice %1046 {offsets = [0, 0], sizes = [8, 64], strides = [1, 1]} : vector<8x96xf32> to vector<8x64xf32>
    %1049 = arith.addf %1047, %1048 : vector<8x64xf32>
    %1050 = arith.negf %1049 : vector<8x64xf32>
    %1051 = math.exp %1050 : vector<8x64xf32>
    %cst_413 = arith.constant 1.000000e+00 : f32
    %1052 = vector.broadcast %cst_413 : f32 to vector<8x64xf32>
    %1053 = arith.addf %1052, %1051 : vector<8x64xf32>
    %1054 = arith.divf %1052, %1053 : vector<8x64xf32>
    %1055 = vector.extract_strided_slice %1054 {offsets = [0, 0], sizes = [8, 32], strides = [1, 1]} : vector<8x64xf32> to vector<8x32xf32>
    %1056 = vector.extract_strided_slice %1054 {offsets = [0, 32], sizes = [8, 32], strides = [1, 1]} : vector<8x64xf32> to vector<8x32xf32>
    %1057 = vector.extract_strided_slice %1045 {offsets = [0, 64], sizes = [8, 32], strides = [1, 1]} : vector<8x96xf32> to vector<8x32xf32>
    %1058 = vector.extract_strided_slice %1046 {offsets = [0, 64], sizes = [8, 32], strides = [1, 1]} : vector<8x96xf32> to vector<8x32xf32>
    %1059 = vector.broadcast %987 : vector<1x32xf32> to vector<8x32xf32>
    %1060 = arith.addf %1058, %1059 : vector<8x32xf32>
    %1061 = arith.mulf %1055, %1060 : vector<8x32xf32>
    %1062 = arith.addf %1057, %1061 : vector<8x32xf32>
    %1063 = math.tanh %1062 : vector<8x32xf32>
    %cst_414 = arith.constant 1.000000e+00 : f32
    %1064 = vector.broadcast %cst_414 : f32 to vector<8x32xf32>
    %1065 = arith.subf %1064, %1056 : vector<8x32xf32>
    %1066 = arith.mulf %1065, %1063 : vector<8x32xf32>
    %1067 = arith.mulf %1056, %1040 : vector<8x32xf32>
    %1068 = arith.addf %1066, %1067 : vector<8x32xf32>
    %c2_415 = arith.constant 2 : index
    %c0_416 = arith.constant 0 : index
    %c0_417 = arith.constant 0 : index
    %1069 = vector.load %arg36[%c2_415, %c0_416, %c0_417] : memref<8x8x32xf32, #tpu.memory_space<vmem>>, vector<1x8x32xf32>
    %1070 = vector.shape_cast %1069 : vector<1x8x32xf32> to vector<8x32xf32>
    %1071 = vector.shape_cast %1068 : vector<8x32xf32> to vector<1x8x32xf32>
    tpu.vector_store %arg36[%c2_415, %c0_416, %c0_417], %1071 {strides = array<i32>} : memref<8x8x32xf32, #tpu.memory_space<vmem>>, vector<1x8x32xf32>,
    %c2_418 = arith.constant 2 : index
    %c3_419 = arith.constant 3 : index
    %c0_420 = arith.constant 0 : index
    %c0_421 = arith.constant 0 : index
    %1072 = vector.load %arg35[%c2_418, %c3_419, %c0_420, %c0_421] : memref<4x8x8x96xf32, #tpu.memory_space<vmem>>, vector<1x1x8x96xf32>
    %1073 = vector.shape_cast %1072 : vector<1x1x8x96xf32> to vector<8x96xf32>
    %cst_422 = arith.constant dense<0.000000e+00> : vector<8x96xf32>
    %1074 = tpu.matmul %1068, %985, %cst_422 {dimension_numbers = #tpu.dot_dimension_numbers<[1], [0], [0], [1], [0, 0, 1, 1], [], []>} : vector<8x32xf32>, vector<32x96xf32>, vector<8x96xf32> -> vector<8x96xf32>
    %1075 = vector.extract_strided_slice %1073 {offsets = [0, 0], sizes = [8, 64], strides = [1, 1]} : vector<8x96xf32> to vector<8x64xf32>
    %1076 = vector.extract_strided_slice %1074 {offsets = [0, 0], sizes = [8, 64], strides = [1, 1]} : vector<8x96xf32> to vector<8x64xf32>
    %1077 = arith.addf %1075, %1076 : vector<8x64xf32>
    %1078 = arith.negf %1077 : vector<8x64xf32>
    %1079 = math.exp %1078 : vector<8x64xf32>
    %cst_423 = arith.constant 1.000000e+00 : f32
    %1080 = vector.broadcast %cst_423 : f32 to vector<8x64xf32>
    %1081 = arith.addf %1080, %1079 : vector<8x64xf32>
    %1082 = arith.divf %1080, %1081 : vector<8x64xf32>
    %1083 = vector.extract_strided_slice %1082 {offsets = [0, 0], sizes = [8, 32], strides = [1, 1]} : vector<8x64xf32> to vector<8x32xf32>
    %1084 = vector.extract_strided_slice %1082 {offsets = [0, 32], sizes = [8, 32], strides = [1, 1]} : vector<8x64xf32> to vector<8x32xf32>
    %1085 = vector.extract_strided_slice %1073 {offsets = [0, 64], sizes = [8, 32], strides = [1, 1]} : vector<8x96xf32> to vector<8x32xf32>
    %1086 = vector.extract_strided_slice %1074 {offsets = [0, 64], sizes = [8, 32], strides = [1, 1]} : vector<8x96xf32> to vector<8x32xf32>
    %1087 = vector.broadcast %987 : vector<1x32xf32> to vector<8x32xf32>
    %1088 = arith.addf %1086, %1087 : vector<8x32xf32>
    %1089 = arith.mulf %1083, %1088 : vector<8x32xf32>
    %1090 = arith.addf %1085, %1089 : vector<8x32xf32>
    %1091 = math.tanh %1090 : vector<8x32xf32>
    %cst_424 = arith.constant 1.000000e+00 : f32
    %1092 = vector.broadcast %cst_424 : f32 to vector<8x32xf32>
    %1093 = arith.subf %1092, %1084 : vector<8x32xf32>
    %1094 = arith.mulf %1093, %1091 : vector<8x32xf32>
    %1095 = arith.mulf %1084, %1068 : vector<8x32xf32>
    %1096 = arith.addf %1094, %1095 : vector<8x32xf32>
    %c3_425 = arith.constant 3 : index
    %c0_426 = arith.constant 0 : index
    %c0_427 = arith.constant 0 : index
    %1097 = vector.load %arg36[%c3_425, %c0_426, %c0_427] : memref<8x8x32xf32, #tpu.memory_space<vmem>>, vector<1x8x32xf32>
    %1098 = vector.shape_cast %1097 : vector<1x8x32xf32> to vector<8x32xf32>
    %1099 = vector.shape_cast %1096 : vector<8x32xf32> to vector<1x8x32xf32>
    tpu.vector_store %arg36[%c3_425, %c0_426, %c0_427], %1099 {strides = array<i32>} : memref<8x8x32xf32, #tpu.memory_space<vmem>>, vector<1x8x32xf32>,
    %c2_428 = arith.constant 2 : index
    %c4_429 = arith.constant 4 : index
    %c0_430 = arith.constant 0 : index
    %c0_431 = arith.constant 0 : index
    %1100 = vector.load %arg35[%c2_428, %c4_429, %c0_430, %c0_431] : memref<4x8x8x96xf32, #tpu.memory_space<vmem>>, vector<1x1x8x96xf32>
    %1101 = vector.shape_cast %1100 : vector<1x1x8x96xf32> to vector<8x96xf32>
    %cst_432 = arith.constant dense<0.000000e+00> : vector<8x96xf32>
    %1102 = tpu.matmul %1096, %985, %cst_432 {dimension_numbers = #tpu.dot_dimension_numbers<[1], [0], [0], [1], [0, 0, 1, 1], [], []>} : vector<8x32xf32>, vector<32x96xf32>, vector<8x96xf32> -> vector<8x96xf32>
    %1103 = vector.extract_strided_slice %1101 {offsets = [0, 0], sizes = [8, 64], strides = [1, 1]} : vector<8x96xf32> to vector<8x64xf32>
    %1104 = vector.extract_strided_slice %1102 {offsets = [0, 0], sizes = [8, 64], strides = [1, 1]} : vector<8x96xf32> to vector<8x64xf32>
    %1105 = arith.addf %1103, %1104 : vector<8x64xf32>
    %1106 = arith.negf %1105 : vector<8x64xf32>
    %1107 = math.exp %1106 : vector<8x64xf32>
    %cst_433 = arith.constant 1.000000e+00 : f32
    %1108 = vector.broadcast %cst_433 : f32 to vector<8x64xf32>
    %1109 = arith.addf %1108, %1107 : vector<8x64xf32>
    %1110 = arith.divf %1108, %1109 : vector<8x64xf32>
    %1111 = vector.extract_strided_slice %1110 {offsets = [0, 0], sizes = [8, 32], strides = [1, 1]} : vector<8x64xf32> to vector<8x32xf32>
    %1112 = vector.extract_strided_slice %1110 {offsets = [0, 32], sizes = [8, 32], strides = [1, 1]} : vector<8x64xf32> to vector<8x32xf32>
    %1113 = vector.extract_strided_slice %1101 {offsets = [0, 64], sizes = [8, 32], strides = [1, 1]} : vector<8x96xf32> to vector<8x32xf32>
    %1114 = vector.extract_strided_slice %1102 {offsets = [0, 64], sizes = [8, 32], strides = [1, 1]} : vector<8x96xf32> to vector<8x32xf32>
    %1115 = vector.broadcast %987 : vector<1x32xf32> to vector<8x32xf32>
    %1116 = arith.addf %1114, %1115 : vector<8x32xf32>
    %1117 = arith.mulf %1111, %1116 : vector<8x32xf32>
    %1118 = arith.addf %1113, %1117 : vector<8x32xf32>
    %1119 = math.tanh %1118 : vector<8x32xf32>
    %cst_434 = arith.constant 1.000000e+00 : f32
    %1120 = vector.broadcast %cst_434 : f32 to vector<8x32xf32>
    %1121 = arith.subf %1120, %1112 : vector<8x32xf32>
    %1122 = arith.mulf %1121, %1119 : vector<8x32xf32>
    %1123 = arith.mulf %1112, %1096 : vector<8x32xf32>
    %1124 = arith.addf %1122, %1123 : vector<8x32xf32>
    %c4_435 = arith.constant 4 : index
    %c0_436 = arith.constant 0 : index
    %c0_437 = arith.constant 0 : index
    %1125 = vector.load %arg36[%c4_435, %c0_436, %c0_437] : memref<8x8x32xf32, #tpu.memory_space<vmem>>, vector<1x8x32xf32>
    %1126 = vector.shape_cast %1125 : vector<1x8x32xf32> to vector<8x32xf32>
    %1127 = vector.shape_cast %1124 : vector<8x32xf32> to vector<1x8x32xf32>
    tpu.vector_store %arg36[%c4_435, %c0_436, %c0_437], %1127 {strides = array<i32>} : memref<8x8x32xf32, #tpu.memory_space<vmem>>, vector<1x8x32xf32>,
    %c2_438 = arith.constant 2 : index
    %c5_439 = arith.constant 5 : index
    %c0_440 = arith.constant 0 : index
    %c0_441 = arith.constant 0 : index
    %1128 = vector.load %arg35[%c2_438, %c5_439, %c0_440, %c0_441] : memref<4x8x8x96xf32, #tpu.memory_space<vmem>>, vector<1x1x8x96xf32>
    %1129 = vector.shape_cast %1128 : vector<1x1x8x96xf32> to vector<8x96xf32>
    %cst_442 = arith.constant dense<0.000000e+00> : vector<8x96xf32>
    %1130 = tpu.matmul %1124, %985, %cst_442 {dimension_numbers = #tpu.dot_dimension_numbers<[1], [0], [0], [1], [0, 0, 1, 1], [], []>} : vector<8x32xf32>, vector<32x96xf32>, vector<8x96xf32> -> vector<8x96xf32>
    %1131 = vector.extract_strided_slice %1129 {offsets = [0, 0], sizes = [8, 64], strides = [1, 1]} : vector<8x96xf32> to vector<8x64xf32>
    %1132 = vector.extract_strided_slice %1130 {offsets = [0, 0], sizes = [8, 64], strides = [1, 1]} : vector<8x96xf32> to vector<8x64xf32>
    %1133 = arith.addf %1131, %1132 : vector<8x64xf32>
    %1134 = arith.negf %1133 : vector<8x64xf32>
    %1135 = math.exp %1134 : vector<8x64xf32>
    %cst_443 = arith.constant 1.000000e+00 : f32
    %1136 = vector.broadcast %cst_443 : f32 to vector<8x64xf32>
    %1137 = arith.addf %1136, %1135 : vector<8x64xf32>
    %1138 = arith.divf %1136, %1137 : vector<8x64xf32>
    %1139 = vector.extract_strided_slice %1138 {offsets = [0, 0], sizes = [8, 32], strides = [1, 1]} : vector<8x64xf32> to vector<8x32xf32>
    %1140 = vector.extract_strided_slice %1138 {offsets = [0, 32], sizes = [8, 32], strides = [1, 1]} : vector<8x64xf32> to vector<8x32xf32>
    %1141 = vector.extract_strided_slice %1129 {offsets = [0, 64], sizes = [8, 32], strides = [1, 1]} : vector<8x96xf32> to vector<8x32xf32>
    %1142 = vector.extract_strided_slice %1130 {offsets = [0, 64], sizes = [8, 32], strides = [1, 1]} : vector<8x96xf32> to vector<8x32xf32>
    %1143 = vector.broadcast %987 : vector<1x32xf32> to vector<8x32xf32>
    %1144 = arith.addf %1142, %1143 : vector<8x32xf32>
    %1145 = arith.mulf %1139, %1144 : vector<8x32xf32>
    %1146 = arith.addf %1141, %1145 : vector<8x32xf32>
    %1147 = math.tanh %1146 : vector<8x32xf32>
    %cst_444 = arith.constant 1.000000e+00 : f32
    %1148 = vector.broadcast %cst_444 : f32 to vector<8x32xf32>
    %1149 = arith.subf %1148, %1140 : vector<8x32xf32>
    %1150 = arith.mulf %1149, %1147 : vector<8x32xf32>
    %1151 = arith.mulf %1140, %1124 : vector<8x32xf32>
    %1152 = arith.addf %1150, %1151 : vector<8x32xf32>
    %c5_445 = arith.constant 5 : index
    %c0_446 = arith.constant 0 : index
    %c0_447 = arith.constant 0 : index
    %1153 = vector.load %arg36[%c5_445, %c0_446, %c0_447] : memref<8x8x32xf32, #tpu.memory_space<vmem>>, vector<1x8x32xf32>
    %1154 = vector.shape_cast %1153 : vector<1x8x32xf32> to vector<8x32xf32>
    %1155 = vector.shape_cast %1152 : vector<8x32xf32> to vector<1x8x32xf32>
    tpu.vector_store %arg36[%c5_445, %c0_446, %c0_447], %1155 {strides = array<i32>} : memref<8x8x32xf32, #tpu.memory_space<vmem>>, vector<1x8x32xf32>,
    %c2_448 = arith.constant 2 : index
    %c6_449 = arith.constant 6 : index
    %c0_450 = arith.constant 0 : index
    %c0_451 = arith.constant 0 : index
    %1156 = vector.load %arg35[%c2_448, %c6_449, %c0_450, %c0_451] : memref<4x8x8x96xf32, #tpu.memory_space<vmem>>, vector<1x1x8x96xf32>
    %1157 = vector.shape_cast %1156 : vector<1x1x8x96xf32> to vector<8x96xf32>
    %cst_452 = arith.constant dense<0.000000e+00> : vector<8x96xf32>
    %1158 = tpu.matmul %1152, %985, %cst_452 {dimension_numbers = #tpu.dot_dimension_numbers<[1], [0], [0], [1], [0, 0, 1, 1], [], []>} : vector<8x32xf32>, vector<32x96xf32>, vector<8x96xf32> -> vector<8x96xf32>
    %1159 = vector.extract_strided_slice %1157 {offsets = [0, 0], sizes = [8, 64], strides = [1, 1]} : vector<8x96xf32> to vector<8x64xf32>
    %1160 = vector.extract_strided_slice %1158 {offsets = [0, 0], sizes = [8, 64], strides = [1, 1]} : vector<8x96xf32> to vector<8x64xf32>
    %1161 = arith.addf %1159, %1160 : vector<8x64xf32>
    %1162 = arith.negf %1161 : vector<8x64xf32>
    %1163 = math.exp %1162 : vector<8x64xf32>
    %cst_453 = arith.constant 1.000000e+00 : f32
    %1164 = vector.broadcast %cst_453 : f32 to vector<8x64xf32>
    %1165 = arith.addf %1164, %1163 : vector<8x64xf32>
    %1166 = arith.divf %1164, %1165 : vector<8x64xf32>
    %1167 = vector.extract_strided_slice %1166 {offsets = [0, 0], sizes = [8, 32], strides = [1, 1]} : vector<8x64xf32> to vector<8x32xf32>
    %1168 = vector.extract_strided_slice %1166 {offsets = [0, 32], sizes = [8, 32], strides = [1, 1]} : vector<8x64xf32> to vector<8x32xf32>
    %1169 = vector.extract_strided_slice %1157 {offsets = [0, 64], sizes = [8, 32], strides = [1, 1]} : vector<8x96xf32> to vector<8x32xf32>
    %1170 = vector.extract_strided_slice %1158 {offsets = [0, 64], sizes = [8, 32], strides = [1, 1]} : vector<8x96xf32> to vector<8x32xf32>
    %1171 = vector.broadcast %987 : vector<1x32xf32> to vector<8x32xf32>
    %1172 = arith.addf %1170, %1171 : vector<8x32xf32>
    %1173 = arith.mulf %1167, %1172 : vector<8x32xf32>
    %1174 = arith.addf %1169, %1173 : vector<8x32xf32>
    %1175 = math.tanh %1174 : vector<8x32xf32>
    %cst_454 = arith.constant 1.000000e+00 : f32
    %1176 = vector.broadcast %cst_454 : f32 to vector<8x32xf32>
    %1177 = arith.subf %1176, %1168 : vector<8x32xf32>
    %1178 = arith.mulf %1177, %1175 : vector<8x32xf32>
    %1179 = arith.mulf %1168, %1152 : vector<8x32xf32>
    %1180 = arith.addf %1178, %1179 : vector<8x32xf32>
    %c6_455 = arith.constant 6 : index
    %c0_456 = arith.constant 0 : index
    %c0_457 = arith.constant 0 : index
    %1181 = vector.load %arg36[%c6_455, %c0_456, %c0_457] : memref<8x8x32xf32, #tpu.memory_space<vmem>>, vector<1x8x32xf32>
    %1182 = vector.shape_cast %1181 : vector<1x8x32xf32> to vector<8x32xf32>
    %1183 = vector.shape_cast %1180 : vector<8x32xf32> to vector<1x8x32xf32>
    tpu.vector_store %arg36[%c6_455, %c0_456, %c0_457], %1183 {strides = array<i32>} : memref<8x8x32xf32, #tpu.memory_space<vmem>>, vector<1x8x32xf32>,
    %c2_458 = arith.constant 2 : index
    %c7_459 = arith.constant 7 : index
    %c0_460 = arith.constant 0 : index
    %c0_461 = arith.constant 0 : index
    %1184 = vector.load %arg35[%c2_458, %c7_459, %c0_460, %c0_461] : memref<4x8x8x96xf32, #tpu.memory_space<vmem>>, vector<1x1x8x96xf32>
    %1185 = vector.shape_cast %1184 : vector<1x1x8x96xf32> to vector<8x96xf32>
    %cst_462 = arith.constant dense<0.000000e+00> : vector<8x96xf32>
    %1186 = tpu.matmul %1180, %985, %cst_462 {dimension_numbers = #tpu.dot_dimension_numbers<[1], [0], [0], [1], [0, 0, 1, 1], [], []>} : vector<8x32xf32>, vector<32x96xf32>, vector<8x96xf32> -> vector<8x96xf32>
    %1187 = vector.extract_strided_slice %1185 {offsets = [0, 0], sizes = [8, 64], strides = [1, 1]} : vector<8x96xf32> to vector<8x64xf32>
    %1188 = vector.extract_strided_slice %1186 {offsets = [0, 0], sizes = [8, 64], strides = [1, 1]} : vector<8x96xf32> to vector<8x64xf32>
    %1189 = arith.addf %1187, %1188 : vector<8x64xf32>
    %1190 = arith.negf %1189 : vector<8x64xf32>
    %1191 = math.exp %1190 : vector<8x64xf32>
    %cst_463 = arith.constant 1.000000e+00 : f32
    %1192 = vector.broadcast %cst_463 : f32 to vector<8x64xf32>
    %1193 = arith.addf %1192, %1191 : vector<8x64xf32>
    %1194 = arith.divf %1192, %1193 : vector<8x64xf32>
    %1195 = vector.extract_strided_slice %1194 {offsets = [0, 0], sizes = [8, 32], strides = [1, 1]} : vector<8x64xf32> to vector<8x32xf32>
    %1196 = vector.extract_strided_slice %1194 {offsets = [0, 32], sizes = [8, 32], strides = [1, 1]} : vector<8x64xf32> to vector<8x32xf32>
    %1197 = vector.extract_strided_slice %1185 {offsets = [0, 64], sizes = [8, 32], strides = [1, 1]} : vector<8x96xf32> to vector<8x32xf32>
    %1198 = vector.extract_strided_slice %1186 {offsets = [0, 64], sizes = [8, 32], strides = [1, 1]} : vector<8x96xf32> to vector<8x32xf32>
    %1199 = vector.broadcast %987 : vector<1x32xf32> to vector<8x32xf32>
    %1200 = arith.addf %1198, %1199 : vector<8x32xf32>
    %1201 = arith.mulf %1195, %1200 : vector<8x32xf32>
    %1202 = arith.addf %1197, %1201 : vector<8x32xf32>
    %1203 = math.tanh %1202 : vector<8x32xf32>
    %cst_464 = arith.constant 1.000000e+00 : f32
    %1204 = vector.broadcast %cst_464 : f32 to vector<8x32xf32>
    %1205 = arith.subf %1204, %1196 : vector<8x32xf32>
    %1206 = arith.mulf %1205, %1203 : vector<8x32xf32>
    %1207 = arith.mulf %1196, %1180 : vector<8x32xf32>
    %1208 = arith.addf %1206, %1207 : vector<8x32xf32>
    %c7_465 = arith.constant 7 : index
    %c0_466 = arith.constant 0 : index
    %c0_467 = arith.constant 0 : index
    %1209 = vector.load %arg36[%c7_465, %c0_466, %c0_467] : memref<8x8x32xf32, #tpu.memory_space<vmem>>, vector<1x8x32xf32>
    %1210 = vector.shape_cast %1209 : vector<1x8x32xf32> to vector<8x32xf32>
    %1211 = vector.shape_cast %1208 : vector<8x32xf32> to vector<1x8x32xf32>
    tpu.vector_store %arg36[%c7_465, %c0_466, %c0_467], %1211 {strides = array<i32>} : memref<8x8x32xf32, #tpu.memory_space<vmem>>, vector<1x8x32xf32>,
    %c0_468 = arith.constant 0 : index
    %c0_469 = arith.constant 0 : index
    %c0_470 = arith.constant 0 : index
    %1212 = vector.load %arg23[%c0_468, %c0_469, %c0_470] : memref<2x32x96xf32, #tpu.memory_space<vmem>>, vector<1x32x96xf32>
    %1213 = vector.shape_cast %1212 : vector<1x32x96xf32> to vector<32x96xf32>
    %c0_471 = arith.constant 0 : index
    %c0_472 = arith.constant 0 : index
    %c0_473 = arith.constant 0 : index
    %1214 = vector.load %arg24[%c0_471, %c0_472, %c0_473] : memref<2x1x32xf32, #tpu.memory_space<vmem>>, vector<1x1x32xf32>
    %1215 = vector.shape_cast %1214 : vector<1x1x32xf32> to vector<1x32xf32>
    %c3_474 = arith.constant 3 : index
    %c7_475 = arith.constant 7 : index
    %c0_476 = arith.constant 0 : index
    %c0_477 = arith.constant 0 : index
    %1216 = vector.load %arg35[%c3_474, %c7_475, %c0_476, %c0_477] : memref<4x8x8x96xf32, #tpu.memory_space<vmem>>, vector<1x1x8x96xf32>
    %1217 = vector.shape_cast %1216 : vector<1x1x8x96xf32> to vector<8x96xf32>
    %cst_478 = arith.constant dense<0.000000e+00> : vector<8x96xf32>
    %1218 = tpu.matmul %26, %1213, %cst_478 {dimension_numbers = #tpu.dot_dimension_numbers<[1], [0], [0], [1], [0, 0, 1, 1], [], []>} : vector<8x32xf32>, vector<32x96xf32>, vector<8x96xf32> -> vector<8x96xf32>
    %1219 = vector.extract_strided_slice %1217 {offsets = [0, 0], sizes = [8, 64], strides = [1, 1]} : vector<8x96xf32> to vector<8x64xf32>
    %1220 = vector.extract_strided_slice %1218 {offsets = [0, 0], sizes = [8, 64], strides = [1, 1]} : vector<8x96xf32> to vector<8x64xf32>
    %1221 = arith.addf %1219, %1220 : vector<8x64xf32>
    %1222 = arith.negf %1221 : vector<8x64xf32>
    %1223 = math.exp %1222 : vector<8x64xf32>
    %cst_479 = arith.constant 1.000000e+00 : f32
    %1224 = vector.broadcast %cst_479 : f32 to vector<8x64xf32>
    %1225 = arith.addf %1224, %1223 : vector<8x64xf32>
    %1226 = arith.divf %1224, %1225 : vector<8x64xf32>
    %1227 = vector.extract_strided_slice %1226 {offsets = [0, 0], sizes = [8, 32], strides = [1, 1]} : vector<8x64xf32> to vector<8x32xf32>
    %1228 = vector.extract_strided_slice %1226 {offsets = [0, 32], sizes = [8, 32], strides = [1, 1]} : vector<8x64xf32> to vector<8x32xf32>
    %1229 = vector.extract_strided_slice %1217 {offsets = [0, 64], sizes = [8, 32], strides = [1, 1]} : vector<8x96xf32> to vector<8x32xf32>
    %1230 = vector.extract_strided_slice %1218 {offsets = [0, 64], sizes = [8, 32], strides = [1, 1]} : vector<8x96xf32> to vector<8x32xf32>
    %1231 = vector.broadcast %1215 : vector<1x32xf32> to vector<8x32xf32>
    %1232 = arith.addf %1230, %1231 : vector<8x32xf32>
    %1233 = arith.mulf %1227, %1232 : vector<8x32xf32>
    %1234 = arith.addf %1229, %1233 : vector<8x32xf32>
    %1235 = math.tanh %1234 : vector<8x32xf32>
    %cst_480 = arith.constant 1.000000e+00 : f32
    %1236 = vector.broadcast %cst_480 : f32 to vector<8x32xf32>
    %1237 = arith.subf %1236, %1228 : vector<8x32xf32>
    %1238 = arith.mulf %1237, %1235 : vector<8x32xf32>
    %1239 = arith.mulf %1228, %26 : vector<8x32xf32>
    %1240 = arith.addf %1238, %1239 : vector<8x32xf32>
    %c7_481 = arith.constant 7 : index
    %c0_482 = arith.constant 0 : index
    %c0_483 = arith.constant 0 : index
    %1241 = vector.load %arg37[%c7_481, %c0_482, %c0_483] : memref<8x8x32xf32, #tpu.memory_space<vmem>>, vector<1x8x32xf32>
    %1242 = vector.shape_cast %1241 : vector<1x8x32xf32> to vector<8x32xf32>
    %1243 = vector.shape_cast %1240 : vector<8x32xf32> to vector<1x8x32xf32>
    tpu.vector_store %arg37[%c7_481, %c0_482, %c0_483], %1243 {strides = array<i32>} : memref<8x8x32xf32, #tpu.memory_space<vmem>>, vector<1x8x32xf32>,
    %c3_484 = arith.constant 3 : index
    %c6_485 = arith.constant 6 : index
    %c0_486 = arith.constant 0 : index
    %c0_487 = arith.constant 0 : index
    %1244 = vector.load %arg35[%c3_484, %c6_485, %c0_486, %c0_487] : memref<4x8x8x96xf32, #tpu.memory_space<vmem>>, vector<1x1x8x96xf32>
    %1245 = vector.shape_cast %1244 : vector<1x1x8x96xf32> to vector<8x96xf32>
    %cst_488 = arith.constant dense<0.000000e+00> : vector<8x96xf32>
    %1246 = tpu.matmul %1240, %1213, %cst_488 {dimension_numbers = #tpu.dot_dimension_numbers<[1], [0], [0], [1], [0, 0, 1, 1], [], []>} : vector<8x32xf32>, vector<32x96xf32>, vector<8x96xf32> -> vector<8x96xf32>
    %1247 = vector.extract_strided_slice %1245 {offsets = [0, 0], sizes = [8, 64], strides = [1, 1]} : vector<8x96xf32> to vector<8x64xf32>
    %1248 = vector.extract_strided_slice %1246 {offsets = [0, 0], sizes = [8, 64], strides = [1, 1]} : vector<8x96xf32> to vector<8x64xf32>
    %1249 = arith.addf %1247, %1248 : vector<8x64xf32>
    %1250 = arith.negf %1249 : vector<8x64xf32>
    %1251 = math.exp %1250 : vector<8x64xf32>
    %cst_489 = arith.constant 1.000000e+00 : f32
    %1252 = vector.broadcast %cst_489 : f32 to vector<8x64xf32>
    %1253 = arith.addf %1252, %1251 : vector<8x64xf32>
    %1254 = arith.divf %1252, %1253 : vector<8x64xf32>
    %1255 = vector.extract_strided_slice %1254 {offsets = [0, 0], sizes = [8, 32], strides = [1, 1]} : vector<8x64xf32> to vector<8x32xf32>
    %1256 = vector.extract_strided_slice %1254 {offsets = [0, 32], sizes = [8, 32], strides = [1, 1]} : vector<8x64xf32> to vector<8x32xf32>
    %1257 = vector.extract_strided_slice %1245 {offsets = [0, 64], sizes = [8, 32], strides = [1, 1]} : vector<8x96xf32> to vector<8x32xf32>
    %1258 = vector.extract_strided_slice %1246 {offsets = [0, 64], sizes = [8, 32], strides = [1, 1]} : vector<8x96xf32> to vector<8x32xf32>
    %1259 = vector.broadcast %1215 : vector<1x32xf32> to vector<8x32xf32>
    %1260 = arith.addf %1258, %1259 : vector<8x32xf32>
    %1261 = arith.mulf %1255, %1260 : vector<8x32xf32>
    %1262 = arith.addf %1257, %1261 : vector<8x32xf32>
    %1263 = math.tanh %1262 : vector<8x32xf32>
    %cst_490 = arith.constant 1.000000e+00 : f32
    %1264 = vector.broadcast %cst_490 : f32 to vector<8x32xf32>
    %1265 = arith.subf %1264, %1256 : vector<8x32xf32>
    %1266 = arith.mulf %1265, %1263 : vector<8x32xf32>
    %1267 = arith.mulf %1256, %1240 : vector<8x32xf32>
    %1268 = arith.addf %1266, %1267 : vector<8x32xf32>
    %c6_491 = arith.constant 6 : index
    %c0_492 = arith.constant 0 : index
    %c0_493 = arith.constant 0 : index
    %1269 = vector.load %arg37[%c6_491, %c0_492, %c0_493] : memref<8x8x32xf32, #tpu.memory_space<vmem>>, vector<1x8x32xf32>
    %1270 = vector.shape_cast %1269 : vector<1x8x32xf32> to vector<8x32xf32>
    %1271 = vector.shape_cast %1268 : vector<8x32xf32> to vector<1x8x32xf32>
    tpu.vector_store %arg37[%c6_491, %c0_492, %c0_493], %1271 {strides = array<i32>} : memref<8x8x32xf32, #tpu.memory_space<vmem>>, vector<1x8x32xf32>,
    %c3_494 = arith.constant 3 : index
    %c5_495 = arith.constant 5 : index
    %c0_496 = arith.constant 0 : index
    %c0_497 = arith.constant 0 : index
    %1272 = vector.load %arg35[%c3_494, %c5_495, %c0_496, %c0_497] : memref<4x8x8x96xf32, #tpu.memory_space<vmem>>, vector<1x1x8x96xf32>
    %1273 = vector.shape_cast %1272 : vector<1x1x8x96xf32> to vector<8x96xf32>
    %cst_498 = arith.constant dense<0.000000e+00> : vector<8x96xf32>
    %1274 = tpu.matmul %1268, %1213, %cst_498 {dimension_numbers = #tpu.dot_dimension_numbers<[1], [0], [0], [1], [0, 0, 1, 1], [], []>} : vector<8x32xf32>, vector<32x96xf32>, vector<8x96xf32> -> vector<8x96xf32>
    %1275 = vector.extract_strided_slice %1273 {offsets = [0, 0], sizes = [8, 64], strides = [1, 1]} : vector<8x96xf32> to vector<8x64xf32>
    %1276 = vector.extract_strided_slice %1274 {offsets = [0, 0], sizes = [8, 64], strides = [1, 1]} : vector<8x96xf32> to vector<8x64xf32>
    %1277 = arith.addf %1275, %1276 : vector<8x64xf32>
    %1278 = arith.negf %1277 : vector<8x64xf32>
    %1279 = math.exp %1278 : vector<8x64xf32>
    %cst_499 = arith.constant 1.000000e+00 : f32
    %1280 = vector.broadcast %cst_499 : f32 to vector<8x64xf32>
    %1281 = arith.addf %1280, %1279 : vector<8x64xf32>
    %1282 = arith.divf %1280, %1281 : vector<8x64xf32>
    %1283 = vector.extract_strided_slice %1282 {offsets = [0, 0], sizes = [8, 32], strides = [1, 1]} : vector<8x64xf32> to vector<8x32xf32>
    %1284 = vector.extract_strided_slice %1282 {offsets = [0, 32], sizes = [8, 32], strides = [1, 1]} : vector<8x64xf32> to vector<8x32xf32>
    %1285 = vector.extract_strided_slice %1273 {offsets = [0, 64], sizes = [8, 32], strides = [1, 1]} : vector<8x96xf32> to vector<8x32xf32>
    %1286 = vector.extract_strided_slice %1274 {offsets = [0, 64], sizes = [8, 32], strides = [1, 1]} : vector<8x96xf32> to vector<8x32xf32>
    %1287 = vector.broadcast %1215 : vector<1x32xf32> to vector<8x32xf32>
    %1288 = arith.addf %1286, %1287 : vector<8x32xf32>
    %1289 = arith.mulf %1283, %1288 : vector<8x32xf32>
    %1290 = arith.addf %1285, %1289 : vector<8x32xf32>
    %1291 = math.tanh %1290 : vector<8x32xf32>
    %cst_500 = arith.constant 1.000000e+00 : f32
    %1292 = vector.broadcast %cst_500 : f32 to vector<8x32xf32>
    %1293 = arith.subf %1292, %1284 : vector<8x32xf32>
    %1294 = arith.mulf %1293, %1291 : vector<8x32xf32>
    %1295 = arith.mulf %1284, %1268 : vector<8x32xf32>
    %1296 = arith.addf %1294, %1295 : vector<8x32xf32>
    %c5_501 = arith.constant 5 : index
    %c0_502 = arith.constant 0 : index
    %c0_503 = arith.constant 0 : index
    %1297 = vector.load %arg37[%c5_501, %c0_502, %c0_503] : memref<8x8x32xf32, #tpu.memory_space<vmem>>, vector<1x8x32xf32>
    %1298 = vector.shape_cast %1297 : vector<1x8x32xf32> to vector<8x32xf32>
    %1299 = vector.shape_cast %1296 : vector<8x32xf32> to vector<1x8x32xf32>
    tpu.vector_store %arg37[%c5_501, %c0_502, %c0_503], %1299 {strides = array<i32>} : memref<8x8x32xf32, #tpu.memory_space<vmem>>, vector<1x8x32xf32>,
    %c3_504 = arith.constant 3 : index
    %c4_505 = arith.constant 4 : index
    %c0_506 = arith.constant 0 : index
    %c0_507 = arith.constant 0 : index
    %1300 = vector.load %arg35[%c3_504, %c4_505, %c0_506, %c0_507] : memref<4x8x8x96xf32, #tpu.memory_space<vmem>>, vector<1x1x8x96xf32>
    %1301 = vector.shape_cast %1300 : vector<1x1x8x96xf32> to vector<8x96xf32>
    %cst_508 = arith.constant dense<0.000000e+00> : vector<8x96xf32>
    %1302 = tpu.matmul %1296, %1213, %cst_508 {dimension_numbers = #tpu.dot_dimension_numbers<[1], [0], [0], [1], [0, 0, 1, 1], [], []>} : vector<8x32xf32>, vector<32x96xf32>, vector<8x96xf32> -> vector<8x96xf32>
    %1303 = vector.extract_strided_slice %1301 {offsets = [0, 0], sizes = [8, 64], strides = [1, 1]} : vector<8x96xf32> to vector<8x64xf32>
    %1304 = vector.extract_strided_slice %1302 {offsets = [0, 0], sizes = [8, 64], strides = [1, 1]} : vector<8x96xf32> to vector<8x64xf32>
    %1305 = arith.addf %1303, %1304 : vector<8x64xf32>
    %1306 = arith.negf %1305 : vector<8x64xf32>
    %1307 = math.exp %1306 : vector<8x64xf32>
    %cst_509 = arith.constant 1.000000e+00 : f32
    %1308 = vector.broadcast %cst_509 : f32 to vector<8x64xf32>
    %1309 = arith.addf %1308, %1307 : vector<8x64xf32>
    %1310 = arith.divf %1308, %1309 : vector<8x64xf32>
    %1311 = vector.extract_strided_slice %1310 {offsets = [0, 0], sizes = [8, 32], strides = [1, 1]} : vector<8x64xf32> to vector<8x32xf32>
    %1312 = vector.extract_strided_slice %1310 {offsets = [0, 32], sizes = [8, 32], strides = [1, 1]} : vector<8x64xf32> to vector<8x32xf32>
    %1313 = vector.extract_strided_slice %1301 {offsets = [0, 64], sizes = [8, 32], strides = [1, 1]} : vector<8x96xf32> to vector<8x32xf32>
    %1314 = vector.extract_strided_slice %1302 {offsets = [0, 64], sizes = [8, 32], strides = [1, 1]} : vector<8x96xf32> to vector<8x32xf32>
    %1315 = vector.broadcast %1215 : vector<1x32xf32> to vector<8x32xf32>
    %1316 = arith.addf %1314, %1315 : vector<8x32xf32>
    %1317 = arith.mulf %1311, %1316 : vector<8x32xf32>
    %1318 = arith.addf %1313, %1317 : vector<8x32xf32>
    %1319 = math.tanh %1318 : vector<8x32xf32>
    %cst_510 = arith.constant 1.000000e+00 : f32
    %1320 = vector.broadcast %cst_510 : f32 to vector<8x32xf32>
    %1321 = arith.subf %1320, %1312 : vector<8x32xf32>
    %1322 = arith.mulf %1321, %1319 : vector<8x32xf32>
    %1323 = arith.mulf %1312, %1296 : vector<8x32xf32>
    %1324 = arith.addf %1322, %1323 : vector<8x32xf32>
    %c4_511 = arith.constant 4 : index
    %c0_512 = arith.constant 0 : index
    %c0_513 = arith.constant 0 : index
    %1325 = vector.load %arg37[%c4_511, %c0_512, %c0_513] : memref<8x8x32xf32, #tpu.memory_space<vmem>>, vector<1x8x32xf32>
    %1326 = vector.shape_cast %1325 : vector<1x8x32xf32> to vector<8x32xf32>
    %1327 = vector.shape_cast %1324 : vector<8x32xf32> to vector<1x8x32xf32>
    tpu.vector_store %arg37[%c4_511, %c0_512, %c0_513], %1327 {strides = array<i32>} : memref<8x8x32xf32, #tpu.memory_space<vmem>>, vector<1x8x32xf32>,
    %c3_514 = arith.constant 3 : index
    %c3_515 = arith.constant 3 : index
    %c0_516 = arith.constant 0 : index
    %c0_517 = arith.constant 0 : index
    %1328 = vector.load %arg35[%c3_514, %c3_515, %c0_516, %c0_517] : memref<4x8x8x96xf32, #tpu.memory_space<vmem>>, vector<1x1x8x96xf32>
    %1329 = vector.shape_cast %1328 : vector<1x1x8x96xf32> to vector<8x96xf32>
    %cst_518 = arith.constant dense<0.000000e+00> : vector<8x96xf32>
    %1330 = tpu.matmul %1324, %1213, %cst_518 {dimension_numbers = #tpu.dot_dimension_numbers<[1], [0], [0], [1], [0, 0, 1, 1], [], []>} : vector<8x32xf32>, vector<32x96xf32>, vector<8x96xf32> -> vector<8x96xf32>
    %1331 = vector.extract_strided_slice %1329 {offsets = [0, 0], sizes = [8, 64], strides = [1, 1]} : vector<8x96xf32> to vector<8x64xf32>
    %1332 = vector.extract_strided_slice %1330 {offsets = [0, 0], sizes = [8, 64], strides = [1, 1]} : vector<8x96xf32> to vector<8x64xf32>
    %1333 = arith.addf %1331, %1332 : vector<8x64xf32>
    %1334 = arith.negf %1333 : vector<8x64xf32>
    %1335 = math.exp %1334 : vector<8x64xf32>
    %cst_519 = arith.constant 1.000000e+00 : f32
    %1336 = vector.broadcast %cst_519 : f32 to vector<8x64xf32>
    %1337 = arith.addf %1336, %1335 : vector<8x64xf32>
    %1338 = arith.divf %1336, %1337 : vector<8x64xf32>
    %1339 = vector.extract_strided_slice %1338 {offsets = [0, 0], sizes = [8, 32], strides = [1, 1]} : vector<8x64xf32> to vector<8x32xf32>
    %1340 = vector.extract_strided_slice %1338 {offsets = [0, 32], sizes = [8, 32], strides = [1, 1]} : vector<8x64xf32> to vector<8x32xf32>
    %1341 = vector.extract_strided_slice %1329 {offsets = [0, 64], sizes = [8, 32], strides = [1, 1]} : vector<8x96xf32> to vector<8x32xf32>
    %1342 = vector.extract_strided_slice %1330 {offsets = [0, 64], sizes = [8, 32], strides = [1, 1]} : vector<8x96xf32> to vector<8x32xf32>
    %1343 = vector.broadcast %1215 : vector<1x32xf32> to vector<8x32xf32>
    %1344 = arith.addf %1342, %1343 : vector<8x32xf32>
    %1345 = arith.mulf %1339, %1344 : vector<8x32xf32>
    %1346 = arith.addf %1341, %1345 : vector<8x32xf32>
    %1347 = math.tanh %1346 : vector<8x32xf32>
    %cst_520 = arith.constant 1.000000e+00 : f32
    %1348 = vector.broadcast %cst_520 : f32 to vector<8x32xf32>
    %1349 = arith.subf %1348, %1340 : vector<8x32xf32>
    %1350 = arith.mulf %1349, %1347 : vector<8x32xf32>
    %1351 = arith.mulf %1340, %1324 : vector<8x32xf32>
    %1352 = arith.addf %1350, %1351 : vector<8x32xf32>
    %c3_521 = arith.constant 3 : index
    %c0_522 = arith.constant 0 : index
    %c0_523 = arith.constant 0 : index
    %1353 = vector.load %arg37[%c3_521, %c0_522, %c0_523] : memref<8x8x32xf32, #tpu.memory_space<vmem>>, vector<1x8x32xf32>
    %1354 = vector.shape_cast %1353 : vector<1x8x32xf32> to vector<8x32xf32>
    %1355 = vector.shape_cast %1352 : vector<8x32xf32> to vector<1x8x32xf32>
    tpu.vector_store %arg37[%c3_521, %c0_522, %c0_523], %1355 {strides = array<i32>} : memref<8x8x32xf32, #tpu.memory_space<vmem>>, vector<1x8x32xf32>,
    %c3_524 = arith.constant 3 : index
    %c2_525 = arith.constant 2 : index
    %c0_526 = arith.constant 0 : index
    %c0_527 = arith.constant 0 : index
    %1356 = vector.load %arg35[%c3_524, %c2_525, %c0_526, %c0_527] : memref<4x8x8x96xf32, #tpu.memory_space<vmem>>, vector<1x1x8x96xf32>
    %1357 = vector.shape_cast %1356 : vector<1x1x8x96xf32> to vector<8x96xf32>
    %cst_528 = arith.constant dense<0.000000e+00> : vector<8x96xf32>
    %1358 = tpu.matmul %1352, %1213, %cst_528 {dimension_numbers = #tpu.dot_dimension_numbers<[1], [0], [0], [1], [0, 0, 1, 1], [], []>} : vector<8x32xf32>, vector<32x96xf32>, vector<8x96xf32> -> vector<8x96xf32>
    %1359 = vector.extract_strided_slice %1357 {offsets = [0, 0], sizes = [8, 64], strides = [1, 1]} : vector<8x96xf32> to vector<8x64xf32>
    %1360 = vector.extract_strided_slice %1358 {offsets = [0, 0], sizes = [8, 64], strides = [1, 1]} : vector<8x96xf32> to vector<8x64xf32>
    %1361 = arith.addf %1359, %1360 : vector<8x64xf32>
    %1362 = arith.negf %1361 : vector<8x64xf32>
    %1363 = math.exp %1362 : vector<8x64xf32>
    %cst_529 = arith.constant 1.000000e+00 : f32
    %1364 = vector.broadcast %cst_529 : f32 to vector<8x64xf32>
    %1365 = arith.addf %1364, %1363 : vector<8x64xf32>
    %1366 = arith.divf %1364, %1365 : vector<8x64xf32>
    %1367 = vector.extract_strided_slice %1366 {offsets = [0, 0], sizes = [8, 32], strides = [1, 1]} : vector<8x64xf32> to vector<8x32xf32>
    %1368 = vector.extract_strided_slice %1366 {offsets = [0, 32], sizes = [8, 32], strides = [1, 1]} : vector<8x64xf32> to vector<8x32xf32>
    %1369 = vector.extract_strided_slice %1357 {offsets = [0, 64], sizes = [8, 32], strides = [1, 1]} : vector<8x96xf32> to vector<8x32xf32>
    %1370 = vector.extract_strided_slice %1358 {offsets = [0, 64], sizes = [8, 32], strides = [1, 1]} : vector<8x96xf32> to vector<8x32xf32>
    %1371 = vector.broadcast %1215 : vector<1x32xf32> to vector<8x32xf32>
    %1372 = arith.addf %1370, %1371 : vector<8x32xf32>
    %1373 = arith.mulf %1367, %1372 : vector<8x32xf32>
    %1374 = arith.addf %1369, %1373 : vector<8x32xf32>
    %1375 = math.tanh %1374 : vector<8x32xf32>
    %cst_530 = arith.constant 1.000000e+00 : f32
    %1376 = vector.broadcast %cst_530 : f32 to vector<8x32xf32>
    %1377 = arith.subf %1376, %1368 : vector<8x32xf32>
    %1378 = arith.mulf %1377, %1375 : vector<8x32xf32>
    %1379 = arith.mulf %1368, %1352 : vector<8x32xf32>
    %1380 = arith.addf %1378, %1379 : vector<8x32xf32>
    %c2_531 = arith.constant 2 : index
    %c0_532 = arith.constant 0 : index
    %c0_533 = arith.constant 0 : index
    %1381 = vector.load %arg37[%c2_531, %c0_532, %c0_533] : memref<8x8x32xf32, #tpu.memory_space<vmem>>, vector<1x8x32xf32>
    %1382 = vector.shape_cast %1381 : vector<1x8x32xf32> to vector<8x32xf32>
    %1383 = vector.shape_cast %1380 : vector<8x32xf32> to vector<1x8x32xf32>
    tpu.vector_store %arg37[%c2_531, %c0_532, %c0_533], %1383 {strides = array<i32>} : memref<8x8x32xf32, #tpu.memory_space<vmem>>, vector<1x8x32xf32>,
    %c3_534 = arith.constant 3 : index
    %c1_535 = arith.constant 1 : index
    %c0_536 = arith.constant 0 : index
    %c0_537 = arith.constant 0 : index
    %1384 = vector.load %arg35[%c3_534, %c1_535, %c0_536, %c0_537] : memref<4x8x8x96xf32, #tpu.memory_space<vmem>>, vector<1x1x8x96xf32>
    %1385 = vector.shape_cast %1384 : vector<1x1x8x96xf32> to vector<8x96xf32>
    %cst_538 = arith.constant dense<0.000000e+00> : vector<8x96xf32>
    %1386 = tpu.matmul %1380, %1213, %cst_538 {dimension_numbers = #tpu.dot_dimension_numbers<[1], [0], [0], [1], [0, 0, 1, 1], [], []>} : vector<8x32xf32>, vector<32x96xf32>, vector<8x96xf32> -> vector<8x96xf32>
    %1387 = vector.extract_strided_slice %1385 {offsets = [0, 0], sizes = [8, 64], strides = [1, 1]} : vector<8x96xf32> to vector<8x64xf32>
    %1388 = vector.extract_strided_slice %1386 {offsets = [0, 0], sizes = [8, 64], strides = [1, 1]} : vector<8x96xf32> to vector<8x64xf32>
    %1389 = arith.addf %1387, %1388 : vector<8x64xf32>
    %1390 = arith.negf %1389 : vector<8x64xf32>
    %1391 = math.exp %1390 : vector<8x64xf32>
    %cst_539 = arith.constant 1.000000e+00 : f32
    %1392 = vector.broadcast %cst_539 : f32 to vector<8x64xf32>
    %1393 = arith.addf %1392, %1391 : vector<8x64xf32>
    %1394 = arith.divf %1392, %1393 : vector<8x64xf32>
    %1395 = vector.extract_strided_slice %1394 {offsets = [0, 0], sizes = [8, 32], strides = [1, 1]} : vector<8x64xf32> to vector<8x32xf32>
    %1396 = vector.extract_strided_slice %1394 {offsets = [0, 32], sizes = [8, 32], strides = [1, 1]} : vector<8x64xf32> to vector<8x32xf32>
    %1397 = vector.extract_strided_slice %1385 {offsets = [0, 64], sizes = [8, 32], strides = [1, 1]} : vector<8x96xf32> to vector<8x32xf32>
    %1398 = vector.extract_strided_slice %1386 {offsets = [0, 64], sizes = [8, 32], strides = [1, 1]} : vector<8x96xf32> to vector<8x32xf32>
    %1399 = vector.broadcast %1215 : vector<1x32xf32> to vector<8x32xf32>
    %1400 = arith.addf %1398, %1399 : vector<8x32xf32>
    %1401 = arith.mulf %1395, %1400 : vector<8x32xf32>
    %1402 = arith.addf %1397, %1401 : vector<8x32xf32>
    %1403 = math.tanh %1402 : vector<8x32xf32>
    %cst_540 = arith.constant 1.000000e+00 : f32
    %1404 = vector.broadcast %cst_540 : f32 to vector<8x32xf32>
    %1405 = arith.subf %1404, %1396 : vector<8x32xf32>
    %1406 = arith.mulf %1405, %1403 : vector<8x32xf32>
    %1407 = arith.mulf %1396, %1380 : vector<8x32xf32>
    %1408 = arith.addf %1406, %1407 : vector<8x32xf32>
    %c1_541 = arith.constant 1 : index
    %c0_542 = arith.constant 0 : index
    %c0_543 = arith.constant 0 : index
    %1409 = vector.load %arg37[%c1_541, %c0_542, %c0_543] : memref<8x8x32xf32, #tpu.memory_space<vmem>>, vector<1x8x32xf32>
    %1410 = vector.shape_cast %1409 : vector<1x8x32xf32> to vector<8x32xf32>
    %1411 = vector.shape_cast %1408 : vector<8x32xf32> to vector<1x8x32xf32>
    tpu.vector_store %arg37[%c1_541, %c0_542, %c0_543], %1411 {strides = array<i32>} : memref<8x8x32xf32, #tpu.memory_space<vmem>>, vector<1x8x32xf32>,
    %c3_544 = arith.constant 3 : index
    %c0_545 = arith.constant 0 : index
    %c0_546 = arith.constant 0 : index
    %c0_547 = arith.constant 0 : index
    %1412 = vector.load %arg35[%c3_544, %c0_545, %c0_546, %c0_547] : memref<4x8x8x96xf32, #tpu.memory_space<vmem>>, vector<1x1x8x96xf32>
    %1413 = vector.shape_cast %1412 : vector<1x1x8x96xf32> to vector<8x96xf32>
    %cst_548 = arith.constant dense<0.000000e+00> : vector<8x96xf32>
    %1414 = tpu.matmul %1408, %1213, %cst_548 {dimension_numbers = #tpu.dot_dimension_numbers<[1], [0], [0], [1], [0, 0, 1, 1], [], []>} : vector<8x32xf32>, vector<32x96xf32>, vector<8x96xf32> -> vector<8x96xf32>
    %1415 = vector.extract_strided_slice %1413 {offsets = [0, 0], sizes = [8, 64], strides = [1, 1]} : vector<8x96xf32> to vector<8x64xf32>
    %1416 = vector.extract_strided_slice %1414 {offsets = [0, 0], sizes = [8, 64], strides = [1, 1]} : vector<8x96xf32> to vector<8x64xf32>
    %1417 = arith.addf %1415, %1416 : vector<8x64xf32>
    %1418 = arith.negf %1417 : vector<8x64xf32>
    %1419 = math.exp %1418 : vector<8x64xf32>
    %cst_549 = arith.constant 1.000000e+00 : f32
    %1420 = vector.broadcast %cst_549 : f32 to vector<8x64xf32>
    %1421 = arith.addf %1420, %1419 : vector<8x64xf32>
    %1422 = arith.divf %1420, %1421 : vector<8x64xf32>
    %1423 = vector.extract_strided_slice %1422 {offsets = [0, 0], sizes = [8, 32], strides = [1, 1]} : vector<8x64xf32> to vector<8x32xf32>
    %1424 = vector.extract_strided_slice %1422 {offsets = [0, 32], sizes = [8, 32], strides = [1, 1]} : vector<8x64xf32> to vector<8x32xf32>
    %1425 = vector.extract_strided_slice %1413 {offsets = [0, 64], sizes = [8, 32], strides = [1, 1]} : vector<8x96xf32> to vector<8x32xf32>
    %1426 = vector.extract_strided_slice %1414 {offsets = [0, 64], sizes = [8, 32], strides = [1, 1]} : vector<8x96xf32> to vector<8x32xf32>
    %1427 = vector.broadcast %1215 : vector<1x32xf32> to vector<8x32xf32>
    %1428 = arith.addf %1426, %1427 : vector<8x32xf32>
    %1429 = arith.mulf %1423, %1428 : vector<8x32xf32>
    %1430 = arith.addf %1425, %1429 : vector<8x32xf32>
    %1431 = math.tanh %1430 : vector<8x32xf32>
    %cst_550 = arith.constant 1.000000e+00 : f32
    %1432 = vector.broadcast %cst_550 : f32 to vector<8x32xf32>
    %1433 = arith.subf %1432, %1424 : vector<8x32xf32>
    %1434 = arith.mulf %1433, %1431 : vector<8x32xf32>
    %1435 = arith.mulf %1424, %1408 : vector<8x32xf32>
    %1436 = arith.addf %1434, %1435 : vector<8x32xf32>
    %c0_551 = arith.constant 0 : index
    %c0_552 = arith.constant 0 : index
    %c0_553 = arith.constant 0 : index
    %1437 = vector.load %arg37[%c0_551, %c0_552, %c0_553] : memref<8x8x32xf32, #tpu.memory_space<vmem>>, vector<1x8x32xf32>
    %1438 = vector.shape_cast %1437 : vector<1x8x32xf32> to vector<8x32xf32>
    %1439 = vector.shape_cast %1436 : vector<8x32xf32> to vector<1x8x32xf32>
    tpu.vector_store %arg37[%c0_551, %c0_552, %c0_553], %1439 {strides = array<i32>} : memref<8x8x32xf32, #tpu.memory_space<vmem>>, vector<1x8x32xf32>,
    %c0_554 = arith.constant 0 : index
    %c0_555 = arith.constant 0 : index
    %c0_556 = arith.constant 0 : index
    %1440 = vector.load %arg36[%c0_554, %c0_555, %c0_556] : memref<8x8x32xf32, #tpu.memory_space<vmem>>, vector<8x8x32xf32>
    %1441 = vector.shape_cast %1440 : vector<8x8x32xf32> to vector<64x32xf32>
    %c0_557 = arith.constant 0 : index
    %c0_558 = arith.constant 0 : index
    %c0_559 = arith.constant 0 : index
    %1442 = vector.load %arg37[%c0_557, %c0_558, %c0_559] : memref<8x8x32xf32, #tpu.memory_space<vmem>>, vector<8x8x32xf32>
    %1443 = vector.shape_cast %1442 : vector<8x8x32xf32> to vector<64x32xf32>
    %1444 = tpu.concatenate %1441, %1443 in 1 : vector<64x32xf32>, vector<64x32xf32> -> vector<64x64xf32>
    %c0_560 = arith.constant 0 : index
    %c0_561 = arith.constant 0 : index
    %c0_562 = arith.constant 0 : index
    %1445 = vector.load %arg25[%c0_560, %c0_561, %c0_562] : memref<1x64x96xf32, #tpu.memory_space<vmem>>, vector<1x64x96xf32>
    %1446 = vector.shape_cast %1445 : vector<1x64x96xf32> to vector<64x96xf32>
    %cst_563 = arith.constant dense<0.000000e+00> : vector<64x96xf32>
    %1447 = tpu.matmul %1444, %1446, %cst_563 {dimension_numbers = #tpu.dot_dimension_numbers<[1], [0], [0], [1], [0, 0, 1, 1], [], []>} : vector<64x64xf32>, vector<64x96xf32>, vector<64x96xf32> -> vector<64x96xf32>
    %c0_564 = arith.constant 0 : index
    %c0_565 = arith.constant 0 : index
    %c0_566 = arith.constant 0 : index
    %1448 = vector.load %arg26[%c0_564, %c0_565, %c0_566] : memref<1x1x96xf32, #tpu.memory_space<vmem>>, vector<1x1x96xf32>
    %1449 = vector.shape_cast %1448 : vector<1x1x96xf32> to vector<1x96xf32>
    %1450 = vector.broadcast %1449 : vector<1x96xf32> to vector<64x96xf32>
    %1451 = arith.addf %1447, %1450 : vector<64x96xf32>
    %1452 = vector.shape_cast %1451 : vector<64x96xf32> to vector<8x8x96xf32>
    %c0_567 = arith.constant 0 : index
    %c0_568 = arith.constant 0 : index
    %c0_569 = arith.constant 0 : index
    %1453 = vector.load %arg38[%c0_567, %c0_568, %c0_569] : memref<8x8x96xf32, #tpu.memory_space<vmem>>, vector<8x8x96xf32>
    tpu.vector_store %arg38[%c0_567, %c0_568, %c0_569], %1452 {strides = array<i32>} : memref<8x8x96xf32, #tpu.memory_space<vmem>>, vector<8x8x96xf32>,
    %c0_570 = arith.constant 0 : index
    %c0_571 = arith.constant 0 : index
    %c0_572 = arith.constant 0 : index
    %1454 = vector.load %arg27[%c0_570, %c0_571, %c0_572] : memref<1x64x96xf32, #tpu.memory_space<vmem>>, vector<1x64x96xf32>
    %1455 = vector.shape_cast %1454 : vector<1x64x96xf32> to vector<64x96xf32>
    %cst_573 = arith.constant dense<0.000000e+00> : vector<64x96xf32>
    %1456 = tpu.matmul %1444, %1455, %cst_573 {dimension_numbers = #tpu.dot_dimension_numbers<[1], [0], [0], [1], [0, 0, 1, 1], [], []>} : vector<64x64xf32>, vector<64x96xf32>, vector<64x96xf32> -> vector<64x96xf32>
    %c0_574 = arith.constant 0 : index
    %c0_575 = arith.constant 0 : index
    %c0_576 = arith.constant 0 : index
    %1457 = vector.load %arg28[%c0_574, %c0_575, %c0_576] : memref<1x1x96xf32, #tpu.memory_space<vmem>>, vector<1x1x96xf32>
    %1458 = vector.shape_cast %1457 : vector<1x1x96xf32> to vector<1x96xf32>
    %1459 = vector.broadcast %1458 : vector<1x96xf32> to vector<64x96xf32>
    %1460 = arith.addf %1456, %1459 : vector<64x96xf32>
    %1461 = vector.shape_cast %1460 : vector<64x96xf32> to vector<8x8x96xf32>
    %c0_577 = arith.constant 0 : index
    %c0_578 = arith.constant 0 : index
    %c0_579 = arith.constant 0 : index
    %1462 = vector.load %arg39[%c0_577, %c0_578, %c0_579] : memref<8x8x96xf32, #tpu.memory_space<vmem>>, vector<8x8x96xf32>
    tpu.vector_store %arg39[%c0_577, %c0_578, %c0_579], %1461 {strides = array<i32>} : memref<8x8x96xf32, #tpu.memory_space<vmem>>, vector<8x8x96xf32>,
    %c1_580 = arith.constant 1 : index
    %c0_581 = arith.constant 0 : index
    %c0_582 = arith.constant 0 : index
    %1463 = vector.load %arg21[%c1_580, %c0_581, %c0_582] : memref<2x32x96xf32, #tpu.memory_space<vmem>>, vector<1x32x96xf32>
    %1464 = vector.shape_cast %1463 : vector<1x32x96xf32> to vector<32x96xf32>
    %c1_583 = arith.constant 1 : index
    %c0_584 = arith.constant 0 : index
    %c0_585 = arith.constant 0 : index
    %1465 = vector.load %arg22[%c1_583, %c0_584, %c0_585] : memref<2x1x32xf32, #tpu.memory_space<vmem>>, vector<1x1x32xf32>
    %1466 = vector.shape_cast %1465 : vector<1x1x32xf32> to vector<1x32xf32>
    %c0_586 = arith.constant 0 : index
    %c0_587 = arith.constant 0 : index
    %c0_588 = arith.constant 0 : index
    %1467 = vector.load %arg38[%c0_586, %c0_587, %c0_588] : memref<8x8x96xf32, #tpu.memory_space<vmem>>, vector<1x8x96xf32>
    %1468 = vector.shape_cast %1467 : vector<1x8x96xf32> to vector<8x96xf32>
    %cst_589 = arith.constant dense<0.000000e+00> : vector<8x96xf32>
    %1469 = tpu.matmul %26, %1464, %cst_589 {dimension_numbers = #tpu.dot_dimension_numbers<[1], [0], [0], [1], [0, 0, 1, 1], [], []>} : vector<8x32xf32>, vector<32x96xf32>, vector<8x96xf32> -> vector<8x96xf32>
    %1470 = vector.extract_strided_slice %1468 {offsets = [0, 0], sizes = [8, 64], strides = [1, 1]} : vector<8x96xf32> to vector<8x64xf32>
    %1471 = vector.extract_strided_slice %1469 {offsets = [0, 0], sizes = [8, 64], strides = [1, 1]} : vector<8x96xf32> to vector<8x64xf32>
    %1472 = arith.addf %1470, %1471 : vector<8x64xf32>
    %1473 = arith.negf %1472 : vector<8x64xf32>
    %1474 = math.exp %1473 : vector<8x64xf32>
    %cst_590 = arith.constant 1.000000e+00 : f32
    %1475 = vector.broadcast %cst_590 : f32 to vector<8x64xf32>
    %1476 = arith.addf %1475, %1474 : vector<8x64xf32>
    %1477 = arith.divf %1475, %1476 : vector<8x64xf32>
    %1478 = vector.extract_strided_slice %1477 {offsets = [0, 0], sizes = [8, 32], strides = [1, 1]} : vector<8x64xf32> to vector<8x32xf32>
    %1479 = vector.extract_strided_slice %1477 {offsets = [0, 32], sizes = [8, 32], strides = [1, 1]} : vector<8x64xf32> to vector<8x32xf32>
    %1480 = vector.extract_strided_slice %1468 {offsets = [0, 64], sizes = [8, 32], strides = [1, 1]} : vector<8x96xf32> to vector<8x32xf32>
    %1481 = vector.extract_strided_slice %1469 {offsets = [0, 64], sizes = [8, 32], strides = [1, 1]} : vector<8x96xf32> to vector<8x32xf32>
    %1482 = vector.broadcast %1466 : vector<1x32xf32> to vector<8x32xf32>
    %1483 = arith.addf %1481, %1482 : vector<8x32xf32>
    %1484 = arith.mulf %1478, %1483 : vector<8x32xf32>
    %1485 = arith.addf %1480, %1484 : vector<8x32xf32>
    %1486 = math.tanh %1485 : vector<8x32xf32>
    %cst_591 = arith.constant 1.000000e+00 : f32
    %1487 = vector.broadcast %cst_591 : f32 to vector<8x32xf32>
    %1488 = arith.subf %1487, %1479 : vector<8x32xf32>
    %1489 = arith.mulf %1488, %1486 : vector<8x32xf32>
    %1490 = arith.mulf %1479, %26 : vector<8x32xf32>
    %1491 = arith.addf %1489, %1490 : vector<8x32xf32>
    %c1_592 = arith.constant 1 : index
    %c0_593 = arith.constant 0 : index
    %c0_594 = arith.constant 0 : index
    %1492 = vector.load %arg38[%c1_592, %c0_593, %c0_594] : memref<8x8x96xf32, #tpu.memory_space<vmem>>, vector<1x8x96xf32>
    %1493 = vector.shape_cast %1492 : vector<1x8x96xf32> to vector<8x96xf32>
    %cst_595 = arith.constant dense<0.000000e+00> : vector<8x96xf32>
    %1494 = tpu.matmul %1491, %1464, %cst_595 {dimension_numbers = #tpu.dot_dimension_numbers<[1], [0], [0], [1], [0, 0, 1, 1], [], []>} : vector<8x32xf32>, vector<32x96xf32>, vector<8x96xf32> -> vector<8x96xf32>
    %1495 = vector.extract_strided_slice %1493 {offsets = [0, 0], sizes = [8, 64], strides = [1, 1]} : vector<8x96xf32> to vector<8x64xf32>
    %1496 = vector.extract_strided_slice %1494 {offsets = [0, 0], sizes = [8, 64], strides = [1, 1]} : vector<8x96xf32> to vector<8x64xf32>
    %1497 = arith.addf %1495, %1496 : vector<8x64xf32>
    %1498 = arith.negf %1497 : vector<8x64xf32>
    %1499 = math.exp %1498 : vector<8x64xf32>
    %cst_596 = arith.constant 1.000000e+00 : f32
    %1500 = vector.broadcast %cst_596 : f32 to vector<8x64xf32>
    %1501 = arith.addf %1500, %1499 : vector<8x64xf32>
    %1502 = arith.divf %1500, %1501 : vector<8x64xf32>
    %1503 = vector.extract_strided_slice %1502 {offsets = [0, 0], sizes = [8, 32], strides = [1, 1]} : vector<8x64xf32> to vector<8x32xf32>
    %1504 = vector.extract_strided_slice %1502 {offsets = [0, 32], sizes = [8, 32], strides = [1, 1]} : vector<8x64xf32> to vector<8x32xf32>
    %1505 = vector.extract_strided_slice %1493 {offsets = [0, 64], sizes = [8, 32], strides = [1, 1]} : vector<8x96xf32> to vector<8x32xf32>
    %1506 = vector.extract_strided_slice %1494 {offsets = [0, 64], sizes = [8, 32], strides = [1, 1]} : vector<8x96xf32> to vector<8x32xf32>
    %1507 = vector.broadcast %1466 : vector<1x32xf32> to vector<8x32xf32>
    %1508 = arith.addf %1506, %1507 : vector<8x32xf32>
    %1509 = arith.mulf %1503, %1508 : vector<8x32xf32>
    %1510 = arith.addf %1505, %1509 : vector<8x32xf32>
    %1511 = math.tanh %1510 : vector<8x32xf32>
    %cst_597 = arith.constant 1.000000e+00 : f32
    %1512 = vector.broadcast %cst_597 : f32 to vector<8x32xf32>
    %1513 = arith.subf %1512, %1504 : vector<8x32xf32>
    %1514 = arith.mulf %1513, %1511 : vector<8x32xf32>
    %1515 = arith.mulf %1504, %1491 : vector<8x32xf32>
    %1516 = arith.addf %1514, %1515 : vector<8x32xf32>
    %c2_598 = arith.constant 2 : index
    %c0_599 = arith.constant 0 : index
    %c0_600 = arith.constant 0 : index
    %1517 = vector.load %arg38[%c2_598, %c0_599, %c0_600] : memref<8x8x96xf32, #tpu.memory_space<vmem>>, vector<1x8x96xf32>
    %1518 = vector.shape_cast %1517 : vector<1x8x96xf32> to vector<8x96xf32>
    %cst_601 = arith.constant dense<0.000000e+00> : vector<8x96xf32>
    %1519 = tpu.matmul %1516, %1464, %cst_601 {dimension_numbers = #tpu.dot_dimension_numbers<[1], [0], [0], [1], [0, 0, 1, 1], [], []>} : vector<8x32xf32>, vector<32x96xf32>, vector<8x96xf32> -> vector<8x96xf32>
    %1520 = vector.extract_strided_slice %1518 {offsets = [0, 0], sizes = [8, 64], strides = [1, 1]} : vector<8x96xf32> to vector<8x64xf32>
    %1521 = vector.extract_strided_slice %1519 {offsets = [0, 0], sizes = [8, 64], strides = [1, 1]} : vector<8x96xf32> to vector<8x64xf32>
    %1522 = arith.addf %1520, %1521 : vector<8x64xf32>
    %1523 = arith.negf %1522 : vector<8x64xf32>
    %1524 = math.exp %1523 : vector<8x64xf32>
    %cst_602 = arith.constant 1.000000e+00 : f32
    %1525 = vector.broadcast %cst_602 : f32 to vector<8x64xf32>
    %1526 = arith.addf %1525, %1524 : vector<8x64xf32>
    %1527 = arith.divf %1525, %1526 : vector<8x64xf32>
    %1528 = vector.extract_strided_slice %1527 {offsets = [0, 0], sizes = [8, 32], strides = [1, 1]} : vector<8x64xf32> to vector<8x32xf32>
    %1529 = vector.extract_strided_slice %1527 {offsets = [0, 32], sizes = [8, 32], strides = [1, 1]} : vector<8x64xf32> to vector<8x32xf32>
    %1530 = vector.extract_strided_slice %1518 {offsets = [0, 64], sizes = [8, 32], strides = [1, 1]} : vector<8x96xf32> to vector<8x32xf32>
    %1531 = vector.extract_strided_slice %1519 {offsets = [0, 64], sizes = [8, 32], strides = [1, 1]} : vector<8x96xf32> to vector<8x32xf32>
    %1532 = vector.broadcast %1466 : vector<1x32xf32> to vector<8x32xf32>
    %1533 = arith.addf %1531, %1532 : vector<8x32xf32>
    %1534 = arith.mulf %1528, %1533 : vector<8x32xf32>
    %1535 = arith.addf %1530, %1534 : vector<8x32xf32>
    %1536 = math.tanh %1535 : vector<8x32xf32>
    %cst_603 = arith.constant 1.000000e+00 : f32
    %1537 = vector.broadcast %cst_603 : f32 to vector<8x32xf32>
    %1538 = arith.subf %1537, %1529 : vector<8x32xf32>
    %1539 = arith.mulf %1538, %1536 : vector<8x32xf32>
    %1540 = arith.mulf %1529, %1516 : vector<8x32xf32>
    %1541 = arith.addf %1539, %1540 : vector<8x32xf32>
    %c3_604 = arith.constant 3 : index
    %c0_605 = arith.constant 0 : index
    %c0_606 = arith.constant 0 : index
    %1542 = vector.load %arg38[%c3_604, %c0_605, %c0_606] : memref<8x8x96xf32, #tpu.memory_space<vmem>>, vector<1x8x96xf32>
    %1543 = vector.shape_cast %1542 : vector<1x8x96xf32> to vector<8x96xf32>
    %cst_607 = arith.constant dense<0.000000e+00> : vector<8x96xf32>
    %1544 = tpu.matmul %1541, %1464, %cst_607 {dimension_numbers = #tpu.dot_dimension_numbers<[1], [0], [0], [1], [0, 0, 1, 1], [], []>} : vector<8x32xf32>, vector<32x96xf32>, vector<8x96xf32> -> vector<8x96xf32>
    %1545 = vector.extract_strided_slice %1543 {offsets = [0, 0], sizes = [8, 64], strides = [1, 1]} : vector<8x96xf32> to vector<8x64xf32>
    %1546 = vector.extract_strided_slice %1544 {offsets = [0, 0], sizes = [8, 64], strides = [1, 1]} : vector<8x96xf32> to vector<8x64xf32>
    %1547 = arith.addf %1545, %1546 : vector<8x64xf32>
    %1548 = arith.negf %1547 : vector<8x64xf32>
    %1549 = math.exp %1548 : vector<8x64xf32>
    %cst_608 = arith.constant 1.000000e+00 : f32
    %1550 = vector.broadcast %cst_608 : f32 to vector<8x64xf32>
    %1551 = arith.addf %1550, %1549 : vector<8x64xf32>
    %1552 = arith.divf %1550, %1551 : vector<8x64xf32>
    %1553 = vector.extract_strided_slice %1552 {offsets = [0, 0], sizes = [8, 32], strides = [1, 1]} : vector<8x64xf32> to vector<8x32xf32>
    %1554 = vector.extract_strided_slice %1552 {offsets = [0, 32], sizes = [8, 32], strides = [1, 1]} : vector<8x64xf32> to vector<8x32xf32>
    %1555 = vector.extract_strided_slice %1543 {offsets = [0, 64], sizes = [8, 32], strides = [1, 1]} : vector<8x96xf32> to vector<8x32xf32>
    %1556 = vector.extract_strided_slice %1544 {offsets = [0, 64], sizes = [8, 32], strides = [1, 1]} : vector<8x96xf32> to vector<8x32xf32>
    %1557 = vector.broadcast %1466 : vector<1x32xf32> to vector<8x32xf32>
    %1558 = arith.addf %1556, %1557 : vector<8x32xf32>
    %1559 = arith.mulf %1553, %1558 : vector<8x32xf32>
    %1560 = arith.addf %1555, %1559 : vector<8x32xf32>
    %1561 = math.tanh %1560 : vector<8x32xf32>
    %cst_609 = arith.constant 1.000000e+00 : f32
    %1562 = vector.broadcast %cst_609 : f32 to vector<8x32xf32>
    %1563 = arith.subf %1562, %1554 : vector<8x32xf32>
    %1564 = arith.mulf %1563, %1561 : vector<8x32xf32>
    %1565 = arith.mulf %1554, %1541 : vector<8x32xf32>
    %1566 = arith.addf %1564, %1565 : vector<8x32xf32>
    %c4_610 = arith.constant 4 : index
    %c0_611 = arith.constant 0 : index
    %c0_612 = arith.constant 0 : index
    %1567 = vector.load %arg38[%c4_610, %c0_611, %c0_612] : memref<8x8x96xf32, #tpu.memory_space<vmem>>, vector<1x8x96xf32>
    %1568 = vector.shape_cast %1567 : vector<1x8x96xf32> to vector<8x96xf32>
    %cst_613 = arith.constant dense<0.000000e+00> : vector<8x96xf32>
    %1569 = tpu.matmul %1566, %1464, %cst_613 {dimension_numbers = #tpu.dot_dimension_numbers<[1], [0], [0], [1], [0, 0, 1, 1], [], []>} : vector<8x32xf32>, vector<32x96xf32>, vector<8x96xf32> -> vector<8x96xf32>
    %1570 = vector.extract_strided_slice %1568 {offsets = [0, 0], sizes = [8, 64], strides = [1, 1]} : vector<8x96xf32> to vector<8x64xf32>
    %1571 = vector.extract_strided_slice %1569 {offsets = [0, 0], sizes = [8, 64], strides = [1, 1]} : vector<8x96xf32> to vector<8x64xf32>
    %1572 = arith.addf %1570, %1571 : vector<8x64xf32>
    %1573 = arith.negf %1572 : vector<8x64xf32>
    %1574 = math.exp %1573 : vector<8x64xf32>
    %cst_614 = arith.constant 1.000000e+00 : f32
    %1575 = vector.broadcast %cst_614 : f32 to vector<8x64xf32>
    %1576 = arith.addf %1575, %1574 : vector<8x64xf32>
    %1577 = arith.divf %1575, %1576 : vector<8x64xf32>
    %1578 = vector.extract_strided_slice %1577 {offsets = [0, 0], sizes = [8, 32], strides = [1, 1]} : vector<8x64xf32> to vector<8x32xf32>
    %1579 = vector.extract_strided_slice %1577 {offsets = [0, 32], sizes = [8, 32], strides = [1, 1]} : vector<8x64xf32> to vector<8x32xf32>
    %1580 = vector.extract_strided_slice %1568 {offsets = [0, 64], sizes = [8, 32], strides = [1, 1]} : vector<8x96xf32> to vector<8x32xf32>
    %1581 = vector.extract_strided_slice %1569 {offsets = [0, 64], sizes = [8, 32], strides = [1, 1]} : vector<8x96xf32> to vector<8x32xf32>
    %1582 = vector.broadcast %1466 : vector<1x32xf32> to vector<8x32xf32>
    %1583 = arith.addf %1581, %1582 : vector<8x32xf32>
    %1584 = arith.mulf %1578, %1583 : vector<8x32xf32>
    %1585 = arith.addf %1580, %1584 : vector<8x32xf32>
    %1586 = math.tanh %1585 : vector<8x32xf32>
    %cst_615 = arith.constant 1.000000e+00 : f32
    %1587 = vector.broadcast %cst_615 : f32 to vector<8x32xf32>
    %1588 = arith.subf %1587, %1579 : vector<8x32xf32>
    %1589 = arith.mulf %1588, %1586 : vector<8x32xf32>
    %1590 = arith.mulf %1579, %1566 : vector<8x32xf32>
    %1591 = arith.addf %1589, %1590 : vector<8x32xf32>
    %c5_616 = arith.constant 5 : index
    %c0_617 = arith.constant 0 : index
    %c0_618 = arith.constant 0 : index
    %1592 = vector.load %arg38[%c5_616, %c0_617, %c0_618] : memref<8x8x96xf32, #tpu.memory_space<vmem>>, vector<1x8x96xf32>
    %1593 = vector.shape_cast %1592 : vector<1x8x96xf32> to vector<8x96xf32>
    %cst_619 = arith.constant dense<0.000000e+00> : vector<8x96xf32>
    %1594 = tpu.matmul %1591, %1464, %cst_619 {dimension_numbers = #tpu.dot_dimension_numbers<[1], [0], [0], [1], [0, 0, 1, 1], [], []>} : vector<8x32xf32>, vector<32x96xf32>, vector<8x96xf32> -> vector<8x96xf32>
    %1595 = vector.extract_strided_slice %1593 {offsets = [0, 0], sizes = [8, 64], strides = [1, 1]} : vector<8x96xf32> to vector<8x64xf32>
    %1596 = vector.extract_strided_slice %1594 {offsets = [0, 0], sizes = [8, 64], strides = [1, 1]} : vector<8x96xf32> to vector<8x64xf32>
    %1597 = arith.addf %1595, %1596 : vector<8x64xf32>
    %1598 = arith.negf %1597 : vector<8x64xf32>
    %1599 = math.exp %1598 : vector<8x64xf32>
    %cst_620 = arith.constant 1.000000e+00 : f32
    %1600 = vector.broadcast %cst_620 : f32 to vector<8x64xf32>
    %1601 = arith.addf %1600, %1599 : vector<8x64xf32>
    %1602 = arith.divf %1600, %1601 : vector<8x64xf32>
    %1603 = vector.extract_strided_slice %1602 {offsets = [0, 0], sizes = [8, 32], strides = [1, 1]} : vector<8x64xf32> to vector<8x32xf32>
    %1604 = vector.extract_strided_slice %1602 {offsets = [0, 32], sizes = [8, 32], strides = [1, 1]} : vector<8x64xf32> to vector<8x32xf32>
    %1605 = vector.extract_strided_slice %1593 {offsets = [0, 64], sizes = [8, 32], strides = [1, 1]} : vector<8x96xf32> to vector<8x32xf32>
    %1606 = vector.extract_strided_slice %1594 {offsets = [0, 64], sizes = [8, 32], strides = [1, 1]} : vector<8x96xf32> to vector<8x32xf32>
    %1607 = vector.broadcast %1466 : vector<1x32xf32> to vector<8x32xf32>
    %1608 = arith.addf %1606, %1607 : vector<8x32xf32>
    %1609 = arith.mulf %1603, %1608 : vector<8x32xf32>
    %1610 = arith.addf %1605, %1609 : vector<8x32xf32>
    %1611 = math.tanh %1610 : vector<8x32xf32>
    %cst_621 = arith.constant 1.000000e+00 : f32
    %1612 = vector.broadcast %cst_621 : f32 to vector<8x32xf32>
    %1613 = arith.subf %1612, %1604 : vector<8x32xf32>
    %1614 = arith.mulf %1613, %1611 : vector<8x32xf32>
    %1615 = arith.mulf %1604, %1591 : vector<8x32xf32>
    %1616 = arith.addf %1614, %1615 : vector<8x32xf32>
    %c6_622 = arith.constant 6 : index
    %c0_623 = arith.constant 0 : index
    %c0_624 = arith.constant 0 : index
    %1617 = vector.load %arg38[%c6_622, %c0_623, %c0_624] : memref<8x8x96xf32, #tpu.memory_space<vmem>>, vector<1x8x96xf32>
    %1618 = vector.shape_cast %1617 : vector<1x8x96xf32> to vector<8x96xf32>
    %cst_625 = arith.constant dense<0.000000e+00> : vector<8x96xf32>
    %1619 = tpu.matmul %1616, %1464, %cst_625 {dimension_numbers = #tpu.dot_dimension_numbers<[1], [0], [0], [1], [0, 0, 1, 1], [], []>} : vector<8x32xf32>, vector<32x96xf32>, vector<8x96xf32> -> vector<8x96xf32>
    %1620 = vector.extract_strided_slice %1618 {offsets = [0, 0], sizes = [8, 64], strides = [1, 1]} : vector<8x96xf32> to vector<8x64xf32>
    %1621 = vector.extract_strided_slice %1619 {offsets = [0, 0], sizes = [8, 64], strides = [1, 1]} : vector<8x96xf32> to vector<8x64xf32>
    %1622 = arith.addf %1620, %1621 : vector<8x64xf32>
    %1623 = arith.negf %1622 : vector<8x64xf32>
    %1624 = math.exp %1623 : vector<8x64xf32>
    %cst_626 = arith.constant 1.000000e+00 : f32
    %1625 = vector.broadcast %cst_626 : f32 to vector<8x64xf32>
    %1626 = arith.addf %1625, %1624 : vector<8x64xf32>
    %1627 = arith.divf %1625, %1626 : vector<8x64xf32>
    %1628 = vector.extract_strided_slice %1627 {offsets = [0, 0], sizes = [8, 32], strides = [1, 1]} : vector<8x64xf32> to vector<8x32xf32>
    %1629 = vector.extract_strided_slice %1627 {offsets = [0, 32], sizes = [8, 32], strides = [1, 1]} : vector<8x64xf32> to vector<8x32xf32>
    %1630 = vector.extract_strided_slice %1618 {offsets = [0, 64], sizes = [8, 32], strides = [1, 1]} : vector<8x96xf32> to vector<8x32xf32>
    %1631 = vector.extract_strided_slice %1619 {offsets = [0, 64], sizes = [8, 32], strides = [1, 1]} : vector<8x96xf32> to vector<8x32xf32>
    %1632 = vector.broadcast %1466 : vector<1x32xf32> to vector<8x32xf32>
    %1633 = arith.addf %1631, %1632 : vector<8x32xf32>
    %1634 = arith.mulf %1628, %1633 : vector<8x32xf32>
    %1635 = arith.addf %1630, %1634 : vector<8x32xf32>
    %1636 = math.tanh %1635 : vector<8x32xf32>
    %cst_627 = arith.constant 1.000000e+00 : f32
    %1637 = vector.broadcast %cst_627 : f32 to vector<8x32xf32>
    %1638 = arith.subf %1637, %1629 : vector<8x32xf32>
    %1639 = arith.mulf %1638, %1636 : vector<8x32xf32>
    %1640 = arith.mulf %1629, %1616 : vector<8x32xf32>
    %1641 = arith.addf %1639, %1640 : vector<8x32xf32>
    %c7_628 = arith.constant 7 : index
    %c0_629 = arith.constant 0 : index
    %c0_630 = arith.constant 0 : index
    %1642 = vector.load %arg38[%c7_628, %c0_629, %c0_630] : memref<8x8x96xf32, #tpu.memory_space<vmem>>, vector<1x8x96xf32>
    %1643 = vector.shape_cast %1642 : vector<1x8x96xf32> to vector<8x96xf32>
    %cst_631 = arith.constant dense<0.000000e+00> : vector<8x96xf32>
    %1644 = tpu.matmul %1641, %1464, %cst_631 {dimension_numbers = #tpu.dot_dimension_numbers<[1], [0], [0], [1], [0, 0, 1, 1], [], []>} : vector<8x32xf32>, vector<32x96xf32>, vector<8x96xf32> -> vector<8x96xf32>
    %1645 = vector.extract_strided_slice %1643 {offsets = [0, 0], sizes = [8, 64], strides = [1, 1]} : vector<8x96xf32> to vector<8x64xf32>
    %1646 = vector.extract_strided_slice %1644 {offsets = [0, 0], sizes = [8, 64], strides = [1, 1]} : vector<8x96xf32> to vector<8x64xf32>
    %1647 = arith.addf %1645, %1646 : vector<8x64xf32>
    %1648 = arith.negf %1647 : vector<8x64xf32>
    %1649 = math.exp %1648 : vector<8x64xf32>
    %cst_632 = arith.constant 1.000000e+00 : f32
    %1650 = vector.broadcast %cst_632 : f32 to vector<8x64xf32>
    %1651 = arith.addf %1650, %1649 : vector<8x64xf32>
    %1652 = arith.divf %1650, %1651 : vector<8x64xf32>
    %1653 = vector.extract_strided_slice %1652 {offsets = [0, 0], sizes = [8, 32], strides = [1, 1]} : vector<8x64xf32> to vector<8x32xf32>
    %1654 = vector.extract_strided_slice %1652 {offsets = [0, 32], sizes = [8, 32], strides = [1, 1]} : vector<8x64xf32> to vector<8x32xf32>
    %1655 = vector.extract_strided_slice %1643 {offsets = [0, 64], sizes = [8, 32], strides = [1, 1]} : vector<8x96xf32> to vector<8x32xf32>
    %1656 = vector.extract_strided_slice %1644 {offsets = [0, 64], sizes = [8, 32], strides = [1, 1]} : vector<8x96xf32> to vector<8x32xf32>
    %1657 = vector.broadcast %1466 : vector<1x32xf32> to vector<8x32xf32>
    %1658 = arith.addf %1656, %1657 : vector<8x32xf32>
    %1659 = arith.mulf %1653, %1658 : vector<8x32xf32>
    %1660 = arith.addf %1655, %1659 : vector<8x32xf32>
    %1661 = math.tanh %1660 : vector<8x32xf32>
    %cst_633 = arith.constant 1.000000e+00 : f32
    %1662 = vector.broadcast %cst_633 : f32 to vector<8x32xf32>
    %1663 = arith.subf %1662, %1654 : vector<8x32xf32>
    %1664 = arith.mulf %1663, %1661 : vector<8x32xf32>
    %1665 = arith.mulf %1654, %1641 : vector<8x32xf32>
    %1666 = arith.addf %1664, %1665 : vector<8x32xf32>
    %c7_634 = arith.constant 7 : index
    %c0_635 = arith.constant 0 : index
    %c0_636 = arith.constant 0 : index
    %1667 = vector.load %arg39[%c7_634, %c0_635, %c0_636] : memref<8x8x96xf32, #tpu.memory_space<vmem>>, vector<1x8x96xf32>
    %1668 = vector.shape_cast %1667 : vector<1x8x96xf32> to vector<8x96xf32>
    %c1_637 = arith.constant 1 : index
    %c0_638 = arith.constant 0 : index
    %c0_639 = arith.constant 0 : index
    %1669 = vector.load %arg23[%c1_637, %c0_638, %c0_639] : memref<2x32x96xf32, #tpu.memory_space<vmem>>, vector<1x32x96xf32>
    %1670 = vector.shape_cast %1669 : vector<1x32x96xf32> to vector<32x96xf32>
    %c1_640 = arith.constant 1 : index
    %c0_641 = arith.constant 0 : index
    %c0_642 = arith.constant 0 : index
    %1671 = vector.load %arg24[%c1_640, %c0_641, %c0_642] : memref<2x1x32xf32, #tpu.memory_space<vmem>>, vector<1x1x32xf32>
    %1672 = vector.shape_cast %1671 : vector<1x1x32xf32> to vector<1x32xf32>
    %cst_643 = arith.constant dense<0.000000e+00> : vector<8x96xf32>
    %1673 = tpu.matmul %26, %1670, %cst_643 {dimension_numbers = #tpu.dot_dimension_numbers<[1], [0], [0], [1], [0, 0, 1, 1], [], []>} : vector<8x32xf32>, vector<32x96xf32>, vector<8x96xf32> -> vector<8x96xf32>
    %1674 = vector.extract_strided_slice %1668 {offsets = [0, 0], sizes = [8, 64], strides = [1, 1]} : vector<8x96xf32> to vector<8x64xf32>
    %1675 = vector.extract_strided_slice %1673 {offsets = [0, 0], sizes = [8, 64], strides = [1, 1]} : vector<8x96xf32> to vector<8x64xf32>
    %1676 = arith.addf %1674, %1675 : vector<8x64xf32>
    %1677 = arith.negf %1676 : vector<8x64xf32>
    %1678 = math.exp %1677 : vector<8x64xf32>
    %cst_644 = arith.constant 1.000000e+00 : f32
    %1679 = vector.broadcast %cst_644 : f32 to vector<8x64xf32>
    %1680 = arith.addf %1679, %1678 : vector<8x64xf32>
    %1681 = arith.divf %1679, %1680 : vector<8x64xf32>
    %1682 = vector.extract_strided_slice %1681 {offsets = [0, 0], sizes = [8, 32], strides = [1, 1]} : vector<8x64xf32> to vector<8x32xf32>
    %1683 = vector.extract_strided_slice %1681 {offsets = [0, 32], sizes = [8, 32], strides = [1, 1]} : vector<8x64xf32> to vector<8x32xf32>
    %1684 = vector.extract_strided_slice %1668 {offsets = [0, 64], sizes = [8, 32], strides = [1, 1]} : vector<8x96xf32> to vector<8x32xf32>
    %1685 = vector.extract_strided_slice %1673 {offsets = [0, 64], sizes = [8, 32], strides = [1, 1]} : vector<8x96xf32> to vector<8x32xf32>
    %1686 = vector.broadcast %1672 : vector<1x32xf32> to vector<8x32xf32>
    %1687 = arith.addf %1685, %1686 : vector<8x32xf32>
    %1688 = arith.mulf %1682, %1687 : vector<8x32xf32>
    %1689 = arith.addf %1684, %1688 : vector<8x32xf32>
    %1690 = math.tanh %1689 : vector<8x32xf32>
    %cst_645 = arith.constant 1.000000e+00 : f32
    %1691 = vector.broadcast %cst_645 : f32 to vector<8x32xf32>
    %1692 = arith.subf %1691, %1683 : vector<8x32xf32>
    %1693 = arith.mulf %1692, %1690 : vector<8x32xf32>
    %1694 = arith.mulf %1683, %26 : vector<8x32xf32>
    %1695 = arith.addf %1693, %1694 : vector<8x32xf32>
    %1696 = tpu.concatenate %1666, %1695 in 1 : vector<8x32xf32>, vector<8x32xf32> -> vector<8x64xf32>
    %c0_646 = arith.constant 0 : index
    %c0_647 = arith.constant 0 : index
    %1697 = vector.load %arg29[%c0_646, %c0_647] : memref<64x128xf32, #tpu.memory_space<vmem>>, vector<64x128xf32>
    %cst_648 = arith.constant dense<0.000000e+00> : vector<8x128xf32>
    %1698 = tpu.matmul %1696, %1697, %cst_648 {dimension_numbers = #tpu.dot_dimension_numbers<[1], [0], [0], [1], [0, 0, 1, 1], [], []>} : vector<8x64xf32>, vector<64x128xf32>, vector<8x128xf32> -> vector<8x128xf32>
    %c0_649 = arith.constant 0 : index
    %c0_650 = arith.constant 0 : index
    %1699 = vector.load %arg30[%c0_649, %c0_650] : memref<1x128xf32, #tpu.memory_space<vmem>>, vector<1x128xf32>
    %1700 = vector.broadcast %1699 : vector<1x128xf32> to vector<8x128xf32>
    %1701 = arith.addf %1698, %1700 : vector<8x128xf32>
    %cst_651 = arith.constant dense<0xFF800000> : vector<8xf32>
    %1702 = vector.multi_reduction <maximumf>, %1701, %cst_651 [1] : vector<8x128xf32> to vector<8xf32>
    %1703 = vector.shape_cast %1702 : vector<8xf32> to vector<8x1xf32>
    %1704 = vector.broadcast %1703 : vector<8x1xf32> to vector<8x128xf32>
    %1705 = arith.subf %1701, %1704 : vector<8x128xf32>
    %1706 = math.exp %1705 : vector<8x128xf32>
    %cst_652 = arith.constant dense<0.000000e+00> : vector<8xf32>
    %1707 = vector.multi_reduction <add>, %1706, %cst_652 [1] : vector<8x128xf32> to vector<8xf32>
    %1708 = vector.shape_cast %1707 : vector<8xf32> to vector<8x1xf32>
    %1709 = math.log %1708 : vector<8x1xf32>
    %1710 = vector.broadcast %1709 : vector<8x1xf32> to vector<8x128xf32>
    %1711 = arith.subf %1705, %1710 : vector<8x128xf32>
    %c0_653 = arith.constant 0 : index
    %c0_654 = arith.constant 0 : index
    %1712 = vector.load %arg34[%c0_653, %c0_654] : memref<8x128xf32, #tpu.memory_space<vmem>>, vector<8x128xf32>
    tpu.vector_store %arg34[%c0_653, %c0_654], %1711 {strides = array<i32>} : memref<8x128xf32, #tpu.memory_space<vmem>>, vector<8x128xf32>,
    return
  }
}

</mosaic_0001>

<bundles_post_ra>
// kernel: eq.1
= control target key start
LH: loop header
LB: loop body
LE: loop exit
PB: predicated region body
PF: predicated region fallthrough
CT: control target
= control target key end

     0   :  { %s171_s22 = smov 52   ;;  %vm42_vm0 = vcmask 31744   ;;  %s172_s23 = smov 56   ;;  %vm48_vm1 = vcmask 523744   ;;  %vm54_vm2 = vcmask 490944   ;;  %vm60_vm3 = vcmask 458144   ;;  %s222_s0 = inlined_call_operand.vmem [shape: s32[8,2,1,4], index: 0, kind: input, shape index: {}]   ;;  %s223_s1 = inlined_call_operand.vmem [shape: s32[64], index: 1, kind: output, shape index: {}]  }
   0x1   :  { %v148_v0 = vld [vmem:[%s222_s0 + $0xe] sm:$0x3]  ;;  %v149_v1 = vld [vmem:[%s222_s0 + $0xc] sm:$0x3]  ;;  %v150_v2 = vld [vmem:[%s222_s0 + $0xa] sm:$0x3] }
   0x2   :  { %9 = vst [vmem:[#allocation1 + $0x38] sm:$0x3] %v148_v0  ;;  %14 = vst [vmem:[#allocation1 + $0x30] sm:$0x3] %v149_v1  ;;  %v151_v3 = vld [vmem:[%s222_s0 + $0x8] sm:$0x3] }
   0x3   :  { %19 = vst [vmem:[#allocation1 + $0x28] sm:$0x3] %v150_v2  ;;  %24 = vst [vmem:[#allocation1 + $0x20] sm:$0x3] %v151_v3  ;;  %v152_v4 = vld [vmem:[%s222_s0 + $0x6] sm:$0x3] }
   0x4   :  { %v153_v5 = vld [vmem:[%s222_s0 + $0x4] sm:$0x3]  ;;  %29 = vst [vmem:[#allocation1 + $0x18] sm:$0x3] %v152_v4  ;;  %v154_v6 = vld [vmem:[%s222_s0 + $0x2] sm:$0x3] }
   0x5   :  { %34 = vst [vmem:[#allocation1 + $0x10] sm:$0x3] %v153_v5  ;;  %v39_v7 = vld [vmem:[%s222_s0] sm:$0x3]  ;;  %38 = vst [vmem:[#allocation1 + $0x8] sm:$0x3] %v154_v6 }
   0x6   :  { %40 = vst [vmem:[#allocation1] sm:$0x3] %v39_v7  ;;  %s170_s0 = smov 60   ;;  %s173_s24 = smov 48   ;;  %vm66_vm4 = vcmask 425344   ;;  %vm72_vm5 = vcmask 392544  }
   0x7   :  { %s174_s25 = smov 44   ;;  %s175_s26 = smov 40   ;;  %vm78_vm6 = vcmask 359744   ;;  %vm84_vm7 = vcmask 326944   ;;  %vm90_vm8 = vcmask 294144   ;;  %vm96_vm9 = vcmask 261344  }
   0x8   :  { %s176_s27 = smov 36   ;;  %s177_s28 = smov 32   ;;  %vm102_vm10 = vcmask 228544   ;;  %vm108_vm11 = vcmask 195744   ;;  %vm114_vm12 = vcmask 162944   ;;  %vm120_vm13 = vcmask 130144  }
   0x9   :  { %v45_v8 = vld [vmem:[#allocation1 + $0x39] sm:$0x1]   ;;  %v57_v9 = vld [vmem:[#allocation1 + $0x31] sm:$0x1]   ;;  %v51_v10 = vld [vmem:[#allocation1 + $0x38] sm:$0x1]  }
   0xa   :  { %46 = vrot.lane.b32.xlu0 %v45_v8, %s170_s0  ;;  %58 = vrot.lane.b32.xlu1 %v57_v9, %s171_s22  ;;  %v63_v11 = vld [vmem:[#allocation1 + $0x30] sm:$0x1]   ;;  %v69_v13 = vld [vmem:[#allocation1 + $0x29] sm:$0x1]   ;;  %v75_v14 = vld [vmem:[#allocation1 + $0x28] sm:$0x1]  }
   0xb   :  { %v81_v15 = vld [vmem:[#allocation1 + $0x21] sm:$0x1]   ;;  %v87_v16 = vld [vmem:[#allocation1 + $0x20] sm:$0x1]   ;;  %v93_v17 = vld [vmem:[#allocation1 + $0x19] sm:$0x1]  }
   0xc   :  { %v99_v18 = vld [vmem:[#allocation1 + $0x18] sm:$0x1]   ;;  %s178_s29 = smov 28   ;;  %s179_s30 = smov 24   ;;  %v105_v19 = vld [vmem:[#allocation1 + $0x11] sm:$0x1]  }
   0xd   :  { %v41_v12 = vld [vmem:[#allocation1] sm:$0x1]   ;;  %v111_v20 = vld [vmem:[#allocation1 + $0x10] sm:$0x1]   ;;  %s180_s2 = smov 20   ;;  %s181_s3 = smov 16  }
   0xe   :  { %52 = vrot.lane.b32.xlu0 %v51_v10, %s172_s23  ;;  %64 = vrot.lane.b32.xlu1 %v63_v11, %s173_s24  ;;  %43 = vst.msk [vmem:[#allocation0] sm:$0x1] %vm42_vm0, %v41_v12   ;;  %v117_v21 = vld [vmem:[#allocation1 + $0x9] sm:$0x1]   ;;  %v123_v22 = vld [vmem:[#allocation1 + $0x8] sm:$0x1]  }
   0xf   :  { %s182_s4 = smov 12   ;;  %s183_s5 = smov 8   ;;  %v129_v23 = vld [vmem:[#allocation1 + $0x1] sm:$0x1]   ;;  %vm126_vm14 = vcmask 97344   ;;  %vm132_vm15 = vcmask 64544  }
  0x10   :  { %s184_s6 = smov 4  }
  0x12   :  { %70 = vrot.lane.b32.xlu0 %v69_v13, %s174_s25  ;;  %76 = vrot.lane.b32.xlu1 %v75_v14, %s175_s26 }
  0x16   :  { %82 = vrot.lane.b32.xlu0 %v81_v15, %s176_s27  ;;  %88 = vrot.lane.b32.xlu1 %v87_v16, %s177_s28 }
  0x1a   :  { %94 = vrot.lane.b32.xlu0 %v93_v17, %s178_s29  ;;  %100 = vrot.lane.b32.xlu1 %v99_v18, %s179_s30 }
  0x1e   :  { %106 = vrot.lane.b32.xlu0 %v105_v19, %s180_s2  ;;  %112 = vrot.lane.b32.xlu1 %v111_v20, %s181_s3 }
  0x22   :  { %118 = vrot.lane.b32.xlu0 %v117_v21, %s182_s4  ;;  %124 = vrot.lane.b32.xlu1 %v123_v22, %s183_s5 }
  0x26   :  { %130 = vrot.lane.b32.xlu0 %v129_v23, %s184_s6 }
  0x7c   :  { %v47_v24 = vpop.permute.xlu0 %46   ;;  %v59_v25 = vpop.permute.xlu1 %58  }
  0x7d   :  { %49 = vst.msk [vmem:[#allocation0] sm:$0x1] %vm48_vm1, %v47_v24  }
  0x80   :  { %v53_v26 = vpop.permute.xlu0 %52   ;;  %v65_v27 = vpop.permute.xlu1 %64  }
  0x81   :  { %55 = vst.msk [vmem:[#allocation0] sm:$0x1] %vm54_vm2, %v53_v26  }
  0x82   :  { %61 = vst.msk [vmem:[#allocation0] sm:$0x1] %vm60_vm3, %v59_v25  }
  0x83   :  { %67 = vst.msk [vmem:[#allocation0] sm:$0x1] %vm66_vm4, %v65_v27  }
  0x84   :  { %v71_v28 = vpop.permute.xlu0 %70   ;;  %v77_v29 = vpop.permute.xlu1 %76  }
  0x85   :  { %73 = vst.msk [vmem:[#allocation0] sm:$0x1] %vm72_vm5, %v71_v28  }
  0x86   :  { %79 = vst.msk [vmem:[#allocation0] sm:$0x1] %vm78_vm6, %v77_v29  }
  0x88   :  { %v83_v30 = vpop.permute.xlu0 %82   ;;  %v89_v31 = vpop.permute.xlu1 %88  }
  0x89   :  { %85 = vst.msk [vmem:[#allocation0] sm:$0x1] %vm84_vm7, %v83_v30  }
  0x8a   :  { %91 = vst.msk [vmem:[#allocation0] sm:$0x1] %vm90_vm8, %v89_v31  }
  0x8c   :  { %v95_v32 = vpop.permute.xlu0 %94   ;;  %v101_v33 = vpop.permute.xlu1 %100  }
  0x8d   :  { %97 = vst.msk [vmem:[#allocation0] sm:$0x1] %vm96_vm9, %v95_v32  }
  0x8e   :  { %103 = vst.msk [vmem:[#allocation0] sm:$0x1] %vm102_vm10, %v101_v33  }
  0x90   :  { %v107_v34 = vpop.permute.xlu0 %106   ;;  %v113_v35 = vpop.permute.xlu1 %112  }
  0x91   :  { %109 = vst.msk [vmem:[#allocation0] sm:$0x1] %vm108_vm11, %v107_v34  }
  0x92   :  { %115 = vst.msk [vmem:[#allocation0] sm:$0x1] %vm114_vm12, %v113_v35  }
  0x94   :  { %v119_v36 = vpop.permute.xlu0 %118   ;;  %v125_v37 = vpop.permute.xlu1 %124  }
  0x95   :  { %121 = vst.msk [vmem:[#allocation0] sm:$0x1] %vm120_vm13, %v119_v36  }
  0x96   :  { %127 = vst.msk [vmem:[#allocation0] sm:$0x1] %vm126_vm14, %v125_v37  }
  0x98   :  { %v131_v38 = vpop.permute.xlu0 %130  }
  0x99   :  { %133 = vst.msk [vmem:[#allocation0] sm:$0x1] %vm132_vm15, %v131_v38  }
  0xa0   :  { %v138_v39 = vld [vmem:[#allocation0] sm:$0x1] }
  0xa1   :  { %141 = vst [vmem:[%s223_s1] sm:$0x1] %v138_v39 }

// kernel: forward.1
= control target key start
LH: loop header
LB: loop body
LE: loop exit
PB: predicated region body
PF: predicated region fallthrough
CT: control target
= control target key end

     0   :  { %s9864_s3 = smov 1   ;;  %v9865_v0 = vmov 0.0   ;;  %vm193_vm0 = vcmask 1043456   ;;  %s9866_s10 = smov 4   ;;  %vm168_vm1 = vcmask 97280   ;;  %vm9869_vm2 = vmmov 0   ;;  %s11723_s0 = inlined_call_operand.smem [shape: u32[35], index: -1, kind: input, shape index: {}] }
   0x1   :  { %s7982_s6 = sld [smem:[%s11723_s0 + %s9864_s3]]   ;;  %309 = vmatprep.mubr.f32.mxu1 %v9865_v0  ;;  %267 = vmatprep.mubr.f32.mxu0 %v9865_v0  ;;  %s9867_s14 = smov 3   ;;  %v153_v20 = vlaneseq  ;;  %vm421_vm3 = vcmask 785408   ;;  %vm478_vm4 = vcmask 261120   ;;  %vm544_vm5 = vcmask 523264  }
   0x2   :  { %s9915_s9 = sld [smem:[%s11723_s0]]   ;;  %s9868_s18 = smov 64   ;;  %vm2653_vm6 = vcmask 64512  }
   0x3   :  { %s9920_s13 = sld [smem:[%s11723_s0 + %s9866_s10]]   ;;  %s9870_s19 = smov 2   ;;  %v10015_v21 = vshrl.u32 %v153_v20, 7 }
   0x4   :  { %s9925_s17 = sld [smem:[%s11723_s0 + %s9867_s14]]   ;;  %s9871_s23 = smov 96  }
   0x5   :  { %s10013_s22 = sld [smem:[%s11723_s0 + %s9870_s19]]   ;;  %v155_v22 = vsub.s32 0, %v10015_v21  ;;  %v163_v25 = vsub.s32 2, %v10015_v21  ;;  %s9872_s24 = smov 5  }
   0x6   :  { %s7986_s27 = sld [smem:[%s11723_s0 + %s9872_s24]]   ;;  %s9873_s28 = smov 6  }
   0x7   :  { %v149_v1 = vld [vmem:[%s7982_s6 + $0x20] sm:$0xf]  ;;  %v148_v2 = vld [vmem:[%s7982_s6 + $0x18] sm:$0xf]  ;;  %v146_v3 = vld [vmem:[%s7982_s6 + $0x8] sm:$0xff]  ;;  %s7987_s1 = sld [smem:[%s11723_s0 + %s9873_s28]]   ;;  %s9874_s2 = smov 12  }
   0x8   :  { %9441 = vmatprep.subr.msk.mxu1 %vm193_vm0, %v149_v1  ;;  %v145_v4 = vld [vmem:[%s7982_s6] sm:$0xff]  ;;  %8016 = vmatprep.subr.msk.mxu0 %vm193_vm0, %v149_v1  ;;  %v144_v5 = vld [vmem:[%s9915_s9 + $0x38] sm:$0xff]  ;;  %v150_v6 = vld [vmem:[%s7982_s6 + $0x28] sm:$0xf]  ;;  %s7993_s5 = sld [smem:[%s11723_s0 + %s9874_s2]]   ;;  %s9876_s7 = smov 32  }
   0x9   :  { %9443 = vmatpush1.msk.msra.mxu1 %vm193_vm0, %v148_v2  ;;  %8017 = vmatpush1.msk.msra.mxu0 %vm193_vm0, %v148_v2  ;;  %v137_v7 = vld [vmem:[%s9915_s9] sm:$0xff]  ;;  %v147_v8 = vld [vmem:[%s7982_s6 + $0x10] sm:$0xff]  ;;  %v138_v9 = vld [vmem:[%s9915_s9 + $0x8] sm:$0xff]  ;;  %s9875_s6 = smov 8   ;;  %s9877_s8 = smov 7  }
   0xa   :  { %9442 = vmatprep.subr.mxu1 %v146_v3  ;;  %233 = vmatprep.subr.mxu0 %v146_v3  ;;  %v8036_v10 = vld [vmem:[%s9920_s13] ss:$0 sm:$0xff]  ;;  %v9940_v11 = vld [vmem:[%s9925_s17 + $0x18] sm:$0xff]  ;;  %v139_v12 = vld [vmem:[%s9915_s9 + $0x10] sm:$0xff]  ;;  %s10414_s11 = sld [smem:[%s11723_s0 + %s9877_s8]]   ;;  %s9878_s12 = smov 9  }
   0xb   :  { %9444 = vmatpush1.msra.mxu1 %v145_v4  ;;  %234 = vmatpush1.msra.mxu0 %v145_v4  ;;  %v9948_v13 = vld [vmem:[%s9925_s17 + $0x10] sm:$0xff]  ;;  %v140_v14 = vld [vmem:[%s9915_s9 + $0x18] sm:$0xff]  ;;  %v141_v15 = vld [vmem:[%s9915_s9 + $0x20] sm:$0xff]  ;;  %s10419_s15 = sld [smem:[%s11723_s0 + %s9878_s12]]   ;;  %s9879_s16 = smov 16  }
   0xc   :  { %8025 = vmatmul.mubr.msk.f32.vlgmr.msra.gmra.mxu1 %vm168_vm1, %v144_v5  ;;  %8618 = vmatprep.subr.msk.mxu1 %vm193_vm0, %v150_v6  ;;  %v9956_v16 = vld [vmem:[%s9925_s17 + $0x8] sm:$0xff]  ;;  %v9964_v17 = vld [vmem:[%s9925_s17] sm:$0xff]  ;;  %v143_v19 = vld [vmem:[%s9915_s9 + $0x30] sm:$0xff]  ;;  %s10456_s20 = sld [smem:[%s11723_s0 + %s9879_s16]]   ;;  %s9880_s21 = smov 13  }
   0xd   :  { %8619 = vmatpush3.msk.msra.mxu1 %vm193_vm0, %v150_v6  ;;  %8622 = vmatprep.mubr.msk.f32.mxu1 %vm168_vm1, %v137_v7  ;;  %v142_v18 = vld [vmem:[%s9915_s9 + $0x28] sm:$0xff]  ;;  %v151_v23 = vld [vmem:[%s10013_s22] sm:$0x7]  ;;  %s7994_s25 = sld [smem:[%s11723_s0 + %s9880_s21]]   ;;  %s9881_s26 = smov 15  }
   0xe   :  { %8620 = vmatprep.subr.mxu1 %v147_v8  ;;  %8018 = vmatmul.mubr.msk.f32.vlgmr.msra.gmra.mxu0 %vm168_vm1, %v137_v7  ;;  %v10019_v24 = vrot.slane %v151_v23, %v155_v22  ;;  %v10025_v28 = vrot.slane %v151_v23, %v163_v25  ;;  %s10495_s29 = sld [smem:[%s11723_s0 + %s9881_s26]]   ;;  %s9882_s3 = smov 10  }
   0xf   :  { %8621 = vmatpush3.msra.mxu1 %v147_v8  ;;  %694 = vrot.lane.b32.xlu0 %v8036_v10, %s9868_s18  ;;  %s7989_s2 = sld [smem:[%s11723_s0 + %s9875_s6]]   ;;  %s9883_s9 = smov 31  }
  0x10   :  { %8623 = vmatmul.mubr.msk.f32.vlgmr.msra.gmra.mxu1 %vm168_vm1, %v138_v9  ;;  %8634 = vmatprep.subr.mxu1 %v9865_v0  ;;  %s7991_s8 = sld [smem:[%s11723_s0 + %s9882_s3]]   ;;  %s9885_s21 = smov 14  }
  0x11   :  { %8635 = vmatpush3.msra.mxu1 %v9940_v11  ;;  %8625 = vmatprep.mubr.msk.f32.mxu1 %vm168_vm1, %v139_v12  ;;  %s8012_s12 = sld [smem:[%s11723_s0 + %s9883_s9]]   ;;  %s9886_s26 = smov 17  }
  0x12   :  { %8636 = vmatprep.subr.mxu1 %v9865_v0  ;;  %273 = vmatprep.mubr.f32.mxu0 %v9865_v0  ;;  %s7998_s30 = sld [smem:[%s11723_s0 + %s9886_s26]]   ;;  %s9889_s9 = smov 22  }
  0x13   :  { %8637 = vmatpush3.msra.mxu1 %v9948_v13  ;;  %8019 = vmatmul.mubr.msk.f32.gmra.mxu0 %vm168_vm1, %v138_v9  ;;  %s9891_s16 = smov 24  }
  0x14   :  { %8626 = vmatmul.mubr.msk.f32.gmra.mxu1 %vm168_vm1, %v140_v14  ;;  %8638 = vmatprep.subr.mxu1 %v9865_v0 }
  0x15   :  { %8628 = vmatprep.mubr.msk.f32.mxu1 %vm168_vm1, %v141_v15  ;;  %8639 = vmatpush3.msra.mxu1 %v9956_v16 }
  0x16   :  { %8640 = vmatprep.subr.mxu1 %v9865_v0  ;;  %8656 = vmatprep.subr.mxu0 %v9865_v0 }
  0x17   :  { %8641 = vmatpush3.msra.mxu1 %v9964_v17  ;;  %8657 = vmatpush3.msra.mxu0 %v9940_v11 }
  0x18   :  { %8629 = vmatmul.mubr.msk.f32.gmra.mxu1 %vm168_vm1, %v142_v18  ;;  %8645 = vmatprep.subr.mxu1 %v9865_v0 }
  0x19   :  { %8631 = vmatprep.mubr.msk.f32.mxu1 %vm168_vm1, %v143_v19  ;;  %279 = vmatprep.mubr.f32.mxu0 %v9865_v0 }
  0x1a   :  { %8020 = vmatmul.mubr.msk.f32.gmra.mxu0 %vm168_vm1, %v139_v12  ;;  %8658 = vmatprep.subr.mxu0 %v9865_v0 }
  0x1b   :  { %8659 = vmatpush3.msra.mxu0 %v9948_v13  ;;  %285 = vmatprep.mubr.f32.mxu0 %v9865_v0 }
  0x1c   :  { %8632 = vmatmul.mubr.msk.f32.gmra.mxu1 %vm168_vm1, %v144_v5  ;;  %8660 = vmatprep.subr.mxu0 %v9865_v0 }
  0x1d   :  { %8642 = vmatprep.mubr.msk.f32.mxu1 %vm9869_vm2, %v9865_v0  ;;  %8661 = vmatpush3.msra.mxu0 %v9956_v16 }
  0x1e   :  { %8021 = vmatmul.mubr.msk.f32.gmra.mxu0 %vm168_vm1, %v140_v14  ;;  %8662 = vmatprep.subr.mxu0 %v9865_v0 }
  0x1f   :  { %291 = vmatprep.mubr.f32.mxu0 %v9865_v0  ;;  %8663 = vmatpush3.msra.mxu0 %v9964_v17 }
  0x20   :  { %8643 = vmatmul.mubr.f32.vlgmr.msra.gmra.mxu1 %v9865_v0  ;;  %8678 = vmatprep.subr.mxu0 %v9865_v0 }
  0x21   :  { %8646 = vmatpush3.msra.mxu1 %v9940_v11  ;;  %8653 = vmatprep.mubr.msk.f32.mxu1 %vm9869_vm2, %v9865_v0 }
  0x22   :  { %8647 = vmatprep.subr.mxu1 %v9865_v0  ;;  %8022 = vmatmul.mubr.msk.f32.gmra.mxu0 %vm168_vm1, %v141_v15 }
  0x23   :  { %8648 = vmatpush3.msra.mxu1 %v9948_v13  ;;  %297 = vmatprep.mubr.f32.mxu0 %v9865_v0 }
  0x24   :  { %8649 = vmatprep.subr.mxu1 %v9865_v0 }
  0x25   :  { %8650 = vmatpush3.msra.mxu1 %v9956_v16 }
  0x26   :  { %8651 = vmatprep.subr.mxu1 %v9865_v0  ;;  %8023 = vmatmul.mubr.msk.f32.gmra.mxu0 %vm168_vm1, %v142_v18 }
  0x27   :  { %8652 = vmatpush3.msra.mxu1 %v9964_v17  ;;  %303 = vmatprep.mubr.f32.mxu0 %v9865_v0 }
  0x28   :  { %8667 = vmatprep.subr.mxu1 %v9865_v0 }
  0x2a   :  { %8024 = vmatmul.mubr.msk.f32.gmra.mxu0 %vm168_vm1, %v143_v19 }
  0x2b   :  { %8664 = vmatprep.mubr.msk.f32.mxu0 %vm9869_vm2, %v9865_v0 }
  0x81   :  { %v10056_v46 = vpop.permute.xlu0 %694 }
  0xcc   :  { %v311_v26 = vpop.f32.mrf.mxu1 }
  0xcd   :  { %v10023_v27 = vadd.f32 %v311_v26, %v10019_v24 }
  0xce   :  { %v10027_v29 = vpop.f32.mrf.mxu1  ;;  %v269_v30 = vpop.f32.mrf.mxu0 }
  0xcf   :  { %429 = vst.msk [vmem:[#allocation2 + $0x38] sm:$0xff] %vm421_vm3, %v10023_v27  ;;  %v10032_v31 = vadd.f32 %v269_v30, %v10019_v24 }
  0xd0   :  { %v8624_v32 = vpop.f32.mrf.mxu1  ;;  %v10065_v62 = vpop.f32.mrf.mxu0 }
  0xd1   :  { %v10035_v33 = vadd.f32 %v8624_v32, %v10025_v28  ;;  %422 = vst.msk [vmem:[#allocation2] sm:$0xff] %vm421_vm3, %v10032_v31 }
  0xd2   :  { %v10039_v34 = vpop.f32.mrf.mxu1 }
  0xd3   :  { %v275_v63 = vpop.f32.mrf.mxu0 }
  0xd4   :  { %v8627_v35 = vpop.f32.mrf.mxu1  ;;  %v10068_v1 = vadd.f32 %v275_v63, %v10019_v24 }
  0xd5   :  { %v10042_v36 = vadd.f32 %v8627_v35, %v10025_v28  ;;  %v10089_v32 = vpop.f32.mrf.mxu0 }
  0xd6   :  { %v392_v37 = vpop.f32.mrf.mxu1  ;;  %423 = vst.msk [vmem:[#allocation2 + $0x8] sm:$0xff] %vm421_vm3, %v10068_v1 }
  0xd7   :  { %v10045_v38 = vadd.f32 %v392_v37, %v10025_v28 }
  0xd8   :  { %v8630_v39 = vpop.f32.mrf.mxu1  ;;  %v608_v51 = vld [vmem:[#allocation2] sm:$0xff] }
  0xd9   :  { %v10048_v40 = vadd.f32 %v8630_v39, %v10025_v28 }
  0xda   :  { %v402_v41 = vpop.f32.mrf.mxu1  ;;  %v281_v35 = vpop.f32.mrf.mxu0 }
  0xdb   :  { %v10051_v42 = vadd.f32 %v402_v41, %v10025_v28  ;;  %v10092_v37 = vadd.f32 %v281_v35, %v10019_v24 }
  0xdc   :  { %v8633_v43 = vpop.f32.mrf.mxu1  ;;  %v10094_v39 = vpop.f32.mrf.mxu0 }
  0xdd   :  { %v10054_v44 = vadd.f32 %v8633_v43, %v10025_v28  ;;  %v723_v12 = vld [vmem:[#allocation2 + $0x8] sm:$0xff]  ;;  %424 = vst.msk [vmem:[#allocation2 + $0x10] sm:$0xff] %vm421_vm3, %v10092_v37 }
  0xde   :  { %v412_v45 = vpop.f32.mrf.mxu1  ;;  %v287_v41 = vpop.f32.mrf.mxu0 }
  0xdf   :  { %v10059_v47 = vadd.f32 %v412_v45, %v10025_v28  ;;  %v10099_v43 = vadd.f32 %v287_v41, %v10019_v24 }
  0xe0   :  { %v678_v48 = vpop.f32.mrf.mxu1  ;;  %v10101_v45 = vpop.f32.mrf.mxu0 }
  0xe1   :  { %v697_v49 = vadd.f32 %v10056_v46, %v678_v48  ;;  %v682_v52 = vadd.f32 %v678_v48, %v608_v51  ;;  %425 = vst.msk [vmem:[#allocation2 + $0x18] sm:$0xff] %vm421_vm3, %v10099_v43 }
  0xe2   :  { %v8644_v50 = vpop.f32.mrf.mxu1 }
  0xe3   :  { %699 = vrot.lane.b32.xlu0 %v697_v49, %s9868_s18  ;;  %v8035_v53 = vmul.f32 -1.442695, %v682_v52  ;;  %v293_v50 = vpop.f32.mrf.mxu0 }
  0xe5   :  { %9483 = vpow2.f32 %v8035_v53  ;;  %v10106_v53 = vadd.f32 %v293_v50, %v10019_v24 }
  0xe7   :  { %426 = vst.msk [vmem:[#allocation2 + $0x20] sm:$0xff] %vm421_vm3, %v10106_v53 }
  0xf2   :  { %v9484_v54 = vpop.eup %9483 }
  0xf3   :  { %v686_v55 = vadd.f32 1.0, %v9484_v54  ;;  %v10108_v54 = vpop.f32.mrf.mxu0 }
  0xf5   :  { %9485 = vrcp.f32 %v686_v55 }
 0x102   :  { %v9486_v56 = vpop.eup %9485 }
 0x103   :  { %v709_v2 = vsub.f32 1.0, %v9486_v56  ;;  %v715_v4 = vmul.f32 0.0, %v9486_v56 }
 0x155   :  { %v700_v57 = vpop.permute.xlu0 %699 }
 0x156   :  { %v702_v58 = vmul.f32 %v9486_v56, %v700_v57  ;;  %v299_v56 = vpop.f32.mrf.mxu0 }
 0x157   :  { %v10114_v57 = vadd.f32 %v299_v56, %v10019_v24 }
 0x158   :  { %704 = vrot.lane.b32.xlu1 %v702_v58, %s9868_s18  ;;  %v10116_v58 = vpop.f32.mrf.mxu0 }
 0x159   :  { %427 = vst.msk [vmem:[#allocation2 + $0x28] sm:$0xff] %vm421_vm3, %v10114_v57 }
 0x1ca   :  { %v705_v59 = vpop.permute.xlu1 %704 }
 0x1cb   :  { %v707_v60 = vadd.f32 %v705_v59, %v608_v51  ;;  %v305_v59 = vpop.f32.mrf.mxu0 }
 0x1cd   :  { %9487 = vtanh.f32 %v707_v60  ;;  %v10121_v60 = vadd.f32 %v305_v59, %v10019_v24  ;;  %v10137_v24 = vpop.f32.mrf.mxu0 }
 0x1cf   :  { %428 = vst.msk [vmem:[#allocation2 + $0x30] sm:$0xff] %vm421_vm3, %v10121_v60 }
 0x1da   :  { %v9488_v61 = vpop.eup %9487 }
 0x1db   :  { %711 = vrot.lane.b32.xlu1 %v9488_v61, %s9871_s23 }
 0x24d   :  { %v712_v3 = vpop.permute.xlu1 %711 }
 0x24e   :  { %v714_v5 = vmul.f32 %v712_v3, %v709_v2 }
 0x250   :  { %v716_v6 = vadd.f32 %v715_v4, %v714_v5  ;;  %v830_v4 = vld [vmem:[#allocation2 + $0x10] sm:$0xff] }
 0x252   :  { %718 = vrot.lane.b32.xlu0 %v716_v6, %s9871_s23 }
 0x2c4   :  { %v719_v7 = vpop.permute.xlu0 %718 }
 0x2c5   :  { %721 = vst.msk [vmem:[#allocation3] sm:$0xff] %vm478_vm4, %v719_v7  ;;  %8654 = vmatmul.mubr.msk.f32.vlgmr.msra.gmra.mxu1 %vm478_vm4, %v719_v7 }
 0x2c6   :  { %8668 = vmatpush3.msra.mxu1 %v9940_v11  ;;  %8675 = vmatprep.mubr.msk.f32.mxu1 %vm9869_vm2, %v9865_v0 }
 0x2c7   :  { %8669 = vmatprep.subr.mxu1 %v9865_v0 }
 0x2c8   :  { %8670 = vmatpush3.msra.mxu1 %v9948_v13 }
 0x2c9   :  { %8671 = vmatprep.subr.mxu1 %v9865_v0 }
 0x2ca   :  { %8672 = vmatpush3.msra.mxu1 %v9956_v16 }
 0x2cb   :  { %8673 = vmatprep.subr.mxu1 %v9865_v0 }
 0x2cc   :  { %8674 = vmatpush3.msra.mxu1 %v9964_v17 }
 0x2cd   :  { %8689 = vmatprep.subr.mxu1 %v9865_v0 }
 0x385   :  { %v792_v8 = vpop.f32.mrf.mxu1 }
 0x386   :  { %v803_v9 = vadd.f32 %v792_v8, %v10056_v46  ;;  %v796_v14 = vadd.f32 %v792_v8, %v723_v12 }
 0x387   :  { %v8655_v10 = vpop.f32.mrf.mxu1 }
 0x388   :  { %805 = vrot.lane.b32.xlu1 %v803_v9, %s9868_s18  ;;  %v8038_v15 = vmul.f32 -1.442695, %v796_v14 }
 0x38a   :  { %9489 = vpow2.f32 %v8038_v15 }
 0x397   :  { %v9490_v18 = vpop.eup %9489 }
 0x398   :  { %v800_v19 = vadd.f32 1.0, %v9490_v18 }
 0x39a   :  { %9491 = vrcp.f32 %v800_v19 }
 0x3a7   :  { %v9492_v20 = vpop.eup %9491 }
 0x3a8   :  { %v815_v48 = vsub.f32 1.0, %v9492_v20  ;;  %v821_v51 = vmul.f32 %v9492_v20, %v716_v6 }
 0x3fa   :  { %v806_v22 = vpop.permute.xlu1 %805 }
 0x3fb   :  { %v808_v23 = vmul.f32 %v9492_v20, %v806_v22 }
 0x3fd   :  { %810 = vrot.lane.b32.xlu0 %v808_v23, %s9868_s18 }
 0x46f   :  { %v811_v25 = vpop.permute.xlu0 %810 }
 0x470   :  { %v813_v26 = vadd.f32 %v811_v25, %v723_v12 }
 0x472   :  { %9493 = vtanh.f32 %v813_v26 }
 0x47f   :  { %v9494_v30 = vpop.eup %9493 }
 0x480   :  { %817 = vrot.lane.b32.xlu1 %v9494_v30, %s9871_s23 }
 0x4f2   :  { %v818_v49 = vpop.permute.xlu1 %817 }
 0x4f3   :  { %v820_v52 = vmul.f32 %v818_v49, %v815_v48  ;;  %v937_v48 = vld [vmem:[#allocation2 + $0x18] sm:$0xff] }
 0x4f5   :  { %v822_v55 = vadd.f32 %v821_v51, %v820_v52 }
 0x4f7   :  { %824 = vrot.lane.b32.xlu0 %v822_v55, %s9871_s23 }
 0x569   :  { %v825_v61 = vpop.permute.xlu0 %824 }
 0x56a   :  { %828 = vst.msk [vmem:[#allocation3 + $0x8] sm:$0xff] %vm478_vm4, %v825_v61  ;;  %8665 = vmatmul.mubr.msk.f32.vlgmr.msra.gmra.mxu0 %vm478_vm4, %v825_v61 }
 0x56b   :  { %8679 = vmatpush3.msra.mxu0 %v9940_v11  ;;  %8686 = vmatprep.mubr.msk.f32.mxu0 %vm9869_vm2, %v9865_v0 }
 0x56c   :  { %8680 = vmatprep.subr.mxu0 %v9865_v0 }
 0x56d   :  { %8681 = vmatpush3.msra.mxu0 %v9948_v13 }
 0x56e   :  { %8682 = vmatprep.subr.mxu0 %v9865_v0 }
 0x56f   :  { %8683 = vmatpush3.msra.mxu0 %v9956_v16 }
 0x570   :  { %8684 = vmatprep.subr.mxu0 %v9865_v0 }
 0x571   :  { %8685 = vmatpush3.msra.mxu0 %v9964_v17 }
 0x572   :  { %8700 = vmatprep.subr.mxu0 %v9865_v0 }
 0x62a   :  { %v899_v63 = vpop.f32.mrf.mxu0 }
 0x62b   :  { %v910_v2 = vadd.f32 %v899_v63, %v10056_v46  ;;  %v903_v5 = vadd.f32 %v899_v63, %v830_v4 }
 0x62c   :  { %v8666_v3 = vpop.f32.mrf.mxu0 }
 0x62d   :  { %912 = vrot.lane.b32.xlu1 %v910_v2, %s9868_s18  ;;  %v8040_v6 = vmul.f32 -1.442695, %v903_v5 }
 0x62f   :  { %9495 = vpow2.f32 %v8040_v6 }
 0x63c   :  { %v9496_v7 = vpop.eup %9495 }
 0x63d   :  { %v907_v8 = vadd.f32 1.0, %v9496_v7 }
 0x63f   :  { %9497 = vrcp.f32 %v907_v8 }
 0x64c   :  { %v9498_v9 = vpop.eup %9497 }
 0x64d   :  { %v922_v19 = vsub.f32 1.0, %v9498_v9  ;;  %v928_v22 = vmul.f32 %v9498_v9, %v822_v55 }
 0x69f   :  { %v913_v10 = vpop.permute.xlu1 %912 }
 0x6a0   :  { %v915_v12 = vmul.f32 %v9498_v9, %v913_v10 }
 0x6a2   :  { %917 = vrot.lane.b32.xlu0 %v915_v12, %s9868_s18 }
 0x714   :  { %v918_v14 = vpop.permute.xlu0 %917 }
 0x715   :  { %v920_v15 = vadd.f32 %v918_v14, %v830_v4  ;;  %v1044_v14 = vld [vmem:[#allocation2 + $0x20] sm:$0xff] }
 0x717   :  { %9499 = vtanh.f32 %v920_v15 }
 0x724   :  { %v9500_v18 = vpop.eup %9499 }
 0x725   :  { %924 = vrot.lane.b32.xlu1 %v9500_v18, %s9871_s23 }
 0x797   :  { %v925_v20 = vpop.permute.xlu1 %924 }
 0x798   :  { %v927_v23 = vmul.f32 %v925_v20, %v922_v19 }
 0x79a   :  { %v929_v25 = vadd.f32 %v928_v22, %v927_v23 }
 0x79c   :  { %931 = vrot.lane.b32.xlu0 %v929_v25, %s9871_s23 }
 0x80e   :  { %v932_v26 = vpop.permute.xlu0 %931 }
 0x80f   :  { %935 = vst.msk [vmem:[#allocation3 + $0x10] sm:$0xff] %vm478_vm4, %v932_v26  ;;  %8676 = vmatmul.mubr.msk.f32.vlgmr.msra.gmra.mxu1 %vm478_vm4, %v932_v26 }
 0x810   :  { %8690 = vmatpush3.msra.mxu1 %v9940_v11  ;;  %8697 = vmatprep.mubr.msk.f32.mxu1 %vm9869_vm2, %v9865_v0 }
 0x811   :  { %8691 = vmatprep.subr.mxu1 %v9865_v0 }
 0x812   :  { %8692 = vmatpush3.msra.mxu1 %v9948_v13 }
 0x813   :  { %8693 = vmatprep.subr.mxu1 %v9865_v0 }
 0x814   :  { %8694 = vmatpush3.msra.mxu1 %v9956_v16 }
 0x815   :  { %8695 = vmatprep.subr.mxu1 %v9865_v0 }
 0x816   :  { %8696 = vmatpush3.msra.mxu1 %v9964_v17 }
 0x817   :  { %8711 = vmatprep.subr.mxu1 %v9865_v0 }
 0x8cf   :  { %v1006_v30 = vpop.f32.mrf.mxu1 }
 0x8d0   :  { %v1017_v35 = vadd.f32 %v1006_v30, %v10056_v46  ;;  %v1010_v49 = vadd.f32 %v1006_v30, %v937_v48 }
 0x8d1   :  { %v8677_v41 = vpop.f32.mrf.mxu1 }
 0x8d2   :  { %1019 = vrot.lane.b32.xlu1 %v1017_v35, %s9868_s18  ;;  %v8042_v50 = vmul.f32 -1.442695, %v1010_v49 }
 0x8d4   :  { %9501 = vpow2.f32 %v8042_v50 }
 0x8e1   :  { %v9502_v51 = vpop.eup %9501 }
 0x8e2   :  { %v1014_v52 = vadd.f32 1.0, %v9502_v51 }
 0x8e4   :  { %9503 = vrcp.f32 %v1014_v52 }
 0x8f1   :  { %v9504_v55 = vpop.eup %9503 }
 0x8f2   :  { %v1029_v3 = vsub.f32 1.0, %v9504_v55  ;;  %v1035_v5 = vmul.f32 %v9504_v55, %v929_v25 }
 0x944   :  { %v1020_v56 = vpop.permute.xlu1 %1019 }
 0x945   :  { %v1022_v59 = vmul.f32 %v9504_v55, %v1020_v56 }
 0x947   :  { %1024 = vrot.lane.b32.xlu0 %v1022_v59, %s9868_s18  ;;  %v1151_v59 = vld [vmem:[#allocation2 + $0x28] sm:$0xff] }
 0x9b9   :  { %v1025_v61 = vpop.permute.xlu0 %1024 }
 0x9ba   :  { %v1027_v63 = vadd.f32 %v1025_v61, %v937_v48 }
 0x9bc   :  { %9505 = vtanh.f32 %v1027_v63 }
 0x9c9   :  { %v9506_v2 = vpop.eup %9505 }
 0x9ca   :  { %1031 = vrot.lane.b32.xlu1 %v9506_v2, %s9871_s23 }
 0xa3c   :  { %v1032_v4 = vpop.permute.xlu1 %1031 }
 0xa3d   :  { %v1034_v6 = vmul.f32 %v1032_v4, %v1029_v3 }
 0xa3f   :  { %v1036_v7 = vadd.f32 %v1035_v5, %v1034_v6  ;;  %v1482_v6 = vld [vmem:[%s7986_s27 + $0x18] sm:$0xff] }
 0xa41   :  { %1038 = vrot.lane.b32.xlu0 %v1036_v7, %s9871_s23 }
 0xab3   :  { %v1039_v8 = vpop.permute.xlu0 %1038 }
 0xab4   :  { %1042 = vst.msk [vmem:[#allocation3 + $0x18] sm:$0xff] %vm478_vm4, %v1039_v8  ;;  %8687 = vmatmul.mubr.msk.f32.vlgmr.msra.gmra.mxu0 %vm478_vm4, %v1039_v8 }
 0xab5   :  { %8701 = vmatpush3.msra.mxu0 %v9940_v11  ;;  %8708 = vmatprep.mubr.msk.f32.mxu0 %vm9869_vm2, %v9865_v0 }
 0xab6   :  { %8702 = vmatprep.subr.mxu0 %v9865_v0 }
 0xab7   :  { %8703 = vmatpush3.msra.mxu0 %v9948_v13 }
 0xab8   :  { %8704 = vmatprep.subr.mxu0 %v9865_v0 }
 0xab9   :  { %8705 = vmatpush3.msra.mxu0 %v9956_v16 }
 0xaba   :  { %8706 = vmatprep.subr.mxu0 %v9865_v0 }
 0xabb   :  { %8707 = vmatpush3.msra.mxu0 %v9964_v17 }
 0xabc   :  { %8722 = vmatprep.subr.mxu0 %v1482_v6 }
 0xb74   :  { %v1113_v9 = vpop.f32.mrf.mxu0 }
 0xb75   :  { %v1124_v10 = vadd.f32 %v1113_v9, %v10056_v46  ;;  %v1117_v15 = vadd.f32 %v1113_v9, %v1044_v14 }
 0xb76   :  { %v8688_v12 = vpop.f32.mrf.mxu0 }
 0xb77   :  { %1126 = vrot.lane.b32.xlu1 %v1124_v10, %s9868_s18  ;;  %v8044_v18 = vmul.f32 -1.442695, %v1117_v15 }
 0xb79   :  { %9507 = vpow2.f32 %v8044_v18  ;;  %v1481_v18 = vld [vmem:[%s7986_s27 + $0x10] sm:$0xff] }
 0xb86   :  { %v9508_v19 = vpop.eup %9507 }
 0xb87   :  { %v1121_v20 = vadd.f32 1.0, %v9508_v19  ;;  %v1471_v19 = vld [vmem:[#allocation3] sm:$0xff] }
 0xb89   :  { %9509 = vrcp.f32 %v1121_v20  ;;  %v1480_v20 = vld [vmem:[%s7986_s27 + $0x8] sm:$0xff] }
 0xb96   :  { %v9510_v22 = vpop.eup %9509 }
 0xb97   :  { %v1136_v41 = vsub.f32 1.0, %v9510_v22  ;;  %v1142_v49 = vmul.f32 %v9510_v22, %v1036_v7 }
 0xbe9   :  { %v1127_v23 = vpop.permute.xlu1 %1126 }
 0xbea   :  { %v1129_v25 = vmul.f32 %v9510_v22, %v1127_v23  ;;  %v1479_v22 = vld [vmem:[%s7986_s27] sm:$0xff]  ;;  %v1472_v23 = vld [vmem:[#allocation3 + $0x8] sm:$0xff]  ;;  %s9893_s27 = smov 25  }
 0xbec   :  { %1131 = vrot.lane.b32.xlu0 %v1129_v25, %s9868_s18  ;;  %v1473_v25 = vld [vmem:[#allocation3 + $0x10] sm:$0xff] }
 0xc5e   :  { %v1132_v26 = vpop.permute.xlu0 %1131 }
 0xc5f   :  { %v1134_v30 = vadd.f32 %v1132_v26, %v1044_v14  ;;  %v1474_v26 = vld [vmem:[#allocation3 + $0x18] sm:$0xff] }
 0xc61   :  { %9511 = vtanh.f32 %v1134_v30 }
 0xc6e   :  { %v9512_v35 = vpop.eup %9511 }
 0xc6f   :  { %1138 = vrot.lane.b32.xlu1 %v9512_v35, %s9871_s23 }
 0xce1   :  { %v1139_v48 = vpop.permute.xlu1 %1138 }
 0xce2   :  { %v1141_v50 = vmul.f32 %v1139_v48, %v1136_v41 }
 0xce4   :  { %v1143_v51 = vadd.f32 %v1142_v49, %v1141_v50  ;;  %v10214_v50 = vld [vmem:[%s7987_s1] ss:$0 sm:$0xff]  ;;  %s9887_s1 = smov 18  }
 0xce5   :  { %s7999_s4 = sld [smem:[%s11723_s0 + %s9887_s1]]  }
 0xce6   :  { %1145 = vrot.lane.b32.xlu0 %v1143_v51, %s9871_s23  ;;  %s11387_s1 = sld [smem:[%s11723_s0 + %s9893_s27]]  }
 0xd58   :  { %v1146_v52 = vpop.permute.xlu0 %1145 }
 0xd59   :  { %1149 = vst.msk [vmem:[#allocation3 + $0x20] sm:$0xff] %vm478_vm4, %v1146_v52  ;;  %8698 = vmatmul.mubr.msk.f32.vlgmr.msra.gmra.mxu1 %vm478_vm4, %v1146_v52 }
 0xd5a   :  { %8712 = vmatpush3.msra.mxu1 %v9940_v11  ;;  %8719 = vmatprep.mubr.msk.f32.mxu1 %vm9869_vm2, %v9865_v0 }
 0xd5b   :  { %8713 = vmatprep.subr.mxu1 %v9865_v0 }
 0xd5c   :  { %8714 = vmatpush3.msra.mxu1 %v9948_v13 }
 0xd5d   :  { %8715 = vmatprep.subr.mxu1 %v9865_v0 }
 0xd5e   :  { %8716 = vmatpush3.msra.mxu1 %v9956_v16 }
 0xd5f   :  { %8717 = vmatprep.subr.mxu1 %v9865_v0 }
 0xd60   :  { %8718 = vmatpush3.msra.mxu1 %v9964_v17  ;;  %v1475_v30 = vld [vmem:[#allocation3 + $0x20] sm:$0xff] }
 0xd61   :  { %8742 = vmatprep.subr.mxu1 %v9865_v0 }
 0xe19   :  { %v1220_v55 = vpop.f32.mrf.mxu1 }
 0xe1a   :  { %v1231_v11 = vadd.f32 %v1220_v55, %v10056_v46  ;;  %v1224_v61 = vadd.f32 %v1220_v55, %v1151_v59 }
 0xe1b   :  { %v8699_v56 = vpop.f32.mrf.mxu1 }
 0xe1c   :  { %1233 = vrot.lane.b32.xlu1 %v1231_v11, %s9868_s18  ;;  %v8046_v63 = vmul.f32 -1.442695, %v1224_v61 }
 0xe1e   :  { %9513 = vpow2.f32 %v8046_v63 }
 0xe2b   :  { %v9514_v13 = vpop.eup %9513 }
 0xe2c   :  { %v1228_v2 = vadd.f32 1.0, %v9514_v13 }
 0xe2e   :  { %9515 = vrcp.f32 %v1228_v2 }
 0xe3b   :  { %v9516_v16 = vpop.eup %9515 }
 0xe3c   :  { %v1243_v8 = vsub.f32 1.0, %v9516_v16  ;;  %v1249_v10 = vmul.f32 %v9516_v16, %v1143_v51 }
 0xe8e   :  { %v1234_v3 = vpop.permute.xlu1 %1233 }
 0xe8f   :  { %v1236_v4 = vmul.f32 %v9516_v16, %v1234_v3 }
 0xe91   :  { %1238 = vrot.lane.b32.xlu0 %v1236_v4, %s9868_s18  ;;  %v1258_v4 = vld [vmem:[#allocation2 + $0x30] sm:$0xff] }
 0xf03   :  { %v1239_v17 = vpop.permute.xlu0 %1238 }
 0xf04   :  { %v1241_v5 = vadd.f32 %v1239_v17, %v1151_v59 }
 0xf06   :  { %9517 = vtanh.f32 %v1241_v5 }
 0xf13   :  { %v9518_v7 = vpop.eup %9517 }
 0xf14   :  { %1245 = vrot.lane.b32.xlu1 %v9518_v7, %s9871_s23 }
 0xf86   :  { %v1246_v9 = vpop.permute.xlu1 %1245 }
 0xf87   :  { %v1248_v12 = vmul.f32 %v1246_v9, %v1243_v8 }
 0xf89   :  { %v10196_v14 = vadd.f32 %v1249_v10, %v1248_v12 }
 0xf8b   :  { %1252 = vrot.lane.b32.xlu0 %v10196_v14, %s9871_s23 }
 0xffd   :  { %v1253_v15 = vpop.permute.xlu0 %1252 }
 0xffe   :  { %1256 = vst.msk [vmem:[#allocation3 + $0x28] sm:$0xff] %vm478_vm4, %v1253_v15  ;;  %8709 = vmatmul.mubr.msk.f32.vlgmr.msra.gmra.mxu0 %vm478_vm4, %v1253_v15 }
 0xfff   :  { %8723 = vmatpush3.msra.mxu0 %v1482_v6  ;;  %8730 = vmatprep.mubr.msk.f32.mxu0 %vm478_vm4, %v1471_v19  ;;  %v10231_v19 = vld [vmem:[%s9925_s17 + $0x38] sm:$0xff] }
0x1000   :  { %8724 = vmatprep.subr.mxu0 %v1481_v18 }
0x1001   :  { %8725 = vmatpush3.msra.mxu0 %v1481_v18 }
0x1002   :  { %8726 = vmatprep.subr.mxu0 %v1480_v20 }
0x1003   :  { %8727 = vmatpush3.msra.mxu0 %v1480_v20  ;;  %v10235_v20 = vld [vmem:[%s9925_s17 + $0x30] sm:$0xff] }
0x1004   :  { %8728 = vmatprep.subr.mxu0 %v1479_v22 }
0x1005   :  { %8729 = vmatpush3.msra.mxu0 %v1479_v22  ;;  %v1476_v35 = vld [vmem:[#allocation3 + $0x28] sm:$0xff] }
0x1006   :  { %8731 = vmatmul.mubr.msk.f32.vlgmr.msra.gmra.mxu0 %vm478_vm4, %v1472_v23  ;;  %8764 = vmatprep.subr.mxu0 %v9865_v0  ;;  %v10240_v22 = vld [vmem:[%s9925_s17 + $0x28] sm:$0xff]  ;;  %v10245_v23 = vld [vmem:[%s9925_s17 + $0x20] sm:$0xff] }
0x1007   :  { %8733 = vmatprep.mubr.msk.f32.mxu0 %vm478_vm4, %v1473_v25  ;;  %8765 = vmatpush3.msra.mxu0 %v10231_v19 }
0x1008   :  { %8766 = vmatprep.subr.mxu0 %v9865_v0 }
0x1009   :  { %8767 = vmatpush3.msra.mxu0 %v10235_v20 }
0x100a   :  { %8734 = vmatmul.mubr.msk.f32.gmra.mxu0 %vm478_vm4, %v1474_v26  ;;  %8768 = vmatprep.subr.mxu0 %v9865_v0 }
0x100b   :  { %8736 = vmatprep.mubr.msk.f32.mxu0 %vm478_vm4, %v1475_v30  ;;  %8769 = vmatpush3.msra.mxu0 %v10240_v22  ;;  %v8066_v30 = vld [vmem:[%s9920_s13 + $0x1] ss:$0 sm:$0xff]  ;;  %s9890_s13 = smov 21  }
0x100c   :  { %8770 = vmatprep.subr.mxu0 %v9865_v0 }
0x100d   :  { %8771 = vmatpush3.msra.mxu0 %v10245_v23 }
0x100e   :  { %8737 = vmatmul.mubr.msk.f32.gmra.mxu0 %vm478_vm4, %v1476_v35  ;;  %8786 = vmatprep.subr.mxu0 %v9865_v0 }
0x10be   :  { %v1327_v41 = vpop.f32.mrf.mxu0 }
0x10bf   :  { %v1338_v48 = vadd.f32 %v1327_v41, %v10056_v46  ;;  %v1331_v17 = vadd.f32 %v1327_v41, %v1258_v4 }
0x10c0   :  { %v8710_v49 = vpop.f32.mrf.mxu0 }
0x10c1   :  { %1340 = vrot.lane.b32.xlu1 %v1338_v48, %s9868_s18  ;;  %v8048_v5 = vmul.f32 -1.442695, %v1331_v17 }
0x10c3   :  { %9519 = vpow2.f32 %v8048_v5 }
0x10c6   :  { %v8732_v51 = vpop.f32.mrf.mxu0 }
0x10c7   :  { %v1586_v52 = vadd.f32 %v8732_v51, %v10214_v50 }
0x10c8   :  { %v1580_v55 = vpop.f32.mrf.mxu0 }
0x10c9   :  { %1620 = vst.msk [vmem:[#allocation5 + $0x8] sm:$0xff] %vm421_vm3, %v1586_v52  ;;  %v1581_v11 = vadd.f32 %v10214_v50, %v1580_v55 }
0x10ca   :  { %v8735_v56 = vpop.f32.mrf.mxu0 }
0x10cb   :  { %1619 = vst.msk [vmem:[#allocation5] sm:$0xff] %vm421_vm3, %v1581_v11  ;;  %v1596_v59 = vadd.f32 %v8735_v56, %v10214_v50 }
0x10cc   :  { %v1590_v61 = vpop.f32.mrf.mxu0 }
0x10cd   :  { %1622 = vst.msk [vmem:[#allocation5 + $0x18] sm:$0xff] %vm421_vm3, %v1596_v59  ;;  %v1591_v63 = vadd.f32 %v10214_v50, %v1590_v61 }
0x10ce   :  { %v8738_v13 = vpop.f32.mrf.mxu0 }
0x10cf   :  { %1621 = vst.msk [vmem:[#allocation5 + $0x10] sm:$0xff] %vm421_vm3, %v1591_v63  ;;  %v1606_v2 = vadd.f32 %v8738_v13, %v10214_v50 }
0x10d0   :  { %v1600_v16 = vpop.f32.mrf.mxu0  ;;  %v9520_v6 = vpop.eup %9519 }
0x10d1   :  { %1624 = vst.msk [vmem:[#allocation5 + $0x28] sm:$0xff] %vm421_vm3, %v1606_v2  ;;  %v1601_v3 = vadd.f32 %v10214_v50, %v1600_v16  ;;  %v1335_v7 = vadd.f32 1.0, %v9520_v6 }
0x10d2   :  { %v1634_v61 = vld [vmem:[#allocation5] sm:$0xff] }
0x10d3   :  { %1623 = vst.msk [vmem:[#allocation5 + $0x20] sm:$0xff] %vm421_vm3, %v1601_v3  ;;  %9521 = vrcp.f32 %v1335_v7 }
0x10e0   :  { %v9522_v8 = vpop.eup %9521 }
0x10e1   :  { %v1350_v25 = vsub.f32 1.0, %v9522_v8  ;;  %v1356_v35 = vmul.f32 %v9522_v8, %v10196_v14 }
0x1133   :  { %v1341_v9 = vpop.permute.xlu1 %1340 }
0x1134   :  { %v1343_v10 = vmul.f32 %v9522_v8, %v1341_v9  ;;  %v1365_v9 = vld [vmem:[#allocation2 + $0x38] sm:$0xff] }
0x1136   :  { %1345 = vrot.lane.b32.xlu0 %v1343_v10, %s9868_s18 }
0x11a8   :  { %v1346_v12 = vpop.permute.xlu0 %1345 }
0x11a9   :  { %v1348_v15 = vadd.f32 %v1346_v12, %v1258_v4 }
0x11ab   :  { %9523 = vtanh.f32 %v1348_v15 }
0x11b8   :  { %v9524_v18 = vpop.eup %9523 }
0x11b9   :  { %1352 = vrot.lane.b32.xlu1 %v9524_v18, %s9871_s23 }
0x11bd   :  { %1717 = vrot.lane.b32.xlu1 %v8066_v30, %s9868_s18 }
0x122b   :  { %v1353_v26 = vpop.permute.xlu1 %1352 }
0x122c   :  { %v1355_v41 = vmul.f32 %v1353_v26, %v1350_v25 }
0x122e   :  { %v10253_v48 = vadd.f32 %v1356_v35, %v1355_v41 }
0x122f   :  { %v10281_v55 = vpop.permute.xlu1 %1717 }
0x1230   :  { %1359 = vrot.lane.b32.xlu0 %v10253_v48, %s9871_s23 }
0x12a2   :  { %v1360_v49 = vpop.permute.xlu0 %1359 }
0x12a3   :  { %1363 = vst.msk [vmem:[#allocation3 + $0x30] sm:$0xff] %vm478_vm4, %v1360_v49  ;;  %8720 = vmatmul.mubr.msk.f32.vlgmr.msra.gmra.mxu1 %vm478_vm4, %v1360_v49 }
0x12a4   :  { %8743 = vmatpush3.msra.mxu1 %v10231_v19  ;;  %8750 = vmatprep.mubr.msk.f32.mxu1 %vm9869_vm2, %v9865_v0 }
0x12a5   :  { %8744 = vmatprep.subr.mxu1 %v9865_v0 }
0x12a6   :  { %8745 = vmatpush3.msra.mxu1 %v10235_v20 }
0x12a7   :  { %8746 = vmatprep.subr.mxu1 %v9865_v0 }
0x12a8   :  { %8747 = vmatpush3.msra.mxu1 %v10240_v22 }
0x12a9   :  { %8748 = vmatprep.subr.mxu1 %v9865_v0 }
0x12aa   :  { %8749 = vmatpush3.msra.mxu1 %v10245_v23  ;;  %v1477_v14 = vld [vmem:[#allocation3 + $0x30] sm:$0xff] }
0x12ab   :  { %8751 = vmatmul.mubr.f32.vlgmr.msra.gmra.mxu1 %v9865_v0  ;;  %8739 = vmatprep.mubr.msk.f32.mxu0 %vm478_vm4, %v1477_v14 }
0x12ac   :  { %8753 = vmatprep.subr.mxu1 %v9865_v0  ;;  %8761 = vmatprep.mubr.msk.f32.mxu1 %vm9869_vm2, %v9865_v0 }
0x12ad   :  { %8754 = vmatpush3.msra.mxu1 %v10231_v19 }
0x12ae   :  { %8755 = vmatprep.subr.mxu1 %v9865_v0 }
0x12af   :  { %8756 = vmatpush3.msra.mxu1 %v10235_v20 }
0x12b0   :  { %8757 = vmatprep.subr.mxu1 %v9865_v0 }
0x12b1   :  { %8758 = vmatpush3.msra.mxu1 %v10240_v22 }
0x12b2   :  { %8759 = vmatprep.subr.mxu1 %v9865_v0 }
0x12b3   :  { %8760 = vmatpush3.msra.mxu1 %v10245_v23 }
0x12b4   :  { %8775 = vmatprep.subr.mxu1 %v9865_v0 }
0x1363   :  { %v1434_v51 = vpop.f32.mrf.mxu1 }
0x1364   :  { %v1445_v8 = vadd.f32 %v1434_v51, %v10056_v46  ;;  %v1438_v10 = vadd.f32 %v1434_v51, %v1365_v9 }
0x1365   :  { %v8721_v52 = vpop.f32.mrf.mxu1 }
0x1366   :  { %v8050_v12 = vmul.f32 -1.442695, %v1438_v10 }
0x136b   :  { %v1701_v11 = vpop.f32.mrf.mxu1 }
0x136c   :  { %v1720_v56 = vadd.f32 %v10281_v55, %v1701_v11  ;;  %v1705_v63 = vadd.f32 %v1701_v11, %v1634_v61 }
0x136d   :  { %v8752_v59 = vpop.f32.mrf.mxu1 }
0x136e   :  { %1722 = vrot.lane.b32.xlu0 %v1720_v56, %s9868_s18  ;;  %v8065_v13 = vmul.f32 -1.442695, %v1705_v63 }
0x1370   :  { %9525 = vpow2.f32 %v8065_v13 }
0x137d   :  { %v9526_v2 = vpop.eup %9525 }
0x137e   :  { %v1709_v16 = vadd.f32 1.0, %v9526_v2 }
0x1380   :  { %9527 = vrcp.f32 %v1709_v16 }
0x138d   :  { %v9528_v3 = vpop.eup %9527 }
0x138e   :  { %v1732_v25 = vsub.f32 1.0, %v9528_v3  ;;  %v1738_v30 = vmul.f32 0.0, %v9528_v3 }
0x13e0   :  { %v1723_v4 = vpop.permute.xlu0 %1722 }
0x13e1   :  { %v1725_v17 = vmul.f32 %v9528_v3, %v1723_v4 }
0x13e3   :  { %1727 = vrot.lane.b32.xlu1 %v1725_v17, %s9868_s18 }
0x1455   :  { %v1728_v5 = vpop.permute.xlu1 %1727 }
0x1456   :  { %v1730_v6 = vadd.f32 %v1728_v5, %v1634_v61 }
0x1458   :  { %9529 = vtanh.f32 %v1730_v6 }
0x1459   :  { %9531 = vpow2.f32 %v8050_v12 }
0x1465   :  { %v9530_v7 = vpop.eup %9529 }
0x1466   :  { %1734 = vrot.lane.b32.xlu0 %v9530_v7, %s9871_s23  ;;  %v9532_v15 = vpop.eup %9531 }
0x1467   :  { %v1442_v18 = vadd.f32 1.0, %v9532_v15 }
0x1469   :  { %9533 = vrcp.f32 %v1442_v18 }
0x146a   :  { %1447 = vrot.lane.b32.xlu0 %v1445_v8, %s9868_s18 }
0x1476   :  { %v9534_v49 = vpop.eup %9533 }
0x1477   :  { %v1457_v59 = vsub.f32 1.0, %v9534_v49  ;;  %v1463_v63 = vmul.f32 %v9534_v49, %v10253_v48  ;;  %v1741_v48 = vld [vmem:[#allocation5 + $0x8] sm:$0xff] }
0x14d8   :  { %v1735_v26 = vpop.permute.xlu0 %1734 }
0x14d9   :  { %v1737_v35 = vmul.f32 %v1735_v26, %v1732_v25 }
0x14db   :  { %v1739_v41 = vadd.f32 %v1738_v30, %v1737_v35 }
0x14dc   :  { %v1448_v14 = vpop.permute.xlu0 %1447 }
0x14dd   :  { %v1450_v52 = vmul.f32 %v9534_v49, %v1448_v14  ;;  %1743 = vrot.lane.b32.xlu1 %v1739_v41, %s9871_s23 }
0x14df   :  { %1452 = vrot.lane.b32.xlu0 %v1450_v52, %s9868_s18 }
0x154f   :  { %v1744_v46 = vpop.permute.xlu1 %1743 }
0x1550   :  { %8762 = vmatmul.mubr.msk.f32.vlgmr.msra.gmra.mxu1 %vm478_vm4, %v1744_v46 }
0x1551   :  { %v1453_v51 = vpop.permute.xlu0 %1452  ;;  %8776 = vmatpush3.msra.mxu1 %v10231_v19  ;;  %8783 = vmatprep.mubr.msk.f32.mxu1 %vm9869_vm2, %v9865_v0 }
0x1552   :  { %v1455_v11 = vadd.f32 %v1453_v51, %v1365_v9  ;;  %8777 = vmatprep.subr.mxu1 %v9865_v0 }
0x1553   :  { %8778 = vmatpush3.msra.mxu1 %v10235_v20 }
0x1554   :  { %9535 = vtanh.f32 %v1455_v11  ;;  %8779 = vmatprep.subr.mxu1 %v9865_v0 }
0x1555   :  { %8780 = vmatpush3.msra.mxu1 %v10240_v22 }
0x1556   :  { %8781 = vmatprep.subr.mxu1 %v9865_v0 }
0x1557   :  { %8782 = vmatpush3.msra.mxu1 %v10245_v23 }
0x1558   :  { %8797 = vmatprep.subr.mxu1 %v9865_v0 }
0x1561   :  { %v9536_v56 = vpop.eup %9535 }
0x1562   :  { %1459 = vrot.lane.b32.xlu0 %v9536_v56, %s9871_s23 }
0x15d4   :  { %v1460_v61 = vpop.permute.xlu0 %1459 }
0x15d5   :  { %v1462_v13 = vmul.f32 %v1460_v61, %v1457_v59 }
0x15d7   :  { %v1464_v2 = vadd.f32 %v1463_v63, %v1462_v13  ;;  %v1845_v63 = vld [vmem:[#allocation5 + $0x10] sm:$0xff] }
0x15d9   :  { %1466 = vrot.lane.b32.xlu0 %v1464_v2, %s9871_s23 }
0x1610   :  { %v1813_v16 = vpop.f32.mrf.mxu1 }
0x1611   :  { %v1824_v3 = vadd.f32 %v1813_v16, %v10281_v55  ;;  %v1817_v6 = vadd.f32 %v1813_v16, %v1741_v48 }
0x1612   :  { %v8763_v4 = vpop.f32.mrf.mxu1 }
0x1613   :  { %1826 = vrot.lane.b32.xlu1 %v1824_v3, %s9868_s18  ;;  %v8068_v7 = vmul.f32 -1.442695, %v1817_v6 }
0x1615   :  { %9537 = vpow2.f32 %v8068_v7 }
0x1622   :  { %v9538_v8 = vpop.eup %9537 }
0x1623   :  { %v1821_v9 = vadd.f32 1.0, %v9538_v8 }
0x1625   :  { %9539 = vrcp.f32 %v1821_v9 }
0x1632   :  { %v9540_v10 = vpop.eup %9539 }
0x1633   :  { %v1836_v52 = vsub.f32 1.0, %v9540_v10  ;;  %v1842_v51 = vmul.f32 %v9540_v10, %v1739_v41 }
0x164b   :  { %v10307_v17 = vpop.permute.xlu0 %1466 }
0x164c   :  { %1470 = vst.msk [vmem:[#allocation3 + $0x38] sm:$0xff] %vm478_vm4, %v10307_v17 }
0x1653   :  { %v1478_v5 = vld [vmem:[#allocation3 + $0x38] sm:$0xff] }
0x1654   :  { %8740 = vmatmul.mubr.msk.f32.gmra.mxu0 %vm478_vm4, %v1478_v5 }
0x1655   :  { %8772 = vmatprep.mubr.msk.f32.mxu0 %vm9869_vm2, %v9865_v0 }
0x1685   :  { %v1827_v12 = vpop.permute.xlu1 %1826 }
0x1686   :  { %v1829_v15 = vmul.f32 %v9540_v10, %v1827_v12 }
0x1688   :  { %1831 = vrot.lane.b32.xlu1 %v1829_v15, %s9868_s18 }
0x16fa   :  { %v1832_v18 = vpop.permute.xlu1 %1831 }
0x16fb   :  { %v1834_v25 = vadd.f32 %v1832_v18, %v1741_v48 }
0x16fd   :  { %9541 = vtanh.f32 %v1834_v25 }
0x170a   :  { %v9542_v26 = vpop.eup %9541 }
0x170b   :  { %1838 = vrot.lane.b32.xlu1 %v9542_v26, %s9871_s23 }
0x1714   :  { %v8741_v30 = vpop.f32.mrf.mxu0 }
0x1715   :  { %v1616_v35 = vadd.f32 %v8741_v30, %v10214_v50 }
0x1716   :  { %v1610_v49 = vpop.f32.mrf.mxu0 }
0x1717   :  { %1626 = vst.msk [vmem:[#allocation5 + $0x38] sm:$0xff] %vm421_vm3, %v1616_v35  ;;  %v1611_v14 = vadd.f32 %v10214_v50, %v1610_v49  ;;  %v1949_v49 = vld [vmem:[#allocation5 + $0x18] sm:$0xff] }
0x1719   :  { %1625 = vst.msk [vmem:[#allocation5 + $0x30] sm:$0xff] %vm421_vm3, %v1611_v14 }
0x177d   :  { %v1839_v46 = vpop.permute.xlu1 %1838 }
0x177e   :  { %v1841_v11 = vmul.f32 %v1839_v46, %v1836_v52 }
0x1780   :  { %v1843_v56 = vadd.f32 %v1842_v51, %v1841_v11 }
0x1782   :  { %1847 = vrot.lane.b32.xlu1 %v1843_v56, %s9871_s23 }
0x17f4   :  { %v1848_v59 = vpop.permute.xlu1 %1847 }
0x17f5   :  { %8773 = vmatmul.mubr.msk.f32.vlgmr.msra.gmra.mxu0 %vm478_vm4, %v1848_v59 }
0x17f6   :  { %8787 = vmatpush3.msra.mxu0 %v10231_v19  ;;  %8794 = vmatprep.mubr.msk.f32.mxu0 %vm9869_vm2, %v9865_v0 }
0x17f7   :  { %8788 = vmatprep.subr.mxu0 %v9865_v0 }
0x17f8   :  { %8789 = vmatpush3.msra.mxu0 %v10235_v20 }
0x17f9   :  { %8790 = vmatprep.subr.mxu0 %v9865_v0 }
0x17fa   :  { %8791 = vmatpush3.msra.mxu0 %v10240_v22 }
0x17fb   :  { %8792 = vmatprep.subr.mxu0 %v9865_v0 }
0x17fc   :  { %8793 = vmatpush3.msra.mxu0 %v10245_v23 }
0x17fd   :  { %8808 = vmatprep.subr.mxu0 %v9865_v0 }
0x18b5   :  { %v1917_v50 = vpop.f32.mrf.mxu0 }
0x18b6   :  { %v1928_v41 = vadd.f32 %v1917_v50, %v10281_v55  ;;  %v1921_v13 = vadd.f32 %v1917_v50, %v1845_v63 }
0x18b7   :  { %v8774_v61 = vpop.f32.mrf.mxu0 }
0x18b8   :  { %1930 = vrot.lane.b32.xlu0 %v1928_v41, %s9868_s18  ;;  %v8070_v2 = vmul.f32 -1.442695, %v1921_v13 }
0x18ba   :  { %9543 = vpow2.f32 %v8070_v2 }
0x18c7   :  { %v9544_v16 = vpop.eup %9543 }
0x18c8   :  { %v1925_v3 = vadd.f32 1.0, %v9544_v16 }
0x18ca   :  { %9545 = vrcp.f32 %v1925_v3 }
0x18d7   :  { %v9546_v4 = vpop.eup %9545 }
0x18d8   :  { %v1940_v9 = vsub.f32 1.0, %v9546_v4  ;;  %v1946_v12 = vmul.f32 %v9546_v4, %v1843_v56 }
0x192a   :  { %v1931_v5 = vpop.permute.xlu0 %1930 }
0x192b   :  { %v1933_v48 = vmul.f32 %v9546_v4, %v1931_v5 }
0x192d   :  { %1935 = vrot.lane.b32.xlu1 %v1933_v48, %s9868_s18 }
0x199f   :  { %v1936_v6 = vpop.permute.xlu1 %1935 }
0x19a0   :  { %v1938_v7 = vadd.f32 %v1936_v6, %v1845_v63 }
0x19a2   :  { %9547 = vtanh.f32 %v1938_v7  ;;  %v2053_v7 = vld [vmem:[#allocation5 + $0x20] sm:$0xff] }
0x19af   :  { %v9548_v8 = vpop.eup %9547 }
0x19b0   :  { %1942 = vrot.lane.b32.xlu0 %v9548_v8, %s9871_s23 }
0x1a22   :  { %v1943_v10 = vpop.permute.xlu0 %1942 }
0x1a23   :  { %v1945_v15 = vmul.f32 %v1943_v10, %v1940_v9 }
0x1a25   :  { %v1947_v18 = vadd.f32 %v1946_v12, %v1945_v15 }
0x1a27   :  { %1951 = vrot.lane.b32.xlu1 %v1947_v18, %s9871_s23 }
0x1a99   :  { %v1952_v25 = vpop.permute.xlu1 %1951 }
0x1a9a   :  { %8784 = vmatmul.mubr.msk.f32.vlgmr.msra.gmra.mxu1 %vm478_vm4, %v1952_v25 }
0x1a9b   :  { %8798 = vmatpush3.msra.mxu1 %v10231_v19  ;;  %8805 = vmatprep.mubr.msk.f32.mxu1 %vm9869_vm2, %v9865_v0 }
0x1a9c   :  { %8799 = vmatprep.subr.mxu1 %v9865_v0 }
0x1a9d   :  { %8800 = vmatpush3.msra.mxu1 %v10235_v20 }
0x1a9e   :  { %8801 = vmatprep.subr.mxu1 %v9865_v0 }
0x1a9f   :  { %8802 = vmatpush3.msra.mxu1 %v10240_v22 }
0x1aa0   :  { %8803 = vmatprep.subr.mxu1 %v9865_v0 }
0x1aa1   :  { %8804 = vmatpush3.msra.mxu1 %v10245_v23 }
0x1aa2   :  { %8819 = vmatprep.subr.mxu1 %v9865_v0 }
0x1b5a   :  { %v2021_v26 = vpop.f32.mrf.mxu1 }
0x1b5b   :  { %v2032_v30 = vadd.f32 %v2021_v26, %v10281_v55  ;;  %v2025_v14 = vadd.f32 %v2021_v26, %v1949_v49 }
0x1b5c   :  { %v8785_v35 = vpop.f32.mrf.mxu1 }
0x1b5d   :  { %2034 = vrot.lane.b32.xlu0 %v2032_v30, %s9868_s18  ;;  %v8072_v52 = vmul.f32 -1.442695, %v2025_v14 }
0x1b5f   :  { %9549 = vpow2.f32 %v8072_v52 }
0x1b6c   :  { %v9550_v46 = vpop.eup %9549 }
0x1b6d   :  { %v2029_v51 = vadd.f32 1.0, %v9550_v46 }
0x1b6f   :  { %9551 = vrcp.f32 %v2029_v51 }
0x1b7c   :  { %v9552_v11 = vpop.eup %9551 }
0x1b7d   :  { %v2044_v63 = vsub.f32 1.0, %v9552_v11  ;;  %v2050_v2 = vmul.f32 %v9552_v11, %v1947_v18 }
0x1bcf   :  { %v2035_v56 = vpop.permute.xlu0 %2034 }
0x1bd0   :  { %v2037_v59 = vmul.f32 %v9552_v11, %v2035_v56 }
0x1bd2   :  { %2039 = vrot.lane.b32.xlu1 %v2037_v59, %s9868_s18 }
0x1c44   :  { %v2040_v50 = vpop.permute.xlu1 %2039 }
0x1c45   :  { %v2042_v41 = vadd.f32 %v2040_v50, %v1949_v49  ;;  %v2157_v50 = vld [vmem:[#allocation5 + $0x28] sm:$0xff] }
0x1c47   :  { %9553 = vtanh.f32 %v2042_v41 }
0x1c54   :  { %v9554_v61 = vpop.eup %9553 }
0x1c55   :  { %2046 = vrot.lane.b32.xlu0 %v9554_v61, %s9871_s23 }
0x1cc7   :  { %v2047_v13 = vpop.permute.xlu0 %2046 }
0x1cc8   :  { %v2049_v16 = vmul.f32 %v2047_v13, %v2044_v63 }
0x1cca   :  { %v2051_v3 = vadd.f32 %v2050_v2, %v2049_v16 }
0x1ccc   :  { %2055 = vrot.lane.b32.xlu1 %v2051_v3, %s9871_s23 }
0x1d3e   :  { %v2056_v4 = vpop.permute.xlu1 %2055 }
0x1d3f   :  { %8795 = vmatmul.mubr.msk.f32.vlgmr.msra.gmra.mxu0 %vm478_vm4, %v2056_v4 }
0x1d40   :  { %8809 = vmatpush3.msra.mxu0 %v10231_v19  ;;  %8816 = vmatprep.mubr.msk.f32.mxu0 %vm9869_vm2, %v9865_v0 }
0x1d41   :  { %8810 = vmatprep.subr.mxu0 %v9865_v0 }
0x1d42   :  { %8811 = vmatpush3.msra.mxu0 %v10235_v20 }
0x1d43   :  { %8812 = vmatprep.subr.mxu0 %v9865_v0 }
0x1d44   :  { %8813 = vmatpush3.msra.mxu0 %v10240_v22 }
0x1d45   :  { %8814 = vmatprep.subr.mxu0 %v9865_v0 }
0x1d46   :  { %8815 = vmatpush3.msra.mxu0 %v10245_v23 }
0x1d47   :  { %8830 = vmatprep.subr.mxu0 %v9865_v0 }
0x1dff   :  { %v2125_v5 = vpop.f32.mrf.mxu0 }
0x1e00   :  { %v2136_v48 = vadd.f32 %v2125_v5, %v10281_v55  ;;  %v2129_v8 = vadd.f32 %v2125_v5, %v2053_v7 }
0x1e01   :  { %v8796_v6 = vpop.f32.mrf.mxu0 }
0x1e02   :  { %2138 = vrot.lane.b32.xlu0 %v2136_v48, %s9868_s18  ;;  %v8074_v9 = vmul.f32 -1.442695, %v2129_v8 }
0x1e04   :  { %9555 = vpow2.f32 %v8074_v9 }
0x1e11   :  { %v9556_v10 = vpop.eup %9555 }
0x1e12   :  { %v2133_v12 = vadd.f32 1.0, %v9556_v10 }
0x1e14   :  { %9557 = vrcp.f32 %v2133_v12 }
0x1e21   :  { %v9558_v15 = vpop.eup %9557 }
0x1e22   :  { %v2148_v49 = vsub.f32 1.0, %v9558_v15  ;;  %v2154_v52 = vmul.f32 %v9558_v15, %v2051_v3 }
0x1e74   :  { %v2139_v18 = vpop.permute.xlu0 %2138 }
0x1e75   :  { %v2141_v25 = vmul.f32 %v9558_v15, %v2139_v18  ;;  %v2261_v15 = vld [vmem:[#allocation5 + $0x30] sm:$0xff] }
0x1e77   :  { %2143 = vrot.lane.b32.xlu1 %v2141_v25, %s9868_s18 }
0x1ee9   :  { %v2144_v26 = vpop.permute.xlu1 %2143 }
0x1eea   :  { %v2146_v30 = vadd.f32 %v2144_v26, %v2053_v7 }
0x1eec   :  { %9559 = vtanh.f32 %v2146_v30 }
0x1ef9   :  { %v9560_v35 = vpop.eup %9559 }
0x1efa   :  { %2150 = vrot.lane.b32.xlu0 %v9560_v35, %s9871_s23 }
0x1f6c   :  { %v2151_v14 = vpop.permute.xlu0 %2150 }
0x1f6d   :  { %v2153_v46 = vmul.f32 %v2151_v14, %v2148_v49 }
0x1f6f   :  { %v2155_v51 = vadd.f32 %v2154_v52, %v2153_v46 }
0x1f71   :  { %2159 = vrot.lane.b32.xlu1 %v2155_v51, %s9871_s23 }
0x1fe3   :  { %v2160_v11 = vpop.permute.xlu1 %2159 }
0x1fe4   :  { %8806 = vmatmul.mubr.msk.f32.vlgmr.msra.gmra.mxu1 %vm478_vm4, %v2160_v11 }
0x1fe5   :  { %8820 = vmatpush3.msra.mxu1 %v10231_v19  ;;  %8827 = vmatprep.mubr.msk.f32.mxu1 %vm9869_vm2, %v9865_v0 }
0x1fe6   :  { %8821 = vmatprep.subr.mxu1 %v9865_v0 }
0x1fe7   :  { %8822 = vmatpush3.msra.mxu1 %v10235_v20 }
0x1fe8   :  { %8823 = vmatprep.subr.mxu1 %v9865_v0 }
0x1fe9   :  { %8824 = vmatpush3.msra.mxu1 %v10240_v22 }
0x1fea   :  { %8825 = vmatprep.subr.mxu1 %v9865_v0 }
0x1feb   :  { %8826 = vmatpush3.msra.mxu1 %v10245_v23 }
0x1fec   :  { %8849 = vmatprep.subr.mxu1 %v9865_v0 }
0x20a4   :  { %v2229_v56 = vpop.f32.mrf.mxu1 }
0x20a5   :  { %v2240_v19 = vadd.f32 %v2229_v56, %v10281_v55  ;;  %v2233_v41 = vadd.f32 %v2229_v56, %v2157_v50 }
0x20a6   :  { %v8807_v59 = vpop.f32.mrf.mxu1 }
0x20a7   :  { %2242 = vrot.lane.b32.xlu0 %v2240_v19, %s9868_s18  ;;  %v8076_v61 = vmul.f32 -1.442695, %v2233_v41 }
0x20a9   :  { %9561 = vpow2.f32 %v8076_v61 }
0x20b6   :  { %v9562_v20 = vpop.eup %9561 }
0x20b7   :  { %v2237_v63 = vadd.f32 1.0, %v9562_v20 }
0x20b9   :  { %9563 = vrcp.f32 %v2237_v63 }
0x20c6   :  { %v9564_v22 = vpop.eup %9563 }
0x20c7   :  { %v2252_v4 = vsub.f32 1.0, %v9564_v22  ;;  %v2258_v48 = vmul.f32 %v9564_v22, %v2155_v51 }
0x2119   :  { %v2243_v13 = vpop.permute.xlu0 %2242 }
0x211a   :  { %v2245_v2 = vmul.f32 %v9564_v22, %v2243_v13  ;;  %v2365_v22 = vld [vmem:[#allocation5 + $0x38] sm:$0xff] }
0x211c   :  { %2247 = vrot.lane.b32.xlu1 %v2245_v2, %s9868_s18 }
0x218e   :  { %v2248_v23 = vpop.permute.xlu1 %2247 }
0x218f   :  { %v2250_v16 = vadd.f32 %v2248_v23, %v2157_v50 }
0x2191   :  { %9565 = vtanh.f32 %v2250_v16 }
0x219e   :  { %v9566_v3 = vpop.eup %9565 }
0x219f   :  { %2254 = vrot.lane.b32.xlu0 %v9566_v3, %s9871_s23 }
0x2211   :  { %v2255_v5 = vpop.permute.xlu0 %2254 }
0x2212   :  { %v2257_v6 = vmul.f32 %v2255_v5, %v2252_v4  ;;  %v2648_v5 = vld [vmem:[%s7993_s5] sm:$0xff] }
0x2214   :  { %v2259_v7 = vadd.f32 %v2258_v48, %v2257_v6  ;;  %v2475_v48 = vld [vmem:[%s10414_s11 + $0x30] sm:$0xff]  ;;  %v2564_v6 = vld [vmem:[%s10419_s15 + $0x38] sm:$0xff] }
0x2216   :  { %2263 = vrot.lane.b32.xlu1 %v2259_v7, %s9871_s23 }
0x2288   :  { %v2264_v8 = vpop.permute.xlu1 %2263 }
0x2289   :  { %8817 = vmatmul.mubr.msk.f32.vlgmr.msra.gmra.mxu0 %vm478_vm4, %v2264_v8  ;;  %v2474_v8 = vld [vmem:[%s10414_s11 + $0x28] sm:$0xff] }
0x228a   :  { %8846 = vmatprep.mubr.msk.f32.mxu0 %vm9869_vm2, %v9865_v0 }
0x2349   :  { %v2333_v9 = vpop.f32.mrf.mxu0 }
0x234a   :  { %v2344_v10 = vadd.f32 %v2333_v9, %v10281_v55  ;;  %v2337_v18 = vadd.f32 %v2333_v9, %v2261_v15  ;;  %v2562_v9 = vld [vmem:[%s10419_s15 + $0x28] sm:$0xff] }
0x234b   :  { %v8818_v12 = vpop.f32.mrf.mxu0 }
0x234c   :  { %2346 = vrot.lane.b32.xlu0 %v2344_v10, %s9868_s18  ;;  %v8078_v25 = vmul.f32 -1.442695, %v2337_v18  ;;  %v2473_v10 = vld [vmem:[%s10414_s11 + $0x20] sm:$0xff]  ;;  %v2560_v18 = vld [vmem:[%s10419_s15 + $0x18] sm:$0xff] }
0x234d   :  { %v2561_v12 = vld [vmem:[%s10419_s15 + $0x20] sm:$0xff] }
0x234e   :  { %9567 = vpow2.f32 %v8078_v25 }
0x235b   :  { %v9568_v26 = vpop.eup %9567 }
0x235c   :  { %v2341_v30 = vadd.f32 1.0, %v9568_v26 }
0x235e   :  { %9569 = vrcp.f32 %v2341_v30  ;;  %v2471_v30 = vld [vmem:[%s10414_s11 + $0x10] sm:$0xff] }
0x236b   :  { %v9570_v35 = vpop.eup %9569 }
0x236c   :  { %v2356_v11 = vsub.f32 1.0, %v9570_v35  ;;  %v2362_v19 = vmul.f32 %v9570_v35, %v2259_v7  ;;  %v2563_v7 = vld [vmem:[%s10419_s15 + $0x30] sm:$0xff] }
0x23be   :  { %v2347_v49 = vpop.permute.xlu0 %2346 }
0x23bf   :  { %v2349_v14 = vmul.f32 %v9570_v35, %v2347_v49  ;;  %v2559_v35 = vld [vmem:[%s10419_s15 + $0x10] sm:$0xff]  ;;  %v2470_v49 = vld [vmem:[%s10414_s11 + $0x8] sm:$0xff] }
0x23c1   :  { %2351 = vrot.lane.b32.xlu1 %v2349_v14, %s9868_s18  ;;  %v2558_v14 = vld [vmem:[%s10419_s15 + $0x8] sm:$0xff] }
0x2433   :  { %v2352_v52 = vpop.permute.xlu1 %2351 }
0x2434   :  { %v2354_v46 = vadd.f32 %v2352_v52, %v2261_v15  ;;  %v2472_v15 = vld [vmem:[%s10414_s11 + $0x18] sm:$0xff]  ;;  %v2469_v52 = vld [vmem:[%s10414_s11] sm:$0xff] }
0x2436   :  { %9571 = vtanh.f32 %v2354_v46  ;;  %v2557_v46 = vld [vmem:[%s10419_s15] sm:$0xff]  ;;  %s8013_s15 = sld [smem:[%s11723_s0 + %s9876_s7]]  }
0x2443   :  { %v9572_v51 = vpop.eup %9571 }
0x2444   :  { %2358 = vrot.lane.b32.xlu0 %v9572_v51, %s9871_s23 }
0x24b6   :  { %v2359_v56 = vpop.permute.xlu0 %2358 }
0x24b7   :  { %v2361_v59 = vmul.f32 %v2359_v56, %v2356_v11  ;;  %v159_v11 = vsub.s32 1, %v10015_v21  ;;  %v8090_v56 = vld [vmem:[%s10456_s20] ss:$0 sm:$0xff] }
0x24b9   :  { %v10392_v50 = vadd.f32 %v2362_v19, %v2361_v59  ;;  %v9863_v19 = vld [vmem:[%s10013_s22] sm:$0x7]  ;;  %s9892_s22 = smov 23  }
0x24ba   :  { %v10462_v59 = vrot.slane %v9863_v19, %v159_v11  ;;  %s11182_s26 = sld [smem:[%s11723_s0 + %s9892_s22]]  }
0x24bb   :  { %2367 = vrot.lane.b32.xlu1 %v10392_v50, %s9871_s23 }
0x252d   :  { %v2368_v41 = vpop.permute.xlu1 %2367 }
0x252e   :  { %8828 = vmatmul.mubr.msk.f32.vlgmr.msra.gmra.mxu1 %vm478_vm4, %v2368_v41  ;;  %v10467_v41 = vadd.f32 %v10065_v62, %v10462_v59 }
0x252f   :  { %8865 = vmatprep.mubr.msk.f32.mxu1 %vm9869_vm2, %v9865_v0  ;;  %8850 = vmatpush3.msra.mxu1 %v2564_v6 }
0x2530   :  { %8851 = vmatprep.subr.mxu1 %v9865_v0 }
0x2531   :  { %8852 = vmatpush3.msra.mxu1 %v2563_v7 }
0x2532   :  { %8853 = vmatprep.subr.mxu1 %v9865_v0 }
0x2533   :  { %8854 = vmatpush3.msra.mxu1 %v2562_v9 }
0x2534   :  { %8855 = vmatprep.subr.mxu1 %v9865_v0 }
0x2535   :  { %8856 = vmatpush3.msra.mxu1 %v2561_v12 }
0x2536   :  { %8857 = vmatprep.subr.mxu1 %v9865_v0 }
0x2537   :  { %8858 = vmatpush3.msra.mxu1 %v2560_v18 }
0x2538   :  { %8859 = vmatprep.subr.mxu1 %v9865_v0 }
0x2539   :  { %8860 = vmatpush3.msra.mxu1 %v2559_v35 }
0x253a   :  { %8861 = vmatprep.subr.mxu1 %v9865_v0 }
0x253b   :  { %8862 = vmatpush3.msra.mxu1 %v2558_v14  ;;  %v10541_v14 = vld [vmem:[%s10495_s29] sm:$0xff] }
0x253c   :  { %8863 = vmatprep.subr.mxu1 %v9865_v0 }
0x253d   :  { %8864 = vmatpush3.msra.mxu1 %v2557_v46 }
0x253e   :  { %8875 = vmatprep.subr.mxu1 %v9865_v0 }
0x25ee   :  { %v2437_v61 = vpop.f32.mrf.mxu1 }
0x25ef   :  { %v2448_v20 = vadd.f32 %v2437_v61, %v10281_v55  ;;  %v2441_v13 = vadd.f32 %v2437_v61, %v2365_v22 }
0x25f0   :  { %v8829_v63 = vpop.f32.mrf.mxu1 }
0x25f1   :  { %2450 = vrot.lane.b32.xlu0 %v2448_v20, %s9868_s18  ;;  %v8080_v2 = vmul.f32 -1.442695, %v2441_v13 }
0x25f3   :  { %9573 = vpow2.f32 %v8080_v2 }
0x2600   :  { %v9574_v23 = vpop.eup %9573 }
0x2601   :  { %v2445_v16 = vadd.f32 1.0, %v9574_v23 }
0x2603   :  { %9575 = vrcp.f32 %v2445_v16 }
0x2610   :  { %v10404_v3 = vpop.eup %9575 }
0x2611   :  { %v2460_v61 = vsub.f32 1.0, %v10404_v3  ;;  %v2466_v21 = vmul.f32 %v10404_v3, %v10392_v50 }
0x2663   :  { %v2451_v4 = vpop.permute.xlu0 %2450 }
0x2664   :  { %v2453_v55 = vmul.f32 %v10404_v3, %v2451_v4  ;;  %v2655_v3 = vld [vmem:[%s7994_s25] sm:$0xff]  ;;  %v10498_v4 = vld [vmem:[%s10495_s29 + $0x18] sm:$0xff] }
0x2666   :  { %2455 = vrot.lane.b32.xlu1 %v2453_v55, %s9868_s18  ;;  %v10501_v55 = vld [vmem:[%s10495_s29 + $0x10] sm:$0xff] }
0x266a   :  { %2650 = vrot.lane.b32.xlu1 %v2648_v5, %s9875_s6  ;;  %v8081_v5 = vld [vmem:[%s7989_s2] ss:$0 sm:$0xff]  ;;  %s9884_s6 = smov 11   ;;  %s9894_s2 = smov 27  }
0x266b   :  { %s7992_s19 = sld [smem:[%s11723_s0 + %s9884_s6]]  }
0x266c   :  { %s10960_s6 = sld [smem:[%s11723_s0 + %s9890_s13]]   ;;  %s9897_s13 = smov 20  }
0x266e   :  { %446 = vrot.lane.b32.xlu1 %v10032_v31, %s9876_s7  ;;  %v2476_v31 = vld [vmem:[%s10414_s11 + $0x38] sm:$0xff] }
0x266f   :  { %8831 = vmatpush3.msra.mxu0 %v2476_v31  ;;  %v8083_v31 = vld [vmem:[%s7991_s8] ss:$0 sm:$0xff] }
0x2670   :  { %8832 = vmatprep.subr.mxu0 %v9865_v0 }
0x2671   :  { %8833 = vmatpush3.msra.mxu0 %v2475_v48  ;;  %v2642_v18 = vld [vmem:[%s7992_s19] sm:$0xff] }
0x2672   :  { %8834 = vmatprep.subr.mxu0 %v9865_v0 }
0x2673   :  { %8835 = vmatpush3.msra.mxu0 %v2474_v8 }
0x2674   :  { %8836 = vmatprep.subr.mxu0 %v9865_v0 }
0x2675   :  { %8837 = vmatpush3.msra.mxu0 %v2473_v10 }
0x2676   :  { %8838 = vmatprep.subr.mxu0 %v9865_v0 }
0x2677   :  { %8839 = vmatpush3.msra.mxu0 %v2472_v15 }
0x2678   :  { %8840 = vmatprep.subr.mxu0 %v9865_v0 }
0x2679   :  { %8841 = vmatpush3.msra.mxu0 %v2471_v30 }
0x267a   :  { %8842 = vmatprep.subr.mxu0 %v9865_v0 }
0x267b   :  { %8843 = vmatpush3.msra.mxu0 %v2470_v49  ;;  %v10535_v49 = vld [vmem:[%s10495_s29 + $0x8] sm:$0xff] }
0x267c   :  { %8844 = vmatprep.subr.mxu0 %v9865_v0 }
0x267d   :  { %8845 = vmatpush3.msra.mxu0 %v2469_v52 }
0x267e   :  { %8868 = vmatprep.subr.mxu0 %v9865_v0 }
0x26d8   :  { %v2456_v25 = vpop.permute.xlu1 %2455 }
0x26d9   :  { %v2458_v26 = vadd.f32 %v2456_v25, %v2365_v22 }
0x26db   :  { %9577 = vtanh.f32 %v2458_v26 }
0x26dc   :  { %v2651_v22 = vpop.permute.xlu1 %2650 }
0x26e0   :  { %v447_v62 = vpop.permute.xlu1 %446 }
0x26e8   :  { %v9578_v51 = vpop.eup %9577 }
0x26e9   :  { %2462 = vrot.lane.b32.xlu0 %v9578_v51, %s9871_s23 }
0x26ed   :  { %2833 = vrot.lane.b32.xlu0 %v8090_v56, %s9868_s18 }
0x26f1   :  { %448 = vrot.lane.b32.xlu0 %v10467_v41, %s9876_s7 }
0x275b   :  { %v2463_v20 = vpop.permute.xlu0 %2462 }
0x275c   :  { %v2465_v63 = vmul.f32 %v2463_v20, %v2460_v61 }
0x275e   :  { %v2467_v13 = vadd.f32 %v2466_v21, %v2465_v63 }
0x275f   :  { %v10474_v2 = vpop.permute.xlu0 %2833 }
0x2760   :  { %v2468_v23 = vsel %vm478_vm4, %v10307_v17, %v2467_v13  ;;  %v2656_v17 = vld [vmem:[%s7994_s25 + $0x8] sm:$0xf]  ;;  %s7995_s25 = sld [smem:[%s11723_s0 + %s9885_s21]]  }
0x2761   :  { %8847 = vmatmul.mubr.msk.f32.vlgmr.msra.gmra.mxu0 %vm544_vm5, %v2468_v23  ;;  %8866 = vmatmul.mubr.msk.f32.vlgmr.msra.gmra.mxu1 %vm544_vm5, %v2468_v23  ;;  %s11164_s21 = sld [smem:[%s11723_s0 + %s9891_s16]]   ;;  %s9898_s16 = smov 33  }
0x2762   :  { %8872 = vmatprep.mubr.msk.f32.mxu0 %vm9869_vm2, %v9865_v0  ;;  %8883 = vmatprep.mubr.msk.f32.mxu1 %vm9869_vm2, %v9865_v0  ;;  %s11660_s19 = sld [smem:[%s11723_s0 + %s9898_s16]]  }
0x2763   :  { %v449_v50 = vpop.permute.xlu0 %448  ;;  %8869 = vmatpush3.msk.msra.mxu0 %vm193_vm0, %v2656_v17  ;;  %8876 = vmatpush3.msra.mxu1 %v10498_v4 }
0x2764   :  { %v479_v16 = vsel %vm478_vm4, %v447_v62, %v449_v50  ;;  %8870 = vmatprep.subr.mxu0 %v9865_v0  ;;  %8877 = vmatprep.subr.mxu1 %v9865_v0 }
0x2765   :  { %496 = vst.msk [vmem:[#allocation2 + $0x40] sm:$0xff] %vm421_vm3, %v479_v16  ;;  %8871 = vmatpush3.msra.mxu0 %v2655_v3  ;;  %8878 = vmatpush3.msra.mxu1 %v10501_v55 }
0x2766   :  { %8886 = vmatprep.subr.mxu0 %v9865_v0  ;;  %8879 = vmatprep.subr.mxu1 %v9865_v0  ;;  %v8085_v52 = vld [vmem:[%s7995_s25] ss:$0 sm:$0xff] }
0x2767   :  { %8880 = vmatpush3.msra.mxu1 %v10535_v49 }
0x2768   :  { %8881 = vmatprep.subr.mxu1 %v9865_v0 }
0x2769   :  { %8882 = vmatpush3.msra.mxu1 %v10541_v14 }
0x276a   :  { %8897 = vmatprep.subr.mxu1 %v9865_v0 }
0x276c   :  { %v2747_v20 = vld [vmem:[#allocation2 + $0x40] sm:$0xff] }
0x2821   :  { %v2553_v48 = vpop.f32.mrf.mxu0  ;;  %v2638_v6 = vpop.f32.mrf.mxu1 }
0x2822   :  { %v2554_v7 = vadd.f32 %v8081_v5, %v2553_v48  ;;  %v2639_v8 = vadd.f32 %v8083_v31, %v2638_v6 }
0x2823   :  { %v8848_v9 = vpop.f32.mrf.mxu0  ;;  %v8867_v10 = vpop.f32.mrf.mxu1 }
0x2824   :  { %2740 = vst.msk [vmem:[%s8012_s12] sm:$0xff] %vm2653_vm6, %v2554_v7  ;;  %v2643_v12 = vmul.f32 0.5, %v2639_v8  ;;  %2741 = vst.msk [vmem:[%s8013_s15] sm:$0xff] %vm2653_vm6, %v2639_v8  ;;  %v10576_v9 = vadd.f32 %v10089_v32, %v10462_v59  ;;  %s10946_s12 = sld [smem:[%s11723_s0 + %s9889_s9]]   ;;  %s9896_s9 = smov 28  }
0x2826   :  { %v2644_v15 = vmul.f32 1.442695, %v2643_v12 }
0x2828   :  { %9579 = vpow2.f32 %v2644_v15 }
0x2835   :  { %v9580_v25 = vpop.eup %9579 }
0x2836   :  { %v2646_v26 = vmul.f32 %v9580_v25, %v2642_v18 }
0x2838   :  { %v2647_v30 = vadd.f32 %v2646_v26, %v2554_v7 }
0x283a   :  { %v2654_v35 = vsel %vm2653_vm6, %v2647_v30, %v2651_v22 }
0x283b   :  { %8873 = vmatmul.mubr.msk.f32.vlgmr.msra.gmra.mxu0 %vm168_vm1, %v2654_v35 }
0x283c   :  { %8887 = vmatpush3.msra.mxu0 %v10498_v4  ;;  %8894 = vmatprep.mubr.msk.f32.mxu0 %vm9869_vm2, %v9865_v0 }
0x283d   :  { %8888 = vmatprep.subr.mxu0 %v9865_v0 }
0x283e   :  { %8889 = vmatpush3.msra.mxu0 %v10501_v55 }
0x283f   :  { %8890 = vmatprep.subr.mxu0 %v9865_v0 }
0x2840   :  { %8891 = vmatpush3.msra.mxu0 %v10535_v49 }
0x2841   :  { %8892 = vmatprep.subr.mxu0 %v9865_v0 }
0x2842   :  { %8893 = vmatpush3.msra.mxu0 %v10541_v14 }
0x2843   :  { %8908 = vmatprep.subr.mxu0 %v9865_v0 }
0x28fb   :  { %v2736_v46 = vpop.f32.mrf.mxu0 }
0x28fc   :  { %v10551_v51 = vadd.f32 %v8085_v52, %v2736_v46 }
0x28fd   :  { %v8874_v11 = vpop.f32.mrf.mxu0 }
0x28fe   :  { %8884 = vmatmul.mubr.msk.f32.vlgmr.msra.gmra.mxu1 %vm478_vm4, %v10551_v51 }
0x28ff   :  { %8898 = vmatpush3.msra.mxu1 %v10498_v4  ;;  %8905 = vmatprep.mubr.msk.f32.mxu1 %vm9869_vm2, %v9865_v0 }
0x2900   :  { %8899 = vmatprep.subr.mxu1 %v9865_v0 }
0x2901   :  { %8900 = vmatpush3.msra.mxu1 %v10501_v55 }
0x2902   :  { %8901 = vmatprep.subr.mxu1 %v9865_v0 }
0x2903   :  { %8902 = vmatpush3.msra.mxu1 %v10535_v49 }
0x2904   :  { %8903 = vmatprep.subr.mxu1 %v9865_v0 }
0x2905   :  { %8904 = vmatpush3.msra.mxu1 %v10541_v14 }
0x2906   :  { %8919 = vmatprep.subr.mxu1 %v9865_v0 }
0x29be   :  { %v2817_v56 = vpop.f32.mrf.mxu1 }
0x29bf   :  { %v2836_v19 = vadd.f32 %v10474_v2, %v2817_v56  ;;  %v2821_v21 = vadd.f32 %v2817_v56, %v2747_v20 }
0x29c0   :  { %v8885_v61 = vpop.f32.mrf.mxu1 }
0x29c1   :  { %2838 = vrot.lane.b32.xlu1 %v2836_v19, %s9868_s18  ;;  %v8089_v63 = vmul.f32 -1.442695, %v2821_v21 }
0x29c3   :  { %9581 = vpow2.f32 %v8089_v63 }
0x29d0   :  { %v9582_v22 = vpop.eup %9581 }
0x29d1   :  { %v2825_v13 = vadd.f32 1.0, %v9582_v22 }
0x29d3   :  { %9583 = vrcp.f32 %v2825_v13 }
0x29e0   :  { %v9584_v23 = vpop.eup %9583 }
0x29e1   :  { %v2848_v31 = vsub.f32 1.0, %v9584_v23 }
0x2a33   :  { %v2839_v62 = vpop.permute.xlu1 %2838 }
0x2a34   :  { %v2841_v50 = vmul.f32 %v9584_v23, %v2839_v62 }
0x2a36   :  { %2843 = vrot.lane.b32.xlu0 %v2841_v50, %s9868_s18  ;;  %v10603_v50 = vadd.f32 %v10094_v39, %v10462_v59 }
0x2a3a   :  { %2854 = vrot.lane.b32.xlu0 %v10551_v51, %s9876_s7 }
0x2a3e   :  { %450 = vrot.lane.b32.xlu0 %v10068_v1, %s9876_s7 }
0x2aa8   :  { %v2844_v16 = vpop.permute.xlu0 %2843 }
0x2aa9   :  { %v2846_v17 = vadd.f32 %v2844_v16, %v2747_v20 }
0x2aab   :  { %9585 = vtanh.f32 %v2846_v17 }
0x2aac   :  { %v2855_v5 = vpop.permute.xlu0 %2854 }
0x2aad   :  { %v2857_v6 = vmul.f32 %v9584_v23, %v2855_v5 }
0x2ab0   :  { %v451_v10 = vpop.permute.xlu0 %450 }
0x2ab8   :  { %v9586_v3 = vpop.eup %9585 }
0x2ab9   :  { %2850 = vrot.lane.b32.xlu1 %v9586_v3, %s9871_s23 }
0x2b2b   :  { %v2851_v48 = vpop.permute.xlu1 %2850 }
0x2b2c   :  { %v2853_v7 = vmul.f32 %v2851_v48, %v2848_v31 }
0x2b2e   :  { %v2858_v8 = vadd.f32 %v2857_v6, %v2853_v7 }
0x2b30   :  { %2860 = vrot.lane.b32.xlu1 %v2858_v8, %s9871_s23 }
0x2b34   :  { %452 = vrot.lane.b32.xlu1 %v10576_v9, %s9876_s7 }
0x2ba2   :  { %v2861_v1 = vpop.permute.xlu1 %2860 }
0x2ba3   :  { %2863 = vst.msk [vmem:[#allocation3] sm:$0xff] %vm478_vm4, %v2861_v1  ;;  %8895 = vmatmul.mubr.msk.f32.vlgmr.msra.gmra.mxu0 %vm478_vm4, %v2861_v1 }
0x2ba4   :  { %8909 = vmatpush3.msra.mxu0 %v10498_v4  ;;  %8916 = vmatprep.mubr.msk.f32.mxu0 %vm9869_vm2, %v9865_v0 }
0x2ba5   :  { %8910 = vmatprep.subr.mxu0 %v9865_v0 }
0x2ba6   :  { %v453_v12 = vpop.permute.xlu1 %452  ;;  %8911 = vmatpush3.msra.mxu0 %v10501_v55 }
0x2ba7   :  { %v480_v32 = vsel %vm478_vm4, %v451_v10, %v453_v12  ;;  %8912 = vmatprep.subr.mxu0 %v9865_v0 }
0x2ba8   :  { %497 = vst.msk [vmem:[#allocation2 + $0x48] sm:$0xff] %vm421_vm3, %v480_v32  ;;  %8913 = vmatpush3.msra.mxu0 %v10535_v49 }
0x2ba9   :  { %8914 = vmatprep.subr.mxu0 %v9865_v0 }
0x2baa   :  { %8915 = vmatpush3.msra.mxu0 %v10541_v14 }
0x2bab   :  { %8930 = vmatprep.subr.mxu0 %v9865_v0 }
0x2baf   :  { %v2865_v26 = vld [vmem:[#allocation2 + $0x48] sm:$0xff] }
0x2c63   :  { %v2934_v15 = vpop.f32.mrf.mxu0 }
0x2c64   :  { %v2945_v18 = vadd.f32 %v2934_v15, %v10474_v2  ;;  %v2938_v30 = vadd.f32 %v2934_v15, %v2865_v26 }
0x2c65   :  { %v8896_v25 = vpop.f32.mrf.mxu0 }
0x2c66   :  { %2947 = vrot.lane.b32.xlu0 %v2945_v18, %s9868_s18  ;;  %v8092_v35 = vmul.f32 -1.442695, %v2938_v30 }
0x2c68   :  { %9587 = vpow2.f32 %v8092_v35 }
0x2c75   :  { %v9588_v52 = vpop.eup %9587 }
0x2c76   :  { %v2942_v46 = vadd.f32 1.0, %v9588_v52 }
0x2c78   :  { %9589 = vrcp.f32 %v2942_v46 }
0x2c85   :  { %v9590_v11 = vpop.eup %9589 }
0x2c86   :  { %v2957_v63 = vsub.f32 1.0, %v9590_v11  ;;  %v2963_v13 = vmul.f32 %v9590_v11, %v2858_v8 }
0x2cd8   :  { %v2948_v56 = vpop.permute.xlu0 %2947 }
0x2cd9   :  { %v2950_v19 = vmul.f32 %v9590_v11, %v2948_v56  ;;  %v10630_v11 = vadd.f32 %v10101_v45, %v10462_v59 }
0x2cdb   :  { %2952 = vrot.lane.b32.xlu1 %v2950_v19, %s9868_s18 }
0x2d4d   :  { %v2953_v61 = vpop.permute.xlu1 %2952 }
0x2d4e   :  { %v2955_v20 = vadd.f32 %v2953_v61, %v2865_v26 }
0x2d50   :  { %9591 = vtanh.f32 %v2955_v20 }
0x2d5d   :  { %v9592_v21 = vpop.eup %9591 }
0x2d5e   :  { %2959 = vrot.lane.b32.xlu0 %v9592_v21, %s9871_s23 }
0x2d62   :  { %454 = vrot.lane.b32.xlu0 %v10092_v37, %s9876_s7 }
0x2dd0   :  { %v2960_v22 = vpop.permute.xlu0 %2959 }
0x2dd1   :  { %v2962_v23 = vmul.f32 %v2960_v22, %v2957_v63 }
0x2dd3   :  { %v2964_v62 = vadd.f32 %v2963_v13, %v2962_v23 }
0x2dd4   :  { %v455_v37 = vpop.permute.xlu0 %454 }
0x2dd5   :  { %2966 = vrot.lane.b32.xlu1 %v2964_v62, %s9871_s23 }
0x2dd9   :  { %456 = vrot.lane.b32.xlu1 %v10603_v50, %s9876_s7 }
0x2e47   :  { %v2967_v16 = vpop.permute.xlu1 %2966 }
0x2e48   :  { %2969 = vst.msk [vmem:[#allocation3 + $0x8] sm:$0xff] %vm478_vm4, %v2967_v16  ;;  %8906 = vmatmul.mubr.msk.f32.vlgmr.msra.gmra.mxu1 %vm478_vm4, %v2967_v16 }
0x2e49   :  { %8920 = vmatpush3.msra.mxu1 %v10498_v4  ;;  %8927 = vmatprep.mubr.msk.f32.mxu1 %vm9869_vm2, %v9865_v0 }
0x2e4a   :  { %8921 = vmatprep.subr.mxu1 %v9865_v0 }
0x2e4b   :  { %v457_v17 = vpop.permute.xlu1 %456  ;;  %8922 = vmatpush3.msra.mxu1 %v10501_v55 }
0x2e4c   :  { %v481_v39 = vsel %vm478_vm4, %v455_v37, %v457_v17  ;;  %8923 = vmatprep.subr.mxu1 %v9865_v0 }
0x2e4d   :  { %498 = vst.msk [vmem:[#allocation2 + $0x50] sm:$0xff] %vm421_vm3, %v481_v39  ;;  %8924 = vmatpush3.msra.mxu1 %v10535_v49 }
0x2e4e   :  { %8925 = vmatprep.subr.mxu1 %v9865_v0 }
0x2e4f   :  { %8926 = vmatpush3.msra.mxu1 %v10541_v14 }
0x2e50   :  { %8941 = vmatprep.subr.mxu1 %v9865_v0 }
0x2e54   :  { %v2971_v48 = vld [vmem:[#allocation2 + $0x50] sm:$0xff] }
0x2f08   :  { %v3040_v3 = vpop.f32.mrf.mxu1 }
0x2f09   :  { %v3051_v5 = vadd.f32 %v3040_v3, %v10474_v2  ;;  %v3044_v6 = vadd.f32 %v3040_v3, %v2971_v48 }
0x2f0a   :  { %v8907_v31 = vpop.f32.mrf.mxu1 }
0x2f0b   :  { %3053 = vrot.lane.b32.xlu0 %v3051_v5, %s9868_s18  ;;  %v8094_v7 = vmul.f32 -1.442695, %v3044_v6 }
0x2f0d   :  { %9593 = vpow2.f32 %v8094_v7 }
0x2f1a   :  { %v9594_v8 = vpop.eup %9593 }
0x2f1b   :  { %v3048_v1 = vadd.f32 1.0, %v9594_v8 }
0x2f1d   :  { %9595 = vrcp.f32 %v3048_v1  ;;  %v10657_v1 = vadd.f32 %v10108_v54, %v10462_v59 }
0x2f2a   :  { %v9596_v10 = vpop.eup %9595 }
0x2f2b   :  { %v3063_v26 = vsub.f32 1.0, %v9596_v10  ;;  %v3069_v35 = vmul.f32 %v9596_v10, %v2964_v62 }
0x2f7d   :  { %v3054_v12 = vpop.permute.xlu0 %3053 }
0x2f7e   :  { %v3056_v32 = vmul.f32 %v9596_v10, %v3054_v12 }
0x2f80   :  { %3058 = vrot.lane.b32.xlu1 %v3056_v32, %s9868_s18 }
0x2ff2   :  { %v3059_v15 = vpop.permute.xlu1 %3058 }
0x2ff3   :  { %v3061_v18 = vadd.f32 %v3059_v15, %v2971_v48 }
0x2ff5   :  { %9597 = vtanh.f32 %v3061_v18 }
0x3002   :  { %v9598_v25 = vpop.eup %9597 }
0x3003   :  { %3065 = vrot.lane.b32.xlu0 %v9598_v25, %s9871_s23 }
0x3007   :  { %458 = vrot.lane.b32.xlu0 %v10099_v43, %s9876_s7 }
0x3075   :  { %v3066_v30 = vpop.permute.xlu0 %3065 }
0x3076   :  { %v3068_v52 = vmul.f32 %v3066_v30, %v3063_v26 }
0x3078   :  { %v3070_v46 = vadd.f32 %v3069_v35, %v3068_v52 }
0x3079   :  { %v459_v43 = vpop.permute.xlu0 %458 }
0x307a   :  { %3072 = vrot.lane.b32.xlu1 %v3070_v46, %s9871_s23 }
0x307e   :  { %460 = vrot.lane.b32.xlu1 %v10630_v11, %s9876_s7 }
0x30ec   :  { %v3073_v56 = vpop.permute.xlu1 %3072 }
0x30ed   :  { %3075 = vst.msk [vmem:[#allocation3 + $0x10] sm:$0xff] %vm478_vm4, %v3073_v56  ;;  %8917 = vmatmul.mubr.msk.f32.vlgmr.msra.gmra.mxu0 %vm478_vm4, %v3073_v56 }
0x30ee   :  { %8931 = vmatpush3.msra.mxu0 %v10498_v4  ;;  %8938 = vmatprep.mubr.msk.f32.mxu0 %vm9869_vm2, %v9865_v0 }
0x30ef   :  { %8932 = vmatprep.subr.mxu0 %v9865_v0 }
0x30f0   :  { %v461_v19 = vpop.permute.xlu1 %460  ;;  %8933 = vmatpush3.msra.mxu0 %v10501_v55 }
0x30f1   :  { %v482_v45 = vsel %vm478_vm4, %v459_v43, %v461_v19  ;;  %8934 = vmatprep.subr.mxu0 %v9865_v0 }
0x30f2   :  { %499 = vst.msk [vmem:[#allocation2 + $0x58] sm:$0xff] %vm421_vm3, %v482_v45  ;;  %8935 = vmatpush3.msra.mxu0 %v10535_v49 }
0x30f3   :  { %8936 = vmatprep.subr.mxu0 %v9865_v0 }
0x30f4   :  { %8937 = vmatpush3.msra.mxu0 %v10541_v14 }
0x30f5   :  { %8952 = vmatprep.subr.mxu0 %v9865_v0 }
0x30f9   :  { %v3077_v63 = vld [vmem:[#allocation2 + $0x58] sm:$0xff] }
0x31ad   :  { %v3146_v61 = vpop.f32.mrf.mxu0 }
0x31ae   :  { %v3157_v20 = vadd.f32 %v3146_v61, %v10474_v2  ;;  %v3150_v22 = vadd.f32 %v3146_v61, %v3077_v63 }
0x31af   :  { %v8918_v21 = vpop.f32.mrf.mxu0 }
0x31b0   :  { %3159 = vrot.lane.b32.xlu0 %v3157_v20, %s9868_s18  ;;  %v8096_v13 = vmul.f32 -1.442695, %v3150_v22 }
0x31b2   :  { %9599 = vpow2.f32 %v8096_v13 }
0x31bf   :  { %v9600_v23 = vpop.eup %9599 }
0x31c0   :  { %v3154_v62 = vadd.f32 1.0, %v9600_v23  ;;  %v10683_v23 = vadd.f32 %v10116_v58, %v10462_v59 }
0x31c2   :  { %9601 = vrcp.f32 %v3154_v62 }
0x31cf   :  { %v9602_v16 = vpop.eup %9601 }
0x31d0   :  { %v3169_v31 = vsub.f32 1.0, %v9602_v16  ;;  %v3175_v6 = vmul.f32 %v9602_v16, %v3070_v46 }
0x3222   :  { %v3160_v37 = vpop.permute.xlu0 %3159 }
0x3223   :  { %v3162_v17 = vmul.f32 %v9602_v16, %v3160_v37 }
0x3225   :  { %3164 = vrot.lane.b32.xlu1 %v3162_v17, %s9868_s18 }
0x3297   :  { %v3165_v39 = vpop.permute.xlu1 %3164 }
0x3298   :  { %v3167_v3 = vadd.f32 %v3165_v39, %v3077_v63 }
0x329a   :  { %9603 = vtanh.f32 %v3167_v3 }
0x32a7   :  { %v9604_v5 = vpop.eup %9603 }
0x32a8   :  { %3171 = vrot.lane.b32.xlu0 %v9604_v5, %s9871_s23 }
0x32ac   :  { %462 = vrot.lane.b32.xlu0 %v10106_v53, %s9876_s7 }
0x331a   :  { %v3172_v48 = vpop.permute.xlu0 %3171 }
0x331b   :  { %v3174_v7 = vmul.f32 %v3172_v48, %v3169_v31 }
0x331d   :  { %v3176_v8 = vadd.f32 %v3175_v6, %v3174_v7 }
0x331e   :  { %v463_v53 = vpop.permute.xlu0 %462 }
0x331f   :  { %3178 = vrot.lane.b32.xlu1 %v3176_v8, %s9871_s23 }
0x3323   :  { %464 = vrot.lane.b32.xlu1 %v10657_v1, %s9876_s7 }
0x3391   :  { %v3179_v10 = vpop.permute.xlu1 %3178 }
0x3392   :  { %3181 = vst.msk [vmem:[#allocation3 + $0x18] sm:$0xff] %vm478_vm4, %v3179_v10  ;;  %8928 = vmatmul.mubr.msk.f32.vlgmr.msra.gmra.mxu1 %vm478_vm4, %v3179_v10  ;;  %v3617_v10 = vld [vmem:[%s7998_s30 + $0x18] sm:$0xff] }
0x3393   :  { %8942 = vmatpush3.msra.mxu1 %v10498_v4  ;;  %8949 = vmatprep.mubr.msk.f32.mxu1 %vm9869_vm2, %v9865_v0 }
0x3394   :  { %8943 = vmatprep.subr.mxu1 %v9865_v0 }
0x3395   :  { %v465_v12 = vpop.permute.xlu1 %464  ;;  %8944 = vmatpush3.msra.mxu1 %v10501_v55 }
0x3396   :  { %v483_v54 = vsel %vm478_vm4, %v463_v53, %v465_v12  ;;  %8945 = vmatprep.subr.mxu1 %v9865_v0 }
0x3397   :  { %500 = vst.msk [vmem:[#allocation2 + $0x60] sm:$0xff] %vm421_vm3, %v483_v54  ;;  %8946 = vmatpush3.msra.mxu1 %v10535_v49 }
0x3398   :  { %8947 = vmatprep.subr.mxu1 %v9865_v0 }
0x3399   :  { %8948 = vmatpush3.msra.mxu1 %v10541_v14 }
0x339a   :  { %8963 = vmatprep.subr.mxu1 %v3617_v10 }
0x339e   :  { %v3183_v25 = vld [vmem:[#allocation2 + $0x60] sm:$0xff] }
0x3452   :  { %v3252_v32 = vpop.f32.mrf.mxu1 }
0x3453   :  { %v3263_v15 = vadd.f32 %v3252_v32, %v10474_v2  ;;  %v3256_v26 = vadd.f32 %v3252_v32, %v3183_v25 }
0x3454   :  { %v8929_v18 = vpop.f32.mrf.mxu1 }
0x3455   :  { %3265 = vrot.lane.b32.xlu0 %v3263_v15, %s9868_s18  ;;  %v8098_v30 = vmul.f32 -1.442695, %v3256_v26  ;;  %v10716_v18 = vadd.f32 %v10137_v24, %v10462_v59  ;;  %v3616_v26 = vld [vmem:[%s7998_s30 + $0x10] sm:$0xff]  ;;  %v3614_v24 = vld [vmem:[%s7998_s30] sm:$0xff] }
0x3457   :  { %9605 = vpow2.f32 %v8098_v30  ;;  %v3615_v30 = vld [vmem:[%s7998_s30 + $0x8] sm:$0xff]  ;;  %s9901_s30 = smov 34  }
0x3458   :  { %s8015_s3 = sld [smem:[%s11723_s0 + %s9901_s30]]  }
0x3464   :  { %v9606_v35 = vpop.eup %9605 }
0x3465   :  { %v3260_v52 = vadd.f32 1.0, %v9606_v35 }
0x3467   :  { %9607 = vrcp.f32 %v3260_v52 }
0x3474   :  { %v9608_v46 = vpop.eup %9607 }
0x3475   :  { %v3275_v20 = vsub.f32 1.0, %v9608_v46  ;;  %v3281_v63 = vmul.f32 %v9608_v46, %v3176_v8 }
0x34c7   :  { %v3266_v56 = vpop.permute.xlu0 %3265 }
0x34c8   :  { %v3268_v43 = vmul.f32 %v9608_v46, %v3266_v56  ;;  %v3607_v56 = vld [vmem:[#allocation3 + $0x8] sm:$0xff] }
0x34ca   :  { %3270 = vrot.lane.b32.xlu1 %v3268_v43, %s9868_s18  ;;  %v3608_v43 = vld [vmem:[#allocation3 + $0x10] sm:$0xff] }
0x353c   :  { %v3271_v19 = vpop.permute.xlu1 %3270 }
0x353d   :  { %v3273_v45 = vadd.f32 %v3271_v19, %v3183_v25  ;;  %v3609_v19 = vld [vmem:[#allocation3 + $0x18] sm:$0xff] }
0x353f   :  { %9609 = vtanh.f32 %v3273_v45 }
0x354c   :  { %v9610_v61 = vpop.eup %9609 }
0x354d   :  { %3277 = vrot.lane.b32.xlu0 %v9610_v61, %s9871_s23 }
0x3551   :  { %466 = vrot.lane.b32.xlu0 %v10114_v57, %s9876_s7 }
0x35bf   :  { %v3278_v21 = vpop.permute.xlu0 %3277 }
0x35c0   :  { %v3280_v22 = vmul.f32 %v3278_v21, %v3275_v20 }
0x35c2   :  { %v3282_v13 = vadd.f32 %v3281_v63, %v3280_v22  ;;  %v10736_v22 = vld [vmem:[%s7999_s4] ss:$0 sm:$0xff] }
0x35c3   :  { %v467_v57 = vpop.permute.xlu0 %466 }
0x35c4   :  { %3284 = vrot.lane.b32.xlu1 %v3282_v13, %s9871_s23 }
0x35c8   :  { %468 = vrot.lane.b32.xlu1 %v10683_v23, %s9876_s7 }
0x3636   :  { %v3285_v62 = vpop.permute.xlu1 %3284 }
0x3637   :  { %3287 = vst.msk [vmem:[#allocation3 + $0x20] sm:$0xff] %vm478_vm4, %v3285_v62  ;;  %8939 = vmatmul.mubr.msk.f32.vlgmr.msra.gmra.mxu0 %vm478_vm4, %v3285_v62 }
0x3638   :  { %8953 = vmatpush3.msra.mxu0 %v10498_v4  ;;  %8960 = vmatprep.mubr.msk.f32.mxu0 %vm9869_vm2, %v9865_v0 }
0x3639   :  { %8954 = vmatprep.subr.mxu0 %v9865_v0 }
0x363a   :  { %v469_v16 = vpop.permute.xlu1 %468  ;;  %8955 = vmatpush3.msra.mxu0 %v10501_v55 }
0x363b   :  { %v484_v58 = vsel %vm478_vm4, %v467_v57, %v469_v16  ;;  %8956 = vmatprep.subr.mxu0 %v9865_v0 }
0x363c   :  { %501 = vst.msk [vmem:[#allocation2 + $0x68] sm:$0xff] %vm421_vm3, %v484_v58  ;;  %8957 = vmatpush3.msra.mxu0 %v10535_v49 }
0x363d   :  { %8958 = vmatprep.subr.mxu0 %v9865_v0 }
0x363e   :  { %8959 = vmatpush3.msra.mxu0 %v10541_v14  ;;  %v3610_v45 = vld [vmem:[#allocation3 + $0x20] sm:$0xff] }
0x363f   :  { %8983 = vmatprep.subr.mxu0 %v9865_v0 }
0x3643   :  { %v3289_v55 = vld [vmem:[#allocation2 + $0x68] sm:$0xff] }
0x36f7   :  { %v3358_v4 = vpop.f32.mrf.mxu0 }
0x36f8   :  { %v3369_v37 = vadd.f32 %v3358_v4, %v10474_v2  ;;  %v3362_v39 = vadd.f32 %v3358_v4, %v3289_v55 }
0x36f9   :  { %v8940_v17 = vpop.f32.mrf.mxu0 }
0x36fa   :  { %3371 = vrot.lane.b32.xlu0 %v3369_v37, %s9868_s18  ;;  %v8100_v3 = vmul.f32 -1.442695, %v3362_v39 }
0x36fc   :  { %9611 = vpow2.f32 %v8100_v3 }
0x3709   :  { %v9612_v5 = vpop.eup %9611 }
0x370a   :  { %v3366_v31 = vadd.f32 1.0, %v9612_v5 }
0x370c   :  { %9613 = vrcp.f32 %v3366_v31 }
0x3719   :  { %v9614_v49 = vpop.eup %9613 }
0x371a   :  { %v3381_v53 = vsub.f32 1.0, %v9614_v49  ;;  %v3387_v54 = vmul.f32 %v9614_v49, %v3282_v13 }
0x376c   :  { %v3372_v48 = vpop.permute.xlu0 %3371 }
0x376d   :  { %v3374_v6 = vmul.f32 %v9614_v49, %v3372_v48 }
0x376f   :  { %3376 = vrot.lane.b32.xlu1 %v3374_v6, %s9868_s18 }
0x37e1   :  { %v3377_v14 = vpop.permute.xlu1 %3376 }
0x37e2   :  { %v3379_v7 = vadd.f32 %v3377_v14, %v3289_v55 }
0x37e4   :  { %9615 = vtanh.f32 %v3379_v7 }
0x37f1   :  { %v9616_v8 = vpop.eup %9615 }
0x37f2   :  { %3383 = vrot.lane.b32.xlu0 %v9616_v8, %s9871_s23 }
0x37f6   :  { %470 = vrot.lane.b32.xlu0 %v10121_v60, %s9876_s7  ;;  %v3606_v60 = vld [vmem:[#allocation3] sm:$0xff] }
0x3864   :  { %v3384_v12 = vpop.permute.xlu0 %3383 }
0x3865   :  { %v3386_v32 = vmul.f32 %v3384_v12, %v3381_v53 }
0x3867   :  { %v10710_v15 = vadd.f32 %v3387_v54, %v3386_v32  ;;  %v10755_v32 = vld [vmem:[%s10495_s29 + $0x38] sm:$0xff] }
0x3868   :  { %v471_v35 = vpop.permute.xlu0 %470 }
0x3869   :  { %3390 = vrot.lane.b32.xlu1 %v10710_v15, %s9871_s23 }
0x386d   :  { %472 = vrot.lane.b32.xlu1 %v10716_v18, %s9876_s7 }
0x38db   :  { %v3391_v25 = vpop.permute.xlu1 %3390 }
0x38dc   :  { %3393 = vst.msk [vmem:[#allocation3 + $0x28] sm:$0xff] %vm478_vm4, %v3391_v25  ;;  %8950 = vmatmul.mubr.msk.f32.vlgmr.msra.gmra.mxu1 %vm478_vm4, %v3391_v25  ;;  %v10759_v25 = vld [vmem:[%s10495_s29 + $0x30] sm:$0xff] }
0x38dd   :  { %8964 = vmatpush3.msra.mxu1 %v3617_v10  ;;  %8971 = vmatprep.mubr.msk.f32.mxu1 %vm478_vm4, %v3606_v60  ;;  %v10769_v60 = vld [vmem:[%s10495_s29 + $0x20] sm:$0xff] }
0x38de   :  { %8965 = vmatprep.subr.mxu1 %v3616_v26 }
0x38df   :  { %8966 = vmatpush3.msra.mxu1 %v3616_v26  ;;  %v473_v52 = vpop.permute.xlu1 %472  ;;  %v10764_v26 = vld [vmem:[%s10495_s29 + $0x28] sm:$0xff] }
0x38e0   :  { %8967 = vmatprep.subr.mxu1 %v3615_v30  ;;  %v485_v46 = vsel %vm478_vm4, %v471_v35, %v473_v52 }
0x38e1   :  { %502 = vst.msk [vmem:[#allocation2 + $0x70] sm:$0xff] %vm421_vm3, %v485_v46  ;;  %8968 = vmatpush3.msra.mxu1 %v3615_v30 }
0x38e2   :  { %8969 = vmatprep.subr.mxu1 %v3614_v24 }
0x38e3   :  { %8970 = vmatpush3.msra.mxu1 %v3614_v24  ;;  %v3611_v61 = vld [vmem:[#allocation3 + $0x28] sm:$0xff] }
0x38e4   :  { %8972 = vmatmul.mubr.msk.f32.vlgmr.msra.gmra.mxu1 %vm478_vm4, %v3607_v56  ;;  %9005 = vmatprep.subr.mxu1 %v9865_v0  ;;  %v8121_v56 = vld [vmem:[%s10456_s20 + $0x1] ss:$0 sm:$0xff]  ;;  %s9888_s20 = smov 19  }
0x38e5   :  { %8974 = vmatprep.mubr.msk.f32.mxu1 %vm478_vm4, %v3608_v43  ;;  %9006 = vmatpush3.msra.mxu1 %v10755_v32  ;;  %s8000_s8 = sld [smem:[%s11723_s0 + %s9888_s20]]  }
0x38e6   :  { %9007 = vmatprep.subr.mxu1 %v9865_v0  ;;  %s11392_s20 = sld [smem:[%s11723_s0 + %s9894_s2]]  }
0x38e7   :  { %9008 = vmatpush3.msra.mxu1 %v10759_v25 }
0x38e8   :  { %8975 = vmatmul.mubr.msk.f32.gmra.mxu1 %vm478_vm4, %v3609_v19  ;;  %v3395_v31 = vld [vmem:[#allocation2 + $0x70] sm:$0xff]  ;;  %9009 = vmatprep.subr.mxu1 %v9865_v0 }
0x38e9   :  { %8977 = vmatprep.mubr.msk.f32.mxu1 %vm478_vm4, %v3610_v45  ;;  %9010 = vmatpush3.msra.mxu1 %v10764_v26 }
0x38ea   :  { %9011 = vmatprep.subr.mxu1 %v9865_v0 }
0x38eb   :  { %9012 = vmatpush3.msra.mxu1 %v10769_v60 }
0x38ec   :  { %8978 = vmatmul.mubr.msk.f32.gmra.mxu1 %vm478_vm4, %v3611_v61  ;;  %9027 = vmatprep.subr.mxu1 %v9865_v0 }
0x399c   :  { %v3464_v20 = vpop.f32.mrf.mxu1 }
0x399d   :  { %v3475_v21 = vadd.f32 %v3464_v20, %v10474_v2  ;;  %v3468_v49 = vadd.f32 %v3464_v20, %v3395_v31 }
0x399e   :  { %v8951_v63 = vpop.f32.mrf.mxu1 }
0x399f   :  { %3477 = vrot.lane.b32.xlu0 %v3475_v21, %s9868_s18  ;;  %v8102_v48 = vmul.f32 -1.442695, %v3468_v49 }
0x39a1   :  { %9617 = vpow2.f32 %v8102_v48 }
0x39a4   :  { %v8973_v13 = vpop.f32.mrf.mxu1 }
0x39a5   :  { %v3721_v62 = vadd.f32 %v8973_v13, %v10736_v22 }
0x39a6   :  { %v3715_v57 = vpop.f32.mrf.mxu1 }
0x39a7   :  { %3755 = vst.msk [vmem:[#allocation5 + $0x8] sm:$0xff] %vm421_vm3, %v3721_v62  ;;  %v3716_v16 = vadd.f32 %v10736_v22, %v3715_v57 }
0x39a8   :  { %v8976_v58 = vpop.f32.mrf.mxu1 }
0x39a9   :  { %3754 = vst.msk [vmem:[#allocation5] sm:$0xff] %vm421_vm3, %v3716_v16  ;;  %v3731_v4 = vadd.f32 %v8976_v58, %v10736_v22 }
0x39aa   :  { %v3725_v37 = vpop.f32.mrf.mxu1 }
0x39ab   :  { %3757 = vst.msk [vmem:[#allocation5 + $0x18] sm:$0xff] %vm421_vm3, %v3731_v4  ;;  %v3726_v17 = vadd.f32 %v10736_v22, %v3725_v37 }
0x39ac   :  { %v8979_v55 = vpop.f32.mrf.mxu1 }
0x39ad   :  { %3756 = vst.msk [vmem:[#allocation5 + $0x10] sm:$0xff] %vm421_vm3, %v3726_v17  ;;  %v3741_v39 = vadd.f32 %v8979_v55, %v10736_v22 }
0x39ae   :  { %v3735_v3 = vpop.f32.mrf.mxu1  ;;  %v9618_v6 = vpop.eup %9617 }
0x39af   :  { %3759 = vst.msk [vmem:[#allocation5 + $0x28] sm:$0xff] %vm421_vm3, %v3741_v39  ;;  %v3736_v5 = vadd.f32 %v10736_v22, %v3735_v3  ;;  %v3472_v14 = vadd.f32 1.0, %v9618_v6 }
0x39b0   :  { %v3769_v62 = vld [vmem:[#allocation5] sm:$0xff] }
0x39b1   :  { %3758 = vst.msk [vmem:[#allocation5 + $0x20] sm:$0xff] %vm421_vm3, %v3736_v5  ;;  %9619 = vrcp.f32 %v3472_v14 }
0x39be   :  { %v9620_v7 = vpop.eup %9619 }
0x39bf   :  { %v3487_v30 = vsub.f32 1.0, %v9620_v7  ;;  %v3493_v52 = vmul.f32 %v9620_v7, %v10710_v15 }
0x3a11   :  { %v3478_v8 = vpop.permute.xlu0 %3477 }
0x3a12   :  { %v3480_v10 = vmul.f32 %v9620_v7, %v3478_v8  ;;  %v10822_v8 = vadd.f32 %v10027_v29, %v10462_v59 }
0x3a14   :  { %3482 = vrot.lane.b32.xlu1 %v3480_v10, %s9868_s18 }
0x3a86   :  { %v3483_v53 = vpop.permute.xlu1 %3482 }
0x3a87   :  { %v3485_v12 = vadd.f32 %v3483_v53, %v3395_v31 }
0x3a89   :  { %9621 = vtanh.f32 %v3485_v12 }
0x3a96   :  { %v9622_v54 = vpop.eup %9621 }
0x3a97   :  { %3489 = vrot.lane.b32.xlu0 %v9622_v54, %s9871_s23 }
0x3a9b   :  { %3770 = vrot.lane.b32.xlu0 %v10551_v51, %s9871_s23 }
0x3b09   :  { %v3490_v35 = vpop.permute.xlu0 %3489 }
0x3b0a   :  { %v3492_v24 = vmul.f32 %v3490_v35, %v3487_v30 }
0x3b0c   :  { %v10775_v46 = vadd.f32 %v3493_v52, %v3492_v24 }
0x3b0d   :  { %v3771_v15 = vpop.permute.xlu0 %3770 }
0x3b0e   :  { %3496 = vrot.lane.b32.xlu1 %v10775_v46, %s9871_s23 }
0x3b12   :  { %3856 = vrot.lane.b32.xlu1 %v8121_v56, %s9868_s18 }
0x3b80   :  { %v3497_v43 = vpop.permute.xlu1 %3496 }
0x3b81   :  { %3499 = vst.msk [vmem:[#allocation3 + $0x30] sm:$0xff] %vm478_vm4, %v3497_v43  ;;  %8961 = vmatmul.mubr.msk.f32.vlgmr.msra.gmra.mxu0 %vm478_vm4, %v3497_v43 }
0x3b82   :  { %8984 = vmatpush3.msra.mxu0 %v10755_v32  ;;  %8991 = vmatprep.mubr.msk.f32.mxu0 %vm9869_vm2, %v9865_v0 }
0x3b83   :  { %8985 = vmatprep.subr.mxu0 %v9865_v0 }
0x3b84   :  { %8986 = vmatpush3.msra.mxu0 %v10759_v25  ;;  %v10805_v20 = vpop.permute.xlu1 %3856 }
0x3b85   :  { %8987 = vmatprep.subr.mxu0 %v9865_v0 }
0x3b86   :  { %8988 = vmatpush3.msra.mxu0 %v10764_v26 }
0x3b87   :  { %8989 = vmatprep.subr.mxu0 %v9865_v0 }
0x3b88   :  { %8990 = vmatpush3.msra.mxu0 %v10769_v60  ;;  %v3612_v19 = vld [vmem:[#allocation3 + $0x30] sm:$0xff] }
0x3b89   :  { %8992 = vmatmul.mubr.msk.f32.vlgmr.msra.gmra.mxu0 %vm478_vm4, %v3771_v15  ;;  %8980 = vmatprep.mubr.msk.f32.mxu1 %vm478_vm4, %v3612_v19 }
0x3b8a   :  { %8994 = vmatprep.subr.mxu0 %v9865_v0  ;;  %9002 = vmatprep.mubr.msk.f32.mxu0 %vm9869_vm2, %v9865_v0 }
0x3b8b   :  { %8995 = vmatpush3.msra.mxu0 %v10755_v32 }
0x3b8c   :  { %8996 = vmatprep.subr.mxu0 %v9865_v0 }
0x3b8d   :  { %8997 = vmatpush3.msra.mxu0 %v10759_v25 }
0x3b8e   :  { %8998 = vmatprep.subr.mxu0 %v9865_v0 }
0x3b8f   :  { %8999 = vmatpush3.msra.mxu0 %v10764_v26 }
0x3b90   :  { %9000 = vmatprep.subr.mxu0 %v9865_v0 }
0x3b91   :  { %9001 = vmatpush3.msra.mxu0 %v10769_v60 }
0x3b92   :  { %9016 = vmatprep.subr.mxu0 %v9865_v0 }
0x3c41   :  { %v3570_v45 = vpop.f32.mrf.mxu0 }
0x3c42   :  { %v3581_v31 = vadd.f32 %v3570_v45, %v10474_v2 }
0x3c43   :  { %v8962_v61 = vpop.f32.mrf.mxu0 }
0x3c44   :  { %v3884_v61 = vld [vmem:[#allocation5 + $0x8] sm:$0xff] }
0x3c49   :  { %v3840_v21 = vpop.f32.mrf.mxu0 }
0x3c4a   :  { %v3859_v63 = vadd.f32 %v10805_v20, %v3840_v21  ;;  %v3844_v57 = vadd.f32 %v3840_v21, %v3769_v62 }
0x3c4b   :  { %v8993_v13 = vpop.f32.mrf.mxu0 }
0x3c4c   :  { %3861 = vrot.lane.b32.xlu0 %v3859_v63, %s9868_s18  ;;  %v8120_v16 = vmul.f32 -1.442695, %v3844_v57 }
0x3c4e   :  { %9623 = vpow2.f32 %v8120_v16 }
0x3c5b   :  { %v9624_v58 = vpop.eup %9623 }
0x3c5c   :  { %v3848_v4 = vadd.f32 1.0, %v9624_v58 }
0x3c5e   :  { %9625 = vrcp.f32 %v3848_v4 }
0x3c6b   :  { %v9626_v37 = vpop.eup %9625 }
0x3c6c   :  { %v3871_v49 = vsub.f32 1.0, %v9626_v37  ;;  %v3877_v6 = vmul.f32 %v9626_v37, %v10551_v51 }
0x3cbe   :  { %v3862_v17 = vpop.permute.xlu0 %3861 }
0x3cbf   :  { %v3864_v55 = vmul.f32 %v9626_v37, %v3862_v17 }
0x3cc1   :  { %3866 = vrot.lane.b32.xlu1 %v3864_v55, %s9868_s18 }
0x3d33   :  { %v3867_v39 = vpop.permute.xlu1 %3866 }
0x3d34   :  { %v3869_v3 = vadd.f32 %v3867_v39, %v3769_v62 }
0x3d36   :  { %9627 = vtanh.f32 %v3869_v3 }
0x3d43   :  { %v9628_v5 = vpop.eup %9627 }
0x3d44   :  { %3873 = vrot.lane.b32.xlu0 %v9628_v5, %s9871_s23 }
0x3d48   :  { %474 = vrot.lane.b32.xlu0 %v10023_v27, %s9876_s7 }
0x3d4c   :  { %3583 = vrot.lane.b32.xlu0 %v3581_v31, %s9868_s18 }
0x3db6   :  { %v3874_v48 = vpop.permute.xlu0 %3873 }
0x3db7   :  { %v3876_v14 = vmul.f32 %v3874_v48, %v3871_v49 }
0x3db9   :  { %v10816_v7 = vadd.f32 %v3877_v6, %v3876_v14 }
0x3dba   :  { %v475_v2 = vpop.permute.xlu0 %474 }
0x3dbb   :  { %3880 = vrot.lane.b32.xlu1 %v10816_v7, %s9871_s23 }
0x3dbe   :  { %v3584_v35 = vpop.permute.xlu0 %3583 }
0x3dbf   :  { %476 = vrot.lane.b32.xlu1 %v10822_v8, %s9876_s7 }
0x3e2d   :  { %v3881_v27 = vpop.permute.xlu1 %3880 }
0x3e2e   :  { %3883 = vst.msk [vmem:[#allocation3] sm:$0xff] %vm478_vm4, %v3881_v27  ;;  %9003 = vmatmul.mubr.msk.f32.vlgmr.msra.gmra.mxu0 %vm478_vm4, %v3881_v27 }
0x3e2f   :  { %9017 = vmatpush3.msra.mxu0 %v10755_v32  ;;  %9024 = vmatprep.mubr.msk.f32.mxu0 %vm9869_vm2, %v9865_v0 }
0x3e30   :  { %9018 = vmatprep.subr.mxu0 %v9865_v0 }
0x3e31   :  { %v477_v51 = vpop.permute.xlu1 %476  ;;  %9019 = vmatpush3.msra.mxu0 %v10759_v25 }
0x3e32   :  { %v486_v29 = vsel %vm478_vm4, %v475_v2, %v477_v51  ;;  %9020 = vmatprep.subr.mxu0 %v9865_v0 }
0x3e33   :  { %503 = vst.msk [vmem:[#allocation2 + $0x78] sm:$0xff] %vm421_vm3, %v486_v29  ;;  %9021 = vmatpush3.msra.mxu0 %v10764_v26 }
0x3e34   :  { %9022 = vmatprep.subr.mxu0 %v9865_v0 }
0x3e35   :  { %9023 = vmatpush3.msra.mxu0 %v10769_v60 }
0x3e36   :  { %9038 = vmatprep.subr.mxu0 %v9865_v0 }
0x3e3a   :  { %v3501_v59 = vld [vmem:[#allocation2 + $0x78] sm:$0xff] }
0x3e3b   :  { %v3574_v10 = vadd.f32 %v3570_v45, %v3501_v59 }
0x3e3d   :  { %v8104_v53 = vmul.f32 -1.442695, %v3574_v10 }
0x3e3f   :  { %9629 = vpow2.f32 %v8104_v53 }
0x3e4c   :  { %v9630_v12 = vpop.eup %9629 }
0x3e4d   :  { %v3578_v54 = vadd.f32 1.0, %v9630_v12 }
0x3e4f   :  { %9631 = vrcp.f32 %v3578_v54  ;;  %v3989_v54 = vld [vmem:[#allocation5 + $0x10] sm:$0xff] }
0x3e5c   :  { %v9632_v30 = vpop.eup %9631 }
0x3e5d   :  { %v3586_v52 = vmul.f32 %v9632_v30, %v3584_v35  ;;  %v3593_v57 = vsub.f32 1.0, %v9632_v30  ;;  %v3599_v58 = vmul.f32 %v9632_v30, %v10775_v46 }
0x3e5f   :  { %3588 = vrot.lane.b32.xlu0 %v3586_v52, %s9868_s18 }
0x3ed1   :  { %v3589_v24 = vpop.permute.xlu0 %3588 }
0x3ed2   :  { %v3591_v56 = vadd.f32 %v3589_v24, %v3501_v59 }
0x3ed4   :  { %9633 = vtanh.f32 %v3591_v56 }
0x3ee1   :  { %v9634_v43 = vpop.eup %9633 }
0x3ee2   :  { %3595 = vrot.lane.b32.xlu0 %v9634_v43, %s9871_s23 }
0x3eee   :  { %v3953_v15 = vpop.f32.mrf.mxu0 }
0x3eef   :  { %v3964_v19 = vadd.f32 %v3953_v15, %v10805_v20  ;;  %v3957_v21 = vadd.f32 %v3953_v15, %v3884_v61 }
0x3ef0   :  { %v9004_v45 = vpop.f32.mrf.mxu0 }
0x3ef1   :  { %3966 = vrot.lane.b32.xlu1 %v3964_v19, %s9868_s18  ;;  %v8123_v63 = vmul.f32 -1.442695, %v3957_v21 }
0x3ef3   :  { %9635 = vpow2.f32 %v8123_v63 }
0x3f00   :  { %v9636_v13 = vpop.eup %9635 }
0x3f01   :  { %v3961_v62 = vadd.f32 1.0, %v9636_v13 }
0x3f03   :  { %9637 = vrcp.f32 %v3961_v62 }
0x3f10   :  { %v9638_v17 = vpop.eup %9637 }
0x3f11   :  { %v3976_v48 = vsub.f32 1.0, %v9638_v17  ;;  %v3982_v14 = vmul.f32 %v9638_v17, %v10816_v7 }
0x3f54   :  { %v3596_v16 = vpop.permute.xlu0 %3595 }
0x3f55   :  { %v3598_v4 = vmul.f32 %v3596_v16, %v3593_v57 }
0x3f57   :  { %v3600_v37 = vadd.f32 %v3599_v58, %v3598_v4 }
0x3f59   :  { %3602 = vrot.lane.b32.xlu0 %v3600_v37, %s9871_s23 }
0x3f63   :  { %v3967_v55 = vpop.permute.xlu1 %3966 }
0x3f64   :  { %v3969_v39 = vmul.f32 %v9638_v17, %v3967_v55  ;;  %v4094_v17 = vld [vmem:[#allocation5 + $0x18] sm:$0xff] }
0x3f66   :  { %3971 = vrot.lane.b32.xlu1 %v3969_v39, %s9868_s18 }
0x3fcb   :  { %v3603_v3 = vpop.permute.xlu0 %3602 }
0x3fcc   :  { %3605 = vst.msk [vmem:[#allocation3 + $0x38] sm:$0xff] %vm478_vm4, %v3603_v3 }
0x3fd3   :  { %v3613_v5 = vld [vmem:[#allocation3 + $0x38] sm:$0xff] }
0x3fd4   :  { %8981 = vmatmul.mubr.msk.f32.gmra.mxu1 %vm478_vm4, %v3613_v5 }
0x3fd5   :  { %9013 = vmatprep.mubr.msk.f32.mxu1 %vm9869_vm2, %v9865_v0 }
0x3fd8   :  { %v3972_v46 = vpop.permute.xlu1 %3971 }
0x3fd9   :  { %v3974_v31 = vadd.f32 %v3972_v46, %v3884_v61 }
0x3fdb   :  { %9639 = vtanh.f32 %v3974_v31 }
0x3fe8   :  { %v9640_v49 = vpop.eup %9639 }
0x3fe9   :  { %3978 = vrot.lane.b32.xlu1 %v9640_v49, %s9871_s23 }
0x405b   :  { %v3979_v6 = vpop.permute.xlu1 %3978 }
0x405c   :  { %v3981_v27 = vmul.f32 %v3979_v6, %v3976_v48 }
0x405e   :  { %v3983_v2 = vadd.f32 %v3982_v14, %v3981_v27 }
0x4060   :  { %3985 = vrot.lane.b32.xlu1 %v3983_v2, %s9871_s23 }
0x4094   :  { %v8982_v51 = vpop.f32.mrf.mxu1 }
0x4095   :  { %v3751_v29 = vadd.f32 %v8982_v51, %v10736_v22 }
0x4096   :  { %v3745_v59 = vpop.f32.mrf.mxu1 }
0x4097   :  { %3761 = vst.msk [vmem:[#allocation5 + $0x38] sm:$0xff] %vm421_vm3, %v3751_v29  ;;  %v3746_v10 = vadd.f32 %v10736_v22, %v3745_v59 }
0x4099   :  { %3760 = vst.msk [vmem:[#allocation5 + $0x30] sm:$0xff] %vm421_vm3, %v3746_v10 }
0x40d2   :  { %v3986_v53 = vpop.permute.xlu1 %3985 }
0x40d3   :  { %3988 = vst.msk [vmem:[#allocation3 + $0x8] sm:$0xff] %vm478_vm4, %v3986_v53  ;;  %9014 = vmatmul.mubr.msk.f32.vlgmr.msra.gmra.mxu1 %vm478_vm4, %v3986_v53 }
0x40d4   :  { %9028 = vmatpush3.msra.mxu1 %v10755_v32  ;;  %9035 = vmatprep.mubr.msk.f32.mxu1 %vm9869_vm2, %v9865_v0 }
0x40d5   :  { %9029 = vmatprep.subr.mxu1 %v9865_v0 }
0x40d6   :  { %9030 = vmatpush3.msra.mxu1 %v10759_v25 }
0x40d7   :  { %9031 = vmatprep.subr.mxu1 %v9865_v0 }
0x40d8   :  { %9032 = vmatpush3.msra.mxu1 %v10764_v26 }
0x40d9   :  { %9033 = vmatprep.subr.mxu1 %v9865_v0 }
0x40da   :  { %9034 = vmatpush3.msra.mxu1 %v10769_v60 }
0x40db   :  { %9049 = vmatprep.subr.mxu1 %v9865_v0 }
0x4193   :  { %v4058_v22 = vpop.f32.mrf.mxu1 }
0x4194   :  { %v4069_v7 = vadd.f32 %v4058_v22, %v10805_v20  ;;  %v4062_v30 = vadd.f32 %v4058_v22, %v3989_v54 }
0x4195   :  { %v9015_v12 = vpop.f32.mrf.mxu1 }
0x4196   :  { %4071 = vrot.lane.b32.xlu0 %v4069_v7, %s9868_s18  ;;  %v8125_v35 = vmul.f32 -1.442695, %v4062_v30  ;;  %v4199_v12 = vld [vmem:[#allocation5 + $0x20] sm:$0xff] }
0x4198   :  { %9641 = vpow2.f32 %v8125_v35 }
0x41a5   :  { %v9642_v52 = vpop.eup %9641 }
0x41a6   :  { %v4066_v24 = vadd.f32 1.0, %v9642_v52 }
0x41a8   :  { %9643 = vrcp.f32 %v4066_v24 }
0x41b5   :  { %v9644_v56 = vpop.eup %9643 }
0x41b6   :  { %v4081_v21 = vsub.f32 1.0, %v9644_v56  ;;  %v4087_v13 = vmul.f32 %v9644_v56, %v3983_v2 }
0x4208   :  { %v4072_v43 = vpop.permute.xlu0 %4071 }
0x4209   :  { %v4074_v15 = vmul.f32 %v9644_v56, %v4072_v43 }
0x420b   :  { %4076 = vrot.lane.b32.xlu1 %v4074_v15, %s9868_s18 }
0x427d   :  { %v4077_v19 = vpop.permute.xlu1 %4076 }
0x427e   :  { %v4079_v45 = vadd.f32 %v4077_v19, %v3989_v54 }
0x4280   :  { %9645 = vtanh.f32 %v4079_v45 }
0x428d   :  { %v9646_v61 = vpop.eup %9645 }
0x428e   :  { %4083 = vrot.lane.b32.xlu0 %v9646_v61, %s9871_s23 }
0x4300   :  { %v4084_v63 = vpop.permute.xlu0 %4083 }
0x4301   :  { %v4086_v62 = vmul.f32 %v4084_v63, %v4081_v21 }
0x4303   :  { %v4088_v57 = vadd.f32 %v4087_v13, %v4086_v62 }
0x4305   :  { %4090 = vrot.lane.b32.xlu1 %v4088_v57, %s9871_s23 }
0x4377   :  { %v4091_v16 = vpop.permute.xlu1 %4090 }
0x4378   :  { %4093 = vst.msk [vmem:[#allocation3 + $0x10] sm:$0xff] %vm478_vm4, %v4091_v16  ;;  %9025 = vmatmul.mubr.msk.f32.vlgmr.msra.gmra.mxu0 %vm478_vm4, %v4091_v16 }
0x4379   :  { %9039 = vmatpush3.msra.mxu0 %v10755_v32  ;;  %9046 = vmatprep.mubr.msk.f32.mxu0 %vm9869_vm2, %v9865_v0 }
0x437a   :  { %9040 = vmatprep.subr.mxu0 %v9865_v0 }
0x437b   :  { %9041 = vmatpush3.msra.mxu0 %v10759_v25 }
0x437c   :  { %9042 = vmatprep.subr.mxu0 %v9865_v0 }
0x437d   :  { %9043 = vmatpush3.msra.mxu0 %v10764_v26 }
0x437e   :  { %9044 = vmatprep.subr.mxu0 %v9865_v0 }
0x437f   :  { %9045 = vmatpush3.msra.mxu0 %v10769_v60 }
0x4380   :  { %9060 = vmatprep.subr.mxu0 %v9865_v0 }
0x4438   :  { %v4163_v58 = vpop.f32.mrf.mxu0 }
0x4439   :  { %v4174_v4 = vadd.f32 %v4163_v58, %v10805_v20  ;;  %v4167_v55 = vadd.f32 %v4163_v58, %v4094_v17 }
0x443a   :  { %v9026_v37 = vpop.f32.mrf.mxu0 }
0x443b   :  { %4176 = vrot.lane.b32.xlu0 %v4174_v4, %s9868_s18  ;;  %v8127_v39 = vmul.f32 -1.442695, %v4167_v55  ;;  %v4304_v4 = vld [vmem:[#allocation5 + $0x28] sm:$0xff] }
0x443d   :  { %9647 = vpow2.f32 %v8127_v39 }
0x444a   :  { %v9648_v3 = vpop.eup %9647 }
0x444b   :  { %v4171_v5 = vadd.f32 1.0, %v9648_v3 }
0x444d   :  { %9649 = vrcp.f32 %v4171_v5 }
0x445a   :  { %v9650_v46 = vpop.eup %9649 }
0x445b   :  { %v4186_v27 = vsub.f32 1.0, %v9650_v46  ;;  %v4192_v51 = vmul.f32 %v9650_v46, %v4088_v57 }
0x44ad   :  { %v4177_v31 = vpop.permute.xlu0 %4176 }
0x44ae   :  { %v4179_v49 = vmul.f32 %v9650_v46, %v4177_v31  ;;  %v4630_v46 = vld [vmem:[%s8000_s8 + $0x18] sm:$0xff] }
0x44b0   :  { %4181 = vrot.lane.b32.xlu1 %v4179_v49, %s9868_s18 }
0x4522   :  { %v4182_v48 = vpop.permute.xlu1 %4181 }
0x4523   :  { %v4184_v6 = vadd.f32 %v4182_v48, %v4094_v17 }
0x4525   :  { %9651 = vtanh.f32 %v4184_v6 }
0x4532   :  { %v9652_v14 = vpop.eup %9651 }
0x4533   :  { %4188 = vrot.lane.b32.xlu0 %v9652_v14, %s9871_s23 }
0x45a5   :  { %v4189_v2 = vpop.permute.xlu0 %4188 }
0x45a6   :  { %v4191_v29 = vmul.f32 %v4189_v2, %v4186_v27 }
0x45a8   :  { %v4193_v59 = vadd.f32 %v4192_v51, %v4191_v29  ;;  %v4629_v51 = vld [vmem:[%s8000_s8 + $0x10] sm:$0xff]  ;;  %v4619_v29 = vld [vmem:[#allocation3] sm:$0xff] }
0x45aa   :  { %4195 = vrot.lane.b32.xlu1 %v4193_v59, %s9871_s23 }
0x461c   :  { %v4196_v10 = vpop.permute.xlu1 %4195 }
0x461d   :  { %4198 = vst.msk [vmem:[#allocation3 + $0x18] sm:$0xff] %vm478_vm4, %v4196_v10  ;;  %9036 = vmatmul.mubr.msk.f32.vlgmr.msra.gmra.mxu1 %vm478_vm4, %v4196_v10  ;;  %v4627_v10 = vld [vmem:[%s8000_s8] sm:$0xff] }
0x461e   :  { %9050 = vmatpush3.msra.mxu1 %v10755_v32  ;;  %9057 = vmatprep.mubr.msk.f32.mxu1 %vm9869_vm2, %v9865_v0 }
0x461f   :  { %9051 = vmatprep.subr.mxu1 %v9865_v0 }
0x4620   :  { %9052 = vmatpush3.msra.mxu1 %v10759_v25 }
0x4621   :  { %9053 = vmatprep.subr.mxu1 %v9865_v0 }
0x4622   :  { %9054 = vmatpush3.msra.mxu1 %v10764_v26 }
0x4623   :  { %9055 = vmatprep.subr.mxu1 %v9865_v0 }
0x4624   :  { %9056 = vmatpush3.msra.mxu1 %v10769_v60 }
0x4625   :  { %9071 = vmatprep.subr.mxu1 %v4630_v46 }
0x46dd   :  { %v4268_v53 = vpop.f32.mrf.mxu1 }
0x46de   :  { %v4279_v22 = vadd.f32 %v4268_v53, %v10805_v20  ;;  %v4272_v54 = vadd.f32 %v4268_v53, %v4199_v12  ;;  %v4620_v53 = vld [vmem:[#allocation3 + $0x8] sm:$0xff] }
0x46df   :  { %v9037_v7 = vpop.f32.mrf.mxu1 }
0x46e0   :  { %4281 = vrot.lane.b32.xlu0 %v4279_v22, %s9868_s18  ;;  %v8129_v30 = vmul.f32 -1.442695, %v4272_v54  ;;  %v4621_v22 = vld [vmem:[#allocation3 + $0x10] sm:$0xff]  ;;  %v4622_v7 = vld [vmem:[#allocation3 + $0x18] sm:$0xff] }
0x46e2   :  { %9653 = vpow2.f32 %v8129_v30 }
0x46ef   :  { %v9654_v35 = vpop.eup %9653 }
0x46f0   :  { %v4276_v52 = vadd.f32 1.0, %v9654_v35 }
0x46f2   :  { %9655 = vrcp.f32 %v4276_v52 }
0x46ff   :  { %v9656_v24 = vpop.eup %9655 }
0x4700   :  { %v4291_v61 = vsub.f32 1.0, %v9656_v24  ;;  %v4297_v63 = vmul.f32 %v9656_v24, %v4193_v59  ;;  %v4628_v59 = vld [vmem:[%s8000_s8 + $0x8] sm:$0xff] }
0x4752   :  { %v4282_v56 = vpop.permute.xlu0 %4281 }
0x4753   :  { %v4284_v43 = vmul.f32 %v9656_v24, %v4282_v56  ;;  %v4409_v24 = vld [vmem:[#allocation5 + $0x30] sm:$0xff] }
0x4755   :  { %4286 = vrot.lane.b32.xlu1 %v4284_v43, %s9868_s18 }
0x47c7   :  { %v4287_v15 = vpop.permute.xlu1 %4286 }
0x47c8   :  { %v4289_v19 = vadd.f32 %v4287_v15, %v4199_v12 }
0x47ca   :  { %9657 = vtanh.f32 %v4289_v19 }
0x47d7   :  { %v9658_v45 = vpop.eup %9657 }
0x47d8   :  { %4293 = vrot.lane.b32.xlu0 %v9658_v45, %s9871_s23 }
0x484a   :  { %v4294_v21 = vpop.permute.xlu0 %4293 }
0x484b   :  { %v4296_v13 = vmul.f32 %v4294_v21, %v4291_v61 }
0x484d   :  { %v4298_v62 = vadd.f32 %v4297_v63, %v4296_v13 }
0x484f   :  { %4300 = vrot.lane.b32.xlu1 %v4298_v62, %s9871_s23 }
0x48c1   :  { %v4301_v57 = vpop.permute.xlu1 %4300 }
0x48c2   :  { %4303 = vst.msk [vmem:[#allocation3 + $0x20] sm:$0xff] %vm478_vm4, %v4301_v57  ;;  %9047 = vmatmul.mubr.msk.f32.vlgmr.msra.gmra.mxu0 %vm478_vm4, %v4301_v57  ;;  %v8146_v57 = vld [vmem:[%s10946_s12] ss:$0 sm:$0xff] }
0x48c3   :  { %9061 = vmatpush3.msra.mxu0 %v10755_v32  ;;  %9068 = vmatprep.mubr.msk.f32.mxu0 %vm9869_vm2, %v9865_v0 }
0x48c4   :  { %9062 = vmatprep.subr.mxu0 %v9865_v0 }
0x48c5   :  { %9063 = vmatpush3.msra.mxu0 %v10759_v25 }
0x48c6   :  { %9064 = vmatprep.subr.mxu0 %v9865_v0 }
0x48c7   :  { %9065 = vmatpush3.msra.mxu0 %v10764_v26 }
0x48c8   :  { %9066 = vmatprep.subr.mxu0 %v9865_v0 }
0x48c9   :  { %9067 = vmatpush3.msra.mxu0 %v10769_v60  ;;  %v4623_v12 = vld [vmem:[#allocation3 + $0x20] sm:$0xff] }
0x48ca   :  { %9091 = vmatprep.subr.mxu0 %v9865_v0 }
0x4982   :  { %v4373_v16 = vpop.f32.mrf.mxu0 }
0x4983   :  { %v4384_v32 = vadd.f32 %v4373_v16, %v10805_v20  ;;  %v4377_v37 = vadd.f32 %v4373_v16, %v4304_v4  ;;  %v10953_v16 = vadd.f32 %v10039_v34, %v10025_v28  ;;  %v10972_v28 = vld [vmem:[%s10960_s6 + $0x8] sm:$0xff]  ;;  %v10977_v34 = vld [vmem:[%s10960_s6] sm:$0xff] }
0x4984   :  { %v9048_v58 = vpop.f32.mrf.mxu0 }
0x4985   :  { %4386 = vrot.lane.b32.xlu0 %v4384_v32, %s9868_s18  ;;  %v8131_v17 = vmul.f32 -1.442695, %v4377_v37  ;;  %v10963_v32 = vld [vmem:[%s10960_s6 + $0x18] sm:$0xff]  ;;  %v10967_v58 = vld [vmem:[%s10960_s6 + $0x10] sm:$0xff] }
0x4987   :  { %9659 = vpow2.f32 %v8131_v17 }
0x4994   :  { %v9660_v25 = vpop.eup %9659 }
0x4995   :  { %v4381_v55 = vadd.f32 1.0, %v9660_v25 }
0x4997   :  { %9661 = vrcp.f32 %v4381_v55 }
0x49a4   :  { %v9662_v26 = vpop.eup %9661 }
0x49a5   :  { %v4396_v49 = vsub.f32 1.0, %v9662_v26  ;;  %v4402_v6 = vmul.f32 %v9662_v26, %v4298_v62 }
0x49f7   :  { %v4387_v39 = vpop.permute.xlu0 %4386 }
0x49f8   :  { %v4389_v3 = vmul.f32 %v9662_v26, %v4387_v39 }
0x49fa   :  { %4391 = vrot.lane.b32.xlu1 %v4389_v3, %s9868_s18 }
0x4a6c   :  { %v4392_v60 = vpop.permute.xlu1 %4391 }
0x4a6d   :  { %v4394_v5 = vadd.f32 %v4392_v60, %v4304_v4 }
0x4a6f   :  { %9663 = vtanh.f32 %v4394_v5 }
0x4a7c   :  { %v9664_v31 = vpop.eup %9663 }
0x4a7d   :  { %4398 = vrot.lane.b32.xlu0 %v9664_v31, %s9871_s23 }
0x4aef   :  { %v4399_v48 = vpop.permute.xlu0 %4398 }
0x4af0   :  { %v4401_v14 = vmul.f32 %v4399_v48, %v4396_v49 }
0x4af2   :  { %v10927_v27 = vadd.f32 %v4402_v6, %v4401_v14 }
0x4af4   :  { %4405 = vrot.lane.b32.xlu1 %v10927_v27, %s9871_s23 }
0x4b66   :  { %v4406_v2 = vpop.permute.xlu1 %4405 }
0x4b67   :  { %4408 = vst.msk [vmem:[#allocation3 + $0x28] sm:$0xff] %vm478_vm4, %v4406_v2  ;;  %9058 = vmatmul.mubr.msk.f32.vlgmr.msra.gmra.mxu1 %vm478_vm4, %v4406_v2 }
0x4b68   :  { %9072 = vmatpush3.msra.mxu1 %v4630_v46  ;;  %9079 = vmatprep.mubr.msk.f32.mxu1 %vm478_vm4, %v4619_v29 }
0x4b69   :  { %9073 = vmatprep.subr.mxu1 %v4629_v51 }
0x4b6a   :  { %9074 = vmatpush3.msra.mxu1 %v4629_v51 }
0x4b6b   :  { %9075 = vmatprep.subr.mxu1 %v4628_v59 }
0x4b6c   :  { %9076 = vmatpush3.msra.mxu1 %v4628_v59 }
0x4b6d   :  { %9077 = vmatprep.subr.mxu1 %v4627_v10 }
0x4b6e   :  { %9078 = vmatpush3.msra.mxu1 %v4627_v10  ;;  %v4624_v54 = vld [vmem:[#allocation3 + $0x28] sm:$0xff] }
0x4b6f   :  { %9080 = vmatmul.mubr.msk.f32.vlgmr.msra.gmra.mxu1 %vm478_vm4, %v4620_v53  ;;  %9113 = vmatprep.subr.mxu1 %v9865_v0 }
0x4b70   :  { %9082 = vmatprep.mubr.msk.f32.mxu1 %vm478_vm4, %v4621_v22  ;;  %9114 = vmatpush3.msra.mxu1 %v10963_v32 }
0x4b71   :  { %9115 = vmatprep.subr.mxu1 %v9865_v0 }
0x4b72   :  { %9116 = vmatpush3.msra.mxu1 %v10967_v58 }
0x4b73   :  { %9083 = vmatmul.mubr.msk.f32.gmra.mxu1 %vm478_vm4, %v4622_v7  ;;  %9117 = vmatprep.subr.mxu1 %v9865_v0 }
0x4b74   :  { %9085 = vmatprep.mubr.msk.f32.mxu1 %vm478_vm4, %v4623_v12  ;;  %9118 = vmatpush3.msra.mxu1 %v10972_v28 }
0x4b75   :  { %9119 = vmatprep.subr.mxu1 %v9865_v0 }
0x4b76   :  { %9120 = vmatpush3.msra.mxu1 %v10977_v34 }
0x4b77   :  { %9086 = vmatmul.mubr.msk.f32.gmra.mxu1 %vm478_vm4, %v4624_v54  ;;  %9135 = vmatprep.subr.mxu1 %v9865_v0 }
0x4c27   :  { %v4478_v30 = vpop.f32.mrf.mxu1 }
0x4c28   :  { %v4489_v35 = vadd.f32 %v4478_v30, %v10805_v20  ;;  %v4482_v56 = vadd.f32 %v4478_v30, %v4409_v24  ;;  %v4514_v30 = vld [vmem:[#allocation5 + $0x38] sm:$0xff] }
0x4c29   :  { %v9059_v52 = vpop.f32.mrf.mxu1 }
0x4c2a   :  { %4491 = vrot.lane.b32.xlu0 %v4489_v35, %s9868_s18  ;;  %v8133_v43 = vmul.f32 -1.442695, %v4482_v56 }
0x4c2c   :  { %9665 = vpow2.f32 %v8133_v43 }
0x4c39   :  { %v9666_v15 = vpop.eup %9665 }
0x4c3a   :  { %v4486_v19 = vadd.f32 1.0, %v9666_v15 }
0x4c3c   :  { %9667 = vrcp.f32 %v4486_v19 }
0x4c49   :  { %v9668_v45 = vpop.eup %9667 }
0x4c4a   :  { %v4501_v4 = vsub.f32 1.0, %v9668_v45  ;;  %v4507_v17 = vmul.f32 %v9668_v45, %v10927_v27 }
0x4c9c   :  { %v4492_v61 = vpop.permute.xlu0 %4491 }
0x4c9d   :  { %v4494_v21 = vmul.f32 %v9668_v45, %v4492_v61 }
0x4c9f   :  { %4496 = vrot.lane.b32.xlu1 %v4494_v21, %s9868_s18 }
0x4d11   :  { %v4497_v63 = vpop.permute.xlu1 %4496 }
0x4d12   :  { %v4499_v13 = vadd.f32 %v4497_v63, %v4409_v24 }
0x4d14   :  { %9669 = vtanh.f32 %v4499_v13 }
0x4d21   :  { %v9670_v62 = vpop.eup %9669 }
0x4d22   :  { %4503 = vrot.lane.b32.xlu0 %v9670_v62, %s9871_s23 }
0x4d26   :  { %4943 = vrot.lane.b32.xlu0 %v8146_v57, %s9868_s18 }
0x4d2a   :  { %514 = vrot.lane.b32.xlu0 %v10953_v16, %s9868_s18 }
0x4d94   :  { %v4504_v37 = vpop.permute.xlu0 %4503 }
0x4d95   :  { %v4506_v25 = vmul.f32 %v4504_v37, %v4501_v4 }
0x4d97   :  { %v10983_v55 = vadd.f32 %v4507_v17, %v4506_v25 }
0x4d98   :  { %v10989_v26 = vpop.permute.xlu0 %4943 }
0x4d99   :  { %4510 = vrot.lane.b32.xlu1 %v10983_v55, %s9871_s23 }
0x4d9c   :  { %v515_v3 = vpop.permute.xlu0 %514 }
0x4d9d   :  { %512 = vrot.lane.b32.xlu1 %v10467_v41, %s9868_s18 }
0x4e0b   :  { %v4511_v39 = vpop.permute.xlu1 %4510 }
0x4e0c   :  { %4513 = vst.msk [vmem:[#allocation3 + $0x30] sm:$0xff] %vm478_vm4, %v4511_v39  ;;  %9069 = vmatmul.mubr.msk.f32.vlgmr.msra.gmra.mxu0 %vm478_vm4, %v4511_v39 }
0x4e0d   :  { %9092 = vmatpush3.msra.mxu0 %v10963_v32  ;;  %9099 = vmatprep.mubr.msk.f32.mxu0 %vm9869_vm2, %v9865_v0 }
0x4e0e   :  { %9093 = vmatprep.subr.mxu0 %v9865_v0 }
0x4e0f   :  { %9094 = vmatpush3.msra.mxu0 %v10967_v58  ;;  %v513_v60 = vpop.permute.xlu1 %512 }
0x4e10   :  { %9095 = vmatprep.subr.mxu0 %v9865_v0  ;;  %v545_v41 = vsel %vm544_vm5, %v513_v60, %v515_v3 }
0x4e11   :  { %562 = vst.msk [vmem:[#allocation2 + $0x80] sm:$0xff] %vm421_vm3, %v545_v41  ;;  %9096 = vmatpush3.msra.mxu0 %v10972_v28 }
0x4e12   :  { %9097 = vmatprep.subr.mxu0 %v9865_v0 }
0x4e13   :  { %9098 = vmatpush3.msra.mxu0 %v10977_v34  ;;  %v4625_v5 = vld [vmem:[#allocation3 + $0x30] sm:$0xff] }
0x4e14   :  { %9100 = vmatmul.mubr.f32.vlgmr.msra.gmra.mxu0 %v9865_v0  ;;  %9088 = vmatprep.mubr.msk.f32.mxu1 %vm478_vm4, %v4625_v5 }
0x4e15   :  { %9102 = vmatprep.subr.mxu0 %v9865_v0  ;;  %9110 = vmatprep.mubr.msk.f32.mxu0 %vm9869_vm2, %v9865_v0 }
0x4e16   :  { %9103 = vmatpush3.msra.mxu0 %v10963_v32 }
0x4e17   :  { %9104 = vmatprep.subr.mxu0 %v9865_v0 }
0x4e18   :  { %9105 = vmatpush3.msra.mxu0 %v10967_v58  ;;  %v4860_v14 = vld [vmem:[#allocation2 + $0x80] sm:$0xff] }
0x4e19   :  { %9106 = vmatprep.subr.mxu0 %v9865_v0 }
0x4e1a   :  { %9107 = vmatpush3.msra.mxu0 %v10972_v28 }
0x4e1b   :  { %9108 = vmatprep.subr.mxu0 %v9865_v0 }
0x4e1c   :  { %9109 = vmatpush3.msra.mxu0 %v10977_v34 }
0x4e1d   :  { %9124 = vmatprep.subr.mxu0 %v9865_v0 }
0x4ecc   :  { %v4583_v46 = vpop.f32.mrf.mxu0 }
0x4ecd   :  { %v4594_v54 = vadd.f32 %v4583_v46, %v10805_v20  ;;  %v4587_v35 = vadd.f32 %v4583_v46, %v4514_v30 }
0x4ece   :  { %v9070_v31 = vpop.f32.mrf.mxu0 }
0x4ecf   :  { %v8135_v52 = vmul.f32 -1.442695, %v4587_v35 }
0x4ed4   :  { %v4927_v49 = vpop.f32.mrf.mxu0 }
0x4ed5   :  { %v4946_v48 = vadd.f32 %v10989_v26, %v4927_v49  ;;  %v4931_v27 = vadd.f32 %v4927_v49, %v4860_v14 }
0x4ed6   :  { %v9101_v6 = vpop.f32.mrf.mxu0 }
0x4ed7   :  { %4948 = vrot.lane.b32.xlu1 %v4946_v48, %s9868_s18  ;;  %v8145_v2 = vmul.f32 -1.442695, %v4931_v27 }
0x4ed9   :  { %9671 = vpow2.f32 %v8145_v2 }
0x4ee6   :  { %v9672_v51 = vpop.eup %9671 }
0x4ee7   :  { %v4935_v29 = vadd.f32 1.0, %v9672_v51 }
0x4ee9   :  { %9673 = vrcp.f32 %v4935_v29 }
0x4ef6   :  { %v9674_v59 = vpop.eup %9673 }
0x4ef7   :  { %v4958_v43 = vsub.f32 1.0, %v9674_v59  ;;  %v4964_v19 = vmul.f32 0.0, %v9674_v59 }
0x4f49   :  { %v4949_v10 = vpop.permute.xlu1 %4948 }
0x4f4a   :  { %v4951_v53 = vmul.f32 %v9674_v59, %v4949_v10 }
0x4f4c   :  { %4953 = vrot.lane.b32.xlu0 %v4951_v53, %s9868_s18 }
0x4fbe   :  { %v4954_v22 = vpop.permute.xlu0 %4953 }
0x4fbf   :  { %v4956_v7 = vadd.f32 %v4954_v22, %v4860_v14 }
0x4fc1   :  { %9675 = vtanh.f32 %v4956_v7 }
0x4fc2   :  { %9677 = vpow2.f32 %v8135_v52 }
0x4fce   :  { %v9676_v12 = vpop.eup %9675 }
0x4fcf   :  { %4960 = vrot.lane.b32.xlu1 %v9676_v12, %s9871_s23  ;;  %v9678_v24 = vpop.eup %9677 }
0x4fd0   :  { %v4591_v56 = vadd.f32 1.0, %v9678_v24 }
0x4fd2   :  { %9679 = vrcp.f32 %v4591_v56 }
0x4fd3   :  { %516 = vrot.lane.b32.xlu1 %v10576_v9, %s9868_s18 }
0x4fd7   :  { %4596 = vrot.lane.b32.xlu1 %v4594_v54, %s9868_s18 }
0x4fdf   :  { %v9680_v9 = vpop.eup %9679 }
0x4fe0   :  { %v4606_v25 = vsub.f32 1.0, %v9680_v9  ;;  %v4612_v3 = vmul.f32 %v9680_v9, %v10983_v55 }
0x5041   :  { %v4961_v15 = vpop.permute.xlu1 %4960 }
0x5042   :  { %v4963_v45 = vmul.f32 %v4961_v15, %v4958_v43  ;;  %v11073_v43 = vpop.f32.mrf.mxu1 }
0x5044   :  { %v4965_v61 = vadd.f32 %v4964_v19, %v4963_v45  ;;  %v11075_v15 = vpop.f32.mrf.mxu1 }
0x5045   :  { %v517_v21 = vpop.permute.xlu1 %516 }
0x5046   :  { %4967 = vrot.lane.b32.xlu0 %v4965_v61, %s9871_s23  ;;  %v11077_v19 = vpop.f32.mrf.mxu1 }
0x5048   :  { %v11079_v45 = vpop.f32.mrf.mxu1 }
0x5049   :  { %v4597_v63 = vpop.permute.xlu1 %4596 }
0x504a   :  { %v4599_v20 = vmul.f32 %v9680_v9, %v4597_v63  ;;  %518 = vrot.lane.b32.xlu0 %v10035_v33, %s9868_s18 }
0x504c   :  { %4601 = vrot.lane.b32.xlu1 %v4599_v20, %s9868_s18 }
0x50b8   :  { %v4968_v13 = vpop.permute.xlu0 %4967 }
0x50b9   :  { %4970 = vst.msk [vmem:[#allocation3] sm:$0xff] %vm478_vm4, %v4968_v13  ;;  %9111 = vmatmul.mubr.msk.f32.vlgmr.msra.gmra.mxu0 %vm478_vm4, %v4968_v13 }
0x50ba   :  { %9125 = vmatpush3.msra.mxu0 %v10963_v32  ;;  %9132 = vmatprep.mubr.msk.f32.mxu0 %vm9869_vm2, %v9865_v0 }
0x50bb   :  { %9126 = vmatprep.subr.mxu0 %v9865_v0 }
0x50bc   :  { %v519_v62 = vpop.permute.xlu0 %518  ;;  %9127 = vmatpush3.msra.mxu0 %v10967_v58 }
0x50bd   :  { %v546_v57 = vsel %vm544_vm5, %v517_v21, %v519_v62  ;;  %9128 = vmatprep.subr.mxu0 %v9865_v0 }
0x50be   :  { %563 = vst.msk [vmem:[#allocation2 + $0x88] sm:$0xff] %vm421_vm3, %v546_v57  ;;  %v4602_v4 = vpop.permute.xlu1 %4601  ;;  %9129 = vmatpush3.msra.mxu0 %v10972_v28 }
0x50bf   :  { %v4604_v37 = vadd.f32 %v4602_v4, %v4514_v30  ;;  %9130 = vmatprep.subr.mxu0 %v9865_v0 }
0x50c0   :  { %9131 = vmatpush3.msra.mxu0 %v10977_v34 }
0x50c1   :  { %9681 = vtanh.f32 %v4604_v37  ;;  %9146 = vmatprep.subr.mxu0 %v9865_v0 }
0x50c5   :  { %v4972_v55 = vld [vmem:[#allocation2 + $0x88] sm:$0xff] }
0x50ce   :  { %v9682_v17 = vpop.eup %9681 }
0x50cf   :  { %4608 = vrot.lane.b32.xlu1 %v9682_v17, %s9871_s23 }
0x5141   :  { %v4609_v39 = vpop.permute.xlu1 %4608 }
0x5142   :  { %v4611_v60 = vmul.f32 %v4609_v39, %v4606_v25 }
0x5144   :  { %v4613_v41 = vadd.f32 %v4612_v3, %v4611_v60 }
0x5146   :  { %4615 = vrot.lane.b32.xlu1 %v4613_v41, %s9871_s23 }
0x514a   :  { %520 = vrot.lane.b32.xlu1 %v10603_v50, %s9868_s18 }
0x5179   :  { %v5041_v5 = vpop.f32.mrf.mxu0 }
0x517a   :  { %v5052_v46 = vadd.f32 %v5041_v5, %v10989_v26  ;;  %v5045_v6 = vadd.f32 %v5041_v5, %v4972_v55 }
0x517b   :  { %v9112_v31 = vpop.f32.mrf.mxu0 }
0x517c   :  { %5054 = vrot.lane.b32.xlu0 %v5052_v46, %s9868_s18  ;;  %v8148_v14 = vmul.f32 -1.442695, %v5045_v6 }
0x517e   :  { %9683 = vpow2.f32 %v8148_v14 }
0x518b   :  { %v9684_v50 = vpop.eup %9683 }
0x518c   :  { %v5049_v27 = vadd.f32 1.0, %v9684_v50 }
0x518e   :  { %9685 = vrcp.f32 %v5049_v27 }
0x519b   :  { %v9686_v2 = vpop.eup %9685 }
0x519c   :  { %v5064_v22 = vsub.f32 1.0, %v9686_v2  ;;  %v5070_v12 = vmul.f32 %v9686_v2, %v4965_v61  ;;  %v11081_v61 = vpop.f32.mrf.mxu1 }
0x519e   :  { %v11083_v21 = vpop.f32.mrf.mxu1 }
0x51b8   :  { %v4616_v49 = vpop.permute.xlu1 %4615 }
0x51b9   :  { %4618 = vst.msk [vmem:[#allocation3 + $0x38] sm:$0xff] %vm478_vm4, %v4616_v49 }
0x51bc   :  { %v521_v52 = vpop.permute.xlu1 %520 }
0x51c0   :  { %v4626_v48 = vld [vmem:[#allocation3 + $0x38] sm:$0xff] }
0x51c1   :  { %9089 = vmatmul.mubr.msk.f32.gmra.mxu1 %vm478_vm4, %v4626_v48 }
0x51c2   :  { %9121 = vmatprep.mubr.msk.f32.mxu1 %vm9869_vm2, %v9865_v0 }
0x51ee   :  { %v5055_v51 = vpop.permute.xlu0 %5054 }
0x51ef   :  { %v5057_v29 = vmul.f32 %v9686_v2, %v5055_v51 }
0x51f1   :  { %5059 = vrot.lane.b32.xlu0 %v5057_v29, %s9868_s18 }
0x5263   :  { %v5060_v59 = vpop.permute.xlu0 %5059 }
0x5264   :  { %v5062_v10 = vadd.f32 %v5060_v59, %v4972_v55 }
0x5266   :  { %9687 = vtanh.f32 %v5062_v10 }
0x5273   :  { %v9688_v53 = vpop.eup %9687 }
0x5274   :  { %5066 = vrot.lane.b32.xlu0 %v9688_v53, %s9871_s23 }
0x5281   :  { %v11085_v9 = vpop.f32.mrf.mxu1 }
0x5283   :  { %v11087_v63 = vpop.f32.mrf.mxu1 }
0x52e6   :  { %v5067_v7 = vpop.permute.xlu0 %5066 }
0x52e7   :  { %v5069_v54 = vmul.f32 %v5067_v7, %v5064_v22 }
0x52e9   :  { %v5071_v30 = vadd.f32 %v5070_v12, %v5069_v54 }
0x52eb   :  { %5073 = vrot.lane.b32.xlu0 %v5071_v30, %s9871_s23 }
0x52ef   :  { %522 = vrot.lane.b32.xlu0 %v10045_v38, %s9868_s18 }
0x535d   :  { %v5074_v35 = vpop.permute.xlu0 %5073 }
0x535e   :  { %5076 = vst.msk [vmem:[#allocation3 + $0x8] sm:$0xff] %vm478_vm4, %v5074_v35  ;;  %9122 = vmatmul.mubr.msk.f32.vlgmr.msra.gmra.mxu1 %vm478_vm4, %v5074_v35 }
0x535f   :  { %9136 = vmatpush3.msra.mxu1 %v10963_v32  ;;  %9143 = vmatprep.mubr.msk.f32.mxu1 %vm9869_vm2, %v9865_v0 }
0x5360   :  { %9137 = vmatprep.subr.mxu1 %v9865_v0 }
0x5361   :  { %v523_v24 = vpop.permute.xlu0 %522  ;;  %9138 = vmatpush3.msra.mxu1 %v10967_v58 }
0x5362   :  { %v547_v56 = vsel %vm544_vm5, %v521_v52, %v523_v24  ;;  %9139 = vmatprep.subr.mxu1 %v9865_v0 }
0x5363   :  { %564 = vst.msk [vmem:[#allocation2 + $0x90] sm:$0xff] %vm421_vm3, %v547_v56  ;;  %9140 = vmatpush3.msra.mxu1 %v10972_v28 }
0x5364   :  { %9141 = vmatprep.subr.mxu1 %v9865_v0 }
0x5365   :  { %9142 = vmatpush3.msra.mxu1 %v10977_v34 }
0x5366   :  { %9157 = vmatprep.subr.mxu1 %v9865_v0 }
0x536a   :  { %v5078_v57 = vld [vmem:[#allocation2 + $0x90] sm:$0xff] }
0x541e   :  { %v5147_v20 = vpop.f32.mrf.mxu1 }
0x541f   :  { %v5158_v13 = vadd.f32 %v5147_v20, %v10989_v26  ;;  %v5151_v4 = vadd.f32 %v5147_v20, %v5078_v57 }
0x5420   :  { %v9123_v62 = vpop.f32.mrf.mxu1 }
0x5421   :  { %5160 = vrot.lane.b32.xlu1 %v5158_v13, %s9868_s18  ;;  %v8150_v37 = vmul.f32 -1.442695, %v5151_v4 }
0x5423   :  { %9689 = vpow2.f32 %v8150_v37 }
0x5430   :  { %v9690_v17 = vpop.eup %9689 }
0x5431   :  { %v5155_v25 = vadd.f32 1.0, %v9690_v17 }
0x5433   :  { %9691 = vrcp.f32 %v5155_v25 }
0x5440   :  { %v9692_v39 = vpop.eup %9691 }
0x5441   :  { %v5170_v31 = vsub.f32 1.0, %v9692_v39  ;;  %v5176_v48 = vmul.f32 %v9692_v39, %v5071_v30 }
0x5493   :  { %v5161_v3 = vpop.permute.xlu1 %5160 }
0x5494   :  { %v5163_v60 = vmul.f32 %v9692_v39, %v5161_v3 }
0x5496   :  { %5165 = vrot.lane.b32.xlu0 %v5163_v60, %s9868_s18 }
0x5508   :  { %v5166_v41 = vpop.permute.xlu0 %5165 }
0x5509   :  { %v5168_v5 = vadd.f32 %v5166_v41, %v5078_v57 }
0x550b   :  { %9693 = vtanh.f32 %v5168_v5 }
0x5518   :  { %v9694_v46 = vpop.eup %9693 }
0x5519   :  { %5172 = vrot.lane.b32.xlu1 %v9694_v46, %s9871_s23 }
0x551d   :  { %524 = vrot.lane.b32.xlu1 %v10630_v11, %s9868_s18 }
0x558b   :  { %v5173_v49 = vpop.permute.xlu1 %5172 }
0x558c   :  { %v5175_v55 = vmul.f32 %v5173_v49, %v5170_v31 }
0x558e   :  { %v5177_v6 = vadd.f32 %v5176_v48, %v5175_v55 }
0x558f   :  { %v525_v11 = vpop.permute.xlu1 %524 }
0x5590   :  { %5179 = vrot.lane.b32.xlu0 %v5177_v6, %s9871_s23 }
0x5594   :  { %526 = vrot.lane.b32.xlu0 %v10042_v36, %s9868_s18 }
0x5602   :  { %v5180_v14 = vpop.permute.xlu0 %5179 }
0x5603   :  { %5182 = vst.msk [vmem:[#allocation3 + $0x10] sm:$0xff] %vm478_vm4, %v5180_v14  ;;  %9133 = vmatmul.mubr.msk.f32.vlgmr.msra.gmra.mxu0 %vm478_vm4, %v5180_v14 }
0x5604   :  { %9147 = vmatpush3.msra.mxu0 %v10963_v32  ;;  %9154 = vmatprep.mubr.msk.f32.mxu0 %vm9869_vm2, %v9865_v0 }
0x5605   :  { %9148 = vmatprep.subr.mxu0 %v9865_v0 }
0x5606   :  { %v527_v50 = vpop.permute.xlu0 %526  ;;  %9149 = vmatpush3.msra.mxu0 %v10967_v58 }
0x5607   :  { %v548_v27 = vsel %vm544_vm5, %v525_v11, %v527_v50  ;;  %9150 = vmatprep.subr.mxu0 %v9865_v0 }
0x5608   :  { %565 = vst.msk [vmem:[#allocation2 + $0x98] sm:$0xff] %vm421_vm3, %v548_v27  ;;  %9151 = vmatpush3.msra.mxu0 %v10972_v28 }
0x5609   :  { %9152 = vmatprep.subr.mxu0 %v9865_v0 }
0x560a   :  { %9153 = vmatpush3.msra.mxu0 %v10977_v34 }
0x560b   :  { %9168 = vmatprep.subr.mxu0 %v9865_v0 }
0x560f   :  { %v5184_v59 = vld [vmem:[#allocation2 + $0x98] sm:$0xff] }
0x56c3   :  { %v5253_v2 = vpop.f32.mrf.mxu0 }
0x56c4   :  { %v5264_v51 = vadd.f32 %v5253_v2, %v10989_v26  ;;  %v5257_v10 = vadd.f32 %v5253_v2, %v5184_v59 }
0x56c5   :  { %v9134_v29 = vpop.f32.mrf.mxu0 }
0x56c6   :  { %5266 = vrot.lane.b32.xlu1 %v5264_v51, %s9868_s18  ;;  %v8152_v53 = vmul.f32 -1.442695, %v5257_v10 }
0x56c8   :  { %9695 = vpow2.f32 %v8152_v53 }
0x56d5   :  { %v9696_v22 = vpop.eup %9695 }
0x56d6   :  { %v5261_v7 = vadd.f32 1.0, %v9696_v22 }
0x56d8   :  { %9697 = vrcp.f32 %v5261_v7 }
0x56e5   :  { %v9698_v12 = vpop.eup %9697 }
0x56e6   :  { %v5276_v56 = vsub.f32 1.0, %v9698_v12  ;;  %v5282_v13 = vmul.f32 %v9698_v12, %v5177_v6 }
0x5738   :  { %v5267_v54 = vpop.permute.xlu1 %5266 }
0x5739   :  { %v5269_v30 = vmul.f32 %v9698_v12, %v5267_v54 }
0x573b   :  { %5271 = vrot.lane.b32.xlu0 %v5269_v30, %s9868_s18 }
0x57ad   :  { %v5272_v35 = vpop.permute.xlu0 %5271 }
0x57ae   :  { %v5274_v52 = vadd.f32 %v5272_v35, %v5184_v59 }
0x57b0   :  { %9699 = vtanh.f32 %v5274_v52 }
0x57bd   :  { %v9700_v24 = vpop.eup %9699 }
0x57be   :  { %5278 = vrot.lane.b32.xlu1 %v9700_v24, %s9871_s23 }
0x57c2   :  { %528 = vrot.lane.b32.xlu1 %v10657_v1, %s9868_s18 }
0x5830   :  { %v5279_v20 = vpop.permute.xlu1 %5278 }
0x5831   :  { %v5281_v62 = vmul.f32 %v5279_v20, %v5276_v56 }
0x5833   :  { %v5283_v57 = vadd.f32 %v5282_v13, %v5281_v62  ;;  %v8162_v13 = vld [vmem:[%s11164_s21] ss:$0 sm:$0xff] }
0x5834   :  { %v529_v1 = vpop.permute.xlu1 %528 }
0x5835   :  { %5285 = vrot.lane.b32.xlu0 %v5283_v57, %s9871_s23 }
0x5839   :  { %530 = vrot.lane.b32.xlu0 %v10051_v42, %s9868_s18 }
0x58a7   :  { %v5286_v4 = vpop.permute.xlu0 %5285 }
0x58a8   :  { %5288 = vst.msk [vmem:[#allocation3 + $0x18] sm:$0xff] %vm478_vm4, %v5286_v4  ;;  %9144 = vmatmul.mubr.msk.f32.vlgmr.msra.gmra.mxu1 %vm478_vm4, %v5286_v4 }
0x58a9   :  { %9158 = vmatpush3.msra.mxu1 %v10963_v32  ;;  %9165 = vmatprep.mubr.msk.f32.mxu1 %vm9869_vm2, %v9865_v0 }
0x58aa   :  { %9159 = vmatprep.subr.mxu1 %v9865_v0 }
0x58ab   :  { %v531_v37 = vpop.permute.xlu0 %530  ;;  %9160 = vmatpush3.msra.mxu1 %v10967_v58 }
0x58ac   :  { %v549_v17 = vsel %vm544_vm5, %v529_v1, %v531_v37  ;;  %9161 = vmatprep.subr.mxu1 %v9865_v0 }
0x58ad   :  { %566 = vst.msk [vmem:[#allocation2 + $0xa0] sm:$0xff] %vm421_vm3, %v549_v17  ;;  %9162 = vmatpush3.msra.mxu1 %v10972_v28 }
0x58ae   :  { %9163 = vmatprep.subr.mxu1 %v9865_v0 }
0x58af   :  { %9164 = vmatpush3.msra.mxu1 %v10977_v34 }
0x58b0   :  { %9179 = vmatprep.subr.mxu1 %v9865_v0 }
0x58b4   :  { %v5290_v60 = vld [vmem:[#allocation2 + $0xa0] sm:$0xff] }
0x5968   :  { %v5359_v25 = vpop.f32.mrf.mxu1 }
0x5969   :  { %v5370_v39 = vadd.f32 %v5359_v25, %v10989_v26  ;;  %v5363_v41 = vadd.f32 %v5359_v25, %v5290_v60  ;;  %v11187_v25 = vld [vmem:[%s11182_s26 + $0x18] sm:$0xff] }
0x596a   :  { %v9145_v3 = vpop.f32.mrf.mxu1 }
0x596b   :  { %5372 = vrot.lane.b32.xlu1 %v5370_v39, %s9868_s18  ;;  %v8154_v5 = vmul.f32 -1.442695, %v5363_v41  ;;  %v11199_v3 = vld [vmem:[%s11182_s26 + $0x8] sm:$0xff] }
0x596d   :  { %9701 = vpow2.f32 %v8154_v5 }
0x597a   :  { %v9702_v46 = vpop.eup %9701 }
0x597b   :  { %v5367_v31 = vadd.f32 1.0, %v9702_v46  ;;  %v11205_v46 = vld [vmem:[%s11182_s26] sm:$0xff] }
0x597d   :  { %9703 = vrcp.f32 %v5367_v31 }
0x598a   :  { %v9704_v49 = vpop.eup %9703 }
0x598b   :  { %v5382_v50 = vsub.f32 1.0, %v9704_v49  ;;  %v5388_v2 = vmul.f32 %v9704_v49, %v5283_v57 }
0x59dd   :  { %v5373_v48 = vpop.permute.xlu1 %5372 }
0x59de   :  { %v5375_v55 = vmul.f32 %v9704_v49, %v5373_v48 }
0x59e0   :  { %5377 = vrot.lane.b32.xlu0 %v5375_v55, %s9868_s18 }
0x5a52   :  { %v5378_v6 = vpop.permute.xlu0 %5377 }
0x5a53   :  { %v5380_v14 = vadd.f32 %v5378_v6, %v5290_v60 }
0x5a55   :  { %9705 = vtanh.f32 %v5380_v14 }
0x5a62   :  { %v9706_v11 = vpop.eup %9705 }
0x5a63   :  { %5384 = vrot.lane.b32.xlu1 %v9706_v11, %s9871_s23 }
0x5a67   :  { %532 = vrot.lane.b32.xlu1 %v10683_v23, %s9868_s18 }
0x5ad5   :  { %v5385_v27 = vpop.permute.xlu1 %5384 }
0x5ad6   :  { %v5387_v51 = vmul.f32 %v5385_v27, %v5382_v50 }
0x5ad8   :  { %v5389_v29 = vadd.f32 %v5388_v2, %v5387_v51 }
0x5ad9   :  { %v533_v23 = vpop.permute.xlu1 %532 }
0x5ada   :  { %5391 = vrot.lane.b32.xlu0 %v5389_v29, %s9871_s23 }
0x5ade   :  { %534 = vrot.lane.b32.xlu0 %v10048_v40, %s9868_s18 }
0x5b4c   :  { %v5392_v59 = vpop.permute.xlu0 %5391 }
0x5b4d   :  { %5394 = vst.msk [vmem:[#allocation3 + $0x20] sm:$0xff] %vm478_vm4, %v5392_v59  ;;  %9155 = vmatmul.mubr.msk.f32.vlgmr.msra.gmra.mxu0 %vm478_vm4, %v5392_v59 }
0x5b4e   :  { %9169 = vmatpush3.msra.mxu0 %v10963_v32  ;;  %9176 = vmatprep.mubr.msk.f32.mxu0 %vm9869_vm2, %v9865_v0 }
0x5b4f   :  { %9170 = vmatprep.subr.mxu0 %v9865_v0 }
0x5b50   :  { %v535_v10 = vpop.permute.xlu0 %534  ;;  %9171 = vmatpush3.msra.mxu0 %v10967_v58 }
0x5b51   :  { %v550_v53 = vsel %vm544_vm5, %v533_v23, %v535_v10  ;;  %9172 = vmatprep.subr.mxu0 %v9865_v0 }
0x5b52   :  { %567 = vst.msk [vmem:[#allocation2 + $0xa8] sm:$0xff] %vm421_vm3, %v550_v53  ;;  %9173 = vmatpush3.msra.mxu0 %v10972_v28 }
0x5b53   :  { %9174 = vmatprep.subr.mxu0 %v9865_v0 }
0x5b54   :  { %9175 = vmatpush3.msra.mxu0 %v10977_v34 }
0x5b55   :  { %9190 = vmatprep.subr.mxu0 %v9865_v0 }
0x5b59   :  { %v5396_v58 = vld [vmem:[#allocation2 + $0xa8] sm:$0xff] }
0x5c0d   :  { %v5465_v32 = vpop.f32.mrf.mxu0 }
0x5c0e   :  { %v5476_v22 = vadd.f32 %v5465_v32, %v10989_v26  ;;  %v5469_v12 = vadd.f32 %v5465_v32, %v5396_v58 }
0x5c0f   :  { %v9156_v7 = vpop.f32.mrf.mxu0 }
0x5c10   :  { %5478 = vrot.lane.b32.xlu1 %v5476_v22, %s9868_s18  ;;  %v8156_v54 = vmul.f32 -1.442695, %v5469_v12 }
0x5c12   :  { %9707 = vpow2.f32 %v8156_v54 }
0x5c1f   :  { %v9708_v30 = vpop.eup %9707 }
0x5c20   :  { %v5473_v35 = vadd.f32 1.0, %v9708_v30 }
0x5c22   :  { %9709 = vrcp.f32 %v5473_v35 }
0x5c2f   :  { %v9710_v28 = vpop.eup %9709 }
0x5c30   :  { %v5488_v62 = vsub.f32 1.0, %v9710_v28  ;;  %v5494_v4 = vmul.f32 %v9710_v28, %v5389_v29 }
0x5c82   :  { %v5479_v52 = vpop.permute.xlu1 %5478 }
0x5c83   :  { %v5481_v24 = vmul.f32 %v9710_v28, %v5479_v52 }
0x5c85   :  { %5483 = vrot.lane.b32.xlu0 %v5481_v24, %s9868_s18 }
0x5cf7   :  { %v5484_v34 = vpop.permute.xlu0 %5483 }
0x5cf8   :  { %v5486_v56 = vadd.f32 %v5484_v34, %v5396_v58 }
0x5cfa   :  { %9711 = vtanh.f32 %v5486_v56 }
0x5d07   :  { %v9712_v20 = vpop.eup %9711 }
0x5d08   :  { %5490 = vrot.lane.b32.xlu1 %v9712_v20, %s9871_s23 }
0x5d0c   :  { %5802 = vrot.lane.b32.xlu1 %v8162_v13, %s9868_s18 }
0x5d10   :  { %538 = vrot.lane.b32.xlu1 %v10059_v47, %s9868_s18 }
0x5d7a   :  { %v5491_v57 = vpop.permute.xlu1 %5490 }
0x5d7b   :  { %v5493_v1 = vmul.f32 %v5491_v57, %v5488_v62 }
0x5d7d   :  { %v11171_v37 = vadd.f32 %v5494_v4, %v5493_v1 }
0x5d7e   :  { %v11184_v17 = vpop.permute.xlu1 %5802 }
0x5d7f   :  { %5497 = vrot.lane.b32.xlu0 %v11171_v37, %s9871_s23 }
0x5d82   :  { %v539_v60 = vpop.permute.xlu1 %538 }
0x5d83   :  { %536 = vrot.lane.b32.xlu0 %v10716_v18, %s9868_s18  ;;  %v11192_v18 = vld [vmem:[%s11182_s26 + $0x10] sm:$0xff] }
0x5d87   :  { %584 = vrot.lane.b32.xlu0 %v10054_v44, %s9871_s23 }
0x5df1   :  { %v5498_v39 = vpop.permute.xlu0 %5497 }
0x5df2   :  { %5500 = vst.msk [vmem:[#allocation3 + $0x28] sm:$0xff] %vm478_vm4, %v5498_v39  ;;  %9166 = vmatmul.mubr.msk.f32.vlgmr.msra.gmra.mxu1 %vm478_vm4, %v5498_v39 }
0x5df3   :  { %9180 = vmatpush3.msra.mxu1 %v11187_v25  ;;  %9187 = vmatprep.mubr.msk.f32.mxu1 %vm9869_vm2, %v9865_v0 }
0x5df4   :  { %9181 = vmatprep.subr.mxu1 %v9865_v0 }
0x5df5   :  { %9182 = vmatpush3.msra.mxu1 %v11192_v18  ;;  %v537_v41 = vpop.permute.xlu0 %536 }
0x5df6   :  { %9183 = vmatprep.subr.mxu1 %v9865_v0  ;;  %v551_v5 = vsel %vm544_vm5, %v537_v41, %v539_v60 }
0x5df7   :  { %568 = vst.msk [vmem:[#allocation2 + $0xb0] sm:$0xff] %vm421_vm3, %v551_v5  ;;  %9184 = vmatpush3.msra.mxu1 %v11199_v3 }
0x5df8   :  { %9185 = vmatprep.subr.mxu1 %v9865_v0 }
0x5df9   :  { %9186 = vmatpush3.msra.mxu1 %v11205_v46  ;;  %v585_v31 = vpop.permute.xlu0 %584 }
0x5dfa   :  { %9188 = vmatmul.mubr.f32.vlgmr.msra.gmra.mxu1 %v9865_v0  ;;  %602 = vst.msk [vmem:[#allocation2 + $0xf8] sm:$0xff] %vm421_vm3, %v585_v31  ;;  %9201 = vmatprep.subr.mxu1 %v9865_v0 }
0x5dfb   :  { %9202 = vmatpush3.msra.mxu1 %v11187_v25  ;;  %9209 = vmatprep.mubr.msk.f32.mxu1 %vm9869_vm2, %v9865_v0 }
0x5dfc   :  { %9203 = vmatprep.subr.mxu1 %v9865_v0 }
0x5dfd   :  { %9204 = vmatpush3.msra.mxu1 %v11192_v18 }
0x5dfe   :  { %9205 = vmatprep.subr.mxu1 %v9865_v0  ;;  %v5502_v50 = vld [vmem:[#allocation2 + $0xb0] sm:$0xff] }
0x5dff   :  { %9206 = vmatpush3.msra.mxu1 %v11199_v3 }
0x5e00   :  { %9207 = vmatprep.subr.mxu1 %v9865_v0 }
0x5e01   :  { %9208 = vmatpush3.msra.mxu1 %v11205_v46  ;;  %v5719_v51 = vld [vmem:[#allocation2 + $0xf8] sm:$0xff] }
0x5e02   :  { %9223 = vmatprep.subr.mxu1 %v9865_v0 }
0x5eb2   :  { %v5571_v49 = vpop.f32.mrf.mxu1 }
0x5eb3   :  { %v5582_v48 = vadd.f32 %v5571_v49, %v10989_v26  ;;  %v5575_v27 = vadd.f32 %v5571_v49, %v5502_v50 }
0x5eb4   :  { %v9167_v55 = vpop.f32.mrf.mxu1 }
0x5eb5   :  { %5584 = vrot.lane.b32.xlu1 %v5582_v48, %s9868_s18  ;;  %v8158_v2 = vmul.f32 -1.442695, %v5575_v27 }
0x5eb7   :  { %9713 = vpow2.f32 %v8158_v2 }
0x5eba   :  { %v5786_v6 = vpop.f32.mrf.mxu1 }
0x5ebb   :  { %v5805_v14 = vadd.f32 %v11184_v17, %v5786_v6  ;;  %v5790_v29 = vadd.f32 %v5786_v6, %v5719_v51 }
0x5ebc   :  { %v9189_v11 = vpop.f32.mrf.mxu1 }
0x5ebd   :  { %5807 = vrot.lane.b32.xlu0 %v5805_v14, %s9868_s18  ;;  %v8161_v59 = vmul.f32 -1.442695, %v5790_v29 }
0x5ebf   :  { %9715 = vpow2.f32 %v8161_v59 }
0x5ec4   :  { %v9714_v23 = vpop.eup %9713 }
0x5ec5   :  { %v5579_v10 = vadd.f32 1.0, %v9714_v23 }
0x5ec7   :  { %9717 = vrcp.f32 %v5579_v10 }
0x5ecc   :  { %v9716_v53 = vpop.eup %9715 }
0x5ecd   :  { %v5794_v32 = vadd.f32 1.0, %v9716_v53 }
0x5ecf   :  { %9719 = vrcp.f32 %v5794_v32 }
0x5ed4   :  { %v9718_v22 = vpop.eup %9717 }
0x5ed5   :  { %v5594_v20 = vsub.f32 1.0, %v9718_v22  ;;  %v5600_v62 = vmul.f32 %v9718_v22, %v11171_v37 }
0x5edc   :  { %v9720_v12 = vpop.eup %9719 }
0x5edd   :  { %v5817_v1 = vsub.f32 1.0, %v9720_v12  ;;  %v5823_v60 = vmul.f32 0.0, %v9720_v12 }
0x5f27   :  { %v5585_v7 = vpop.permute.xlu1 %5584 }
0x5f28   :  { %v5587_v58 = vmul.f32 %v9718_v22, %v5585_v7 }
0x5f2a   :  { %5589 = vrot.lane.b32.xlu1 %v5587_v58, %s9868_s18 }
0x5f2f   :  { %v5808_v54 = vpop.permute.xlu0 %5807 }
0x5f30   :  { %v5810_v30 = vmul.f32 %v9720_v12, %v5808_v54 }
0x5f32   :  { %5812 = vrot.lane.b32.xlu0 %v5810_v30, %s9868_s18 }
0x5f9c   :  { %v5590_v35 = vpop.permute.xlu1 %5589 }
0x5f9d   :  { %v5592_v28 = vadd.f32 %v5590_v35, %v5502_v50 }
0x5f9f   :  { %9721 = vtanh.f32 %v5592_v28 }
0x5fa4   :  { %v5813_v52 = vpop.permute.xlu0 %5812 }
0x5fa5   :  { %v5815_v24 = vadd.f32 %v5813_v52, %v5719_v51 }
0x5fa7   :  { %9723 = vtanh.f32 %v5815_v24 }
0x5fac   :  { %v9722_v34 = vpop.eup %9721 }
0x5fad   :  { %5596 = vrot.lane.b32.xlu1 %v9722_v34, %s9871_s23 }
0x5fb4   :  { %v9724_v56 = vpop.eup %9723 }
0x5fb5   :  { %5819 = vrot.lane.b32.xlu0 %v9724_v56, %s9871_s23 }
0x601f   :  { %v5597_v13 = vpop.permute.xlu1 %5596 }
0x6020   :  { %v5599_v57 = vmul.f32 %v5597_v13, %v5594_v20 }
0x6022   :  { %v11233_v4 = vadd.f32 %v5600_v62, %v5599_v57 }
0x6024   :  { %5603 = vrot.lane.b32.xlu1 %v11233_v4, %s9871_s23 }
0x6027   :  { %v5820_v39 = vpop.permute.xlu0 %5819 }
0x6028   :  { %v5822_v41 = vmul.f32 %v5820_v39, %v5817_v1  ;;  %582 = vrot.lane.b32.xlu1 %v10059_v47, %s9871_s23 }
0x602a   :  { %v5824_v5 = vadd.f32 %v5823_v60, %v5822_v41 }
0x602c   :  { %5826 = vrot.lane.b32.xlu0 %v5824_v5, %s9871_s23 }
0x6096   :  { %v5604_v31 = vpop.permute.xlu1 %5603 }
0x6097   :  { %5606 = vst.msk [vmem:[#allocation3 + $0x30] sm:$0xff] %vm478_vm4, %v5604_v31  ;;  %9177 = vmatmul.mubr.msk.f32.vlgmr.msra.gmra.mxu0 %vm478_vm4, %v5604_v31 }
0x6098   :  { %9191 = vmatpush3.msra.mxu0 %v11187_v25  ;;  %9198 = vmatprep.mubr.msk.f32.mxu0 %vm9869_vm2, %v9865_v0 }
0x6099   :  { %9192 = vmatprep.subr.mxu0 %v9865_v0 }
0x609a   :  { %9193 = vmatpush3.msra.mxu0 %v11192_v18  ;;  %v583_v37 = vpop.permute.xlu1 %582 }
0x609b   :  { %9194 = vmatprep.subr.mxu0 %v9865_v0  ;;  %601 = vst.msk [vmem:[#allocation2 + $0xf0] sm:$0xff] %vm421_vm3, %v583_v37 }
0x609c   :  { %9195 = vmatpush3.msra.mxu0 %v11199_v3 }
0x609d   :  { %9196 = vmatprep.subr.mxu0 %v9865_v0 }
0x609e   :  { %v5827_v47 = vpop.permute.xlu0 %5826  ;;  %9197 = vmatpush3.msra.mxu0 %v11205_v46 }
0x609f   :  { %5830 = vst.msk [vmem:[#allocation4 + $0x38] sm:$0xff] %vm478_vm4, %v5827_v47  ;;  %9199 = vmatmul.mubr.msk.f32.vlgmr.msra.gmra.mxu0 %vm478_vm4, %v5827_v47  ;;  %9212 = vmatprep.subr.mxu0 %v9865_v0 }
0x60a0   :  { %9213 = vmatpush3.msra.mxu0 %v11187_v25  ;;  %9220 = vmatprep.mubr.msk.f32.mxu0 %vm9869_vm2, %v9865_v0 }
0x60a1   :  { %9214 = vmatprep.subr.mxu0 %v9865_v0 }
0x60a2   :  { %9215 = vmatpush3.msra.mxu0 %v11192_v18  ;;  %v5832_v11 = vld [vmem:[#allocation2 + $0xf0] sm:$0xff] }
0x60a3   :  { %9216 = vmatprep.subr.mxu0 %v9865_v0 }
0x60a4   :  { %9217 = vmatpush3.msra.mxu0 %v11199_v3 }
0x60a5   :  { %9218 = vmatprep.subr.mxu0 %v9865_v0 }
0x60a6   :  { %9219 = vmatpush3.msra.mxu0 %v11205_v46 }
0x60a7   :  { %9234 = vmatprep.subr.mxu0 %v9865_v0 }
0x6157   :  { %v11265_v49 = vpop.f32.mrf.mxu0 }
0x6159   :  { %v9178_v48 = vpop.f32.mrf.mxu0 }
0x615f   :  { %v5901_v55 = vpop.f32.mrf.mxu0 }
0x6160   :  { %v5912_v6 = vadd.f32 %v5901_v55, %v11184_v17  ;;  %v5905_v50 = vadd.f32 %v5901_v55, %v5832_v11 }
0x6161   :  { %v9200_v14 = vpop.f32.mrf.mxu0 }
0x6162   :  { %5914 = vrot.lane.b32.xlu0 %v5912_v6, %s9868_s18  ;;  %v8164_v27 = vmul.f32 -1.442695, %v5905_v50 }
0x6164   :  { %9725 = vpow2.f32 %v8164_v27 }
0x6171   :  { %v9726_v2 = vpop.eup %9725 }
0x6172   :  { %v5909_v51 = vadd.f32 1.0, %v9726_v2 }
0x6174   :  { %9727 = vrcp.f32 %v5909_v51 }
0x6181   :  { %v9728_v29 = vpop.eup %9727 }
0x6182   :  { %v5924_v22 = vsub.f32 1.0, %v9728_v29  ;;  %v5930_v58 = vmul.f32 %v9728_v29, %v5824_v5 }
0x61d4   :  { %v5915_v59 = vpop.permute.xlu0 %5914 }
0x61d5   :  { %v5917_v23 = vmul.f32 %v9728_v29, %v5915_v59 }
0x61d7   :  { %5919 = vrot.lane.b32.xlu1 %v5917_v23, %s9868_s18 }
0x6249   :  { %v5920_v10 = vpop.permute.xlu1 %5919 }
0x624a   :  { %v5922_v53 = vadd.f32 %v5920_v10, %v5832_v11 }
0x624c   :  { %9729 = vtanh.f32 %v5922_v53 }
0x6259   :  { %v9730_v32 = vpop.eup %9729 }
0x625a   :  { %5926 = vrot.lane.b32.xlu0 %v9730_v32, %s9871_s23 }
0x625e   :  { %580 = vrot.lane.b32.xlu0 %v10048_v40, %s9871_s23 }
0x62cc   :  { %v5927_v7 = vpop.permute.xlu0 %5926 }
0x62cd   :  { %v5929_v12 = vmul.f32 %v5927_v7, %v5924_v22 }
0x62cf   :  { %v5931_v54 = vadd.f32 %v5930_v58, %v5929_v12 }
0x62d0   :  { %v581_v30 = vpop.permute.xlu0 %580 }
0x62d1   :  { %600 = vst.msk [vmem:[#allocation2 + $0xe8] sm:$0xff] %vm421_vm3, %v581_v30  ;;  %5933 = vrot.lane.b32.xlu1 %v5931_v54, %s9871_s23 }
0x62d8   :  { %v5939_v24 = vld [vmem:[#allocation2 + $0xe8] sm:$0xff] }
0x6343   :  { %v5934_v35 = vpop.permute.xlu1 %5933 }
0x6344   :  { %5937 = vst.msk [vmem:[#allocation4 + $0x30] sm:$0xff] %vm478_vm4, %v5934_v35  ;;  %9210 = vmatmul.mubr.msk.f32.vlgmr.msra.gmra.mxu1 %vm478_vm4, %v5934_v35 }
0x6345   :  { %9224 = vmatpush3.msra.mxu1 %v11187_v25  ;;  %9231 = vmatprep.mubr.msk.f32.mxu1 %vm9869_vm2, %v9865_v0 }
0x6346   :  { %9225 = vmatprep.subr.mxu1 %v9865_v0 }
0x6347   :  { %9226 = vmatpush3.msra.mxu1 %v11192_v18 }
0x6348   :  { %9227 = vmatprep.subr.mxu1 %v9865_v0 }
0x6349   :  { %9228 = vmatpush3.msra.mxu1 %v11199_v3 }
0x634a   :  { %9229 = vmatprep.subr.mxu1 %v9865_v0 }
0x634b   :  { %9230 = vmatpush3.msra.mxu1 %v11205_v46 }
0x634c   :  { %9245 = vmatprep.subr.mxu1 %v9865_v0 }
0x6404   :  { %v6008_v40 = vpop.f32.mrf.mxu1 }
0x6405   :  { %v6019_v28 = vadd.f32 %v6008_v40, %v11184_v17  ;;  %v6012_v34 = vadd.f32 %v6008_v40, %v5939_v24 }
0x6406   :  { %v9211_v52 = vpop.f32.mrf.mxu1 }
0x6407   :  { %6021 = vrot.lane.b32.xlu1 %v6019_v28, %s9868_s18  ;;  %v8166_v56 = vmul.f32 -1.442695, %v6012_v34 }
0x6409   :  { %9731 = vpow2.f32 %v8166_v56 }
0x6416   :  { %v9732_v20 = vpop.eup %9731 }
0x6417   :  { %v6016_v13 = vadd.f32 1.0, %v9732_v20 }
0x6419   :  { %9733 = vrcp.f32 %v6016_v13 }
0x6426   :  { %v9734_v62 = vpop.eup %9733 }
0x6427   :  { %v6031_v5 = vsub.f32 1.0, %v9734_v62  ;;  %v6037_v37 = vmul.f32 %v9734_v62, %v5931_v54 }
0x6479   :  { %v6022_v57 = vpop.permute.xlu1 %6021 }
0x647a   :  { %v6024_v1 = vmul.f32 %v9734_v62, %v6022_v57 }
0x647c   :  { %6026 = vrot.lane.b32.xlu0 %v6024_v1, %s9868_s18 }
0x64ee   :  { %v6027_v39 = vpop.permute.xlu0 %6026 }
0x64ef   :  { %v6029_v60 = vadd.f32 %v6027_v39, %v5939_v24 }
0x64f1   :  { %9735 = vtanh.f32 %v6029_v60 }
0x64fe   :  { %v9736_v41 = vpop.eup %9735 }
0x64ff   :  { %6033 = vrot.lane.b32.xlu1 %v9736_v41, %s9871_s23 }
0x6503   :  { %578 = vrot.lane.b32.xlu1 %v10051_v42, %s9871_s23 }
0x6571   :  { %v6034_v31 = vpop.permute.xlu1 %6033 }
0x6572   :  { %v6036_v47 = vmul.f32 %v6034_v31, %v6031_v5 }
0x6574   :  { %v6038_v48 = vadd.f32 %v6037_v37, %v6036_v47 }
0x6575   :  { %v579_v55 = vpop.permute.xlu1 %578 }
0x6576   :  { %599 = vst.msk [vmem:[#allocation2 + $0xe0] sm:$0xff] %vm421_vm3, %v579_v55  ;;  %6040 = vrot.lane.b32.xlu0 %v6038_v48, %s9871_s23 }
0x657d   :  { %v6046_v50 = vld [vmem:[#allocation2 + $0xe0] sm:$0xff] }
0x65e8   :  { %v6041_v6 = vpop.permute.xlu0 %6040 }
0x65e9   :  { %6044 = vst.msk [vmem:[#allocation4 + $0x28] sm:$0xff] %vm478_vm4, %v6041_v6  ;;  %9221 = vmatmul.mubr.msk.f32.vlgmr.msra.gmra.mxu0 %vm478_vm4, %v6041_v6 }
0x65ea   :  { %9235 = vmatpush3.msra.mxu0 %v11187_v25  ;;  %9242 = vmatprep.mubr.msk.f32.mxu0 %vm9869_vm2, %v9865_v0 }
0x65eb   :  { %9236 = vmatprep.subr.mxu0 %v9865_v0 }
0x65ec   :  { %9237 = vmatpush3.msra.mxu0 %v11192_v18 }
0x65ed   :  { %9238 = vmatprep.subr.mxu0 %v9865_v0 }
0x65ee   :  { %9239 = vmatpush3.msra.mxu0 %v11199_v3 }
0x65ef   :  { %9240 = vmatprep.subr.mxu0 %v9865_v0 }
0x65f0   :  { %9241 = vmatpush3.msra.mxu0 %v11205_v46 }
0x65f1   :  { %9256 = vmatprep.subr.mxu0 %v9865_v0 }
0x66a9   :  { %v6115_v42 = vpop.f32.mrf.mxu0 }
0x66aa   :  { %v6126_v14 = vadd.f32 %v6115_v42, %v11184_v17  ;;  %v6119_v27 = vadd.f32 %v6115_v42, %v6046_v50 }
0x66ab   :  { %v9222_v11 = vpop.f32.mrf.mxu0 }
0x66ac   :  { %6128 = vrot.lane.b32.xlu0 %v6126_v14, %s9868_s18  ;;  %v8168_v2 = vmul.f32 -1.442695, %v6119_v27 }
0x66ae   :  { %9737 = vpow2.f32 %v8168_v2 }
0x66bb   :  { %v9738_v51 = vpop.eup %9737 }
0x66bc   :  { %v6123_v29 = vadd.f32 1.0, %v9738_v51 }
0x66be   :  { %9739 = vrcp.f32 %v6123_v29 }
0x66cb   :  { %v9740_v59 = vpop.eup %9739 }
0x66cc   :  { %v6138_v7 = vsub.f32 1.0, %v9740_v59  ;;  %v6144_v12 = vmul.f32 %v9740_v59, %v6038_v48 }
0x671e   :  { %v6129_v23 = vpop.permute.xlu0 %6128 }
0x671f   :  { %v6131_v10 = vmul.f32 %v9740_v59, %v6129_v23 }
0x6721   :  { %6133 = vrot.lane.b32.xlu1 %v6131_v10, %s9868_s18 }
0x6793   :  { %v6134_v53 = vpop.permute.xlu1 %6133 }
0x6794   :  { %v6136_v32 = vadd.f32 %v6134_v53, %v6046_v50 }
0x6796   :  { %9741 = vtanh.f32 %v6136_v32 }
0x67a3   :  { %v9742_v22 = vpop.eup %9741 }
0x67a4   :  { %6140 = vrot.lane.b32.xlu0 %v9742_v22, %s9871_s23 }
0x67a8   :  { %576 = vrot.lane.b32.xlu0 %v10042_v36, %s9871_s23 }
0x6816   :  { %v6141_v58 = vpop.permute.xlu0 %6140 }
0x6817   :  { %v6143_v54 = vmul.f32 %v6141_v58, %v6138_v7 }
0x6819   :  { %v6145_v30 = vadd.f32 %v6144_v12, %v6143_v54 }
0x681a   :  { %v577_v35 = vpop.permute.xlu0 %576 }
0x681b   :  { %598 = vst.msk [vmem:[#allocation2 + $0xd8] sm:$0xff] %vm421_vm3, %v577_v35  ;;  %6147 = vrot.lane.b32.xlu1 %v6145_v30, %s9871_s23 }
0x6822   :  { %v6153_v24 = vld [vmem:[#allocation2 + $0xd8] sm:$0xff] }
0x688d   :  { %v6148_v40 = vpop.permute.xlu1 %6147 }
0x688e   :  { %6151 = vst.msk [vmem:[#allocation4 + $0x20] sm:$0xff] %vm478_vm4, %v6148_v40  ;;  %9232 = vmatmul.mubr.msk.f32.vlgmr.msra.gmra.mxu1 %vm478_vm4, %v6148_v40 }
0x688f   :  { %9246 = vmatpush3.msra.mxu1 %v11187_v25  ;;  %9253 = vmatprep.mubr.msk.f32.mxu1 %vm9869_vm2, %v9865_v0 }
0x6890   :  { %9247 = vmatprep.subr.mxu1 %v9865_v0 }
0x6891   :  { %9248 = vmatpush3.msra.mxu1 %v11192_v18 }
0x6892   :  { %9249 = vmatprep.subr.mxu1 %v9865_v0 }
0x6893   :  { %9250 = vmatpush3.msra.mxu1 %v11199_v3 }
0x6894   :  { %9251 = vmatprep.subr.mxu1 %v9865_v0 }
0x6895   :  { %9252 = vmatpush3.msra.mxu1 %v11205_v46 }
0x694e   :  { %v6222_v36 = vpop.f32.mrf.mxu1 }
0x694f   :  { %v6233_v28 = vadd.f32 %v6222_v36, %v11184_v17  ;;  %v6226_v34 = vadd.f32 %v6222_v36, %v6153_v24 }
0x6950   :  { %v9233_v52 = vpop.f32.mrf.mxu1 }
0x6951   :  { %6235 = vrot.lane.b32.xlu1 %v6233_v28, %s9868_s18  ;;  %v8170_v56 = vmul.f32 -1.442695, %v6226_v34 }
0x6953   :  { %9743 = vpow2.f32 %v8170_v56 }
0x6960   :  { %v9744_v20 = vpop.eup %9743 }
0x6961   :  { %v6230_v13 = vadd.f32 1.0, %v9744_v20 }
0x6963   :  { %9745 = vrcp.f32 %v6230_v13 }
0x6970   :  { %v9746_v62 = vpop.eup %9745 }
0x6971   :  { %v6245_v5 = vsub.f32 1.0, %v9746_v62  ;;  %v6251_v37 = vmul.f32 %v9746_v62, %v6145_v30 }
0x69c3   :  { %v6236_v57 = vpop.permute.xlu1 %6235 }
0x69c4   :  { %v6238_v1 = vmul.f32 %v9746_v62, %v6236_v57 }
0x69c6   :  { %6240 = vrot.lane.b32.xlu0 %v6238_v1, %s9868_s18 }
0x6a38   :  { %v6241_v39 = vpop.permute.xlu0 %6240 }
0x6a39   :  { %v6243_v60 = vadd.f32 %v6241_v39, %v6153_v24 }
0x6a3b   :  { %9747 = vtanh.f32 %v6243_v60 }
0x6a48   :  { %v9748_v41 = vpop.eup %9747 }
0x6a49   :  { %6247 = vrot.lane.b32.xlu1 %v9748_v41, %s9871_s23 }
0x6a4d   :  { %574 = vrot.lane.b32.xlu1 %v10045_v38, %s9871_s23 }
0x6abb   :  { %v6248_v31 = vpop.permute.xlu1 %6247 }
0x6abc   :  { %v6250_v47 = vmul.f32 %v6248_v31, %v6245_v5 }
0x6abe   :  { %v6252_v48 = vadd.f32 %v6251_v37, %v6250_v47 }
0x6abf   :  { %v575_v55 = vpop.permute.xlu1 %574 }
0x6ac0   :  { %597 = vst.msk [vmem:[#allocation2 + $0xd0] sm:$0xff] %vm421_vm3, %v575_v55  ;;  %6254 = vrot.lane.b32.xlu0 %v6252_v48, %s9871_s23 }
0x6b32   :  { %v6255_v6 = vpop.permute.xlu0 %6254 }
0x6b33   :  { %6258 = vst.msk [vmem:[#allocation4 + $0x18] sm:$0xff] %vm478_vm4, %v6255_v6  ;;  %9243 = vmatmul.mubr.msk.f32.vlgmr.msra.gmra.mxu0 %vm478_vm4, %v6255_v6 }
0x6b34   :  { %9257 = vmatpush3.msra.mxu0 %v11187_v25  ;;  %9264 = vmatprep.mubr.msk.f32.mxu0 %vm9869_vm2, %v9865_v0  ;;  %v6260_v25 = vld [vmem:[#allocation2 + $0xd0] sm:$0xff] }
0x6b35   :  { %9258 = vmatprep.subr.mxu0 %v9865_v0 }
0x6b36   :  { %9259 = vmatpush3.msra.mxu0 %v11192_v18 }
0x6b37   :  { %9260 = vmatprep.subr.mxu0 %v9865_v0 }
0x6b38   :  { %9261 = vmatpush3.msra.mxu0 %v11199_v3 }
0x6b39   :  { %9262 = vmatprep.subr.mxu0 %v9865_v0 }
0x6b3a   :  { %9263 = vmatpush3.msra.mxu0 %v11205_v46 }
0x6bf3   :  { %v6329_v38 = vpop.f32.mrf.mxu0 }
0x6bf4   :  { %v6340_v42 = vadd.f32 %v6329_v38, %v11184_v17  ;;  %v6333_v11 = vadd.f32 %v6329_v38, %v6260_v25 }
0x6bf5   :  { %v9244_v14 = vpop.f32.mrf.mxu0 }
0x6bf6   :  { %6342 = vrot.lane.b32.xlu0 %v6340_v42, %s9868_s18  ;;  %v8172_v50 = vmul.f32 -1.442695, %v6333_v11 }
0x6bf8   :  { %9749 = vpow2.f32 %v8172_v50 }
0x6c05   :  { %v9750_v27 = vpop.eup %9749 }
0x6c06   :  { %v6337_v18 = vadd.f32 1.0, %v9750_v27 }
0x6c08   :  { %9751 = vrcp.f32 %v6337_v18 }
0x6c15   :  { %v9752_v2 = vpop.eup %9751 }
0x6c16   :  { %v6352_v23 = vsub.f32 1.0, %v9752_v2  ;;  %v6358_v53 = vmul.f32 %v9752_v2, %v6252_v48 }
0x6c68   :  { %v6343_v51 = vpop.permute.xlu0 %6342 }
0x6c69   :  { %v6345_v3 = vmul.f32 %v9752_v2, %v6343_v51 }
0x6c6b   :  { %6347 = vrot.lane.b32.xlu1 %v6345_v3, %s9868_s18 }
0x6cdd   :  { %v6348_v29 = vpop.permute.xlu1 %6347 }
0x6cde   :  { %v6350_v46 = vadd.f32 %v6348_v29, %v6260_v25 }
0x6ce0   :  { %9753 = vtanh.f32 %v6350_v46 }
0x6ced   :  { %v9754_v59 = vpop.eup %9753 }
0x6cee   :  { %6354 = vrot.lane.b32.xlu0 %v9754_v59, %s9871_s23 }
0x6cf2   :  { %572 = vrot.lane.b32.xlu0 %v10035_v33, %s9871_s23 }
0x6d60   :  { %v6355_v10 = vpop.permute.xlu0 %6354 }
0x6d61   :  { %v6357_v32 = vmul.f32 %v6355_v10, %v6352_v23 }
0x6d63   :  { %v6359_v22 = vadd.f32 %v6358_v53, %v6357_v32 }
0x6d64   :  { %v573_v7 = vpop.permute.xlu0 %572 }
0x6d65   :  { %596 = vst.msk [vmem:[#allocation2 + $0xc8] sm:$0xff] %vm421_vm3, %v573_v7  ;;  %6361 = vrot.lane.b32.xlu1 %v6359_v22, %s9871_s23 }
0x6d6c   :  { %v6367_v33 = vld [vmem:[#allocation2 + $0xc8] sm:$0xff] }
0x6dd7   :  { %v6362_v58 = vpop.permute.xlu1 %6361 }
0x6dd8   :  { %6365 = vst.msk [vmem:[#allocation4 + $0x10] sm:$0xff] %vm478_vm4, %v6362_v58  ;;  %9254 = vmatmul.mubr.msk.f32.vlgmr.msra.gmra.mxu1 %vm478_vm4, %v6362_v58 }
0x6e98   :  { %v6436_v12 = vpop.f32.mrf.mxu1 }
0x6e99   :  { %v6447_v54 = vadd.f32 %v6436_v12, %v11184_v17  ;;  %v6440_v35 = vadd.f32 %v6436_v12, %v6367_v33 }
0x6e9a   :  { %v9255_v30 = vpop.f32.mrf.mxu1 }
0x6e9b   :  { %6449 = vrot.lane.b32.xlu1 %v6447_v54, %s9868_s18  ;;  %v8174_v40 = vmul.f32 -1.442695, %v6440_v35 }
0x6e9d   :  { %9755 = vpow2.f32 %v8174_v40 }
0x6eaa   :  { %v9756_v36 = vpop.eup %9755 }
0x6eab   :  { %v6444_v28 = vadd.f32 1.0, %v9756_v36  ;;  %v6590_v36 = vld [vmem:[#allocation4 + $0x20] sm:$0xff] }
0x6ead   :  { %9757 = vrcp.f32 %v6444_v28  ;;  %v6641_v28 = vld [vmem:[%s11387_s1 + $0x38] sm:$0xff] }
0x6eae   :  { %9267 = vmatprep.subr.mxu1 %v6641_v28 }
0x6eaf   :  { %9268 = vmatpush3.msra.mxu1 %v6641_v28 }
0x6eba   :  { %v9758_v52 = vpop.eup %9757 }
0x6ebb   :  { %v6459_v62 = vsub.f32 1.0, %v9758_v52  ;;  %v6465_v1 = vmul.f32 %v9758_v52, %v6359_v22 }
0x6f0d   :  { %v6450_v24 = vpop.permute.xlu1 %6449 }
0x6f0e   :  { %v6452_v34 = vmul.f32 %v9758_v52, %v6450_v24  ;;  %v6793_v52 = vld [vmem:[%s11392_s20 + $0x38] sm:$0xff]  ;;  %v6640_v24 = vld [vmem:[%s11387_s1 + $0x30] sm:$0xff] }
0x6f0f   :  { %9295 = vmatprep.subr.mxu0 %v6793_v52  ;;  %9269 = vmatprep.subr.mxu1 %v6640_v24 }
0x6f10   :  { %6454 = vrot.lane.b32.xlu0 %v6452_v34, %s9868_s18  ;;  %v6792_v34 = vld [vmem:[%s11392_s20 + $0x30] sm:$0xff]  ;;  %9270 = vmatpush3.msra.mxu1 %v6640_v24 }
0x6f82   :  { %v6455_v56 = vpop.permute.xlu0 %6454 }
0x6f83   :  { %v6457_v20 = vadd.f32 %v6455_v56, %v6367_v33  ;;  %v6639_v56 = vld [vmem:[%s11387_s1 + $0x28] sm:$0xff] }
0x6f84   :  { %9271 = vmatprep.subr.mxu1 %v6639_v56 }
0x6f85   :  { %9759 = vtanh.f32 %v6457_v20  ;;  %v6791_v20 = vld [vmem:[%s11392_s20 + $0x28] sm:$0xff]  ;;  %9272 = vmatpush3.msra.mxu1 %v6639_v56 }
0x6f92   :  { %v9760_v13 = vpop.eup %9759 }
0x6f93   :  { %6461 = vrot.lane.b32.xlu1 %v9760_v13, %s9871_s23  ;;  %v6592_v13 = vld [vmem:[#allocation4 + $0x30] sm:$0xff] }
0x6f97   :  { %570 = vrot.lane.b32.xlu1 %v10953_v16, %s9871_s23 }
0x6f9b   :  { %540 = vrot.lane.b32.xlu1 %v10822_v8, %s9868_s18  ;;  %v5688_v8 = vadd.f32 %v11265_v49, %v10989_v26 }
0x7005   :  { %v6462_v57 = vpop.permute.xlu1 %6461 }
0x7006   :  { %v6464_v39 = vmul.f32 %v6462_v57, %v6459_v62  ;;  %v6638_v62 = vld [vmem:[%s11387_s1 + $0x20] sm:$0xff] }
0x7007   :  { %v6790_v57 = vld [vmem:[%s11392_s20 + $0x20] sm:$0xff]  ;;  %9273 = vmatprep.subr.mxu1 %v6638_v62 }
0x7008   :  { %v6466_v60 = vadd.f32 %v6465_v1, %v6464_v39  ;;  %v6637_v1 = vld [vmem:[%s11387_s1 + $0x18] sm:$0xff]  ;;  %9274 = vmatpush3.msra.mxu1 %v6638_v62 }
0x7009   :  { %v571_v41 = vpop.permute.xlu1 %570  ;;  %v6789_v39 = vld [vmem:[%s11392_s20 + $0x18] sm:$0xff]  ;;  %9275 = vmatprep.subr.mxu1 %v6637_v1 }
0x700a   :  { %595 = vst.msk [vmem:[#allocation2 + $0xc0] sm:$0xff] %vm421_vm3, %v571_v41  ;;  %6468 = vrot.lane.b32.xlu0 %v6466_v60, %s9871_s23  ;;  %v6788_v41 = vld [vmem:[%s11392_s20 + $0x10] sm:$0xff]  ;;  %9276 = vmatpush3.msra.mxu1 %v6637_v1 }
0x700d   :  { %v541_v25 = vpop.permute.xlu1 %540 }
0x7011   :  { %v6473_v47 = vld [vmem:[#allocation2 + $0xc0] sm:$0xff] }
0x707c   :  { %v6469_v5 = vpop.permute.xlu0 %6468 }
0x707d   :  { %6472 = vst.msk [vmem:[#allocation4 + $0x8] sm:$0xff] %vm478_vm4, %v6469_v5  ;;  %9265 = vmatmul.mubr.msk.f32.vlgmr.msra.gmra.mxu0 %vm478_vm4, %v6469_v5  ;;  %v6635_v5 = vld [vmem:[%s11387_s1 + $0x8] sm:$0xff] }
0x707e   :  { %9296 = vmatpush3.msra.mxu0 %v6793_v52 }
0x707f   :  { %9297 = vmatprep.subr.mxu0 %v6792_v34 }
0x7080   :  { %9298 = vmatpush3.msra.mxu0 %v6792_v34 }
0x7081   :  { %9299 = vmatprep.subr.mxu0 %v6791_v20 }
0x7082   :  { %9300 = vmatpush3.msra.mxu0 %v6791_v20 }
0x7083   :  { %9301 = vmatprep.subr.mxu0 %v6790_v57 }
0x7084   :  { %v6587_v32 = vld [vmem:[#allocation4 + $0x8] sm:$0xff]  ;;  %9302 = vmatpush3.msra.mxu0 %v6790_v57 }
0x7085   :  { %9303 = vmatprep.subr.mxu0 %v6789_v39 }
0x7086   :  { %9304 = vmatpush3.msra.mxu0 %v6789_v39 }
0x7087   :  { %9305 = vmatprep.subr.mxu0 %v6788_v41 }
0x7088   :  { %9306 = vmatpush3.msra.mxu0 %v6788_v41 }
0x713d   :  { %v6542_v31 = vpop.f32.mrf.mxu0 }
0x713e   :  { %v6553_v16 = vadd.f32 %v6542_v31, %v11184_v17  ;;  %v6546_v48 = vadd.f32 %v6542_v31, %v6473_v47  ;;  %v6787_v31 = vld [vmem:[%s11392_s20 + $0x8] sm:$0xff] }
0x713f   :  { %v9266_v37 = vpop.f32.mrf.mxu0  ;;  %9307 = vmatprep.subr.mxu0 %v6787_v31 }
0x7140   :  { %6555 = vrot.lane.b32.xlu0 %v6553_v16, %s9868_s18  ;;  %v8176_v55 = vmul.f32 -1.442695, %v6546_v48  ;;  %9308 = vmatpush3.msra.mxu0 %v6787_v31  ;;  %v6634_v16 = vld [vmem:[%s11387_s1] sm:$0xff]  ;;  %v6588_v48 = vld [vmem:[#allocation4 + $0x10] sm:$0xff] }
0x7141   :  { %v6786_v37 = vld [vmem:[%s11392_s20] sm:$0xff] }
0x7142   :  { %9761 = vpow2.f32 %v8176_v55  ;;  %9309 = vmatprep.subr.mxu0 %v6786_v37  ;;  %v6589_v55 = vld [vmem:[#allocation4 + $0x18] sm:$0xff] }
0x7143   :  { %9310 = vmatpush3.msra.mxu0 %v6786_v37 }
0x7144   :  { %542 = vrot.lane.b32.xlu0 %v10054_v44, %s9868_s18  ;;  %9334 = vmatprep.subr.mxu0 %v9865_v0 }
0x7148   :  { %5690 = vrot.lane.b32.xlu0 %v5688_v8, %s9868_s18 }
0x714f   :  { %v9762_v6 = vpop.eup %9761 }
0x7150   :  { %v6550_v38 = vadd.f32 1.0, %v9762_v6  ;;  %v8201_v6 = vld [vmem:[%s10946_s12 + $0x1] ss:$0 sm:$0xff]  ;;  %s8009_s12 = sld [smem:[%s11723_s0 + %s9896_s9]]  }
0x7152   :  { %9763 = vrcp.f32 %v6550_v38  ;;  %v6591_v38 = vld [vmem:[#allocation4 + $0x28] sm:$0xff] }
0x715f   :  { %v9764_v42 = vpop.eup %9763 }
0x7160   :  { %v6565_v22 = vsub.f32 1.0, %v9764_v42  ;;  %v6571_v58 = vmul.f32 %v9764_v42, %v6466_v60  ;;  %v6636_v60 = vld [vmem:[%s11387_s1 + $0x10] sm:$0xff] }
0x7161   :  { %9277 = vmatprep.subr.mxu1 %v6636_v60 }
0x7162   :  { %9278 = vmatpush3.msra.mxu1 %v6636_v60 }
0x7163   :  { %9279 = vmatprep.subr.mxu1 %v6635_v5 }
0x7164   :  { %9280 = vmatpush3.msra.mxu1 %v6635_v5 }
0x7165   :  { %9281 = vmatprep.subr.mxu1 %v6634_v16 }
0x7166   :  { %9282 = vmatpush3.msra.mxu1 %v6634_v16 }
0x7167   :  { %9323 = vmatprep.subr.mxu1 %v9865_v0 }
0x71b2   :  { %v6556_v17 = vpop.permute.xlu0 %6555 }
0x71b3   :  { %v6558_v14 = vmul.f32 %v9764_v42, %v6556_v17  ;;  %v6593_v42 = vld [vmem:[#allocation4 + $0x38] sm:$0xff] }
0x71b5   :  { %6560 = vrot.lane.b32.xlu1 %v6558_v14, %s9868_s18 }
0x71b6   :  { %v543_v11 = vpop.permute.xlu0 %542 }
0x71b7   :  { %v552_v44 = vsel %vm544_vm5, %v541_v25, %v543_v11  ;;  %v6578_v25 = vld [vmem:[#allocation3] sm:$0xff] }
0x71b8   :  { %569 = vst.msk [vmem:[#allocation2 + $0xb8] sm:$0xff] %vm421_vm3, %v552_v44  ;;  %v6579_v44 = vld [vmem:[#allocation3 + $0x8] sm:$0xff] }
0x71ba   :  { %v5691_v3 = vpop.permute.xlu0 %5690 }
0x71bf   :  { %v5608_v26 = vld [vmem:[#allocation2 + $0xb8] sm:$0xff] }
0x71c0   :  { %v5681_v50 = vadd.f32 %v11265_v49, %v5608_v26 }
0x71c2   :  { %v8160_v27 = vmul.f32 -1.442695, %v5681_v50  ;;  %v11426_v50 = vld [vmem:[%s10960_s6 + $0x38] sm:$0xff] }
0x71c4   :  { %9765 = vpow2.f32 %v8160_v27 }
0x71d1   :  { %v9766_v18 = vpop.eup %9765 }
0x71d2   :  { %v5685_v2 = vadd.f32 1.0, %v9766_v18  ;;  %v6580_v18 = vld [vmem:[#allocation3 + $0x10] sm:$0xff] }
0x71d4   :  { %9767 = vrcp.f32 %v5685_v2 }
0x71e1   :  { %v9768_v51 = vpop.eup %9767 }
0x71e2   :  { %v5693_v29 = vmul.f32 %v9768_v51, %v5691_v3  ;;  %v5700_v30 = vsub.f32 1.0, %v9768_v51  ;;  %v5706_v35 = vmul.f32 %v9768_v51, %v11233_v4  ;;  %v11435_v51 = vld [vmem:[%s10960_s6 + $0x30] sm:$0xff] }
0x71e4   :  { %5695 = vrot.lane.b32.xlu1 %v5693_v29, %s9868_s18 }
0x7227   :  { %v6561_v46 = vpop.permute.xlu1 %6560 }
0x7228   :  { %v6563_v59 = vadd.f32 %v6561_v46, %v6473_v47  ;;  %v11444_v46 = vld [vmem:[%s10960_s6 + $0x28] sm:$0xff] }
0x722a   :  { %9769 = vtanh.f32 %v6563_v59  ;;  %v6581_v59 = vld [vmem:[#allocation3 + $0x18] sm:$0xff] }
0x7237   :  { %v9770_v23 = vpop.eup %9769 }
0x7238   :  { %6567 = vrot.lane.b32.xlu0 %v9770_v23, %s9871_s23 }
0x7256   :  { %v5696_v10 = vpop.permute.xlu1 %5695 }
0x7257   :  { %v5698_v53 = vadd.f32 %v5696_v10, %v5608_v26  ;;  %v6582_v10 = vld [vmem:[#allocation3 + $0x20] sm:$0xff] }
0x7259   :  { %9771 = vtanh.f32 %v5698_v53 }
0x7266   :  { %v9772_v49 = vpop.eup %9771 }
0x7267   :  { %5702 = vrot.lane.b32.xlu0 %v9772_v49, %s9871_s23 }
0x726b   :  { %6604 = vrot.lane.b32.xlu0 %v6587_v32, %s9876_s7  ;;  %v11457_v32 = vld [vmem:[%s10960_s6 + $0x20] sm:$0xff]  ;;  %s8001_s6 = sld [smem:[%s11723_s0 + %s9897_s13]]  }
0x72aa   :  { %v6568_v7 = vpop.permute.xlu0 %6567 }
0x72ab   :  { %v6570_v12 = vmul.f32 %v6568_v7, %v6565_v22  ;;  %v6583_v7 = vld [vmem:[#allocation3 + $0x28] sm:$0xff] }
0x72ad   :  { %v6572_v54 = vadd.f32 %v6571_v58, %v6570_v12  ;;  %v6584_v12 = vld [vmem:[#allocation3 + $0x30] sm:$0xff] }
0x72af   :  { %6574 = vrot.lane.b32.xlu1 %v6572_v54, %s9871_s23 }
0x72d9   :  { %v5703_v33 = vpop.permute.xlu0 %5702 }
0x72da   :  { %v5705_v40 = vmul.f32 %v5703_v33, %v5700_v30 }
0x72dc   :  { %v5707_v4 = vadd.f32 %v5706_v35, %v5705_v40 }
0x72dd   :  { %v6605_v17 = vpop.permute.xlu0 %6604 }
0x72de   :  { %5709 = vrot.lane.b32.xlu0 %v5707_v4, %s9871_s23  ;;  %v6627_v27 = vsel %vm478_vm4, %v6579_v44, %v6605_v17 }
0x72e2   :  { %6610 = vrot.lane.b32.xlu0 %v6590_v36, %s9876_s7  ;;  %v8186_v36 = vld [vmem:[%s8009_s12] ss:$0 sm:$0xff] }
0x72e6   :  { %6614 = vrot.lane.b32.xlu0 %v6592_v13, %s9876_s7 }
0x72ea   :  { %7004 = vrot.lane.b32.xlu0 %v8201_v6, %s9868_s18 }
0x7321   :  { %v6575_v8 = vpop.permute.xlu1 %6574 }
0x7322   :  { %6577 = vst.msk [vmem:[#allocation4] sm:$0xff] %vm478_vm4, %v6575_v8 }
0x7329   :  { %v6586_v47 = vld [vmem:[#allocation4] sm:$0xff] }
0x732a   :  { %6602 = vrot.lane.b32.xlu1 %v6586_v47, %s9876_s7 }
0x732e   :  { %6606 = vrot.lane.b32.xlu1 %v6588_v48, %s9876_s7 }
0x7332   :  { %6608 = vrot.lane.b32.xlu1 %v6589_v55, %s9876_s7 }
0x7336   :  { %6612 = vrot.lane.b32.xlu1 %v6591_v38, %s9876_s7 }
0x733a   :  { %6616 = vrot.lane.b32.xlu1 %v6593_v42, %s9876_s7  ;;  %s9895_s7 = smov 26  }
0x733b   :  { %s8007_s8 = sld [smem:[%s11723_s0 + %s9895_s7]]  }
0x7341   :  { %v8177_v4 = vld [vmem:[%s8007_s8] ss:$0 sm:$0xff] }
0x7350   :  { %v5710_v14 = vpop.permute.xlu0 %5709 }
0x7351   :  { %5712 = vst.msk [vmem:[#allocation3 + $0x38] sm:$0xff] %vm478_vm4, %v5710_v14 }
0x7354   :  { %v6611_v3 = vpop.permute.xlu0 %6610 }
0x7355   :  { %v6630_v49 = vsel %vm478_vm4, %v6582_v10, %v6611_v3 }
0x7358   :  { %v6615_v22 = vpop.permute.xlu0 %6614  ;;  %v6585_v33 = vld [vmem:[#allocation3 + $0x38] sm:$0xff] }
0x7359   :  { %v6632_v30 = vsel %vm478_vm4, %v6584_v12, %v6615_v22 }
0x735c   :  { %v11503_v38 = vpop.permute.xlu0 %7004 }
0x739c   :  { %v6603_v11 = vpop.permute.xlu1 %6602 }
0x739d   :  { %v6626_v26 = vsel %vm478_vm4, %v6578_v25, %v6603_v11 }
0x739e   :  { %9283 = vmatprep.mubr.msk.f32.mxu1 %vm544_vm5, %v6626_v26  ;;  %9311 = vmatprep.mubr.msk.f32.mxu0 %vm544_vm5, %v6626_v26 }
0x739f   :  { %9284 = vmatmul.mubr.msk.f32.vlgmr.msra.gmra.mxu1 %vm544_vm5, %v6627_v27  ;;  %9312 = vmatmul.mubr.msk.f32.vlgmr.msra.gmra.mxu0 %vm544_vm5, %v6627_v27 }
0x73a0   :  { %v6607_v2 = vpop.permute.xlu1 %6606  ;;  %9324 = vmatpush3.msra.mxu1 %v11426_v50  ;;  %9335 = vmatpush3.msra.mxu0 %v11426_v50 }
0x73a1   :  { %v6628_v29 = vsel %vm478_vm4, %v6580_v18, %v6607_v2  ;;  %9325 = vmatprep.subr.mxu1 %v9865_v0  ;;  %9336 = vmatprep.subr.mxu0 %v9865_v0 }
0x73a2   :  { %9286 = vmatprep.mubr.msk.f32.mxu1 %vm544_vm5, %v6628_v29  ;;  %9314 = vmatprep.mubr.msk.f32.mxu0 %vm544_vm5, %v6628_v29 }
0x73a3   :  { %9326 = vmatpush3.msra.mxu1 %v11435_v51  ;;  %9337 = vmatpush3.msra.mxu0 %v11435_v51 }
0x73a4   :  { %v6609_v23 = vpop.permute.xlu1 %6608  ;;  %9327 = vmatprep.subr.mxu1 %v9865_v0  ;;  %9338 = vmatprep.subr.mxu0 %v9865_v0 }
0x73a5   :  { %v6629_v53 = vsel %vm478_vm4, %v6581_v59, %v6609_v23  ;;  %9328 = vmatpush3.msra.mxu1 %v11444_v46  ;;  %9339 = vmatpush3.msra.mxu0 %v11444_v46 }
0x73a6   :  { %9287 = vmatmul.mubr.msk.f32.gmra.mxu1 %vm544_vm5, %v6629_v53  ;;  %9315 = vmatmul.mubr.msk.f32.gmra.mxu0 %vm544_vm5, %v6629_v53 }
0x73a7   :  { %9289 = vmatprep.mubr.msk.f32.mxu1 %vm544_vm5, %v6630_v49  ;;  %9317 = vmatprep.mubr.msk.f32.mxu0 %vm544_vm5, %v6630_v49 }
0x73a8   :  { %v6613_v58 = vpop.permute.xlu1 %6612  ;;  %9329 = vmatprep.subr.mxu1 %v9865_v0  ;;  %9340 = vmatprep.subr.mxu0 %v9865_v0 }
0x73a9   :  { %v6631_v54 = vsel %vm478_vm4, %v6583_v7, %v6613_v58  ;;  %9330 = vmatpush3.msra.mxu1 %v11457_v32  ;;  %9341 = vmatpush3.msra.mxu0 %v11457_v32 }
0x73aa   :  { %9290 = vmatmul.mubr.msk.f32.gmra.mxu1 %vm544_vm5, %v6631_v54  ;;  %9318 = vmatmul.mubr.msk.f32.gmra.mxu0 %vm544_vm5, %v6631_v54 }
0x73ab   :  { %9292 = vmatprep.mubr.msk.f32.mxu1 %vm544_vm5, %v6632_v30  ;;  %9320 = vmatprep.mubr.msk.f32.mxu0 %vm544_vm5, %v6632_v30 }
0x73ac   :  { %v6617_v35 = vpop.permute.xlu1 %6616  ;;  %9345 = vmatprep.subr.mxu1 %v9865_v0  ;;  %9356 = vmatprep.subr.mxu0 %v9865_v0 }
0x73ad   :  { %v6633_v40 = vsel %vm478_vm4, %v6585_v33, %v6617_v35 }
0x73ae   :  { %9293 = vmatmul.mubr.msk.f32.gmra.mxu1 %vm544_vm5, %v6633_v40  ;;  %9321 = vmatmul.mubr.msk.f32.gmra.mxu0 %vm544_vm5, %v6633_v40 }
0x73af   :  { %9331 = vmatprep.mubr.msk.f32.mxu1 %vm9869_vm2, %v9865_v0  ;;  %9342 = vmatprep.mubr.msk.f32.mxu0 %vm9869_vm2, %v9865_v0 }
0x73b2   :  { %9332 = vmatmul.mubr.f32.vlgmr.msra.gmra.mxu1 %v9865_v0 }
0x73b3   :  { %9346 = vmatpush3.msra.mxu1 %v11426_v50  ;;  %9353 = vmatprep.mubr.msk.f32.mxu1 %vm9869_vm2, %v9865_v0 }
0x73b4   :  { %9347 = vmatprep.subr.mxu1 %v9865_v0 }
0x73b5   :  { %9348 = vmatpush3.msra.mxu1 %v11435_v51 }
0x73b6   :  { %9349 = vmatprep.subr.mxu1 %v9865_v0 }
0x73b7   :  { %9350 = vmatpush3.msra.mxu1 %v11444_v46 }
0x73b8   :  { %9351 = vmatprep.subr.mxu1 %v9865_v0 }
0x73b9   :  { %9352 = vmatpush3.msra.mxu1 %v11457_v32 }
0x73ba   :  { %9367 = vmatprep.subr.mxu1 %v9865_v0 }
0x745f   :  { %v9285_v28 = vpop.f32.mrf.mxu1  ;;  %v9313_v52 = vpop.f32.mrf.mxu0 }
0x7460   :  { %v6745_v24 = vadd.f32 %v9285_v28, %v8177_v4 }
0x7461   :  { %v6739_v34 = vpop.f32.mrf.mxu1  ;;  %v6867_v56 = vpop.f32.mrf.mxu0 }
0x7462   :  { %6779 = vst.msk [vmem:[#allocation5 + $0x8] sm:$0xff] %vm421_vm3, %v6745_v24  ;;  %v6740_v20 = vadd.f32 %v8177_v4, %v6739_v34 }
0x7464   :  { %6778 = vst.msk [vmem:[#allocation5] sm:$0xff] %vm421_vm3, %v6740_v20 }
0x7466   :  { %v9288_v13 = vpop.f32.mrf.mxu1  ;;  %v9316_v62 = vpop.f32.mrf.mxu0 }
0x7467   :  { %v6755_v57 = vadd.f32 %v9288_v13, %v8177_v4 }
0x7468   :  { %v6749_v1 = vpop.f32.mrf.mxu1  ;;  %v6877_v39 = vpop.f32.mrf.mxu0 }
0x7469   :  { %6781 = vst.msk [vmem:[#allocation5 + $0x18] sm:$0xff] %vm421_vm3, %v6755_v57  ;;  %v6750_v60 = vadd.f32 %v8177_v4, %v6749_v1 }
0x746a   :  { %v9291_v41 = vpop.f32.mrf.mxu1  ;;  %v9319_v5 = vpop.f32.mrf.mxu0 }
0x746b   :  { %6780 = vst.msk [vmem:[#allocation5 + $0x10] sm:$0xff] %vm421_vm3, %v6750_v60  ;;  %v6765_v31 = vadd.f32 %v9291_v41, %v8177_v4  ;;  %v6921_v26 = vld [vmem:[#allocation5] sm:$0xff] }
0x746c   :  { %v6759_v16 = vpop.f32.mrf.mxu1  ;;  %v6887_v37 = vpop.f32.mrf.mxu0 }
0x746d   :  { %6783 = vst.msk [vmem:[#allocation5 + $0x28] sm:$0xff] %vm421_vm3, %v6765_v31  ;;  %v6760_v8 = vadd.f32 %v8177_v4, %v6759_v16 }
0x746e   :  { %v9294_v47 = vpop.f32.mrf.mxu1  ;;  %v9322_v48 = vpop.f32.mrf.mxu0 }
0x746f   :  { %6782 = vst.msk [vmem:[#allocation5 + $0x20] sm:$0xff] %vm421_vm3, %v6760_v8  ;;  %v6775_v55 = vadd.f32 %v9294_v47, %v8177_v4  ;;  %v6903_v6 = vadd.f32 %v9322_v48, %v8186_v36 }
0x7470   :  { %v6769_v42 = vpop.f32.mrf.mxu1  ;;  %v6897_v17 = vpop.f32.mrf.mxu0 }
0x7471   :  { %6785 = vst.msk [vmem:[#allocation5 + $0x38] sm:$0xff] %vm421_vm3, %v6775_v55  ;;  %6913 = vst.msk [vmem:[#allocation6 + $0x38] sm:$0xff] %vm421_vm3, %v6903_v6  ;;  %v6770_v14 = vadd.f32 %v8177_v4, %v6769_v42  ;;  %v7027_v4 = vld [vmem:[#allocation5 + $0x8] sm:$0xff] }
0x7472   :  { %v6988_v25 = vpop.f32.mrf.mxu1  ;;  %v7130_v47 = vld [vmem:[#allocation5 + $0x10] sm:$0xff] }
0x7473   :  { %6784 = vst.msk [vmem:[#allocation5 + $0x30] sm:$0xff] %vm421_vm3, %v6770_v14  ;;  %v7007_v11 = vadd.f32 %v11503_v38, %v6988_v25  ;;  %v6992_v27 = vadd.f32 %v6988_v25, %v6921_v26 }
0x7474   :  { %v9333_v44 = vpop.f32.mrf.mxu1 }
0x7475   :  { %7009 = vrot.lane.b32.xlu1 %v7007_v11, %s9868_s18  ;;  %v8200_v18 = vmul.f32 -1.442695, %v6992_v27 }
0x7477   :  { %9773 = vpow2.f32 %v8200_v18 }
0x7484   :  { %v9774_v2 = vpop.eup %9773 }
0x7485   :  { %v6996_v3 = vadd.f32 1.0, %v9774_v2 }
0x7487   :  { %9775 = vrcp.f32 %v6996_v3 }
0x7494   :  { %v9776_v29 = vpop.eup %9775 }
0x7495   :  { %v7019_v22 = vsub.f32 1.0, %v9776_v29  ;;  %v7025_v58 = vmul.f32 0.0, %v9776_v29 }
0x74e7   :  { %v7010_v59 = vpop.permute.xlu1 %7009 }
0x74e8   :  { %v7012_v23 = vmul.f32 %v9776_v29, %v7010_v59 }
0x74ea   :  { %7014 = vrot.lane.b32.xlu0 %v7012_v23, %s9868_s18 }
0x755c   :  { %v7015_v10 = vpop.permute.xlu0 %7014 }
0x755d   :  { %v7017_v53 = vadd.f32 %v7015_v10, %v6921_v26 }
0x755f   :  { %9777 = vtanh.f32 %v7017_v53 }
0x756c   :  { %v9778_v49 = vpop.eup %9777 }
0x756d   :  { %7021 = vrot.lane.b32.xlu1 %v9778_v49, %s9871_s23  ;;  %v7233_v49 = vld [vmem:[#allocation5 + $0x18] sm:$0xff] }
0x75df   :  { %v7022_v7 = vpop.permute.xlu1 %7021 }
0x75e0   :  { %v7024_v12 = vmul.f32 %v7022_v7, %v7019_v22 }
0x75e2   :  { %v7026_v54 = vadd.f32 %v7025_v58, %v7024_v12 }
0x75e4   :  { %7029 = vrot.lane.b32.xlu0 %v7026_v54, %s9871_s23 }
0x7656   :  { %v7030_v30 = vpop.permute.xlu0 %7029 }
0x7657   :  { %9343 = vmatmul.mubr.msk.f32.vlgmr.msra.gmra.mxu0 %vm478_vm4, %v7030_v30 }
0x7658   :  { %9357 = vmatpush3.msra.mxu0 %v11426_v50  ;;  %9364 = vmatprep.mubr.msk.f32.mxu0 %vm9869_vm2, %v9865_v0 }
0x7659   :  { %9358 = vmatprep.subr.mxu0 %v9865_v0 }
0x765a   :  { %9359 = vmatpush3.msra.mxu0 %v11435_v51 }
0x765b   :  { %9360 = vmatprep.subr.mxu0 %v9865_v0 }
0x765c   :  { %9361 = vmatpush3.msra.mxu0 %v11444_v46 }
0x765d   :  { %9362 = vmatprep.subr.mxu0 %v9865_v0 }
0x765e   :  { %9363 = vmatpush3.msra.mxu0 %v11457_v32 }
0x765f   :  { %9378 = vmatprep.subr.mxu0 %v9865_v0 }
0x7717   :  { %v7099_v33 = vpop.f32.mrf.mxu0 }
0x7718   :  { %v7110_v35 = vadd.f32 %v7099_v33, %v11503_v38  ;;  %v7103_v36 = vadd.f32 %v7099_v33, %v7027_v4 }
0x7719   :  { %v9344_v40 = vpop.f32.mrf.mxu0 }
0x771a   :  { %7112 = vrot.lane.b32.xlu1 %v7110_v35, %s9868_s18  ;;  %v8203_v28 = vmul.f32 -1.442695, %v7103_v36 }
0x771c   :  { %9779 = vpow2.f32 %v8203_v28 }
0x7729   :  { %v9780_v52 = vpop.eup %9779 }
0x772a   :  { %v7107_v24 = vadd.f32 1.0, %v9780_v52 }
0x772c   :  { %9781 = vrcp.f32 %v7107_v24 }
0x7739   :  { %v9782_v34 = vpop.eup %9781 }
0x773a   :  { %v7122_v1 = vsub.f32 1.0, %v9782_v34  ;;  %v7128_v60 = vmul.f32 %v9782_v34, %v7026_v54 }
0x778c   :  { %v7113_v56 = vpop.permute.xlu1 %7112 }
0x778d   :  { %v7115_v20 = vmul.f32 %v9782_v34, %v7113_v56 }
0x778f   :  { %7117 = vrot.lane.b32.xlu0 %v7115_v20, %s9868_s18 }
0x7801   :  { %v7118_v13 = vpop.permute.xlu0 %7117 }
0x7802   :  { %v7120_v62 = vadd.f32 %v7118_v13, %v7027_v4 }
0x7804   :  { %9783 = vtanh.f32 %v7120_v62 }
0x7811   :  { %v9784_v57 = vpop.eup %9783 }
0x7812   :  { %7124 = vrot.lane.b32.xlu1 %v9784_v57, %s9871_s23  ;;  %v7336_v57 = vld [vmem:[#allocation5 + $0x20] sm:$0xff] }
0x7884   :  { %v7125_v39 = vpop.permute.xlu1 %7124 }
0x7885   :  { %v7127_v41 = vmul.f32 %v7125_v39, %v7122_v1 }
0x7887   :  { %v7129_v5 = vadd.f32 %v7128_v60, %v7127_v41 }
0x7889   :  { %7132 = vrot.lane.b32.xlu0 %v7129_v5, %s9871_s23 }
0x78fb   :  { %v7133_v31 = vpop.permute.xlu0 %7132 }
0x78fc   :  { %9354 = vmatmul.mubr.msk.f32.vlgmr.msra.gmra.mxu1 %vm478_vm4, %v7133_v31 }
0x78fd   :  { %9368 = vmatpush3.msra.mxu1 %v11426_v50  ;;  %9375 = vmatprep.mubr.msk.f32.mxu1 %vm9869_vm2, %v9865_v0 }
0x78fe   :  { %9369 = vmatprep.subr.mxu1 %v9865_v0 }
0x78ff   :  { %9370 = vmatpush3.msra.mxu1 %v11435_v51 }
0x7900   :  { %9371 = vmatprep.subr.mxu1 %v9865_v0 }
0x7901   :  { %9372 = vmatpush3.msra.mxu1 %v11444_v46 }
0x7902   :  { %9373 = vmatprep.subr.mxu1 %v9865_v0 }
0x7903   :  { %9374 = vmatpush3.msra.mxu1 %v11457_v32 }
0x7904   :  { %9389 = vmatprep.subr.mxu1 %v9865_v0 }
0x79bc   :  { %v7202_v16 = vpop.f32.mrf.mxu1 }
0x79bd   :  { %v7213_v37 = vadd.f32 %v7202_v16, %v11503_v38  ;;  %v7206_v48 = vadd.f32 %v7202_v16, %v7130_v47 }
0x79be   :  { %v9355_v8 = vpop.f32.mrf.mxu1 }
0x79bf   :  { %7215 = vrot.lane.b32.xlu1 %v7213_v37, %s9868_s18  ;;  %v8205_v55 = vmul.f32 -1.442695, %v7206_v48 }
0x79c1   :  { %9785 = vpow2.f32 %v8205_v55 }
0x79ce   :  { %v9786_v6 = vpop.eup %9785 }
0x79cf   :  { %v7210_v42 = vadd.f32 1.0, %v9786_v6 }
0x79d1   :  { %9787 = vrcp.f32 %v7210_v42 }
0x79de   :  { %v9788_v17 = vpop.eup %9787 }
0x79df   :  { %v7225_v27 = vsub.f32 1.0, %v9788_v17  ;;  %v7231_v2 = vmul.f32 %v9788_v17, %v7129_v5 }
0x7a31   :  { %v7216_v14 = vpop.permute.xlu1 %7215 }
0x7a32   :  { %v7218_v25 = vmul.f32 %v9788_v17, %v7216_v14 }
0x7a34   :  { %7220 = vrot.lane.b32.xlu0 %v7218_v25, %s9868_s18 }
0x7aa6   :  { %v7221_v11 = vpop.permute.xlu0 %7220 }
0x7aa7   :  { %v7223_v44 = vadd.f32 %v7221_v11, %v7130_v47 }
0x7aa9   :  { %9789 = vtanh.f32 %v7223_v44  ;;  %v7439_v44 = vld [vmem:[#allocation5 + $0x28] sm:$0xff] }
0x7ab6   :  { %v9790_v26 = vpop.eup %9789 }
0x7ab7   :  { %7227 = vrot.lane.b32.xlu1 %v9790_v26, %s9871_s23 }
0x7b29   :  { %v7228_v18 = vpop.permute.xlu1 %7227 }
0x7b2a   :  { %v7230_v3 = vmul.f32 %v7228_v18, %v7225_v27 }
0x7b2c   :  { %v7232_v29 = vadd.f32 %v7231_v2, %v7230_v3 }
0x7b2e   :  { %7235 = vrot.lane.b32.xlu0 %v7232_v29, %s9871_s23 }
0x7ba0   :  { %v7236_v59 = vpop.permute.xlu0 %7235 }
0x7ba1   :  { %9365 = vmatmul.mubr.msk.f32.vlgmr.msra.gmra.mxu0 %vm478_vm4, %v7236_v59 }
0x7ba2   :  { %9379 = vmatpush3.msra.mxu0 %v11426_v50  ;;  %9386 = vmatprep.mubr.msk.f32.mxu0 %vm9869_vm2, %v9865_v0 }
0x7ba3   :  { %9380 = vmatprep.subr.mxu0 %v9865_v0 }
0x7ba4   :  { %9381 = vmatpush3.msra.mxu0 %v11435_v51 }
0x7ba5   :  { %9382 = vmatprep.subr.mxu0 %v9865_v0 }
0x7ba6   :  { %9383 = vmatpush3.msra.mxu0 %v11444_v46 }
0x7ba7   :  { %9384 = vmatprep.subr.mxu0 %v9865_v0 }
0x7ba8   :  { %9385 = vmatpush3.msra.mxu0 %v11457_v32 }
0x7ba9   :  { %9400 = vmatprep.subr.mxu0 %v9865_v0 }
0x7c61   :  { %v7305_v23 = vpop.f32.mrf.mxu0 }
0x7c62   :  { %v7316_v10 = vadd.f32 %v7305_v23, %v11503_v38  ;;  %v7309_v22 = vadd.f32 %v7305_v23, %v7233_v49 }
0x7c63   :  { %v9366_v53 = vpop.f32.mrf.mxu0 }
0x7c64   :  { %7318 = vrot.lane.b32.xlu1 %v7316_v10, %s9868_s18  ;;  %v8207_v7 = vmul.f32 -1.442695, %v7309_v22 }
0x7c66   :  { %9791 = vpow2.f32 %v8207_v7  ;;  %v8219_v7 = vld [vmem:[%s11182_s26 + $0x38] sm:$0xff] }
0x7c73   :  { %v9792_v58 = vpop.eup %9791 }
0x7c74   :  { %v7313_v12 = vadd.f32 1.0, %v9792_v58 }
0x7c76   :  { %9793 = vrcp.f32 %v7313_v12  ;;  %v8218_v12 = vld [vmem:[%s11182_s26 + $0x30] sm:$0xff] }
0x7c83   :  { %v9794_v54 = vpop.eup %9793 }
0x7c84   :  { %v7328_v36 = vsub.f32 1.0, %v9794_v54  ;;  %v7334_v52 = vmul.f32 %v9794_v54, %v7232_v29 }
0x7cd6   :  { %v7319_v30 = vpop.permute.xlu1 %7318 }
0x7cd7   :  { %v7321_v33 = vmul.f32 %v9794_v54, %v7319_v30  ;;  %v8217_v54 = vld [vmem:[%s11182_s26 + $0x28] sm:$0xff]  ;;  %v8216_v30 = vld [vmem:[%s11182_s26 + $0x20] sm:$0xff] }
0x7cd9   :  { %7323 = vrot.lane.b32.xlu0 %v7321_v33, %s9868_s18 }
0x7d4b   :  { %v7324_v35 = vpop.permute.xlu0 %7323 }
0x7d4c   :  { %v7326_v40 = vadd.f32 %v7324_v35, %v7233_v49 }
0x7d4e   :  { %9795 = vtanh.f32 %v7326_v40 }
0x7d5b   :  { %v9796_v4 = vpop.eup %9795 }
0x7d5c   :  { %7330 = vrot.lane.b32.xlu1 %v9796_v4, %s9871_s23 }
0x7dce   :  { %v7331_v28 = vpop.permute.xlu1 %7330 }
0x7dcf   :  { %v7333_v24 = vmul.f32 %v7331_v28, %v7328_v36  ;;  %v7542_v28 = vld [vmem:[#allocation5 + $0x30] sm:$0xff] }
0x7dd1   :  { %v7335_v34 = vadd.f32 %v7334_v52, %v7333_v24 }
0x7dd3   :  { %7338 = vrot.lane.b32.xlu0 %v7335_v34, %s9871_s23 }
0x7e45   :  { %v7339_v56 = vpop.permute.xlu0 %7338 }
0x7e46   :  { %9376 = vmatmul.mubr.msk.f32.vlgmr.msra.gmra.mxu1 %vm478_vm4, %v7339_v56 }
0x7e47   :  { %9390 = vmatpush3.msra.mxu1 %v11426_v50  ;;  %9397 = vmatprep.mubr.msk.f32.mxu1 %vm9869_vm2, %v9865_v0 }
0x7e48   :  { %9391 = vmatprep.subr.mxu1 %v9865_v0 }
0x7e49   :  { %9392 = vmatpush3.msra.mxu1 %v11435_v51 }
0x7e4a   :  { %9393 = vmatprep.subr.mxu1 %v9865_v0 }
0x7e4b   :  { %9394 = vmatpush3.msra.mxu1 %v11444_v46 }
0x7e4c   :  { %9395 = vmatprep.subr.mxu1 %v9865_v0 }
0x7e4d   :  { %9396 = vmatpush3.msra.mxu1 %v11457_v32 }
0x7e4e   :  { %9411 = vmatprep.subr.mxu1 %v9865_v0 }
0x7f06   :  { %v7408_v20 = vpop.f32.mrf.mxu1 }
0x7f07   :  { %v7419_v13 = vadd.f32 %v7408_v20, %v11503_v38  ;;  %v7412_v1 = vadd.f32 %v7408_v20, %v7336_v57 }
0x7f08   :  { %v9377_v62 = vpop.f32.mrf.mxu1 }
0x7f09   :  { %7421 = vrot.lane.b32.xlu1 %v7419_v13, %s9868_s18  ;;  %v8209_v39 = vmul.f32 -1.442695, %v7412_v1 }
0x7f0b   :  { %9797 = vpow2.f32 %v8209_v39 }
0x7f18   :  { %v9798_v60 = vpop.eup %9797 }
0x7f19   :  { %v7416_v41 = vadd.f32 1.0, %v9798_v60  ;;  %v8222_v60 = vld [vmem:[%s11164_s21 + $0x1] ss:$0 sm:$0xff]  ;;  %s9899_s21 = smov 29  }
0x7f1a   :  { %s8010_s25 = sld [smem:[%s11723_s0 + %s9899_s21]]  }
0x7f1b   :  { %9799 = vrcp.f32 %v7416_v41 }
0x7f28   :  { %v9800_v5 = vpop.eup %9799 }
0x7f29   :  { %v7431_v48 = vsub.f32 1.0, %v9800_v5  ;;  %v7437_v6 = vmul.f32 %v9800_v5, %v7335_v34 }
0x7f7b   :  { %v7422_v31 = vpop.permute.xlu1 %7421 }
0x7f7c   :  { %v7424_v16 = vmul.f32 %v9800_v5, %v7422_v31 }
0x7f7e   :  { %7426 = vrot.lane.b32.xlu0 %v7424_v16, %s9868_s18 }
0x7ff0   :  { %v7427_v37 = vpop.permute.xlu0 %7426 }
0x7ff1   :  { %v7429_v8 = vadd.f32 %v7427_v37, %v7336_v57 }
0x7ff3   :  { %9801 = vtanh.f32 %v7429_v8 }
0x8000   :  { %v9802_v47 = vpop.eup %9801 }
0x8001   :  { %7433 = vrot.lane.b32.xlu1 %v9802_v47, %s9871_s23 }
0x8073   :  { %v7434_v55 = vpop.permute.xlu1 %7433 }
0x8074   :  { %v7436_v42 = vmul.f32 %v7434_v55, %v7431_v48  ;;  %v7749_v48 = vld [vmem:[#allocation6 + $0x38] sm:$0xff] }
0x8076   :  { %v7438_v17 = vadd.f32 %v7437_v6, %v7436_v42 }
0x8078   :  { %7441 = vrot.lane.b32.xlu0 %v7438_v17, %s9871_s23 }
0x80ea   :  { %v7442_v14 = vpop.permute.xlu0 %7441 }
0x80eb   :  { %9387 = vmatmul.mubr.msk.f32.vlgmr.msra.gmra.mxu0 %vm478_vm4, %v7442_v14 }
0x80ec   :  { %9401 = vmatpush3.msra.mxu0 %v11426_v50  ;;  %9408 = vmatprep.mubr.msk.f32.mxu0 %vm9869_vm2, %v9865_v0 }
0x80ed   :  { %9402 = vmatprep.subr.mxu0 %v9865_v0 }
0x80ee   :  { %9403 = vmatpush3.msra.mxu0 %v11435_v51 }
0x80ef   :  { %9404 = vmatprep.subr.mxu0 %v9865_v0 }
0x80f0   :  { %9405 = vmatpush3.msra.mxu0 %v11444_v46 }
0x80f1   :  { %9406 = vmatprep.subr.mxu0 %v9865_v0 }
0x80f2   :  { %9407 = vmatpush3.msra.mxu0 %v11457_v32 }
0x80f3   :  { %9422 = vmatprep.subr.mxu0 %v9865_v0 }
0x81ab   :  { %v7511_v25 = vpop.f32.mrf.mxu0 }
0x81ac   :  { %v7522_v50 = vadd.f32 %v7511_v25, %v11503_v38  ;;  %v7515_v26 = vadd.f32 %v7511_v25, %v7439_v44 }
0x81ad   :  { %v9388_v11 = vpop.f32.mrf.mxu0 }
0x81ae   :  { %7524 = vrot.lane.b32.xlu1 %v7522_v50, %s9868_s18  ;;  %v8211_v27 = vmul.f32 -1.442695, %v7515_v26 }
0x81b0   :  { %9803 = vpow2.f32 %v8211_v27 }
0x81bd   :  { %v9804_v51 = vpop.eup %9803 }
0x81be   :  { %v7519_v18 = vadd.f32 1.0, %v9804_v51  ;;  %v11626_v51 = vld [vmem:[%s8001_s6] ss:$0 sm:$0xff] }
0x81c0   :  { %9805 = vrcp.f32 %v7519_v18  ;;  %v4729_v18 = vadd.f32 %v11626_v51, %v11075_v15 }
0x81cd   :  { %v9806_v46 = vpop.eup %9805 }
0x81ce   :  { %v7534_v23 = vsub.f32 1.0, %v9806_v46  ;;  %v7540_v53 = vmul.f32 %v9806_v46, %v7438_v17 }
0x8220   :  { %v7525_v2 = vpop.permute.xlu1 %7524 }
0x8221   :  { %v7527_v3 = vmul.f32 %v9806_v46, %v7525_v2  ;;  %v11632_v46 = vadd.f32 %v11077_v19, %v11626_v51  ;;  %v11637_v2 = vadd.f32 %v11081_v61, %v11626_v51  ;;  %v7645_v19 = vld [vmem:[#allocation5 + $0x38] sm:$0xff] }
0x8223   :  { %7529 = vrot.lane.b32.xlu0 %v7527_v3, %s9868_s18  ;;  %v11642_v3 = vadd.f32 %v11085_v9, %v11626_v51 }
0x8295   :  { %v7530_v32 = vpop.permute.xlu0 %7529 }
0x8296   :  { %v7532_v29 = vadd.f32 %v7530_v32, %v7439_v44 }
0x8298   :  { %9807 = vtanh.f32 %v7532_v29 }
0x82a5   :  { %v9808_v59 = vpop.eup %9807 }
0x82a6   :  { %7536 = vrot.lane.b32.xlu1 %v9808_v59, %s9871_s23 }
0x8318   :  { %v7537_v10 = vpop.permute.xlu1 %7536 }
0x8319   :  { %v7539_v49 = vmul.f32 %v7537_v10, %v7534_v23 }
0x831b   :  { %v7541_v22 = vadd.f32 %v7540_v53, %v7539_v49 }
0x831d   :  { %7544 = vrot.lane.b32.xlu0 %v7541_v22, %s9871_s23 }
0x838f   :  { %v7545_v58 = vpop.permute.xlu0 %7544 }
0x8390   :  { %9398 = vmatmul.mubr.msk.f32.vlgmr.msra.gmra.mxu1 %vm478_vm4, %v7545_v58 }
0x8391   :  { %9412 = vmatpush3.msra.mxu1 %v8219_v7  ;;  %9419 = vmatprep.mubr.msk.f32.mxu1 %vm9869_vm2, %v9865_v0 }
0x8392   :  { %9413 = vmatprep.subr.mxu1 %v9865_v0 }
0x8393   :  { %9414 = vmatpush3.msra.mxu1 %v8218_v12 }
0x8394   :  { %9415 = vmatprep.subr.mxu1 %v9865_v0 }
0x8395   :  { %9416 = vmatpush3.msra.mxu1 %v8217_v54 }
0x8396   :  { %9417 = vmatprep.subr.mxu1 %v9865_v0 }
0x8397   :  { %9418 = vmatpush3.msra.mxu1 %v8216_v30 }
0x8398   :  { %9420 = vmatmul.mubr.f32.vlgmr.msra.gmra.mxu1 %v9865_v0 }
0x8450   :  { %v7614_v33 = vpop.f32.mrf.mxu1 }
0x8451   :  { %v7625_v35 = vadd.f32 %v7614_v33, %v11503_v38  ;;  %v7618_v52 = vadd.f32 %v7614_v33, %v7542_v28 }
0x8452   :  { %v9399_v40 = vpop.f32.mrf.mxu1 }
0x8453   :  { %7627 = vrot.lane.b32.xlu1 %v7625_v35, %s9868_s18  ;;  %v8213_v24 = vmul.f32 -1.442695, %v7618_v52 }
0x8455   :  { %9809 = vpow2.f32 %v8213_v24 }
0x8458   :  { %v7823_v4 = vpop.f32.mrf.mxu1 }
0x8459   :  { %v7827_v55 = vadd.f32 %v7823_v4, %v7749_v48 }
0x845a   :  { %v9421_v36 = vpop.f32.mrf.mxu1 }
0x845b   :  { %v8221_v6 = vmul.f32 -1.442695, %v7827_v55 }
0x8462   :  { %v9810_v34 = vpop.eup %9809 }
0x8463   :  { %v7622_v56 = vadd.f32 1.0, %v9810_v34  ;;  %v7874_v34 = vld [vmem:[%s8010_s25 + $0x38] sm:$0xff] }
0x8465   :  { %9811 = vrcp.f32 %v7622_v56  ;;  %v7873_v56 = vld [vmem:[%s8010_s25 + $0x30] sm:$0xff] }
0x8472   :  { %v9812_v20 = vpop.eup %9811 }
0x8473   :  { %v7637_v41 = vsub.f32 1.0, %v9812_v20  ;;  %v7643_v31 = vmul.f32 %v9812_v20, %v7541_v22 }
0x84c5   :  { %v7628_v13 = vpop.permute.xlu1 %7627 }
0x84c6   :  { %v7630_v62 = vmul.f32 %v9812_v20, %v7628_v13  ;;  %v7872_v20 = vld [vmem:[%s8010_s25 + $0x28] sm:$0xff]  ;;  %v7871_v13 = vld [vmem:[%s8010_s25 + $0x20] sm:$0xff] }
0x84c8   :  { %7632 = vrot.lane.b32.xlu0 %v7630_v62, %s9868_s18  ;;  %v7870_v62 = vld [vmem:[%s8010_s25 + $0x18] sm:$0xff] }
0x853a   :  { %v7633_v57 = vpop.permute.xlu0 %7632 }
0x853b   :  { %v7635_v1 = vadd.f32 %v7633_v57, %v7542_v28  ;;  %v7869_v57 = vld [vmem:[%s8010_s25 + $0x10] sm:$0xff] }
0x853d   :  { %9813 = vtanh.f32 %v7635_v1  ;;  %v7868_v1 = vld [vmem:[%s8010_s25 + $0x8] sm:$0xff] }
0x853e   :  { %9815 = vpow2.f32 %v8221_v6 }
0x854a   :  { %v9814_v39 = vpop.eup %9813 }
0x854b   :  { %7639 = vrot.lane.b32.xlu1 %v9814_v39, %s9871_s23  ;;  %v9816_v42 = vpop.eup %9815  ;;  %v7867_v39 = vld [vmem:[%s8010_s25] sm:$0xff] }
0x854c   :  { %v7831_v17 = vadd.f32 1.0, %v9816_v42 }
0x854e   :  { %9817 = vrcp.f32 %v7831_v17 }
0x854f   :  { %7839 = vrot.lane.b32.xlu1 %v8222_v60, %s9868_s18 }
0x855b   :  { %v11616_v25 = vpop.eup %9817 }
0x855c   :  { %v7860_v6 = vmul.f32 0.0, %v11616_v25 }
0x85bd   :  { %v7640_v5 = vpop.permute.xlu1 %7639 }
0x85be   :  { %v7642_v16 = vmul.f32 %v7640_v5, %v7637_v41 }
0x85c0   :  { %v11610_v37 = vadd.f32 %v7643_v31, %v7642_v16 }
0x85c1   :  { %v7840_v8 = vpop.permute.xlu1 %7839 }
0x85c2   :  { %v7842_v47 = vadd.f32 %v7840_v8, %v7823_v4  ;;  %7647 = vrot.lane.b32.xlu0 %v11610_v37, %s9871_s23  ;;  %v4734_v8 = vadd.f32 %v11073_v43, %v11626_v51 }
0x85c4   :  { %7844 = vrot.lane.b32.xlu1 %v7842_v47, %s9868_s18  ;;  %v4739_v47 = vadd.f32 %v11626_v51, %v11079_v45 }
0x8634   :  { %v7648_v14 = vpop.permute.xlu0 %7647 }
0x8635   :  { %9409 = vmatmul.mubr.msk.f32.vlgmr.msra.gmra.mxu0 %vm478_vm4, %v7648_v14 }
0x8636   :  { %v7845_v50 = vpop.permute.xlu1 %7844  ;;  %9438 = vmatprep.mubr.msk.f32.mxu0 %vm9869_vm2, %v9865_v0  ;;  %9423 = vmatpush3.msra.mxu0 %v7874_v34 }
0x8637   :  { %v7847_v11 = vmul.f32 %v11616_v25, %v7845_v50  ;;  %9424 = vmatprep.subr.mxu0 %v9865_v0 }
0x8638   :  { %9425 = vmatpush3.msra.mxu0 %v7873_v56 }
0x8639   :  { %7849 = vrot.lane.b32.xlu1 %v7847_v11, %s9868_s18  ;;  %9426 = vmatprep.subr.mxu0 %v9865_v0 }
0x863a   :  { %9427 = vmatpush3.msra.mxu0 %v7872_v20 }
0x863b   :  { %9428 = vmatprep.subr.mxu0 %v9865_v0 }
0x863c   :  { %9429 = vmatpush3.msra.mxu0 %v7871_v13 }
0x863d   :  { %9430 = vmatprep.subr.mxu0 %v9865_v0 }
0x863e   :  { %9431 = vmatpush3.msra.mxu0 %v7870_v62 }
0x863f   :  { %9432 = vmatprep.subr.mxu0 %v9865_v0 }
0x8640   :  { %9433 = vmatpush3.msra.mxu0 %v7869_v57 }
0x8641   :  { %9434 = vmatprep.subr.mxu0 %v9865_v0 }
0x8642   :  { %9435 = vmatpush3.msra.mxu0 %v7868_v1 }
0x8643   :  { %9436 = vmatprep.subr.mxu0 %v9865_v0  ;;  %v4749_v0 = vadd.f32 %v11626_v51, %v11083_v21 }
0x8644   :  { %9437 = vmatpush3.msra.mxu0 %v7867_v39 }
0x86ab   :  { %v7850_v44 = vpop.permute.xlu1 %7849 }
0x86ac   :  { %v7852_v26 = vadd.f32 %v7850_v44, %v7749_v48  ;;  %v4759_v48 = vadd.f32 %v11626_v51, %v11087_v63 }
0x86ae   :  { %9819 = vtanh.f32 %v7852_v26 }
0x86bb   :  { %v9820_v27 = vpop.eup %9819 }
0x86bc   :  { %7856 = vrot.lane.b32.xlu1 %v9820_v27, %s9871_s23 }
0x86e0   :  { %4767 = vmax.xlane.f32.xlu1 %v4729_v18 }
0x86e4   :  { %4773 = vmax.xlane.f32.xlu1 %v11632_v46 }
0x86e8   :  { %4777 = vmax.xlane.f32.xlu1 %v11637_v2 }
0x86ec   :  { %4781 = vmax.xlane.f32.xlu1 %v11642_v3 }
0x86f5   :  { %v7717_v15 = vpop.f32.mrf.mxu0 }
0x86f6   :  { %v7728_v32 = vadd.f32 %v7717_v15, %v11503_v38  ;;  %v7721_v59 = vadd.f32 %v7717_v15, %v7645_v19 }
0x86f7   :  { %v9410_v29 = vpop.f32.mrf.mxu0 }
0x86f8   :  { %7730 = vrot.lane.b32.xlu0 %v7728_v32, %s9868_s18  ;;  %v8215_v23 = vmul.f32 -1.442695, %v7721_v59 }
0x86fa   :  { %9821 = vpow2.f32 %v8215_v23 }
0x8707   :  { %v9822_v61 = vpop.eup %9821 }
0x8708   :  { %v7725_v10 = vadd.f32 1.0, %v9822_v61 }
0x870a   :  { %9823 = vrcp.f32 %v7725_v10 }
0x8717   :  { %v9824_v9 = vpop.eup %9823 }
0x8718   :  { %v7740_v60 = vsub.f32 1.0, %v9824_v9  ;;  %v7746_v5 = vmul.f32 %v9824_v9, %v11610_v37  ;;  %v7854_v37 = vsub.f32 1.0, %v11616_v25 }
0x872e   :  { %v11647_v53 = vpop.permute.xlu1 %7856 }
0x872f   :  { %v7859_v55 = vmul.f32 %v11647_v53, %v7854_v37 }
0x8731   :  { %v7861_v43 = vadd.f32 %v7860_v6, %v7859_v55 }
0x8769   :  { %v4768_v49 = vpop.xlane.xlu1 %4767 }
0x876a   :  { %v4783_v22 = vsub.f32 %v4729_v18, %v4768_v49  ;;  %v7731_v7 = vpop.permute.xlu0 %7730 }
0x876b   :  { %v7733_v58 = vmul.f32 %v9824_v9, %v7731_v7 }
0x876c   :  { %v4791_v12 = vmul.f32 1.442695, %v4783_v22 }
0x876d   :  { %7735 = vrot.lane.b32.xlu0 %v7733_v58, %s9868_s18  ;;  %v11651_v35 = vpop.xlane.xlu1 %4773 }
0x876e   :  { %9825 = vpow2.f32 %v4791_v12  ;;  %v11692_v29 = vsub.f32 %v11632_v46, %v11651_v35 }
0x8770   :  { %v4797_v59 = vmul.f32 1.442695, %v11692_v29 }
0x8771   :  { %v11653_v40 = vpop.xlane.xlu1 %4777 }
0x8772   :  { %v11701_v23 = vsub.f32 %v11637_v2, %v11653_v40 }
0x8774   :  { %v4801_v61 = vmul.f32 1.442695, %v11701_v23 }
0x8775   :  { %v11655_v4 = vpop.xlane.xlu1 %4781 }
0x8776   :  { %v11706_v46 = vsub.f32 %v11642_v3, %v11655_v4 }
0x8778   :  { %v4805_v49 = vmul.f32 1.442695, %v11706_v46 }
0x877b   :  { %v9826_v38 = vpop.eup %9825 }
0x877c   :  { %4807 = vadd.xlane.f32.xlu1 %v9826_v38 }
0x87df   :  { %v7736_v54 = vpop.permute.xlu0 %7735 }
0x87e0   :  { %v7738_v30 = vadd.f32 %v7736_v54, %v7645_v19 }
0x87e2   :  { %9827 = vtanh.f32 %v7738_v30 }
0x87ef   :  { %v9828_v33 = vpop.eup %9827 }
0x87f0   :  { %7742 = vrot.lane.b32.xlu0 %v9828_v33, %s9871_s23 }
0x8805   :  { %v4808_v36 = vpop.xlane.xlu1 %4807 }
0x8806   :  { %9829 = vlog2.f32 %v4808_v36 }
0x8813   :  { %v9830_v28 = vpop.eup %9829 }
0x8814   :  { %v4824_v52 = vmul.f32 0.6931472, %v9830_v28 }
0x8816   :  { %v4839_v24 = vsub.f32 %v4783_v22, %v4824_v52 }
0x8818   :  { %4847 = vst [vmem:[%s11660_s19] sm:$0xff] %v4839_v24 }
0x8862   :  { %v7743_v41 = vpop.permute.xlu0 %7742 }
0x8863   :  { %v7745_v31 = vmul.f32 %v7743_v41, %v7740_v60 }
0x8865   :  { %v7747_v16 = vadd.f32 %v7746_v5, %v7745_v31 }
0x8867   :  { %7863 = vrot.lane.b32.xlu0 %v7747_v16, %s9871_s23  ;;  %s9900_s23 = smov 30  }
0x8868   :  { %s8011_s28 = sld [smem:[%s11723_s0 + %s9900_s23]]  }
0x886e   :  { %v8223_v10 = vld [vmem:[%s8011_s28] ss:$0 sm:$0xff] }
0x8886   :  { %4769 = vmax.xlane.f32.xlu0 %v4734_v8 }
0x888a   :  { %4771 = vmax.xlane.f32.xlu0 %v4739_v47 }
0x888e   :  { %4775 = vmax.xlane.f32.xlu0 %v4749_v0 }
0x8892   :  { %4779 = vmax.xlane.f32.xlu0 %v4759_v48 }
0x88d9   :  { %v7864_v42 = vpop.permute.xlu0 %7863 }
0x88da   :  { %v7866_v17 = vsel %vm478_vm4, %v7864_v42, %v7861_v43 }
0x88db   :  { %9439 = vmatmul.mubr.msk.f32.vlgmr.msra.gmra.mxu0 %vm544_vm5, %v7866_v17 }
0x890f   :  { %v4770_v45 = vpop.xlane.xlu0 %4769 }
0x8910   :  { %v11688_v32 = vsub.f32 %v4734_v8, %v4770_v45 }
0x8912   :  { %v4793_v19 = vmul.f32 1.442695, %v11688_v32 }
0x8913   :  { %v4772_v14 = vpop.xlane.xlu0 %4771 }
0x8914   :  { %v4785_v21 = vsub.f32 %v4739_v47, %v4772_v14 }
0x8916   :  { %v4795_v50 = vmul.f32 1.442695, %v4785_v21 }
0x8917   :  { %v4776_v11 = vpop.xlane.xlu0 %4775 }
0x8918   :  { %9831 = vpow2.f32 %v4795_v50  ;;  %v4787_v63 = vsub.f32 %v4749_v0, %v4776_v11 }
0x891a   :  { %v4799_v44 = vmul.f32 1.442695, %v4787_v63 }
0x891b   :  { %v4780_v26 = vpop.xlane.xlu0 %4779 }
0x891c   :  { %9833 = vpow2.f32 %v4799_v44  ;;  %v4789_v27 = vsub.f32 %v4759_v48, %v4780_v26 }
0x891e   :  { %v4803_v51 = vmul.f32 1.442695, %v4789_v27 }
0x8920   :  { %9835 = vpow2.f32 %v4803_v51 }
0x8921   :  { %9837 = vpow2.f32 %v4793_v19 }
0x8922   :  { %9839 = vpow2.f32 %v4797_v59 }
0x8923   :  { %9841 = vpow2.f32 %v4801_v61 }
0x8924   :  { %9843 = vpow2.f32 %v4805_v49 }
0x8925   :  { %v9832_v25 = vpop.eup %9831 }
0x8926   :  { %4811 = vadd.xlane.f32.xlu1 %v9832_v25 }
0x8929   :  { %v9834_v18 = vpop.eup %9833 }
0x892a   :  { %4815 = vadd.xlane.f32.xlu1 %v9834_v18 }
0x892d   :  { %v9836_v15 = vpop.eup %9835 }
0x892e   :  { %4819 = vadd.xlane.f32.xlu1 %v9836_v15  ;;  %v9838_v7 = vpop.eup %9837 }
0x892f   :  { %v9840_v2 = vpop.eup %9839 }
0x8930   :  { %v9842_v58 = vpop.eup %9841 }
0x8931   :  { %v9844_v12 = vpop.eup %9843 }
0x899b   :  { %v7951_v53 = vpop.f32.mrf.mxu0 }
0x899c   :  { %v7952_v9 = vadd.f32 %v8223_v10, %v7951_v53 }
0x899d   :  { %v9440_v22 = vpop.f32.mrf.mxu0 }
0x899e   :  { %7955 = vmax.xlane.f32.xlu0 %v7952_v9 }
0x89a2   :  { %4809 = vadd.xlane.f32.xlu0 %v9838_v7 }
0x89a6   :  { %4813 = vadd.xlane.f32.xlu0 %v9840_v2 }
0x89aa   :  { %4817 = vadd.xlane.f32.xlu0 %v9842_v58 }
0x89ae   :  { %4821 = vadd.xlane.f32.xlu0 %v9844_v12 }
0x89af   :  { %v4812_v3 = vpop.xlane.xlu1 %4811 }
0x89b0   :  { %9845 = vlog2.f32 %v4812_v3 }
0x89b3   :  { %v4816_v38 = vpop.xlane.xlu1 %4815 }
0x89b4   :  { %9847 = vlog2.f32 %v4816_v38 }
0x89b7   :  { %v4820_v54 = vpop.xlane.xlu1 %4819 }
0x89b8   :  { %9849 = vlog2.f32 %v4820_v54 }
0x89bd   :  { %v9846_v30 = vpop.eup %9845 }
0x89be   :  { %v4828_v33 = vmul.f32 0.6931472, %v9846_v30 }
0x89c0   :  { %v4841_v35 = vsub.f32 %v4785_v21, %v4828_v33 }
0x89c1   :  { %v9848_v40 = vpop.eup %9847 }
0x89c2   :  { %4849 = vst [vmem:[%s11660_s19 + $0x10] sm:$0xff] %v4841_v35  ;;  %v4832_v4 = vmul.f32 0.6931472, %v9848_v40 }
0x89c4   :  { %v4843_v36 = vsub.f32 %v4787_v63, %v4832_v4 }
0x89c5   :  { %v9850_v28 = vpop.eup %9849 }
0x89c6   :  { %4851 = vst [vmem:[%s11660_s19 + $0x20] sm:$0xff] %v4843_v36  ;;  %v4836_v52 = vmul.f32 0.6931472, %v9850_v28 }
0x89c8   :  { %v4845_v24 = vsub.f32 %v4789_v27, %v4836_v52 }
0x89ca   :  { %4853 = vst [vmem:[%s11660_s19 + $0x30] sm:$0xff] %v4845_v24 }
0x8a27   :  { %v7956_v34 = vpop.xlane.xlu0 %7955 }
0x8a28   :  { %v7957_v56 = vsub.f32 %v7952_v9, %v7956_v34 }
0x8a2a   :  { %v7958_v20 = vmul.f32 1.442695, %v7957_v56 }
0x8a2b   :  { %v4810_v13 = vpop.xlane.xlu0 %4809 }
0x8a2c   :  { %9851 = vpow2.f32 %v7958_v20 }
0x8a2d   :  { %9853 = vlog2.f32 %v4810_v13 }
0x8a2f   :  { %v4814_v62 = vpop.xlane.xlu0 %4813 }
0x8a30   :  { %9855 = vlog2.f32 %v4814_v62 }
0x8a33   :  { %v4818_v57 = vpop.xlane.xlu0 %4817 }
0x8a34   :  { %9857 = vlog2.f32 %v4818_v57 }
0x8a37   :  { %v4822_v1 = vpop.xlane.xlu0 %4821 }
0x8a38   :  { %9859 = vlog2.f32 %v4822_v1 }
0x8a39   :  { %v9852_v39 = vpop.eup %9851 }
0x8a3a   :  { %v9854_v60 = vpop.eup %9853  ;;  %7960 = vadd.xlane.f32.xlu1 %v9852_v39 }
0x8a3b   :  { %v4826_v41 = vmul.f32 0.6931472, %v9854_v60 }
0x8a3d   :  { %v9856_v5 = vpop.eup %9855  ;;  %v4840_v31 = vsub.f32 %v11688_v32, %v4826_v41 }
0x8a3e   :  { %v4830_v16 = vmul.f32 0.6931472, %v9856_v5 }
0x8a3f   :  { %4848 = vst [vmem:[%s11660_s19 + $0x8] sm:$0xff] %v4840_v31 }
0x8a40   :  { %v4842_v8 = vsub.f32 %v11692_v29, %v4830_v16 }
0x8a41   :  { %v9858_v47 = vpop.eup %9857 }
0x8a42   :  { %4850 = vst [vmem:[%s11660_s19 + $0x18] sm:$0xff] %v4842_v8  ;;  %v4834_v0 = vmul.f32 0.6931472, %v9858_v47 }
0x8a44   :  { %v4844_v48 = vsub.f32 %v11701_v23, %v4834_v0 }
0x8a45   :  { %v9860_v37 = vpop.eup %9859 }
0x8a46   :  { %4852 = vst [vmem:[%s11660_s19 + $0x28] sm:$0xff] %v4844_v48  ;;  %v4838_v55 = vmul.f32 0.6931472, %v9860_v37 }
0x8a48   :  { %v4846_v6 = vsub.f32 %v11706_v46, %v4838_v55 }
0x8a4a   :  { %4854 = vst [vmem:[%s11660_s19 + $0x38] sm:$0xff] %v4846_v6 }
0x8ac3   :  { %v7961_v43 = vpop.xlane.xlu1 %7960 }
0x8ac4   :  { %9861 = vlog2.f32 %v7961_v43 }
0x8ad1   :  { %v9862_v42 = vpop.eup %9861 }
0x8ad2   :  { %v7963_v17 = vmul.f32 0.6931472, %v9862_v42 }
0x8ad4   :  { %v7964_v45 = vsub.f32 %v7957_v56, %v7963_v17 }
0x8ad6   :  { %7965 = vst [vmem:[%s8015_s3] sm:$0xff] %v7964_v45 }

</bundles_post_ra>
